<compile_context>
chip_gen: v5e
topology: v5e:2x2
jax: 0.10.0
libtpu: 0.0.40
codegen_flags: <defaults>
</compile_context>

<pallas_src>
import functools

import numpy as np

import jax
import jax.numpy as jnp
from jax.experimental import pallas as pl
from jax.experimental.pallas import tpu as pltpu


# Toy widths (synthetic weights).  C_EXP / C_OUT are multiples of 128 so every
# MXU matmul and the final store are lane dense.
C_IN = 3
C_STEM = 32
C_EXP = 128
C_SE = 32
C_PROJ = 64
C_OUT = 128
OH = OW = 7          # AdaptiveAvgPool2d((7, 7))


def _round_up(x, m):
    return ((x + m - 1) // m) * m


# ----------------------------------------------------------------------------
# The single fused kernel (one grid step == one image)
# ----------------------------------------------------------------------------
def _encoder_kernel(x_ref, pool_ref, pscale_ref, mask_ref, tab_ref,
                    stem_w_ref, exp_w_ref, se1_w_ref, se2_w_ref, ph_w_ref,
                    o_ref, *, npad, wp, inv_npix):
    f32 = jnp.float32
    bf16 = jnp.bfloat16

    # Packed constant table: rows 0..5 = biases, rows 6..14 = depthwise taps.
    tab = tab_ref[...]                       # (16, 128) f32
    stem_b = tab[0:1, :C_STEM]
    exp_b = tab[1:2, :]
    dw_b = tab[2:3, :]
    se1_b = tab[3:4, :C_SE]
    se2_b = tab[4:5, :]
    ph_b = tab[5:6, :]
    # 1.0 on real pixels, 0.0 on the guard ring / sublane padding rows.
    mask = mask_ref[...]                     # (npad, 1) f32

    # ---- stem: 3x3 stride-2 conv as ONE K=48 matmul over the host-built
    #      2x2 im2col of the space-to-depth input; fused bias + SiLU ----------
    x = x_ref[0]                             # (npad, 48) bf16
    acc = jnp.dot(x, stem_w_ref[...], preferred_element_type=f32) + stem_b
    acc = acc * jax.nn.sigmoid(acc)          # SiLU, (npad, C_STEM) f32

    # ---- MBConv expand 1x1 + SiLU; zero guard/pad rows so the rolled
    #      depthwise taps read true zero padding (no per-tap edge masks) ------
    e = jnp.dot(acc.astype(bf16), exp_w_ref[...],
                preferred_element_type=f32) + exp_b
    e = (e * jax.nn.sigmoid(e)) * mask       # (npad, C_EXP) f32, guards = 0

    # ---- depthwise 3x3, stride 1, same padding: 9 roll+MAC taps, mask-free --
    dw = e * tab[6 + 4:6 + 5, :]             # center tap (t = 4)
    for dh in (-1, 0, 1):
        for dc in (-1, 0, 1):
            if dh == 0 and dc == 0:
                continue
            t = (dh + 1) * 3 + (dc + 1)
            s = dh * wp + dc                 # flat-pixel offset on the guarded grid
            dw = dw + pltpu.roll(e, shift=(-s) % npad, axis=0) * tab[6 + t:7 + t, :]
    dw = dw + dw_b
    dw = dw * jax.nn.sigmoid(dw)             # (npad, C_EXP) f32

    # ---- squeeze & excitation (stays in VMEM) -------------------------------
    pooled = jnp.sum(dw * mask, axis=0, keepdims=True) * inv_npix    # (1, C_EXP)
    s1 = jnp.dot(pooled.astype(bf16), se1_w_ref[...],
                 preferred_element_type=f32) + se1_b
    s1 = s1 * jax.nn.sigmoid(s1)
    s2 = jnp.dot(s1.astype(bf16), se2_w_ref[...],
                 preferred_element_type=f32) + se2_b
    gated = (dw * jax.nn.sigmoid(s2)).astype(bf16)       # channel gate, bf16

    # ---- fused project+head 1x1 (W_ph = proj_w @ head_w) + bias + SiLU ------
    hd = jnp.dot(gated, ph_w_ref[...], preferred_element_type=f32) + ph_b
    hd = hd * jax.nn.sigmoid(hd)             # (npad, C_OUT) f32

    # ---- AdaptiveAvgPool2d((7,7)) + view(B,C,49).transpose(1,2):
    #      bf16 0/1 membership matmul + (49,1) f32 post-scale ------------------
    out = jnp.dot(pool_ref[...], hd.astype(bf16), preferred_element_type=f32)
    o_ref[0] = (out * pscale_ref[...]).astype(o_ref.dtype)


# ----------------------------------------------------------------------------
# Host-side constant builders (pure layout / constant tables, no heavy compute)
# ----------------------------------------------------------------------------
def _stem_im2col(images, ho, wo, hp, wp, npad):
    """NCHW image -> (B, npad, 48) bf16: stride-2 space-to-depth, then the 2x2
    im2col for the stem (tap order (-1,-1),(-1,0),(0,-1),(0,0)), embedded into
    the zero-guarded (hp, wp) flat-pixel layout."""
    b, cin, _, _ = images.shape
    x = jnp.transpose(images, (0, 2, 3, 1))                 # NHWC
    x = x.reshape(b, ho, 2, wo, 2, cin)
    x = jnp.transpose(x, (0, 1, 3, 2, 4, 5)).reshape(b, ho, wo, 4 * cin)
    xp = jnp.pad(x, ((0, 0), (1, 0), (1, 0), (0, 0)))       # zero pad top & left
    taps = [xp[:, 0:ho, 0:wo],          # (-1, -1)
            xp[:, 0:ho, 1:wo + 1],      # (-1,  0)
            xp[:, 1:ho + 1, 0:wo],      # ( 0, -1)
            xp[:, 1:ho + 1, 1:wo + 1]]  # ( 0,  0)
    col = jnp.concatenate(taps, axis=-1)                    # (b, ho, wo, 48)
    col = jnp.pad(col, ((0, 0), (1, 1), (1, 1), (0, 0)))    # guard ring
    col = col.reshape(b, hp * wp, 16 * cin)
    col = jnp.pad(col, ((0, 0), (0, npad - hp * wp), (0, 0)))
    return col.astype(jnp.bfloat16)


def _pool_matrices(ho, wo, oh, ow, wp, npad):
    """0/1 bf16 membership matrix (oh*ow, npad) over the guarded flat layout,
    plus the (oh*ow, 1) f32 1/count post-scale (exact adaptive avg pooling)."""
    M = np.zeros((oh * ow, npad), np.float32)
    S = np.zeros((oh * ow, 1), np.float32)
    for i in range(oh):
        h0, h1 = (i * ho) // oh, -((-(i + 1) * ho) // oh)
        for j in range(ow):
            w0, w1 = (j * wo) // ow, -((-(j + 1) * wo) // ow)
            S[i * ow + j, 0] = 1.0 / ((h1 - h0) * (w1 - w0))
            for r in range(h0, h1):
                g0 = (r + 1) * wp + (w0 + 1)
                M[i * ow + j, g0:g0 + (w1 - w0)] = 1.0
    return jnp.asarray(M, jnp.bfloat16), jnp.asarray(S)


def _real_mask(ho, wo, wp, npad):
    """(npad, 1) f32: 1 on real pixels of the guarded layout, 0 elsewhere."""
    m = np.zeros((npad, 1), np.float32)
    for i in range(ho):
        g0 = (i + 1) * wp + 1
        m[g0:g0 + wo, 0] = 1.0
    return jnp.asarray(m)


def _stem_to_s2d(w3):
    """(3,3,C_IN,C_STEM) stride-2 conv weight -> (48, C_STEM): a 2x2 conv over
    the space-to-depth input, flat (tap, sub-pixel, channel) order."""
    kmap = {0: (0, 1), 1: (1, 0), 2: (1, 1)}   # kernel index -> (block tap, sub-pixel)
    w2 = jnp.zeros((2, 2, 2, 2, C_IN, C_STEM), w3.dtype)
    for kh in range(3):
        th, ph = kmap[kh]
        for kw in range(3):
            tw, pw = kmap[kw]
            w2 = w2.at[th, tw, ph, pw].add(w3[kh, kw])
    return w2.reshape(16 * C_IN, C_STEM)


def _pack_tab(stem_b, exp_b, dw_b, se1_b, se2_b, ph_b, dw_taps):
    """Pack all biases + the 9 depthwise tap weights into one (16,128) f32 table."""
    tab = jnp.zeros((16, 128), jnp.float32)
    tab = tab.at[0, :C_STEM].set(stem_b)
    tab = tab.at[1, :].set(exp_b)
    tab = tab.at[2, :].set(dw_b)
    tab = tab.at[3, :C_SE].set(se1_b)
    tab = tab.at[4, :].set(se2_b)
    tab = tab.at[5, :].set(ph_b)
    tab = tab.at[6:15, :].set(dw_taps)
    return tab


# ----------------------------------------------------------------------------
# Parameters (synthetic, deterministic; MXU weights bf16, biases/dw taps f32)
# ----------------------------------------------------------------------------
def init_params(key):
    ks = jax.random.split(key, 16)

    def w(k, fan_in, shape):
        return jax.random.normal(k, shape, jnp.float32) / np.sqrt(fan_in)

    def b(k, n):
        return 0.02 * jax.random.normal(k, (n,), jnp.float32)

    w3 = w(ks[0], 9 * C_IN, (3, 3, C_IN, C_STEM))
    exp_w = w(ks[1], C_STEM, (C_STEM, C_EXP))
    dw_taps = w(ks[2], 9, (9, C_EXP))
    se1_w = w(ks[3], C_EXP, (C_EXP, C_SE))
    se2_w = w(ks[4], C_SE, (C_SE, C_EXP))
    proj_w = w(ks[5], C_EXP, (C_EXP, C_PROJ))
    head_w = w(ks[6], C_PROJ, (C_PROJ, C_OUT))

    stem_b = b(ks[7], C_STEM)
    exp_b = b(ks[8], C_EXP)
    dw_b = b(ks[9], C_EXP)
    se1_b = b(ks[10], C_SE)
    se2_b = b(ks[11], C_EXP)
    proj_b = b(ks[12], C_PROJ)
    head_b = b(ks[13], C_OUT)

    # Fold project (linear, no activation) into head: one matmul in the kernel.
    ph_w = proj_w @ head_w                          # f32 fold, then bf16 cast
    ph_b = proj_b @ head_w + head_b

    return {
        "stem_w": _stem_to_s2d(w3).astype(jnp.bfloat16),   # (48, C_STEM)
        "exp_w": exp_w.astype(jnp.bfloat16),               # (C_STEM, C_EXP)
        "se1_w": se1_w.astype(jnp.bfloat16),               # (C_EXP, C_SE)
        "se2_w": se2_w.astype(jnp.bfloat16),               # (C_SE, C_EXP)
        "ph_w": ph_w.astype(jnp.bfloat16),                 # (C_EXP, C_OUT)
        "tab": _pack_tab(stem_b, exp_b, dw_b, se1_b, se2_b, ph_b, dw_taps),
    }


# ----------------------------------------------------------------------------
# Forward pass
# ----------------------------------------------------------------------------
def efficientnet_encoder(images, params):
    """images: (B, 3, H, W) NCHW float32 -> (B, OH*OW, C_OUT) features."""
    B, cin, H, W = images.shape
    assert cin == C_IN and H % 2 == 0 and W % 2 == 0
    ho, wo = H // 2, W // 2                  # spatial size after the stride-2 stem
    hp, wp = ho + 2, wo + 2                  # zero guard ring for mask-free taps
    npad = _round_up(hp * wp, 16)            # sublane-friendly (also for bf16 input)

    x_stem = _stem_im2col(images.astype(jnp.float32), ho, wo, hp, wp, npad)
    pool_m, pool_s = _pool_matrices(ho, wo, OH, OW, wp, npad)
    mask = _real_mask(ho, wo, wp, npad)

    p = params
    in_arrays = (x_stem, pool_m, pool_s, mask, p["tab"],
                 p["stem_w"], p["exp_w"], p["se1_w"], p["se2_w"], p["ph_w"])

    def full(shape):
        nd = len(shape)
        return pl.BlockSpec(shape, lambda b, _n=nd: (0,) * _n)

    in_specs = [pl.BlockSpec((1, npad, 16 * C_IN), lambda b: (b, 0, 0))]
    in_specs += [full(a.shape) for a in in_arrays[1:]]

    kernel = functools.partial(_encoder_kernel, npad=npad, wp=wp,
                               inv_npix=1.0 / (ho * wo))

    # Advisory cost estimate for XLA scheduling around the custom call.
    flops = B * (2 * npad * (16 * C_IN * C_STEM + C_STEM * C_EXP + 9 * C_EXP
                             + C_EXP * C_OUT + OH * OW * C_OUT)
                 + 4 * C_EXP * C_SE)
    trans = B * (npad * (C_STEM + 3 * C_EXP) + 2 * C_EXP + C_SE)
    bytes_acc = (B * npad * 16 * C_IN * 2 + OH * OW * npad * 2
                 + B * OH * OW * C_OUT * 4 + 256 * 1024)

    return pl.pallas_call(
        kernel,
        out_shape=jax.ShapeDtypeStruct((B, OH * OW, C_OUT), jnp.float32),
        grid=(B,),
        in_specs=in_specs,
        out_specs=pl.BlockSpec((1, OH * OW, C_OUT), lambda b: (b, 0, 0)),
        compiler_params=pltpu.CompilerParams(
            dimension_semantics=("parallel",),          # megacore across batch
            vmem_limit_bytes=48 * 1024 * 1024),
        cost_estimate=pl.CostEstimate(flops=int(flops),
                                      transcendentals=int(trans),
                                      bytes_accessed=int(bytes_acc)),
    )(*in_arrays)


if __name__ == "__main__":
    key = jax.random.PRNGKey(0)
    k_img, k_par = jax.random.split(key)
    images = jax.random.normal(k_img, (2, 3, 28, 28), jnp.float32)   # NCHW like PyTorch
    params = init_params(k_par)

    out = jax.jit(efficientnet_encoder)(images, params)
    out = jax.block_until_ready(out)

    assert out.shape == (2, OH * OW, C_OUT), out.shape
    assert bool(jnp.all(jnp.isfinite(out)))
    print("KERNEL_OK")
</pallas_src>

<mosaic_0001>
module attributes {stable_mosaic.version = 11 : i64} {
  func.func @_encoder_kernel(%arg0: i32, %arg1: memref<1x256x48xbf16, #tpu.memory_space<vmem>>, %arg2: memref<49x256xbf16, #tpu.memory_space<vmem>>, %arg3: memref<49x1xf32, #tpu.memory_space<vmem>>, %arg4: memref<256x1xf32, #tpu.memory_space<vmem>>, %arg5: memref<16x128xf32, #tpu.memory_space<vmem>>, %arg6: memref<48x32xbf16, #tpu.memory_space<vmem>>, %arg7: memref<32x128xbf16, #tpu.memory_space<vmem>>, %arg8: memref<128x32xbf16, #tpu.memory_space<vmem>>, %arg9: memref<32x128xbf16, #tpu.memory_space<vmem>>, %arg10: memref<128x128xbf16, #tpu.memory_space<vmem>>, %arg11: memref<1x49x128xf32, #tpu.memory_space<vmem>>) attributes {dimension_semantics = [#tpu.dimension_semantics<parallel>], iteration_bounds = array<i64: 2>, scalar_prefetch = 0 : i64, scratch_operands = 0 : i64, tpu.core_type = #tpu.core_type<tc>, window_params = [{transform_indices = @transform_0, window_bounds = array<i64: 1, 256, 48>}, {pipeline_mode = #tpu.pipeline_mode<synchronous>, transform_indices = @transform_1, window_bounds = array<i64: 49, 256>}, {pipeline_mode = #tpu.pipeline_mode<synchronous>, transform_indices = @transform_2, window_bounds = array<i64: 49, 1>}, {pipeline_mode = #tpu.pipeline_mode<synchronous>, transform_indices = @transform_3, window_bounds = array<i64: 256, 1>}, {pipeline_mode = #tpu.pipeline_mode<synchronous>, transform_indices = @transform_4, window_bounds = array<i64: 16, 128>}, {pipeline_mode = #tpu.pipeline_mode<synchronous>, transform_indices = @transform_5, window_bounds = array<i64: 48, 32>}, {pipeline_mode = #tpu.pipeline_mode<synchronous>, transform_indices = @transform_6, window_bounds = array<i64: 32, 128>}, {pipeline_mode = #tpu.pipeline_mode<synchronous>, transform_indices = @transform_7, window_bounds = array<i64: 128, 32>}, {pipeline_mode = #tpu.pipeline_mode<synchronous>, transform_indices = @transform_8, window_bounds = array<i64: 32, 128>}, {pipeline_mode = #tpu.pipeline_mode<synchronous>, transform_indices = @transform_9, window_bounds = array<i64: 128, 128>}, {transform_indices = @transform_10, window_bounds = array<i64: 1, 49, 128>}]} {
    %c0 = arith.constant 0 : index
    %c0_0 = arith.constant 0 : index
    %0 = vector.load %arg5[%c0, %c0_0] : memref<16x128xf32, #tpu.memory_space<vmem>>, vector<16x128xf32>
    %1 = vector.extract_strided_slice %0 {offsets = [0, 0], sizes = [1, 32], strides = [1, 1]} : vector<16x128xf32> to vector<1x32xf32>
    %2 = vector.extract_strided_slice %0 {offsets = [1, 0], sizes = [1, 128], strides = [1, 1]} : vector<16x128xf32> to vector<1x128xf32>
    %3 = vector.extract_strided_slice %0 {offsets = [2, 0], sizes = [1, 128], strides = [1, 1]} : vector<16x128xf32> to vector<1x128xf32>
    %4 = vector.extract_strided_slice %0 {offsets = [3, 0], sizes = [1, 32], strides = [1, 1]} : vector<16x128xf32> to vector<1x32xf32>
    %5 = vector.extract_strided_slice %0 {offsets = [4, 0], sizes = [1, 128], strides = [1, 1]} : vector<16x128xf32> to vector<1x128xf32>
    %6 = vector.extract_strided_slice %0 {offsets = [5, 0], sizes = [1, 128], strides = [1, 1]} : vector<16x128xf32> to vector<1x128xf32>
    %c0_1 = arith.constant 0 : index
    %c0_2 = arith.constant 0 : index
    %7 = vector.load %arg4[%c0_1, %c0_2] : memref<256x1xf32, #tpu.memory_space<vmem>>, vector<256x1xf32>
    %c0_3 = arith.constant 0 : index
    %c0_4 = arith.constant 0 : index
    %c0_5 = arith.constant 0 : index
    %8 = vector.load %arg1[%c0_3, %c0_4, %c0_5] : memref<1x256x48xbf16, #tpu.memory_space<vmem>>, vector<1x256x48xbf16>
    %9 = vector.shape_cast %8 : vector<1x256x48xbf16> to vector<256x48xbf16>
    %c0_6 = arith.constant 0 : index
    %c0_7 = arith.constant 0 : index
    %10 = vector.load %arg6[%c0_6, %c0_7] : memref<48x32xbf16, #tpu.memory_space<vmem>>, vector<48x32xbf16>
    %cst = arith.constant dense<0.000000e+00> : vector<256x32xf32>
    %11 = tpu.matmul %9, %10, %cst {dimension_numbers = #tpu.dot_dimension_numbers<[1], [0], [0], [1], [0, 0, 1, 1], [], []>} : vector<256x48xbf16>, vector<48x32xbf16>, vector<256x32xf32> -> vector<256x32xf32>
    %12 = vector.broadcast %1 : vector<1x32xf32> to vector<256x32xf32>
    %13 = arith.addf %11, %12 : vector<256x32xf32>
    %14 = arith.negf %13 : vector<256x32xf32>
    %15 = math.exp %14 : vector<256x32xf32>
    %cst_8 = arith.constant 1.000000e+00 : f32
    %16 = vector.broadcast %cst_8 : f32 to vector<256x32xf32>
    %17 = arith.addf %16, %15 : vector<256x32xf32>
    %18 = arith.divf %16, %17 : vector<256x32xf32>
    %19 = arith.mulf %13, %18 : vector<256x32xf32>
    %20 = arith.truncf %19 : vector<256x32xf32> to vector<256x32xbf16>
    %c0_9 = arith.constant 0 : index
    %c0_10 = arith.constant 0 : index
    %21 = vector.load %arg7[%c0_9, %c0_10] : memref<32x128xbf16, #tpu.memory_space<vmem>>, vector<32x128xbf16>
    %cst_11 = arith.constant dense<0.000000e+00> : vector<256x128xf32>
    %22 = tpu.matmul %20, %21, %cst_11 {dimension_numbers = #tpu.dot_dimension_numbers<[1], [0], [0], [1], [0, 0, 1, 1], [], []>} : vector<256x32xbf16>, vector<32x128xbf16>, vector<256x128xf32> -> vector<256x128xf32>
    %23 = vector.broadcast %2 : vector<1x128xf32> to vector<256x128xf32>
    %24 = arith.addf %22, %23 : vector<256x128xf32>
    %25 = arith.negf %24 : vector<256x128xf32>
    %26 = math.exp %25 : vector<256x128xf32>
    %cst_12 = arith.constant 1.000000e+00 : f32
    %27 = vector.broadcast %cst_12 : f32 to vector<256x128xf32>
    %28 = arith.addf %27, %26 : vector<256x128xf32>
    %29 = arith.divf %27, %28 : vector<256x128xf32>
    %30 = arith.mulf %24, %29 : vector<256x128xf32>
    %31 = vector.broadcast %7 : vector<256x1xf32> to vector<256x128xf32>
    %32 = arith.mulf %30, %31 : vector<256x128xf32>
    %33 = vector.extract_strided_slice %0 {offsets = [10, 0], sizes = [1, 128], strides = [1, 1]} : vector<16x128xf32> to vector<1x128xf32>
    %34 = vector.broadcast %33 : vector<1x128xf32> to vector<256x128xf32>
    %35 = arith.mulf %32, %34 : vector<256x128xf32>
    %c17_i32 = arith.constant 17 : i32
    %36 = tpu.dynamic_rotate %32 by %c17_i32 dim 0 : vector<256x128xf32>, i32 -> vector<256x128xf32>
    %37 = vector.extract_strided_slice %0 {offsets = [6, 0], sizes = [1, 128], strides = [1, 1]} : vector<16x128xf32> to vector<1x128xf32>
    %38 = vector.broadcast %37 : vector<1x128xf32> to vector<256x128xf32>
    %39 = arith.mulf %36, %38 : vector<256x128xf32>
    %40 = arith.addf %35, %39 : vector<256x128xf32>
    %c16_i32 = arith.constant 16 : i32
    %41 = tpu.dynamic_rotate %32 by %c16_i32 dim 0 : vector<256x128xf32>, i32 -> vector<256x128xf32>
    %42 = vector.extract_strided_slice %0 {offsets = [7, 0], sizes = [1, 128], strides = [1, 1]} : vector<16x128xf32> to vector<1x128xf32>
    %43 = vector.broadcast %42 : vector<1x128xf32> to vector<256x128xf32>
    %44 = arith.mulf %41, %43 : vector<256x128xf32>
    %45 = arith.addf %40, %44 : vector<256x128xf32>
    %c15_i32 = arith.constant 15 : i32
    %46 = tpu.dynamic_rotate %32 by %c15_i32 dim 0 : vector<256x128xf32>, i32 -> vector<256x128xf32>
    %47 = vector.extract_strided_slice %0 {offsets = [8, 0], sizes = [1, 128], strides = [1, 1]} : vector<16x128xf32> to vector<1x128xf32>
    %48 = vector.broadcast %47 : vector<1x128xf32> to vector<256x128xf32>
    %49 = arith.mulf %46, %48 : vector<256x128xf32>
    %50 = arith.addf %45, %49 : vector<256x128xf32>
    %c1_i32 = arith.constant 1 : i32
    %51 = tpu.dynamic_rotate %32 by %c1_i32 dim 0 : vector<256x128xf32>, i32 -> vector<256x128xf32>
    %52 = vector.extract_strided_slice %0 {offsets = [9, 0], sizes = [1, 128], strides = [1, 1]} : vector<16x128xf32> to vector<1x128xf32>
    %53 = vector.broadcast %52 : vector<1x128xf32> to vector<256x128xf32>
    %54 = arith.mulf %51, %53 : vector<256x128xf32>
    %55 = arith.addf %50, %54 : vector<256x128xf32>
    %c255_i32 = arith.constant 255 : i32
    %56 = tpu.dynamic_rotate %32 by %c255_i32 dim 0 : vector<256x128xf32>, i32 -> vector<256x128xf32>
    %57 = vector.extract_strided_slice %0 {offsets = [11, 0], sizes = [1, 128], strides = [1, 1]} : vector<16x128xf32> to vector<1x128xf32>
    %58 = vector.broadcast %57 : vector<1x128xf32> to vector<256x128xf32>
    %59 = arith.mulf %56, %58 : vector<256x128xf32>
    %60 = arith.addf %55, %59 : vector<256x128xf32>
    %c241_i32 = arith.constant 241 : i32
    %61 = tpu.dynamic_rotate %32 by %c241_i32 dim 0 : vector<256x128xf32>, i32 -> vector<256x128xf32>
    %62 = vector.extract_strided_slice %0 {offsets = [12, 0], sizes = [1, 128], strides = [1, 1]} : vector<16x128xf32> to vector<1x128xf32>
    %63 = vector.broadcast %62 : vector<1x128xf32> to vector<256x128xf32>
    %64 = arith.mulf %61, %63 : vector<256x128xf32>
    %65 = arith.addf %60, %64 : vector<256x128xf32>
    %c240_i32 = arith.constant 240 : i32
    %66 = tpu.dynamic_rotate %32 by %c240_i32 dim 0 : vector<256x128xf32>, i32 -> vector<256x128xf32>
    %67 = vector.extract_strided_slice %0 {offsets = [13, 0], sizes = [1, 128], strides = [1, 1]} : vector<16x128xf32> to vector<1x128xf32>
    %68 = vector.broadcast %67 : vector<1x128xf32> to vector<256x128xf32>
    %69 = arith.mulf %66, %68 : vector<256x128xf32>
    %70 = arith.addf %65, %69 : vector<256x128xf32>
    %c239_i32 = arith.constant 239 : i32
    %71 = tpu.dynamic_rotate %32 by %c239_i32 dim 0 : vector<256x128xf32>, i32 -> vector<256x128xf32>
    %72 = vector.extract_strided_slice %0 {offsets = [14, 0], sizes = [1, 128], strides = [1, 1]} : vector<16x128xf32> to vector<1x128xf32>
    %73 = vector.broadcast %72 : vector<1x128xf32> to vector<256x128xf32>
    %74 = arith.mulf %71, %73 : vector<256x128xf32>
    %75 = arith.addf %70, %74 : vector<256x128xf32>
    %76 = vector.broadcast %3 : vector<1x128xf32> to vector<256x128xf32>
    %77 = arith.addf %75, %76 : vector<256x128xf32>
    %78 = arith.negf %77 : vector<256x128xf32>
    %79 = math.exp %78 : vector<256x128xf32>
    %cst_13 = arith.constant 1.000000e+00 : f32
    %80 = vector.broadcast %cst_13 : f32 to vector<256x128xf32>
    %81 = arith.addf %80, %79 : vector<256x128xf32>
    %82 = arith.divf %80, %81 : vector<256x128xf32>
    %83 = arith.mulf %77, %82 : vector<256x128xf32>
    %84 = vector.broadcast %7 : vector<256x1xf32> to vector<256x128xf32>
    %85 = arith.mulf %83, %84 : vector<256x128xf32>
    %cst_14 = arith.constant dense<0.000000e+00> : vector<128xf32>
    %86 = vector.multi_reduction <add>, %85, %cst_14 [0] : vector<256x128xf32> to vector<128xf32>
    %87 = vector.shape_cast %86 : vector<128xf32> to vector<1x128xf32>
    %cst_15 = arith.constant 0.00510204071 : f32
    %88 = vector.broadcast %cst_15 : f32 to vector<1x128xf32>
    %89 = arith.mulf %87, %88 : vector<1x128xf32>
    %90 = arith.truncf %89 : vector<1x128xf32> to vector<1x128xbf16>
    %c0_16 = arith.constant 0 : index
    %c0_17 = arith.constant 0 : index
    %91 = vector.load %arg8[%c0_16, %c0_17] : memref<128x32xbf16, #tpu.memory_space<vmem>>, vector<128x32xbf16>
    %cst_18 = arith.constant dense<0.000000e+00> : vector<1x32xf32>
    %92 = tpu.matmul %90, %91, %cst_18 {dimension_numbers = #tpu.dot_dimension_numbers<[1], [0], [0], [1], [0, 0, 1, 1], [], []>} : vector<1x128xbf16>, vector<128x32xbf16>, vector<1x32xf32> -> vector<1x32xf32>
    %93 = arith.addf %92, %4 : vector<1x32xf32>
    %94 = arith.negf %93 : vector<1x32xf32>
    %95 = math.exp %94 : vector<1x32xf32>
    %cst_19 = arith.constant 1.000000e+00 : f32
    %96 = vector.broadcast %cst_19 : f32 to vector<1x32xf32>
    %97 = arith.addf %96, %95 : vector<1x32xf32>
    %98 = arith.divf %96, %97 : vector<1x32xf32>
    %99 = arith.mulf %93, %98 : vector<1x32xf32>
    %100 = arith.truncf %99 : vector<1x32xf32> to vector<1x32xbf16>
    %c0_20 = arith.constant 0 : index
    %c0_21 = arith.constant 0 : index
    %101 = vector.load %arg9[%c0_20, %c0_21] : memref<32x128xbf16, #tpu.memory_space<vmem>>, vector<32x128xbf16>
    %cst_22 = arith.constant dense<0.000000e+00> : vector<1x128xf32>
    %102 = tpu.matmul %100, %101, %cst_22 {dimension_numbers = #tpu.dot_dimension_numbers<[1], [0], [0], [1], [0, 0, 1, 1], [], []>} : vector<1x32xbf16>, vector<32x128xbf16>, vector<1x128xf32> -> vector<1x128xf32>
    %103 = arith.addf %102, %5 : vector<1x128xf32>
    %104 = arith.negf %103 : vector<1x128xf32>
    %105 = math.exp %104 : vector<1x128xf32>
    %cst_23 = arith.constant 1.000000e+00 : f32
    %106 = vector.broadcast %cst_23 : f32 to vector<1x128xf32>
    %107 = arith.addf %106, %105 : vector<1x128xf32>
    %108 = arith.divf %106, %107 : vector<1x128xf32>
    %109 = vector.broadcast %108 : vector<1x128xf32> to vector<256x128xf32>
    %110 = arith.mulf %83, %109 : vector<256x128xf32>
    %111 = arith.truncf %110 : vector<256x128xf32> to vector<256x128xbf16>
    %c0_24 = arith.constant 0 : index
    %c0_25 = arith.constant 0 : index
    %112 = vector.load %arg10[%c0_24, %c0_25] : memref<128x128xbf16, #tpu.memory_space<vmem>>, vector<128x128xbf16>
    %cst_26 = arith.constant dense<0.000000e+00> : vector<256x128xf32>
    %113 = tpu.matmul %111, %112, %cst_26 {dimension_numbers = #tpu.dot_dimension_numbers<[1], [0], [0], [1], [0, 0, 1, 1], [], []>} : vector<256x128xbf16>, vector<128x128xbf16>, vector<256x128xf32> -> vector<256x128xf32>
    %114 = vector.broadcast %6 : vector<1x128xf32> to vector<256x128xf32>
    %115 = arith.addf %113, %114 : vector<256x128xf32>
    %116 = arith.negf %115 : vector<256x128xf32>
    %117 = math.exp %116 : vector<256x128xf32>
    %cst_27 = arith.constant 1.000000e+00 : f32
    %118 = vector.broadcast %cst_27 : f32 to vector<256x128xf32>
    %119 = arith.addf %118, %117 : vector<256x128xf32>
    %120 = arith.divf %118, %119 : vector<256x128xf32>
    %121 = arith.mulf %115, %120 : vector<256x128xf32>
    %c0_28 = arith.constant 0 : index
    %c0_29 = arith.constant 0 : index
    %122 = vector.load %arg2[%c0_28, %c0_29] : memref<49x256xbf16, #tpu.memory_space<vmem>>, vector<49x256xbf16>
    %123 = arith.truncf %121 : vector<256x128xf32> to vector<256x128xbf16>
    %cst_30 = arith.constant dense<0.000000e+00> : vector<49x128xf32>
    %124 = tpu.matmul %122, %123, %cst_30 {dimension_numbers = #tpu.dot_dimension_numbers<[1], [0], [0], [1], [0, 0, 1, 1], [], []>} : vector<49x256xbf16>, vector<256x128xbf16>, vector<49x128xf32> -> vector<49x128xf32>
    %c0_31 = arith.constant 0 : index
    %c0_32 = arith.constant 0 : index
    %125 = vector.load %arg3[%c0_31, %c0_32] : memref<49x1xf32, #tpu.memory_space<vmem>>, vector<49x1xf32>
    %126 = vector.broadcast %125 : vector<49x1xf32> to vector<49x128xf32>
    %127 = arith.mulf %124, %126 : vector<49x128xf32>
    %c0_33 = arith.constant 0 : index
    %c0_34 = arith.constant 0 : index
    %c0_35 = arith.constant 0 : index
    %128 = vector.load %arg11[%c0_33, %c0_34, %c0_35] : memref<1x49x128xf32, #tpu.memory_space<vmem>>, vector<1x49x128xf32>
    %129 = vector.shape_cast %128 : vector<1x49x128xf32> to vector<49x128xf32>
    %130 = vector.shape_cast %127 : vector<49x128xf32> to vector<1x49x128xf32>
    tpu.vector_store %arg11[%c0_33, %c0_34, %c0_35], %130 {strides = array<i32>} : memref<1x49x128xf32, #tpu.memory_space<vmem>>, vector<1x49x128xf32>,
    return
  }
  func.func @transform_0(%arg0: i32) -> (i32, i32, i32) {
    %c0_i32 = arith.constant 0 : i32
    %c0_i32_0 = arith.constant 0 : i32
    %c0_i32_1 = arith.constant 0 : i32
    return %arg0, %c0_i32, %c0_i32_0 : i32, i32, i32
  }
  func.func @transform_1(%arg0: i32) -> (i32, i32) {
    %c0_i32 = arith.constant 0 : i32
    %c0_i32_0 = arith.constant 0 : i32
    %c0_i32_1 = arith.constant 0 : i32
    return %c0_i32, %c0_i32_0 : i32, i32
  }
  func.func @transform_2(%arg0: i32) -> (i32, i32) {
    %c0_i32 = arith.constant 0 : i32
    %c0_i32_0 = arith.constant 0 : i32
    %c0_i32_1 = arith.constant 0 : i32
    return %c0_i32, %c0_i32_0 : i32, i32
  }
  func.func @transform_3(%arg0: i32) -> (i32, i32) {
    %c0_i32 = arith.constant 0 : i32
    %c0_i32_0 = arith.constant 0 : i32
    %c0_i32_1 = arith.constant 0 : i32
    return %c0_i32, %c0_i32_0 : i32, i32
  }
  func.func @transform_4(%arg0: i32) -> (i32, i32) {
    %c0_i32 = arith.constant 0 : i32
    %c0_i32_0 = arith.constant 0 : i32
    %c0_i32_1 = arith.constant 0 : i32
    return %c0_i32, %c0_i32_0 : i32, i32
  }
  func.func @transform_5(%arg0: i32) -> (i32, i32) {
    %c0_i32 = arith.constant 0 : i32
    %c0_i32_0 = arith.constant 0 : i32
    %c0_i32_1 = arith.constant 0 : i32
    return %c0_i32, %c0_i32_0 : i32, i32
  }
  func.func @transform_6(%arg0: i32) -> (i32, i32) {
    %c0_i32 = arith.constant 0 : i32
    %c0_i32_0 = arith.constant 0 : i32
    %c0_i32_1 = arith.constant 0 : i32
    return %c0_i32, %c0_i32_0 : i32, i32
  }
  func.func @transform_7(%arg0: i32) -> (i32, i32) {
    %c0_i32 = arith.constant 0 : i32
    %c0_i32_0 = arith.constant 0 : i32
    %c0_i32_1 = arith.constant 0 : i32
    return %c0_i32, %c0_i32_0 : i32, i32
  }
  func.func @transform_8(%arg0: i32) -> (i32, i32) {
    %c0_i32 = arith.constant 0 : i32
    %c0_i32_0 = arith.constant 0 : i32
    %c0_i32_1 = arith.constant 0 : i32
    return %c0_i32, %c0_i32_0 : i32, i32
  }
  func.func @transform_9(%arg0: i32) -> (i32, i32) {
    %c0_i32 = arith.constant 0 : i32
    %c0_i32_0 = arith.constant 0 : i32
    %c0_i32_1 = arith.constant 0 : i32
    return %c0_i32, %c0_i32_0 : i32, i32
  }
  func.func @transform_10(%arg0: i32) -> (i32, i32, i32) {
    %c0_i32 = arith.constant 0 : i32
    %c0_i32_0 = arith.constant 0 : i32
    %c0_i32_1 = arith.constant 0 : i32
    return %arg0, %c0_i32, %c0_i32_0 : i32, i32, i32
  }
}

</mosaic_0001>

<bundles_post_ra>
// kernel: efficientnet_encoder.1
= control target key start
LH: loop header
LB: loop body
LE: loop exit
PB: predicated region body
PF: predicated region fallthrough
CT: control target
= control target key end

     0   :  { %s5973_s13 = smov 0   ;;  %s11238_s0 = inlined_call_operand.vmem [shape: bf16[2,256,48], index: 0, kind: input, shape index: {}]   ;;  %s11239_s1 = inlined_call_operand.vmem [shape: bf16[49,256], index: 1, kind: input, shape index: {}]   ;;  %s11240_s2 = inlined_call_operand.vmem [shape: f32[49,1], index: 2, kind: input, shape index: {}]   ;;  %s11241_s3 = inlined_call_operand.vmem [shape: f32[256,1], index: 3, kind: input, shape index: {}]   ;;  %s11242_s4 = inlined_call_operand.vmem [shape: f32[16,128], index: 4, kind: input, shape index: {}]   ;;  %s11243_s5 = inlined_call_operand.vmem [shape: bf16[48,32], index: 5, kind: input, shape index: {}]   ;;  %s11244_s6 = inlined_call_operand.vmem [shape: bf16[32,128], index: 6, kind: input, shape index: {}]   ;;  %s11245_s7 = inlined_call_operand.vmem [shape: bf16[128,32], index: 7, kind: input, shape index: {}]   ;;  %s11246_s8 = inlined_call_operand.vmem [shape: bf16[32,128], index: 8, kind: input, shape index: {}]   ;;  %s11247_s9 = inlined_call_operand.vmem [shape: bf16[128,128], index: 9, kind: input, shape index: {}]   ;;  %s11248_s10 = inlined_call_operand.vmem [shape: f32[2,49,128], index: 10, kind: output, shape index: {}]  }
   0x1 LB: > { %s4966_s14 = sadd.s32 4294967295, %s5915_s13   ;;  %p4970_p0 = scmp.ge.s32.totalorder %s5915_s13, 1  ;;  %s5915_s13 = sphi %s5973_s13, %s20_s13  }
   0x2   : > { %p312_p1 = scmp.lt.s32.totalorder %s5915_s13, 3 }
   0x4   : > { %p313_p2 = pnand %p4970_p0, %p312_p1 }
   0x6   : > { %316 = sbr.rel (%p313_p2) target bundleno = 1840 (0x730), region = 60 }
   0xb   : > { %v5338_v0 = vld [vmem:[%s11243_s5 + $0x10] sm:$0xff]  ;;  %p350_p3 = scmp.lt.s32.totalorder %s4966_s14, 1  ;;  %v5337_v1 = vld [vmem:[%s11243_s5 + $0x8] sm:$0xff]  ;;  %v5336_v2 = vld [vmem:[%s11243_s5] sm:$0xff]  ;;  %vm532_vm0 = vcmask 392192   ;;  %vm1343_vm9 = vcmask 261120  }
   0xc   : > { %586 = vmatpush.bf16.msra.mxu0 %v5338_v0  ;;  %v6017_v11 = vld [vmem:[%s11242_s4] sm:$0xff]  ;;  %v5340_v17 = vld [vmem:[%s11244_s6 + $0x8] sm:$0xff] }
   0xd   : > { %s11914_s14 = smov (!%p350_p3, %s4966_s14), 1  ;;  %v6020_v12 = vperm.slane %v6017_v11, 0  ;;  %1398 = vmatpush.bf16.msra.mxu1 %v5340_v17  ;;  %v5339_v18 = vld [vmem:[%s11244_s6] sm:$0xff] }
   0xe   : > { %s5319_s19 = sshll.u32 %s11914_s14, 7  ;;  %s5373_s17 = smul.u32 56, %s11914_s14 }
   0xf   : > { %s5996_s24 = scalar_lea.vmem %s11238_s0, %s5319_s19 }
  0x10   : > { %587 = vmatpush.bf16.msra.mxu0 %v5337_v1  ;;  %v5320_v3 = vld [vmem:[%s5996_s24] sm:$0xff]  ;;  %v5321_v4 = vld [vmem:[%s5996_s24 + $0x8] sm:$0xff]  ;;  %v5322_v5 = vld [vmem:[%s5996_s24 + $0x10] sm:$0xff]  ;;  %s11226_s20 = scalar_lea.vmem %s11248_s10, %s5373_s17 }
  0x11   : > { %v5323_v6 = vld [vmem:[%s5996_s24 + $0x18] sm:$0xff]  ;;  %v5324_v7 = vld [vmem:[%s5996_s24 + $0x20] sm:$0xff]  ;;  %v5325_v8 = vld [vmem:[%s5996_s24 + $0x28] sm:$0xff]  ;;  %1399 = vmatpush.bf16.msra.mxu1 %v5339_v18 }
  0x12   : > { %v5326_v9 = vld [vmem:[%s5996_s24 + $0x30] sm:$0xff]  ;;  %v5327_v10 = vld [vmem:[%s5996_s24 + $0x38] sm:$0xff]  ;;  %v5328_v13 = vld [vmem:[%s5996_s24 + $0x40] sm:$0xff] }
  0x13   : > { %v5329_v24 = vld [vmem:[%s5996_s24 + $0x48] sm:$0xff]  ;;  %v5330_v45 = vld [vmem:[%s5996_s24 + $0x50] sm:$0xff] }
  0x14   : > { %588 = vmatpush.bf16.msra.mxu0 %v5336_v2 }
  0x17   : > { %5050 = vmatmul.msk.bf16.vlgmr.msra.gmra.mxu0 %vm532_vm0, %v5320_v3 }
  0x27   : > { %5051 = vmatmul.msk.bf16.gmra.mxu0 %vm532_vm0, %v5321_v4 }
  0x37   : > { %5052 = vmatmul.msk.bf16.gmra.mxu0 %vm532_vm0, %v5322_v5 }
  0x47   : > { %5053 = vmatmul.msk.bf16.gmra.mxu0 %vm532_vm0, %v5323_v6 }
  0x57   : > { %5054 = vmatmul.msk.bf16.gmra.mxu0 %vm532_vm0, %v5324_v7 }
  0x67   : > { %5055 = vmatmul.msk.bf16.gmra.mxu0 %vm532_vm0, %v5325_v8 }
  0x77   : > { %5056 = vmatmul.msk.bf16.gmra.mxu0 %vm532_vm0, %v5326_v9 }
  0x87   : > { %5057 = vmatmul.msk.bf16.gmra.mxu0 %vm532_vm0, %v5327_v10 }
  0x94   : > { %v590_v14 = vpop.f32.mrf.mxu0 }
  0x95   : > { %v6024_v15 = vadd.f32 %v590_v14, %v6020_v12 }
  0x97   : > { %v5066_v16 = vmul.f32 -1.442695, %v6024_v15  ;;  %5058 = vmatmul.msk.bf16.gmra.mxu0 %vm532_vm0, %v5328_v13 }
  0x99   : > { %5386 = vpow2.f32 %v5066_v16  ;;  %v394_v16 = vld [vmem:[%s11241_s3 + $0xf8] sm:$0xff] }
  0x9c   : > { %v592_v19 = vpop.f32.mrf.mxu0 }
  0x9d   : > { %v6035_v20 = vadd.f32 %v592_v19, %v6020_v12  ;;  %v5331_v19 = vld [vmem:[%s5996_s24 + $0x58] sm:$0xff] }
  0x9f   : > { %v5387_v21 = vpop.eup %5386  ;;  %v5067_v22 = vmul.f32 -1.442695, %v6035_v20 }
  0xa0   : > { %v766_v23 = vadd.f32 1.0, %v5387_v21 }
  0xa1   : > { %5388 = vpow2.f32 %v5067_v22 }
  0xa2   : > { %5390 = vrcp.f32 %v766_v23  ;;  %v809_v42 = vand.u32 2147483648, %v766_v23  ;;  %vm803_vm2 = vweird.f32 %v766_v23  ;;  %v807_v43 = vand.u32 2147483647, %v766_v23 }
  0xa4   : > { %v595_v25 = vpop.f32.mrf.mxu0  ;;  %v810_v53 = vor.u32 1.1754944e-38, %v809_v42  ;;  %vm808_vm5 = vcmp.eq.f32.partialorder %v807_v43, 8.507059e+37 }
  0xa5   : > { %v6040_v26 = vadd.f32 %v595_v25, %v6020_v12 }
  0xa7   : > { %v5389_v27 = vpop.eup %5388  ;;  %v5068_v28 = vmul.f32 -1.442695, %v6040_v26  ;;  %5059 = vmatmul.msk.bf16.gmra.mxu0 %vm532_vm0, %v5329_v24  ;;  %v5917_v24 = vmov 0  }
  0xa8   : > { %v5391_v29 = vpop.eup %5390  ;;  %v767_v30 = vadd.f32 1.0, %v5389_v27  ;;  %5384 = vset.pattern.permute.xlu1 %v5917_v24  ;;  %5383 = vset.pattern.permute.xlu0 %v5917_v24 }
  0xa9   : > { %v799_v31 = vmul.f32 %v5391_v29, %v766_v23  ;;  %5392 = vpow2.f32 %v5068_v28  ;;  %vm804_vm1 = vweird.f32 %v5391_v29  ;;  %2278 = vperm.xlu1 %5384, %v394_v16   ;;  %5385 = vset.pattern.permute.xlu2 %v5917_v24  ;;  %v393_v16 = vld [vmem:[%s11241_s3 + $0xf0] sm:$0xff] }
  0xaa   : > { %5394 = vrcp.f32 %v767_v30  ;;  %vm6052_vm3 = vmor %vm803_vm2, %vm804_vm1  ;;  %v822_v47 = vand.u32 2147483647, %v767_v30  ;;  %v824_v48 = vand.u32 2147483648, %v767_v30  ;;  %vm818_vm6 = vweird.f32 %v767_v30 }
  0xab   : > { %v800_v32 = vsub.f32 1.0, %v799_v31 }
  0xac   : > { %v597_v33 = vpop.f32.mrf.mxu0  ;;  %v825_v59 = vor.u32 1.1754944e-38, %v824_v48  ;;  %vm823_vm8 = vcmp.eq.f32.partialorder %v822_v47, 8.507059e+37 }
  0xad   : > { %v801_v34 = vmul.f32 %v5391_v29, %v800_v32  ;;  %v6045_v35 = vadd.f32 %v597_v33, %v6020_v12 }
  0xaf   : > { %v5393_v36 = vpop.eup %5392  ;;  %v5069_v37 = vmul.f32 -1.442695, %v6045_v35  ;;  %v802_v40 = vadd.f32 %v5391_v29, %v801_v34 }
  0xb0   : > { %v5395_v38 = vpop.eup %5394  ;;  %v6048_v39 = vadd.f32 1.0, %v5393_v36 }
  0xb1   : > { %v814_v41 = vmul.f32 %v5395_v38, %v767_v30  ;;  %5396 = vpow2.f32 %v5069_v37  ;;  %v806_v50 = vsel %vm6052_vm3, %v5391_v29, %v802_v40  ;;  %vm819_vm4 = vweird.f32 %v5395_v38 }
  0xb2   : > { %5398 = vrcp.f32 %v6048_v39  ;;  %v811_v58 = vsel %vm808_vm5, %v810_v53, %v806_v50  ;;  %vm820_vm7 = vmor %vm818_vm6, %vm819_vm4  ;;  %vm833_vm11 = vweird.f32 %v6048_v39  ;;  %v837_v17 = vand.u32 2147483647, %v6048_v39 }
  0xb3   : > { %v815_v44 = vsub.f32 1.0, %v814_v41  ;;  %v1278_v0 = vmul.f32 %v811_v58, %v6024_v15  ;;  %v839_v15 = vand.u32 2147483648, %v6048_v39  ;;  %v363_v41 = vld [vmem:[%s11241_s3] sm:$0xff] }
  0xb4   : > { %v600_v49 = vpop.f32.mrf.mxu0  ;;  %vm838_vm14 = vcmp.eq.f32.partialorder %v837_v17, 8.507059e+37  ;;  %2123 = vperm.xlu1 %5384, %v363_v41   ;;  %v5332_v58 = vld [vmem:[%s5996_s24 + $0x60] sm:$0xff] }
  0xb5   : > { %v816_v51 = vmul.f32 %v5395_v38, %v815_v44  ;;  %v6059_v52 = vadd.f32 %v600_v49, %v6020_v12  ;;  %v840_v29 = vor.u32 1.1754944e-38, %v839_v15 }
  0xb7   : > { %v5397_v54 = vpop.eup %5396  ;;  %v817_v55 = vadd.f32 %v5395_v38, %v816_v51  ;;  %v5070_v56 = vmul.f32 -1.442695, %v6059_v52  ;;  %5060 = vmatmul.msk.bf16.gmra.mxu0 %vm532_vm0, %v5330_v45 }
  0xb8   : > { %v5399_v57 = vpop.eup %5398  ;;  %v769_v60 = vadd.f32 1.0, %v5397_v54 }
  0xb9   : > { %v821_v61 = vsel %vm820_vm7, %v5395_v38, %v817_v55  ;;  %v829_v62 = vmul.f32 %v5399_v57, %v6048_v39  ;;  %5400 = vpow2.f32 %v5070_v56  ;;  %vm834_vm10 = vweird.f32 %v5399_v57  ;;  %v392_v55 = vld [vmem:[%s11241_s3 + $0xe8] sm:$0xff] }
  0xba   : > { %v826_v63 = vsel %vm823_vm8, %v825_v59, %v821_v61  ;;  %5402 = vrcp.f32 %v769_v60  ;;  %vm6081_vm12 = vmor %vm833_vm11, %vm834_vm10  ;;  %v852_v21 = vand.u32 2147483647, %v769_v60  ;;  %v854_v22 = vand.u32 2147483648, %v769_v60  ;;  %2268 = vperm.xlu0 %5383, %v392_v55   ;;  %v367_v55 = vld [vmem:[%s11241_s3 + $0x20] sm:$0xff] }
  0xbb   : > { %v1279_v1 = vmul.f32 %v826_v63, %v6035_v20  ;;  %v830_v2 = vsub.f32 1.0, %v829_v62  ;;  %vm848_vm15 = vweird.f32 %v769_v60 }
  0xbc   : > { %v602_v3 = vpop.f32.mrf.mxu0  ;;  %v855_v36 = vor.u32 1.1754944e-38, %v854_v22  ;;  %vm853_vm2 = vcmp.eq.f32.partialorder %v852_v21, 8.507059e+37  ;;  %2143 = vperm.xlu1 %5384, %v367_v55  }
  0xbd   : > { %v831_v4 = vmul.f32 %v5399_v57, %v830_v2  ;;  %v6067_v5 = vadd.f32 %v602_v3, %v6020_v12  ;;  %v1310_v6 = vpack.c.bf16 %v1279_v1, %v1278_v0 }
  0xbf   : > { %v5401_v7 = vpop.eup %5400  ;;  %v5071_v8 = vmul.f32 -1.442695, %v6067_v5  ;;  %5106 = vmatmul.msk.bf16.vlgmr.msra.gmra.mxu1 %vm1343_vm9, %v1310_v6  ;;  %v832_v13 = vadd.f32 %v5399_v57, %v831_v4 }
  0xc0   : > { %v5403_v9 = vpop.eup %5402  ;;  %v6071_v10 = vadd.f32 1.0, %v5401_v7 }
  0xc1   : > { %v844_v14 = vmul.f32 %v5403_v9, %v769_v60  ;;  %5404 = vpow2.f32 %v5071_v8  ;;  %v836_v25 = vsel %vm6081_vm12, %v5399_v57, %v832_v13  ;;  %vm849_vm13 = vweird.f32 %v5403_v9 }
  0xc2   : > { %5406 = vrcp.f32 %v6071_v10  ;;  %v841_v34 = vsel %vm838_vm14, %v840_v29, %v836_v25  ;;  %vm850_vm1 = vmor %vm848_vm15, %vm849_vm13  ;;  %v869_v54 = vand.u32 2147483648, %v6071_v10  ;;  %vm863_vm4 = vweird.f32 %v6071_v10  ;;  %2273 = vperm.xlu0 %5383, %v393_v16  }
  0xc3   : > { %v845_v18 = vsub.f32 1.0, %v844_v14  ;;  %v1280_v42 = vmul.f32 %v841_v34, %v6040_v26  ;;  %v867_v56 = vand.u32 2147483647, %v6071_v10  ;;  %v5333_v34 = vld [vmem:[%s5996_s24 + $0x68] sm:$0xff] }
  0xc4   : > { %v605_v23 = vpop.f32.mrf.mxu0  ;;  %v870_v2 = vor.u32 1.1754944e-38, %v869_v54  ;;  %v364_v54 = vld [vmem:[%s11241_s3 + $0x8] sm:$0xff] }
  0xc5   : > { %v846_v27 = vmul.f32 %v5403_v9, %v845_v18  ;;  %v6088_v28 = vadd.f32 %v605_v23, %v6020_v12  ;;  %vm868_vm7 = vcmp.eq.f32.partialorder %v867_v56, 8.507059e+37  ;;  %2128 = vperm.xlu2 %5385, %v364_v54  }
  0xc7   : > { %v5405_v30 = vpop.eup %5404  ;;  %v847_v31 = vadd.f32 %v5403_v9, %v846_v27  ;;  %v5072_v32 = vmul.f32 -1.442695, %v6088_v28  ;;  %5061 = vmatmul.msk.bf16.gmra.mxu0 %vm532_vm0, %v5331_v19 }
  0xc8   : > { %v5407_v33 = vpop.eup %5406  ;;  %v771_v37 = vadd.f32 1.0, %v5405_v30 }
  0xc9   : > { %v851_v38 = vsel %vm850_vm1, %v5403_v9, %v847_v31  ;;  %v859_v39 = vmul.f32 %v5407_v33, %v6071_v10  ;;  %5408 = vpow2.f32 %v5072_v32  ;;  %vm864_vm3 = vweird.f32 %v5407_v33  ;;  %v366_v31 = vld [vmem:[%s11241_s3 + $0x18] sm:$0xff] }
  0xca   : > { %v856_v40 = vsel %vm853_vm2, %v855_v36, %v851_v38  ;;  %5410 = vrcp.f32 %v771_v37  ;;  %vm6113_vm5 = vmor %vm863_vm4, %vm864_vm3  ;;  %v882_v60 = vand.u32 2147483647, %v771_v37  ;;  %v884_v61 = vand.u32 2147483648, %v771_v37  ;;  %2138 = vperm.xlu0 %5383, %v366_v31   ;;  %v369_v31 = vld [vmem:[%s11241_s3 + $0x30] sm:$0xff] }
  0xcb   : > { %v1281_v43 = vmul.f32 %v856_v40, %v6045_v35  ;;  %v860_v44 = vsub.f32 1.0, %v859_v39  ;;  %vm878_vm8 = vweird.f32 %v771_v37 }
  0xcc   : > { %v607_v45 = vpop.f32.mrf.mxu0  ;;  %v885_v9 = vor.u32 1.1754944e-38, %v884_v61  ;;  %vm883_vm11 = vcmp.eq.f32.partialorder %v882_v60, 8.507059e+37 }
  0xcd   : > { %v861_v46 = vmul.f32 %v5407_v33, %v860_v44  ;;  %v6099_v47 = vadd.f32 %v607_v45, %v6020_v12  ;;  %v1311_v48 = vpack.c.bf16 %v1281_v43, %v1280_v42 }
  0xcf   : > { %v5409_v49 = vpop.eup %5408  ;;  %v5073_v50 = vmul.f32 -1.442695, %v6099_v47  ;;  %5107 = vmatmul.msk.bf16.gmra.mxu1 %vm1343_vm9, %v1311_v48  ;;  %v862_v26 = vadd.f32 %v5407_v33, %v861_v46 }
  0xd0   : > { %v5411_v51 = vpop.eup %5410  ;;  %v6103_v53 = vadd.f32 1.0, %v5409_v49 }
  0xd1   : > { %v874_v35 = vmul.f32 %v5411_v51, %v771_v37  ;;  %5412 = vpow2.f32 %v5073_v50  ;;  %v866_v63 = vsel %vm6113_vm5, %v5407_v33, %v862_v26  ;;  %vm879_vm6 = vweird.f32 %v5411_v51 }
  0xd2   : > { %5414 = vrcp.f32 %v6103_v53  ;;  %v871_v8 = vsel %vm868_vm7, %v870_v2, %v866_v63  ;;  %vm880_vm10 = vmor %vm878_vm8, %vm879_vm6  ;;  %v899_v30 = vand.u32 2147483648, %v6103_v53  ;;  %vm893_vm13 = vweird.f32 %v6103_v53  ;;  %2153 = vperm.xlu0 %5383, %v369_v31  }
  0xd3   : > { %v875_v57 = vsub.f32 1.0, %v874_v35  ;;  %v1282_v17 = vmul.f32 %v871_v8, %v6059_v52  ;;  %v897_v32 = vand.u32 2147483647, %v6103_v53 }
  0xd4   : > { %v610_v62 = vpop.f32.mrf.mxu0  ;;  %v900_v43 = vor.u32 1.1754944e-38, %v899_v30 }
  0xd5   : > { %v876_v0 = vmul.f32 %v5411_v51, %v875_v57  ;;  %v6120_v1 = vadd.f32 %v610_v62, %v6020_v12  ;;  %vm898_vm1 = vcmp.eq.f32.partialorder %v897_v32, 8.507059e+37 }
  0xd7   : > { %v5413_v3 = vpop.eup %5412  ;;  %v877_v4 = vadd.f32 %v5411_v51, %v876_v0  ;;  %v5074_v6 = vmul.f32 -1.442695, %v6120_v1  ;;  %5062 = vmatmul.msk.bf16.gmra.mxu0 %vm532_vm0, %v5332_v58 }
  0xd8   : > { %v5415_v7 = vpop.eup %5414  ;;  %v773_v10 = vadd.f32 1.0, %v5413_v3 }
  0xd9   : > { %v881_v13 = vsel %vm880_vm10, %v5411_v51, %v877_v4  ;;  %v889_v14 = vmul.f32 %v5415_v7, %v6103_v53  ;;  %5416 = vpow2.f32 %v5074_v6  ;;  %vm894_vm12 = vweird.f32 %v5415_v7  ;;  %v365_v6 = vld [vmem:[%s11241_s3 + $0x10] sm:$0xff] }
  0xda   : > { %v886_v15 = vsel %vm883_vm11, %v885_v9, %v881_v13  ;;  %5418 = vrcp.f32 %v773_v10  ;;  %vm6145_vm14 = vmor %vm893_vm13, %vm894_vm12  ;;  %v912_v37 = vand.u32 2147483647, %v773_v10  ;;  %v914_v38 = vand.u32 2147483648, %v773_v10  ;;  %v5334_v9 = vld [vmem:[%s5996_s24 + $0x70] sm:$0xff]  ;;  %2133 = vperm.xlu2 %5385, %v365_v6  }
  0xdb   : > { %v1283_v18 = vmul.f32 %v886_v15, %v6067_v5  ;;  %v890_v19 = vsub.f32 1.0, %v889_v14  ;;  %vm908_vm2 = vweird.f32 %v773_v10 }
  0xdc   : > { %v612_v20 = vpop.f32.mrf.mxu0  ;;  %v915_v50 = vor.u32 1.1754944e-38, %v914_v38  ;;  %vm913_vm4 = vcmp.eq.f32.partialorder %v912_v37, 8.507059e+37 }
  0xdd   : > { %v891_v21 = vmul.f32 %v5415_v7, %v890_v19  ;;  %v6131_v22 = vadd.f32 %v612_v20, %v6020_v12  ;;  %v1312_v23 = vpack.c.bf16 %v1283_v18, %v1282_v17 }
  0xdf   : > { %v5417_v24 = vpop.eup %5416  ;;  %v5075_v25 = vmul.f32 -1.442695, %v6131_v22  ;;  %5108 = vmatmul.msk.bf16.gmra.mxu1 %vm1343_vm9, %v1312_v23  ;;  %v892_v52 = vadd.f32 %v5415_v7, %v891_v21 }
  0xe0   : > { %v5419_v27 = vpop.eup %5418  ;;  %v6135_v29 = vadd.f32 1.0, %v5417_v24 }
  0xe1   : > { %v904_v5 = vmul.f32 %v5419_v27, %v773_v10  ;;  %5420 = vpow2.f32 %v5075_v25  ;;  %v896_v40 = vsel %vm6145_vm14, %v5415_v7, %v892_v52  ;;  %vm909_vm15 = vweird.f32 %v5419_v27 }
  0xe2   : > { %5422 = vrcp.f32 %v6135_v29  ;;  %v901_v49 = vsel %vm898_vm1, %v900_v43, %v896_v40  ;;  %vm910_vm3 = vmor %vm908_vm2, %vm909_vm15  ;;  %v929_v4 = vand.u32 2147483648, %v6135_v29  ;;  %vm923_vm6 = vweird.f32 %v6135_v29 }
  0xe3   : > { %v905_v33 = vsub.f32 1.0, %v904_v5  ;;  %v1284_v56 = vmul.f32 %v901_v49, %v6088_v28  ;;  %v927_v7 = vand.u32 2147483647, %v6135_v29 }
  0xe4   : > { %v615_v39 = vpop.f32.mrf.mxu0  ;;  %v930_v19 = vor.u32 1.1754944e-38, %v929_v4  ;;  %v368_v4 = vld [vmem:[%s11241_s3 + $0x28] sm:$0xff] }
  0xe5   : > { %v906_v41 = vmul.f32 %v5419_v27, %v905_v33  ;;  %v6152_v42 = vadd.f32 %v615_v39, %v6020_v12  ;;  %vm928_vm10 = vcmp.eq.f32.partialorder %v927_v7, 8.507059e+37  ;;  %2148 = vperm.xlu2 %5385, %v368_v4  }
  0xe7   : > { %v5421_v44 = vpop.eup %5420  ;;  %v907_v45 = vadd.f32 %v5419_v27, %v906_v41  ;;  %v5076_v46 = vmul.f32 -1.442695, %v6152_v42  ;;  %5063 = vmatmul.msk.bf16.gmra.mxu0 %vm532_vm0, %v5333_v34 }
  0xe8   : > { %v5423_v48 = vpop.eup %5422  ;;  %v775_v51 = vadd.f32 1.0, %v5421_v44 }
  0xe9   : > { %v911_v53 = vsel %vm910_vm3, %v5419_v27, %v907_v45  ;;  %v919_v26 = vmul.f32 %v5423_v48, %v6135_v29  ;;  %5424 = vpow2.f32 %v5076_v46  ;;  %vm924_vm5 = vweird.f32 %v5423_v48  ;;  %v370_v46 = vld [vmem:[%s11241_s3 + $0x38] sm:$0xff] }
  0xea   : > { %v916_v35 = vsel %vm913_vm4, %v915_v50, %v911_v53  ;;  %5426 = vrcp.f32 %v775_v51  ;;  %vm6180_vm7 = vmor %vm923_vm6, %vm924_vm5  ;;  %v942_v13 = vand.u32 2147483647, %v775_v51  ;;  %v944_v14 = vand.u32 2147483648, %v775_v51  ;;  %v5335_v50 = vld [vmem:[%s5996_s24 + $0x78] sm:$0xff]  ;;  %2158 = vperm.xlu1 %5384, %v370_v46  }
  0xeb   : > { %v1285_v57 = vmul.f32 %v916_v35, %v6099_v47  ;;  %v920_v58 = vsub.f32 1.0, %v919_v26  ;;  %vm938_vm11 = vweird.f32 %v775_v51 }
  0xec   : > { %v617_v59 = vpop.f32.mrf.mxu0  ;;  %v945_v27 = vor.u32 1.1754944e-38, %v944_v14  ;;  %vm943_vm13 = vcmp.eq.f32.partialorder %v942_v13, 8.507059e+37 }
  0xed   : > { %v921_v60 = vmul.f32 %v5423_v48, %v920_v58  ;;  %v6166_v61 = vadd.f32 %v617_v59, %v6020_v12  ;;  %v1313_v62 = vpack.c.bf16 %v1285_v57, %v1284_v56 }
  0xef   : > { %v5425_v63 = vpop.eup %5424  ;;  %v5077_v0 = vmul.f32 -1.442695, %v6166_v61  ;;  %5109 = vmatmul.msk.bf16.gmra.mxu1 %vm1343_vm9, %v1313_v62  ;;  %v922_v28 = vadd.f32 %v5423_v48, %v921_v60 }
  0xf0   : > { %v5427_v2 = vpop.eup %5426  ;;  %v6170_v3 = vadd.f32 1.0, %v5425_v63 }
  0xf1   : > { %v934_v47 = vmul.f32 %v5427_v2, %v775_v51  ;;  %5428 = vpow2.f32 %v5077_v0  ;;  %v926_v16 = vsel %vm6180_vm7, %v5423_v48, %v922_v28  ;;  %vm939_vm8 = vweird.f32 %v5427_v2 }
  0xf2   : > { %5430 = vrcp.f32 %v6170_v3  ;;  %v931_v25 = vsel %vm928_vm10, %v930_v19, %v926_v16  ;;  %vm940_vm12 = vmor %vm938_vm11, %vm939_vm8  ;;  %v959_v45 = vand.u32 2147483648, %v6170_v3  ;;  %vm953_vm15 = vweird.f32 %v6170_v3 }
  0xf3   : > { %v935_v8 = vsub.f32 1.0, %v934_v47  ;;  %v1286_v32 = vmul.f32 %v931_v25, %v6120_v1  ;;  %v957_v48 = vand.u32 2147483647, %v6170_v3  ;;  %v375_v25 = vld [vmem:[%s11241_s3 + $0x60] sm:$0xff] }
  0xf4   : > { %v620_v15 = vpop.f32.mrf.mxu0  ;;  %v960_v57 = vor.u32 1.1754944e-38, %v959_v45 }
  0xf5   : > { %v936_v17 = vmul.f32 %v5427_v2, %v935_v8  ;;  %v6187_v18 = vadd.f32 %v620_v15, %v6020_v12  ;;  %vm958_vm3 = vcmp.eq.f32.partialorder %v957_v48, 8.507059e+37 }
  0xf7   : > { %v5429_v20 = vpop.eup %5428  ;;  %v937_v21 = vadd.f32 %v5427_v2, %v936_v17  ;;  %v5078_v23 = vmul.f32 -1.442695, %v6187_v18  ;;  %5064 = vmatmul.msk.bf16.gmra.mxu0 %vm532_vm0, %v5334_v9 }
  0xf8   : > { %v5431_v24 = vpop.eup %5430  ;;  %v777_v29 = vadd.f32 1.0, %v5429_v20 }
  0xf9   : > { %v941_v52 = vsel %vm940_vm12, %v5427_v2, %v937_v21  ;;  %v949_v5 = vmul.f32 %v5431_v24, %v6170_v3  ;;  %5432 = vpow2.f32 %v5078_v23  ;;  %vm954_vm14 = vweird.f32 %v5431_v24  ;;  %v372_v21 = vld [vmem:[%s11241_s3 + $0x48] sm:$0xff] }
  0xfa   : > { %v946_v30 = vsel %vm943_vm13, %v945_v27, %v941_v52  ;;  %5434 = vrcp.f32 %v777_v29  ;;  %vm6212_vm1 = vmor %vm953_vm15, %vm954_vm14  ;;  %v972_v53 = vand.u32 2147483647, %v777_v29  ;;  %v974_v26 = vand.u32 2147483648, %v777_v29  ;;  %2168 = vperm.xlu0 %5383, %v372_v21  }
  0xfb   : > { %v1287_v33 = vmul.f32 %v946_v30, %v6131_v22  ;;  %v950_v34 = vsub.f32 1.0, %v949_v5  ;;  %vm968_vm4 = vweird.f32 %v777_v29 }
  0xfc   : > { %v622_v36 = vpop.f32.mrf.mxu0  ;;  %v975_v0 = vor.u32 1.1754944e-38, %v974_v26  ;;  %vm973_vm6 = vcmp.eq.f32.partialorder %v972_v53, 8.507059e+37 }
  0xfd   : > { %v951_v37 = vmul.f32 %v5431_v24, %v950_v34  ;;  %v6198_v38 = vadd.f32 %v622_v36, %v6020_v12  ;;  %v1314_v39 = vpack.c.bf16 %v1287_v33, %v1286_v32 }
  0xff   : > { %v5433_v40 = vpop.eup %5432  ;;  %v5079_v41 = vmul.f32 -1.442695, %v6198_v38  ;;  %5110 = vmatmul.msk.bf16.gmra.mxu1 %vm1343_vm9, %v1314_v39  ;;  %v952_v1 = vadd.f32 %v5431_v24, %v951_v37 }
 0x100   : > { %v5435_v43 = vpop.eup %5434  ;;  %v6202_v44 = vadd.f32 1.0, %v5433_v40 }
 0x101   : > { %v964_v22 = vmul.f32 %v5435_v43, %v777_v29  ;;  %5436 = vpow2.f32 %v5079_v41  ;;  %v956_v54 = vsel %vm6212_vm1, %v5431_v24, %v952_v1  ;;  %vm969_vm2 = vweird.f32 %v5435_v43 }
 0x102   : > { %5438 = vrcp.f32 %v6202_v44  ;;  %v961_v63 = vsel %vm958_vm3, %v960_v57, %v956_v54  ;;  %vm970_vm5 = vmor %vm968_vm4, %vm969_vm2  ;;  %vm983_vm7 = vweird.f32 %v6202_v44  ;;  %v987_v23 = vand.u32 2147483647, %v6202_v44  ;;  %2183 = vperm.xlu0 %5383, %v375_v25  }
 0x103   : > { %v965_v49 = vsub.f32 1.0, %v964_v22  ;;  %v1288_v6 = vmul.f32 %v961_v63, %v6152_v42  ;;  %v373_v22 = vld [vmem:[%s11241_s3 + $0x50] sm:$0xff] }
 0x104   : > { %v625_v35 = vpop.f32.mrf.mxu0  ;;  %vm988_vm11 = vcmp.eq.f32.partialorder %v987_v23, 8.507059e+37  ;;  %2173 = vperm.xlu1 %5384, %v373_v22  }
 0x105   : > { %v966_v55 = vmul.f32 %v5435_v43, %v965_v49  ;;  %v6219_v56 = vadd.f32 %v625_v35, %v6020_v12 }
 0x107   : > { %v5437_v58 = vpop.eup %5436  ;;  %v967_v59 = vadd.f32 %v5435_v43, %v966_v55  ;;  %v5080_v60 = vmul.f32 -1.442695, %v6219_v56  ;;  %5065 = vmatmul.msk.bf16.gmra.mxu0 %vm532_vm0, %v5335_v50 }
 0x108   : > { %v5439_v62 = vpop.eup %5438  ;;  %v779_v2 = vadd.f32 1.0, %v5437_v58 }
 0x109   : > { %v971_v3 = vsel %vm970_vm5, %v5435_v43, %v967_v59  ;;  %v979_v28 = vmul.f32 %v5439_v62, %v6202_v44  ;;  %5440 = vpow2.f32 %v5080_v60  ;;  %vm984_vm0 = vweird.f32 %v5439_v62 }
 0x10a   : > { %v976_v47 = vsel %vm973_vm6, %v975_v0, %v971_v3  ;;  %5442 = vrcp.f32 %v779_v2  ;;  %vm6243_vm8 = vmor %vm983_vm7, %vm984_vm0  ;;  %v1002_v27 = vand.u32 2147483647, %v779_v2  ;;  %v1004_v29 = vand.u32 2147483648, %v779_v2 }
 0x10b   : > { %v1289_v7 = vmul.f32 %v976_v47, %v6166_v61  ;;  %v980_v8 = vsub.f32 1.0, %v979_v28  ;;  %v989_v61 = vand.u32 2147483648, %v6202_v44  ;;  %vm998_vm12 = vweird.f32 %v779_v2  ;;  %v371_v47 = vld [vmem:[%s11241_s3 + $0x40] sm:$0xff] }
 0x10c   : > { %v627_v9 = vpop.f32.mrf.mxu0  ;;  %v1005_v40 = vor.u32 1.1754944e-38, %v1004_v29  ;;  %vm1003_vm14 = vcmp.eq.f32.partialorder %v1002_v27, 8.507059e+37  ;;  %2163 = vperm.xlu2 %5385, %v371_v47  }
 0x10d   : > { %v981_v10 = vmul.f32 %v5439_v62, %v980_v8  ;;  %v6230_v13 = vadd.f32 %v627_v9, %v6020_v12  ;;  %v1315_v14 = vpack.c.bf16 %v1289_v7, %v1288_v6  ;;  %v990_v32 = vor.u32 1.1754944e-38, %v989_v61 }
 0x10f   : > { %v5441_v15 = vpop.eup %5440  ;;  %v5081_v16 = vmul.f32 -1.442695, %v6230_v13  ;;  %5111 = vmatmul.msk.bf16.gmra.mxu1 %vm1343_vm9, %v1315_v14  ;;  %v982_v20 = vadd.f32 %v5439_v62, %v981_v10 }
 0x110   : > { %v5443_v17 = vpop.eup %5442  ;;  %v6234_v19 = vadd.f32 1.0, %v5441_v15 }
 0x111   : > { %v994_v42 = vmul.f32 %v5443_v17, %v779_v2  ;;  %5444 = vpow2.f32 %v5081_v16  ;;  %v986_v5 = vsel %vm6243_vm8, %v5439_v62, %v982_v20  ;;  %vm999_vm10 = vweird.f32 %v5443_v17 }
 0x112   : > { %5446 = vrcp.f32 %v6234_v19  ;;  %v991_v39 = vsel %vm988_vm11, %v990_v32, %v986_v5  ;;  %vm1000_vm13 = vmor %vm998_vm12, %vm999_vm10  ;;  %vm1013_vm1 = vweird.f32 %v6234_v19  ;;  %v1017_v58 = vand.u32 2147483647, %v6234_v19 }
 0x113   : > { %v995_v24 = vsub.f32 1.0, %v994_v42  ;;  %v1290_v45 = vmul.f32 %v991_v39, %v6187_v18 }
 0x114   : > { %v630_v52 = vpop.f32.mrf.mxu0  ;;  %vm1018_vm4 = vcmp.eq.f32.partialorder %v1017_v58, 8.507059e+37 }
 0x115   : > { %v996_v30 = vmul.f32 %v5443_v17, %v995_v24  ;;  %v6250_v31 = vadd.f32 %v630_v52, %v6020_v12 }
 0x117   : > { %v5445_v33 = vpop.eup %5444  ;;  %v997_v34 = vadd.f32 %v5443_v17, %v996_v30  ;;  %v5082_v36 = vmul.f32 -1.442695, %v6250_v31 }
 0x118   : > { %v5447_v37 = vpop.eup %5446  ;;  %v781_v41 = vadd.f32 1.0, %v5445_v33 }
 0x119   : > { %v1001_v43 = vsel %vm1000_vm13, %v5443_v17, %v997_v34  ;;  %v1009_v44 = vmul.f32 %v5447_v37, %v6234_v19  ;;  %5448 = vpow2.f32 %v5082_v36  ;;  %vm1014_vm15 = vweird.f32 %v5447_v37 }
 0x11a   : > { %v1006_v1 = vsel %vm1003_vm14, %v1005_v40, %v1001_v43  ;;  %5450 = vrcp.f32 %v781_v41  ;;  %vm6270_vm2 = vmor %vm1013_vm1, %vm1014_vm15  ;;  %v1032_v62 = vand.u32 2147483647, %v781_v41  ;;  %v1034_v63 = vand.u32 2147483648, %v781_v41 }
 0x11b   : > { %v1291_v46 = vmul.f32 %v1006_v1, %v6198_v38  ;;  %v1010_v48 = vsub.f32 1.0, %v1009_v44  ;;  %v1019_v38 = vand.u32 2147483648, %v6234_v19  ;;  %vm1028_vm5 = vweird.f32 %v781_v41 }
 0x11c   : > { %v632_v49 = vpop.f32.mrf.mxu0  ;;  %v1035_v14 = vor.u32 1.1754944e-38, %v1034_v63  ;;  %vm1033_vm0 = vcmp.eq.f32.partialorder %v1032_v62, 8.507059e+37  ;;  %v6310_v1 = vperm.slane %v6017_v11, 1 }
 0x11d   : > { %v1011_v50 = vmul.f32 %v5447_v37, %v1010_v48  ;;  %v6260_v51 = vadd.f32 %v632_v49, %v6020_v12  ;;  %v1316_v53 = vpack.c.bf16 %v1291_v46, %v1290_v45  ;;  %v1020_v4 = vor.u32 1.1754944e-38, %v1019_v38 }
 0x11f   : > { %v5449_v26 = vpop.eup %5448  ;;  %v5083_v35 = vmul.f32 -1.442695, %v6260_v51  ;;  %5112 = vmatmul.msk.bf16.gmra.mxu1 %vm1343_vm9, %v1316_v53  ;;  %v1012_v57 = vadd.f32 %v5447_v37, %v1011_v50 }
 0x120   : > { %v5451_v54 = vpop.eup %5450  ;;  %v6264_v55 = vadd.f32 1.0, %v5449_v26  ;;  %v376_v26 = vld [vmem:[%s11241_s3 + $0x68] sm:$0xff] }
 0x121   : > { %v1024_v18 = vmul.f32 %v5451_v54, %v781_v41  ;;  %5452 = vpow2.f32 %v5083_v35  ;;  %v1016_v2 = vsel %vm6270_vm2, %v5447_v37, %v1012_v57  ;;  %vm1029_vm3 = vweird.f32 %v5451_v54  ;;  %2188 = vperm.xlu1 %5384, %v376_v26  }
 0x122   : > { %5454 = vrcp.f32 %v6264_v55  ;;  %v1021_v10 = vsel %vm1018_vm4, %v1020_v4, %v1016_v2  ;;  %vm1030_vm6 = vmor %vm1028_vm5, %vm1029_vm3  ;;  %v1049_v32 = vand.u32 2147483648, %v6264_v55  ;;  %vm1043_vm8 = vweird.f32 %v6264_v55 }
 0x123   : > { %v1025_v59 = vsub.f32 1.0, %v1024_v18  ;;  %v1292_v20 = vmul.f32 %v1021_v10, %v6219_v56  ;;  %v1047_v34 = vand.u32 2147483647, %v6264_v55 }
 0x124   : > { %v635_v0 = vpop.f32.mrf.mxu0  ;;  %v1050_v45 = vor.u32 1.1754944e-38, %v1049_v32 }
 0x125   : > { %v1026_v3 = vmul.f32 %v5451_v54, %v1025_v59  ;;  %v6277_v28 = vadd.f32 %v635_v0, %v6020_v12  ;;  %vm1048_vm13 = vcmp.eq.f32.partialorder %v1047_v34, 8.507059e+37 }
 0x127   : > { %v5453_v6 = vpop.eup %5452  ;;  %v1027_v7 = vadd.f32 %v5451_v54, %v1026_v3  ;;  %v5084_v8 = vmul.f32 -1.442695, %v6277_v28 }
 0x128   : > { %v5455_v9 = vpop.eup %5454  ;;  %v783_v15 = vadd.f32 1.0, %v5453_v6 }
 0x129   : > { %v1031_v16 = vsel %vm1030_vm6, %v5451_v54, %v1027_v7  ;;  %v1039_v17 = vmul.f32 %v5455_v9, %v6264_v55  ;;  %5456 = vpow2.f32 %v5084_v8  ;;  %vm1044_vm7 = vweird.f32 %v5455_v9 }
 0x12a   : > { %v1036_v19 = vsel %vm1033_vm0, %v1035_v14, %v1031_v16  ;;  %5458 = vrcp.f32 %v783_v15  ;;  %v1062_v36 = vand.u32 2147483647, %v783_v15  ;;  %v1064_v37 = vand.u32 2147483648, %v783_v15  ;;  %vm6300_vm10 = vmor %vm1043_vm8, %vm1044_vm7 }
 0x12b   : > { %v1293_v42 = vmul.f32 %v1036_v19, %v6230_v13  ;;  %v1040_v61 = vsub.f32 1.0, %v1039_v17  ;;  %vm1058_vm12 = vweird.f32 %v783_v15 }
 0x12c   : > { %v637_v21 = vpop.f32.mrf.mxu0  ;;  %vm1063_vm15 = vcmp.eq.f32.partialorder %v1062_v36, 8.507059e+37  ;;  %v1065_v50 = vor.u32 1.1754944e-38, %v1064_v37 }
 0x12d   : > { %v6287_v23 = vadd.f32 %v637_v21, %v6020_v12  ;;  %v1317_v24 = vpack.c.bf16 %v1293_v42, %v1292_v20  ;;  %v1041_v27 = vmul.f32 %v5455_v9, %v1040_v61 }
 0x12f   : > { %v5457_v29 = vpop.eup %5456  ;;  %v5085_v52 = vmul.f32 -1.442695, %v6287_v23  ;;  %5113 = vmatmul.msk.bf16.gmra.mxu1 %vm1343_vm9, %v1317_v24  ;;  %v1042_v30 = vadd.f32 %v5455_v9, %v1041_v27 }
 0x130   : > { %v5459_v56 = vpop.eup %5458  ;;  %v6294_v5 = vadd.f32 1.0, %v5457_v29 }
 0x131   : > { %v1054_v13 = vmul.f32 %v5459_v56, %v783_v15  ;;  %5460 = vpow2.f32 %v5085_v52  ;;  %vm1059_vm11 = vweird.f32 %v5459_v56  ;;  %v1046_v44 = vsel %vm6300_vm10, %v5455_v9, %v1042_v30 }
 0x132   : > { %5462 = vrcp.f32 %v6294_v5  ;;  %vm1060_vm14 = vmor %vm1058_vm12, %vm1059_vm11  ;;  %v1051_v35 = vsel %vm1048_vm13, %v1050_v45, %v1046_v44  ;;  %v1077_v7 = vand.u32 2147483647, %v6294_v5  ;;  %v1079_v10 = vand.u32 2147483648, %v6294_v5 }
 0x133   : > { %v1055_v33 = vsub.f32 1.0, %v1054_v13  ;;  %v1294_v38 = vmul.f32 %v1051_v35, %v6250_v31  ;;  %v374_v31 = vld [vmem:[%s11241_s3 + $0x58] sm:$0xff]  ;;  %vm1073_vm2 = vweird.f32 %v6294_v5 }
 0x134   : > { %v640_v39 = vpop.f32.mrf.mxu0  ;;  %2178 = vperm.xlu2 %5385, %v374_v31   ;;  %vm6350_vm5 = vcmp.eq.f32.partialorder %v1077_v7, 8.507059e+37  ;;  %v1080_v52 = vor.u32 1.1754944e-38, %v1079_v10 }
 0x135   : > { %v1056_v41 = vmul.f32 %v5459_v56, %v1055_v33  ;;  %v6305_v43 = vadd.f32 %v640_v39, %v6020_v12 }
 0x137   : > { %v5461_v22 = vpop.eup %5460  ;;  %v1057_v46 = vadd.f32 %v5459_v56, %v1056_v41  ;;  %v5086_v48 = vmul.f32 -1.442695, %v6305_v43 }
 0x138   : > { %v6313_v49 = vpop.eup %5462  ;;  %v785_v53 = vadd.f32 1.0, %v5461_v22  ;;  %v378_v22 = vld [vmem:[%s11241_s3 + $0x78] sm:$0xff] }
 0x139   : > { %v1061_v11 = vsel %vm1060_vm14, %v5459_v56, %v1057_v46  ;;  %v1069_v54 = vmul.f32 %v6313_v49, %v6294_v5  ;;  %5464 = vpow2.f32 %v5086_v48  ;;  %vm1074_vm1 = vweird.f32 %v6313_v49  ;;  %2198 = vperm.xlu0 %5383, %v378_v22  }
 0x13a   : > { %v1066_v55 = vsel %vm1063_vm15, %v1065_v50, %v1061_v11  ;;  %5466 = vrcp.f32 %v785_v53  ;;  %v1092_v14 = vand.u32 2147483647, %v785_v53  ;;  %v1094_v15 = vand.u32 2147483648, %v785_v53  ;;  %vm6346_vm4 = vmor %vm1073_vm2, %vm1074_vm1 }
 0x13b   : > { %v1295_v57 = vmul.f32 %v1066_v55, %v6260_v51  ;;  %v1070_v18 = vsub.f32 1.0, %v1069_v54  ;;  %vm1088_vm6 = vweird.f32 %v785_v53 }
 0x13c   : > { %v642_v58 = vpop.f32.mrf.mxu0  ;;  %v1401_v59 = vpop.f32.mrf.mxu1  ;;  %vm1093_vm7 = vcmp.eq.f32.partialorder %v1092_v14, 8.507059e+37  ;;  %v1095_v56 = vor.u32 1.1754944e-38, %v1094_v15 }
 0x13d   : > { %v6323_v60 = vadd.f32 %v642_v58, %v6020_v12  ;;  %v6326_v62 = vadd.f32 %v1401_v59, %v6310_v1  ;;  %v1318_v63 = vpack.c.bf16 %v1295_v57, %v1294_v38  ;;  %v1071_v2 = vmul.f32 %v6313_v49, %v1070_v18 }
 0x13f   : > { %v5465_v0 = vpop.eup %5464  ;;  %v5087_v3 = vmul.f32 -1.442695, %v6323_v60  ;;  %v5122_v47 = vmul.f32 -1.442695, %v6326_v62  ;;  %5114 = vmatmul.msk.bf16.gmra.mxu1 %vm1343_vm9, %v1318_v63  ;;  %v1072_v8 = vadd.f32 %v6313_v49, %v1071_v2 }
 0x140   : > { %v5467_v51 = vpop.eup %5466  ;;  %v6331_v4 = vadd.f32 1.0, %v5465_v0 }
 0x141   : > { %v1084_v6 = vmul.f32 %v5467_v51, %v785_v53  ;;  %5468 = vpow2.f32 %v5087_v3  ;;  %vm1089_vm3 = vweird.f32 %v5467_v51  ;;  %v1076_v24 = vsel %vm6346_vm4, %v6313_v49, %v1072_v8 }
 0x142   : > { %5470 = vrcp.f32 %v6331_v4  ;;  %vm1090_vm0 = vmor %vm1088_vm6, %vm1089_vm3  ;;  %v1081_v34 = vsel %vm6350_vm5, %v1080_v52, %v1076_v24  ;;  %vm1103_vm8 = vweird.f32 %v6331_v4  ;;  %v1107_v18 = vand.u32 2147483647, %v6331_v4 }
 0x143   : > { %v1085_v9 = vsub.f32 1.0, %v1084_v6  ;;  %5472 = vpow2.f32 %v5122_v47  ;;  %v1296_v45 = vmul.f32 %v1081_v34, %v6277_v28  ;;  %v1109_v38 = vand.u32 2147483648, %v6331_v4 }
 0x144   : > { %v645_v16 = vpop.f32.mrf.mxu0  ;;  %v1403_v17 = vpop.f32.mrf.mxu1  ;;  %vm1108_vm15 = vcmp.eq.f32.partialorder %v1107_v18, 8.507059e+37 }
 0x145   : > { %v1086_v19 = vmul.f32 %v5467_v51, %v1085_v9  ;;  %v6344_v20 = vadd.f32 %v645_v16, %v6020_v12  ;;  %v6363_v33 = vadd.f32 %v1403_v17, %v6310_v1  ;;  %v1110_v9 = vor.u32 1.1754944e-38, %v1109_v38 }
 0x147   : > { %v5469_v21 = vpop.eup %5468  ;;  %v1087_v25 = vadd.f32 %v5467_v51, %v1086_v19  ;;  %v5088_v27 = vmul.f32 -1.442695, %v6344_v20  ;;  %v5123_v46 = vmul.f32 -1.442695, %v6363_v33 }
 0x148   : > { %v6358_v29 = vpop.eup %5470  ;;  %v787_v5 = vadd.f32 1.0, %v5469_v21 }
 0x149   : > { %v5473_v13 = vpop.eup %5472  ;;  %v1091_v30 = vsel %vm1090_vm0, %v5467_v51, %v1087_v25  ;;  %v1099_v32 = vmul.f32 %v6358_v29, %v6331_v4  ;;  %5474 = vpow2.f32 %v5088_v27  ;;  %vm1104_vm10 = vweird.f32 %v6358_v29 }
 0x14a   : > { %v1096_v36 = vsel %vm1093_vm7, %v1095_v56, %v1091_v30  ;;  %5476 = vrcp.f32 %v787_v5  ;;  %v6368_v40 = vadd.f32 1.0, %v5473_v13  ;;  %v1124_v58 = vand.u32 2147483648, %v787_v5  ;;  %vm6401_vm12 = vmor %vm1103_vm8, %vm1104_vm10 }
 0x14b   : > { %v1297_v37 = vmul.f32 %v1096_v36, %v6287_v23  ;;  %v1100_v39 = vsub.f32 1.0, %v1099_v32  ;;  %v1122_v2 = vand.u32 2147483647, %v787_v5  ;;  %vm1118_vm13 = vweird.f32 %v787_v5 }
 0x14c   : > { %v647_v41 = vpop.f32.mrf.mxu0  ;;  %v1406_v44 = vpop.f32.mrf.mxu1  ;;  %5478 = vrcp.f32 %v6368_v40  ;;  %v1125_v10 = vor.u32 1.1754944e-38, %v1124_v58  ;;  %vm1614_vm3 = vweird.f32 %v6368_v40  ;;  %v2378_v58 = vlaneseq }
 0x14d   : > { %v6376_v48 = vadd.f32 %v647_v41, %v6020_v12  ;;  %v6379_v49 = vadd.f32 %v1406_v44, %v6310_v1  ;;  %v1101_v50 = vmul.f32 %v6358_v29, %v1100_v39  ;;  %v1319_v53 = vpack.c.bf16 %v1297_v37, %v1296_v45  ;;  %v6442_v39 = vld [vmem:[%s11242_s4 + $0x8] sm:$0xff] }
 0x14e   : > { %5480 = vpow2.f32 %v5123_v46  ;;  %vm1123_vm1 = vcmp.eq.f32.partialorder %v1122_v2, 8.507059e+37  ;;  %v1618_v44 = vand.u32 2147483647, %v6368_v40 }
 0x14f   : > { %v5475_v23 = vpop.eup %5474  ;;  %v5089_v28 = vmul.f32 -1.442695, %v6376_v48  ;;  %5115 = vmatmul.msk.bf16.gmra.mxu1 %vm1343_vm9, %v1319_v53  ;;  %v5124_v54 = vmul.f32 -1.442695, %v6379_v49  ;;  %v1102_v55 = vadd.f32 %v6358_v29, %v1101_v50  ;;  %v1620_v53 = vand.u32 2147483648, %v6368_v40 }
 0x150   : > { %v5477_v26 = vpop.eup %5476  ;;  %v6383_v35 = vadd.f32 1.0, %v5475_v23  ;;  %vm1619_vm5 = vcmp.eq.f32.partialorder %v1618_v44, 8.507059e+37 }
 0x151   : > { %v1114_v11 = vmul.f32 %v5477_v26, %v787_v5  ;;  %vm1119_vm11 = vweird.f32 %v5477_v26  ;;  %v1106_v31 = vsel %vm6401_vm12, %v6358_v29, %v1102_v55 }
 0x152   : > { %5482 = vrcp.f32 %v6383_v35  ;;  %v6394_v63 = vpop.eup %5478  ;;  %vm1120_vm14 = vmor %vm1118_vm13, %vm1119_vm11  ;;  %v1111_v17 = vsel %vm1108_vm15, %v1110_v9, %v1106_v31  ;;  %v1137_v18 = vand.u32 2147483647, %v6383_v35  ;;  %v1139_v2 = vand.u32 2147483648, %v6383_v35 }
 0x153   : > { %v1115_v57 = vsub.f32 1.0, %v1114_v11  ;;  %5484 = vpow2.f32 %v5089_v28  ;;  %v1610_v4 = vmul.f32 %v6394_v63, %v6368_v40  ;;  %v1298_v27 = vmul.f32 %v1111_v17, %v6305_v43  ;;  %v6459_v28 = vpop.permute.xlu1 %2278 }
 0x154   : > { %v650_v59 = vpop.f32.mrf.mxu0  ;;  %5486 = vpow2.f32 %v5124_v54  ;;  %v5481_v51 = vpop.eup %5480  ;;  %vm1615_vm2 = vweird.f32 %v6394_v63  ;;  %11379 = vst [vmem:[#allocation2_spill] sm:$0xff] %v6459_v28  ;;  %v6462_v11 = vperm.slane %v6442_v39, 2  ;;  %v6467_v54 = vld [vmem:[%s11242_s4] sm:$0xff]  ;;  %vm1133_vm0 = vweird.f32 %v6383_v35 }
 0x155   : > { %v1116_v0 = vmul.f32 %v5477_v26, %v1115_v57  ;;  %v6397_v3 = vadd.f32 %v650_v59, %v6020_v12  ;;  %v1408_v8 = vpop.f32.mrf.mxu1  ;;  %v6413_v42 = vadd.f32 1.0, %v5481_v51  ;;  %v1611_v25 = vsub.f32 1.0, %v1610_v4  ;;  %v377_v59 = vld [vmem:[%s11241_s3 + $0x70] sm:$0xff]  ;;  %vm6483_vm4 = vmor %vm1614_vm3, %vm1615_vm2 }
 0x156   : > { %v6429_v13 = vadd.f32 %v1408_v8, %v6310_v1  ;;  %v6470_v55 = vperm.slane %v6467_v54, 7  ;;  %2193 = vperm.xlu2 %5385, %v377_v59   ;;  %vm6501_vm7 = vcmp.eq.f32.partialorder %v1137_v18, 8.507059e+37 }
 0x157   : > { %v1117_v6 = vadd.f32 %v5477_v26, %v1116_v0  ;;  %v5090_v7 = vmul.f32 -1.442695, %v6397_v3  ;;  %v1612_v43 = vmul.f32 %v6394_v63, %v1611_v25  ;;  %v6512_v25 = vshrl.u32 %v2378_v58, 7 }
 0x158   : > { %v6411_v14 = vpop.eup %5482  ;;  %v5125_v22 = vmul.f32 -1.442695, %v6429_v13  ;;  %vm1629_vm10 = vweird.f32 %v6413_v42 }
 0x159   : > { %v1121_v15 = vsel %vm1120_vm14, %v5477_v26, %v1117_v6  ;;  %5488 = vpow2.f32 %v5090_v7  ;;  %v5485_v16 = vpop.eup %5484  ;;  %v1129_v29 = vmul.f32 %v6411_v14, %v6383_v35  ;;  %v1613_v46 = vadd.f32 %v6394_v63, %v1612_v43 }
 0x15a   : > { %v1126_v19 = vsel %vm1123_vm1, %v1125_v10, %v1121_v15  ;;  %v6416_v21 = vadd.f32 1.0, %v5485_v16  ;;  %v5487_v24 = vpop.eup %5486  ;;  %v1621_v7 = vor.u32 1.1754944e-38, %v1620_v53  ;;  %vm1134_vm6 = vweird.f32 %v6411_v14 }
 0x15b   : > { %v1299_v61 = vmul.f32 %v1126_v19, %v6323_v60  ;;  %v6423_v56 = vadd.f32 1.0, %v5487_v24  ;;  %v379_v60 = vld [vmem:[%s11241_s3 + $0x80] sm:$0xff]  ;;  %v1130_v34 = vsub.f32 1.0, %v1129_v29  ;;  %v1617_v51 = vsel %vm6483_vm4, %v6394_v63, %v1613_v46  ;;  %vm6507_vm8 = vmor %vm1133_vm0, %vm1134_vm6 }
 0x15c   : > { %5490 = vrcp.f32 %v6416_v21  ;;  %v652_v52 = vpop.f32.mrf.mxu0  ;;  %2203 = vperm.xlu1 %5384, %v379_v60   ;;  %v1622_v15 = vsel %vm1619_vm5, %v1621_v7, %v1617_v51  ;;  %v1140_v16 = vor.u32 1.1754944e-38, %v1139_v2  ;;  %v1152_v24 = vand.u32 2147483647, %v6416_v21  ;;  %v6559_v51 = vpop.permute.xlu2 %2128 }
 0x15d   : > { %5492 = vrcp.f32 %v6413_v42  ;;  %v1320_v30 = vpack.c.bf16 %v1299_v61, %v1298_v27  ;;  %v6434_v32 = vadd.f32 %v652_v52, %v6020_v12  ;;  %v1411_v37 = vpop.f32.mrf.mxu1  ;;  %v1131_v26 = vmul.f32 %v6411_v14, %v1130_v34  ;;  %11392 = vst [vmem:[#allocation5_spill] sm:$0xff] %v6559_v51 }
 0x15e   : > { %5494 = vrcp.f32 %v6423_v56  ;;  %v6455_v50 = vadd.f32 %v1411_v37, %v6310_v1  ;;  %v1633_v35 = vand.u32 2147483647, %v6413_v42  ;;  %v2089_v43 = vmul.f32 %v1622_v15, %v6326_v62 }
 0x15f   : > { %v5489_v5 = vpop.eup %5488  ;;  %5116 = vmatmul.msk.bf16.gmra.mxu1 %vm1343_vm9, %v1320_v30  ;;  %v5091_v23 = vmul.f32 -1.442695, %v6434_v32  ;;  %v1132_v8 = vadd.f32 %v6411_v14, %v1131_v26  ;;  %vm1148_vm12 = vweird.f32 %v6416_v21  ;;  %v1154_v44 = vand.u32 2147483648, %v6416_v21 }
 0x160   : > { %v6436_v36 = vadd.f32 1.0, %v5489_v5  ;;  %v5126_v31 = vmul.f32 -1.442695, %v6455_v50  ;;  %v1635_v5 = vand.u32 2147483648, %v6413_v42  ;;  %vm6537_vm13 = vcmp.eq.f32.partialorder %v1152_v24, 8.507059e+37 }
 0x161   : > { %v1136_v52 = vsel %vm6507_vm8, %v6411_v14, %v1132_v8  ;;  %v1648_v18 = vand.u32 2147483647, %v6423_v56  ;;  %vm6548_vm15 = vcmp.eq.f32.partialorder %v1633_v35, 8.507059e+37  ;;  %vm1644_vm2 = vweird.f32 %v6423_v56 }
 0x162   : > { %v6444_v41 = vpop.eup %5490  ;;  %5496 = vrcp.f32 %v6436_v36  ;;  %v1141_v26 = vsel %vm6501_vm7, %v1140_v16, %v1136_v52  ;;  %v1167_v7 = vand.u32 2147483647, %v6436_v36  ;;  %v1155_v4 = vor.u32 1.1754944e-38, %v1154_v44 }
 0x163   : > { %v6449_v45 = vpop.eup %5492  ;;  %v1144_v38 = vmul.f32 %v6444_v41, %v6416_v21  ;;  %5498 = vpow2.f32 %v5125_v22  ;;  %v6530_v22 = vpop.permute.xlu1 %2123  ;;  %vm1149_vm1 = vweird.f32 %v6444_v41  ;;  %vm6574_vm4 = vcmp.eq.f32.partialorder %v1648_v18, 8.507059e+37 }
 0x164   : > { %v6472_v57 = vpop.eup %5494  ;;  %v1625_v47 = vmul.f32 %v6449_v45, %v6413_v42  ;;  %5500 = vpow2.f32 %v5091_v23  ;;  %v655_v10 = vpop.f32.mrf.mxu0  ;;  %vm1630_vm11 = vweird.f32 %v6449_v45  ;;  %11386 = vst [vmem:[#allocation3_spill] sm:$0xff] %v6530_v22  ;;  %vm6581_vm5 = vmor %vm1148_vm12, %vm1149_vm1  ;;  %vm1163_vm6 = vweird.f32 %v6436_v36 }
 0x165   : > { %v1640_v40 = vmul.f32 %v6472_v57, %v6423_v56  ;;  %v1145_v63 = vsub.f32 1.0, %v1144_v38  ;;  %5502 = vpow2.f32 %v5126_v31  ;;  %v6516_v27 = vadd.f32 %v655_v10, %v6020_v12  ;;  %vm6599_vm0 = vmor %vm1629_vm10, %vm1630_vm11 }
 0x166   : > { %v1626_v19 = vsub.f32 1.0, %v1625_v47  ;;  %v1650_v38 = vand.u32 2147483648, %v6423_v56  ;;  %vm1645_vm14 = vweird.f32 %v6472_v57  ;;  %v6566_v10 = vmul.f32 %v1141_v26, %v6344_v20 }
 0x167   : > { %v1641_v9 = vsub.f32 1.0, %v1640_v40  ;;  %v1146_v34 = vmul.f32 %v6444_v41, %v1145_v63  ;;  %v5092_v37 = vmul.f32 -1.442695, %v6516_v27  ;;  %v6555_v40 = vmul.f32 %v6530_v22, %v2089_v43  ;;  %vm6570_vm3 = vmor %vm1644_vm2, %vm1645_vm14 }
 0x168   : > { %v6496_v6 = vpop.eup %5496  ;;  %v1627_v23 = vmul.f32 %v6449_v45, %v1626_v19  ;;  %v1651_v16 = vor.u32 1.1754944e-38, %v1650_v38  ;;  %vm6610_vm8 = vcmp.eq.f32.partialorder %v1167_v7, 8.507059e+37  ;;  %v6642_v62 = vperm.slane %v6442_v39, 1 }
 0x169   : > { %v1159_v17 = vmul.f32 %v6496_v6, %v6436_v36  ;;  %v5499_v29 = vpop.eup %5498  ;;  %v1642_v60 = vmul.f32 %v6472_v57, %v1641_v9  ;;  %5504 = vpow2.f32 %v5092_v37  ;;  %v1147_v2 = vadd.f32 %v6444_v41, %v1146_v34  ;;  %11391 = vst [vmem:[#allocation4_spill] sm:$0xff] %v6555_v40  ;;  %v1413_v9 = vpop.f32.mrf.mxu1 }
 0x16a   : > { %v5501_v30 = vpop.eup %5500  ;;  %v6545_v59 = vadd.f32 1.0, %v5499_v29  ;;  %v1628_v8 = vadd.f32 %v6449_v45, %v1627_v23  ;;  %v11249_v21 = vrot.slane %v6555_v40, 7  ;;  %v6604_v35 = vadd.f32 %v1413_v9, %v6310_v1  ;;  %v6658_v9 = vpop.permute.xlu2 %2133 }
 0x16b   : > { %v1160_v14 = vsub.f32 1.0, %v1159_v17  ;;  %v6532_v46 = vadd.f32 1.0, %v5501_v30  ;;  %v5503_v53 = vpop.eup %5502  ;;  %v1643_v58 = vadd.f32 %v6472_v57, %v1642_v60  ;;  %v1169_v17 = vand.u32 2147483648, %v6436_v36  ;;  %v6614_v60 = vpop.permute.xlu0 %2268  ;;  %11406 = vst [vmem:[#allocation7_spill] sm:$0xff] %v6658_v9 }
 0x16c   : > { %v6557_v47 = vadd.f32 1.0, %v5503_v53  ;;  %v657_v19 = vpop.f32.mrf.mxu0  ;;  %v1151_v24 = vsel %vm6581_vm5, %v6444_v41, %v1147_v2  ;;  %vm1164_vm7 = vweird.f32 %v6496_v6  ;;  %11403 = vst [vmem:[#allocation6_spill] sm:$0xff] %v6614_v60  ;;  %v1632_v42 = vsel %vm6599_vm0, %v6449_v45, %v1628_v8 }
 0x16d   : > { %5506 = vrcp.f32 %v6532_v46  ;;  %v1161_v31 = vmul.f32 %v6496_v6, %v1160_v14  ;;  %v1647_v20 = vsel %vm6570_vm3, %v6472_v57, %v1643_v58  ;;  %v1636_v34 = vor.u32 1.1754944e-38, %v1635_v5  ;;  %vm6635_vm10 = vmor %vm1163_vm6, %vm1164_vm7 }
 0x16e   : > { %5508 = vrcp.f32 %v6557_v47  ;;  %v1652_v30 = vsel %vm6574_vm4, %v1651_v16, %v1647_v20  ;;  %v6624_v37 = vadd.f32 %v657_v19, %v6020_v12  ;;  %v1156_v44 = vsel %vm6537_vm13, %v1155_v4, %v1151_v24 }
 0x16f   : > { %v5505_v61 = vpop.eup %5504  ;;  %5510 = vrcp.f32 %v6545_v59  ;;  %v1162_v52 = vadd.f32 %v6496_v6, %v1161_v31  ;;  %v1170_v14 = vor.u32 1.1754944e-38, %v1169_v17  ;;  %v6629_v23 = vperm.slane %v6442_v39, 0 }
 0x170   : > { %v6631_v53 = vadd.f32 1.0, %v5505_v61  ;;  %v1637_v18 = vsel %vm6548_vm15, %v1636_v34, %v1632_v42  ;;  %v5127_v38 = vmul.f32 -1.442695, %v6604_v35  ;;  %v2091_v58 = vmul.f32 %v1652_v30, %v6379_v49 }
 0x171   : > { %v1166_v2 = vsel %vm6635_vm10, %v6496_v6, %v1162_v52  ;;  %v1182_v36 = vand.u32 2147483647, %v6532_v46  ;;  %v1301_v0 = vmul.f32 %v1156_v44, %v6376_v48  ;;  %v6655_v8 = vperm.slane %v6442_v39, 3  ;;  %v381_v6 = vld [vmem:[%s11241_s3 + $0x90] sm:$0xff]  ;;  %v1416_v15 = vpop.f32.mrf.mxu1 }
 0x172   : > { %5512 = vrcp.f32 %v6631_v53  ;;  %v5093_v49 = vmul.f32 -1.442695, %v6624_v37  ;;  %vm1178_vm11 = vweird.f32 %v6532_v46  ;;  %v1184_v63 = vand.u32 2147483648, %v6532_v46  ;;  %2213 = vperm.xlu0 %5383, %v381_v6  }
 0x173   : > { %v6606_v29 = vpop.eup %5506  ;;  %v1171_v56 = vsel %vm6610_vm8, %v1170_v14, %v1166_v2  ;;  %v1680_v20 = vand.u32 2147483648, %v6557_v47  ;;  %v2090_v16 = vmul.f32 %v1637_v18, %v6363_v33  ;;  %5514 = vpow2.f32 %v5127_v38  ;;  %v6686_v41 = vpop.permute.xlu0 %2273 }
 0x174   : > { %v1174_v43 = vmul.f32 %v6606_v29, %v6532_v46  ;;  %v5509_v45 = vpop.eup %5508  ;;  %vm6671_vm12 = vcmp.eq.f32.partialorder %v1182_v36, 8.507059e+37  ;;  %v1678_v61 = vand.u32 2147483647, %v6557_v47  ;;  %v6677_v24 = vmul.f32 %v6658_v9, %v2091_v58  ;;  %11409 = vst [vmem:[#allocation8_spill] sm:$0xff] %v6686_v41  ;;  %v660_v18 = vpop.f32.mrf.mxu0  ;;  %v382_v36 = vld [vmem:[%s11241_s3 + $0x98] sm:$0xff] }
 0x175   : > { %v1670_v31 = vmul.f32 %v5509_v45, %v6557_v47  ;;  %v6651_v7 = vpop.eup %5510  ;;  %vm1675_vm13 = vweird.f32 %v5509_v45  ;;  %vm1179_vm14 = vweird.f32 %v6606_v29  ;;  %vm1674_vm15 = vweird.f32 %v6557_v47  ;;  %2218 = vperm.xlu1 %5384, %v382_v36  }
 0x176   : > { %v1175_v5 = vsub.f32 1.0, %v1174_v43  ;;  %5516 = vpow2.f32 %v5093_v49  ;;  %v6682_v57 = vadd.f32 %v1416_v15, %v6310_v1  ;;  %vm2380_vm1 = vcmp.lt.s32.totalorder %v6512_v25, 1  ;;  %vm1676_vm2 = vmor %vm1674_vm15, %vm1675_vm13 }
 0x177   : > { %v1671_v48 = vsub.f32 1.0, %v1670_v31  ;;  %v1321_v42 = vpack.c.bf16 %v1301_v0, %v6566_v10  ;;  %v1655_v30 = vmul.f32 %v6651_v7, %v6545_v59  ;;  %v6694_v47 = vmul.f32 %v1171_v56, %v6397_v3  ;;  %vm6705_vm4 = vmor %vm1178_vm11, %vm1179_vm14 }
 0x178   : > { %v1176_v4 = vmul.f32 %v6606_v29, %v1175_v5  ;;  %v6691_v43 = vpop.eup %5512  ;;  %v1185_v34 = vor.u32 1.1754944e-38, %v1184_v63  ;;  %v1681_v44 = vor.u32 1.1754944e-38, %v1680_v20  ;;  %v5128_v14 = vmul.f32 -1.442695, %v6682_v57 }
 0x179   : > { %v1672_v19 = vmul.f32 %v5509_v45, %v1671_v48  ;;  %vm1679_vm3 = vcmp.eq.f32.partialorder %v1678_v61, 8.507059e+37  ;;  %v1189_v5 = vmul.f32 %v6691_v43, %v6631_v53  ;;  %5117 = vmatmul.msk.bf16.gmra.mxu1 %vm1343_vm9, %v1321_v42  ;;  %v1656_v10 = vsub.f32 1.0, %v1655_v30  ;;  %v5515_v38 = vpop.eup %5514 }
 0x17a   : > { %v1177_v33 = vadd.f32 %v6606_v29, %v1176_v4  ;;  %v2348_v2 = vrot.slane %v6677_v24, 7  ;;  %5518 = vpow2.f32 %v5128_v14  ;;  %v1665_v49 = vand.u32 2147483648, %v6545_v59 }
 0x17b   : > { %v1673_v52 = vadd.f32 %v5509_v45, %v1672_v19  ;;  %v1190_v46 = vsub.f32 1.0, %v1189_v5  ;;  %v1657_v0 = vmul.f32 %v6651_v7, %v1656_v10  ;;  %vm2575_vm5 = vcmp.lt.s32.totalorder %v6512_v25, 7 }
 0x17c   : > { %v1181_v31 = vsel %vm6705_vm4, %v6606_v29, %v1177_v33  ;;  %v5517_v6 = vpop.eup %5516  ;;  %vm1660_vm6 = vweird.f32 %v6651_v7  ;;  %v1663_v63 = vand.u32 2147483647, %v6545_v59  ;;  %v6726_v48 = vadd.f32 %v660_v18, %v6020_v12 }
 0x17d   : > { %v1677_v26 = vsel %vm1676_vm2, %v5509_v45, %v1673_v52  ;;  %v6710_v45 = vmul.f32 %v6559_v51, %v2090_v16  ;;  %v6730_v29 = vmul.f32 %v6470_v55, %v6677_v24  ;;  %v2545_v15 = vrot.slane %v6677_v24, 1 }
 0x17e   : > { %v1682_v58 = vsel %vm1679_vm3, %v1681_v44, %v1677_v26  ;;  %v6733_v56 = vadd.f32 1.0, %v5517_v6  ;;  %v1658_v20 = vadd.f32 %v6651_v7, %v1657_v0  ;;  %v1186_v16 = vsel %vm6671_vm12, %v1185_v34, %v1181_v31  ;;  %v6759_v26 = vpop.permute.xlu0 %2138 }
 0x17f   : > { %v2093_v4 = vmul.f32 %v1682_v58, %v6455_v50  ;;  %v6736_v50 = vpop.permute.xlu1 %2143  ;;  %v2347_v19 = vrot.slane %v6710_v45, 7  ;;  %vm1659_vm0 = vweird.f32 %v6545_v59  ;;  %v5094_v61 = vmul.f32 -1.442695, %v6726_v48  ;;  %11414 = vst [vmem:[#allocation11_spill] sm:$0xff] %v6759_v26 }
 0x180   : > { %11412 = vst [vmem:[#allocation9_spill] sm:$0xff] %v6736_v50  ;;  %v6745_v33 = vmul.f32 %v6470_v55, %v6710_v45  ;;  %v1191_v52 = vmul.f32 %v6691_v43, %v1190_v46  ;;  %5520 = vrcp.f32 %v6733_v56  ;;  %vm1661_vm7 = vmor %vm1659_vm0, %vm1660_vm6  ;;  %v1666_v42 = vor.u32 1.1754944e-38, %v1665_v49  ;;  %v5519_v17 = vpop.eup %5518 }
 0x181   : > { %v1662_v30 = vsel %vm1661_vm7, %v6651_v7, %v1658_v20  ;;  %vm1664_vm8 = vcmp.eq.f32.partialorder %v1663_v63, 8.507059e+37  ;;  %5522 = vpow2.f32 %v5094_v61  ;;  %v6753_v59 = vmul.f32 %v6736_v50, %v2093_v4 }
 0x182   : > { %v1303_v34 = vmul.f32 %v1186_v16, %v6434_v32  ;;  %v11250_v44 = vrot.slane %v6710_v45, 1  ;;  %v6757_v14 = vadd.f32 1.0, %v5519_v17  ;;  %v1667_v5 = vsel %vm1664_vm8, %v1666_v42, %v1662_v30 }
 0x183   : > { %11413 = vst [vmem:[#allocation10_spill] sm:$0xff] %v6753_v59  ;;  %v6765_v10 = vsel %vm2380_vm1, %v11249_v21, %v2347_v19  ;;  %v1197_v7 = vand.u32 2147483647, %v6631_v53  ;;  %v1199_v18 = vand.u32 2147483648, %v6631_v53  ;;  %v2092_v3 = vmul.f32 %v1667_v5, %v6429_v13  ;;  %v1418_v13 = vpop.f32.mrf.mxu1 }
 0x184   : > { %v1192_v32 = vadd.f32 %v6691_v43, %v1191_v52  ;;  %vm1194_vm10 = vweird.f32 %v6691_v43  ;;  %v6776_v58 = vsel %vm2380_vm1, %v2347_v19, %v2348_v2  ;;  %5524 = vrcp.f32 %v6757_v14 }
 0x185   : > { %v6779_v36 = vadd.f32 1.0, %v5515_v38  ;;  %v6782_v31 = vmul.f32 %v6759_v26, %v2092_v3  ;;  %v6785_v46 = vperm.slane %v6467_v54, 6  ;;  %v2318_v0 = vmul.f32 %v6462_v11, %v6753_v59 }
 0x186   : > { %v5521_v49 = vpop.eup %5520  ;;  %v1322_v6 = vpack.c.bf16 %v1303_v34, %v6694_v47  ;;  %vm1193_vm11 = vweird.f32 %v6631_v53  ;;  %v6797_v38 = vsel %vm2575_vm5, %v11250_v44, %v2545_v15  ;;  %v1212_v54 = vand.u32 2147483647, %v6733_v56 }
 0x187   : > { %11415 = vst [vmem:[#allocation12_spill] sm:$0xff] %v6797_v38  ;;  %v5523_v4 = vpop.eup %5522  ;;  %vm6800_vm12 = vmor %vm1193_vm11, %vm1194_vm10  ;;  %vm6804_vm13 = vcmp.eq.f32.partialorder %v1197_v7, 8.507059e+37  ;;  %v1200_v53 = vor.u32 1.1754944e-38, %v1199_v18  ;;  %v1204_v47 = vmul.f32 %v5521_v49, %v6733_v56  ;;  %v2418_v16 = vmul.f32 %v6785_v46, %v6776_v58 }
 0x188   : > { %v1196_v19 = vsel %vm6800_vm12, %v6691_v43, %v1192_v32  ;;  %v1214_v61 = vand.u32 2147483648, %v6733_v56  ;;  %v2317_v52 = vmul.f32 %v6462_v11, %v6782_v31  ;;  %v2546_v42 = vrot.slane %v6782_v31, 1 }
 0x189   : > { %5526 = vrcp.f32 %v6779_v36  ;;  %v1205_v17 = vsub.f32 1.0, %v1204_v47  ;;  %v2417_v30 = vmul.f32 %v6785_v46, %v6765_v10  ;;  %v2450_v34 = vadd.f32 %v2418_v16, %v2318_v0  ;;  %5118 = vmatmul.msk.bf16.gmra.mxu1 %vm1343_vm9, %v1322_v6 }
 0x18a   : > { %v5525_v5 = vpop.eup %5524  ;;  %vm1208_vm14 = vweird.f32 %v6733_v56  ;;  %vm6822_vm15 = vcmp.eq.f32.partialorder %v1212_v54, 8.507059e+37  ;;  %v6826_v43 = vadd.f32 1.0, %v5523_v4  ;;  %v6829_v18 = vadd.f32 %v1418_v13, %v6310_v1  ;;  %v662_v13 = vpop.f32.mrf.mxu0 }
 0x18b   : > { %v1201_v3 = vsel %vm6804_vm13, %v1200_v53, %v1196_v19  ;;  %v1206_v32 = vmul.f32 %v5521_v49, %v1205_v17  ;;  %vm1209_vm2 = vweird.f32 %v5521_v49  ;;  %v1700_v0 = vmul.f32 %v5525_v5, %v6757_v14 }
 0x18c   : > { %v1215_v63 = vor.u32 1.1754944e-38, %v1214_v61  ;;  %v1708_v54 = vand.u32 2147483647, %v6757_v14  ;;  %v2449_v47 = vadd.f32 %v2417_v30, %v2317_v52  ;;  %v6840_v4 = vsel %vm2575_vm5, %v2545_v15, %v2546_v42  ;;  %vm1210_vm3 = vmor %vm1208_vm14, %vm1209_vm2  ;;  %v380_v15 = vld [vmem:[%s11241_s3 + $0x88] sm:$0xff] }
 0x18d   : > { %v1207_v16 = vadd.f32 %v5521_v49, %v1206_v32  ;;  %v1701_v6 = vsub.f32 1.0, %v1700_v0  ;;  %v1710_v20 = vand.u32 2147483648, %v6757_v14  ;;  %vm1705_vm4 = vweird.f32 %v5525_v5  ;;  %v1421_v0 = vpop.f32.mrf.mxu1  ;;  %2208 = vperm.xlu2 %5385, %v380_v15  }
 0x18e   : > { %v2349_v19 = vrot.slane %v6782_v31, 7  ;;  %5528 = vrcp.f32 %v6826_v43  ;;  %v2613_v32 = vmul.f32 %v6629_v23, %v6840_v4  ;;  %v2515_v56 = vadd.f32 %v6730_v29, %v2450_v34 }
 0x18f   : > { %v6852_v52 = vpop.eup %5526  ;;  %v1211_v17 = vsel %vm1210_vm3, %v5521_v49, %v1207_v16  ;;  %v1702_v30 = vmul.f32 %v5525_v5, %v1701_v6  ;;  %v2612_v21 = vmul.f32 %v6629_v23, %v6797_v38  ;;  %v2514_v53 = vadd.f32 %v6745_v33, %v2449_v47 }
 0x190   : > { %v1216_v44 = vsel %vm6822_vm15, %v1215_v63, %v1211_v17  ;;  %v5129_v61 = vmul.f32 -1.442695, %v6829_v18  ;;  %v1304_v49 = vmul.f32 %v1201_v3, %v6516_v27  ;;  %vm1704_vm6 = vweird.f32 %v6757_v14 }
 0x191   : > { %v1703_v16 = vadd.f32 %v5525_v5, %v1702_v30  ;;  %v2645_v6 = vadd.f32 %v2613_v32, %v2515_v56  ;;  %v1305_v29 = vmul.f32 %v1216_v44, %v6624_v37  ;;  %vm1706_vm0 = vmor %vm1704_vm6, %vm1705_vm4  ;;  %v1711_v34 = vor.u32 1.1754944e-38, %v1710_v20  ;;  %v6906_v56 = vpop.permute.xlu0 %2153 }
 0x192   : > { %v6871_v7 = vsel %vm2380_vm1, %v2348_v2, %v2349_v19  ;;  %v11423_v33 = vrot.slane %v6753_v59, 1  ;;  %vm1709_vm7 = vcmp.eq.f32.partialorder %v1708_v54, 8.507059e+37  ;;  %v11425_v14 = vrot.slane %v6753_v59, 7  ;;  %v665_v30 = vpop.f32.mrf.mxu0  ;;  %11427 = vst [vmem:[#allocation16_spill] sm:$0xff] %v6906_v56 }
 0x193   : > { %11422 = vst [vmem:[#allocation13_spill] sm:$0xff] %v6871_v7  ;;  %v1707_v3 = vsel %vm1706_vm0, %v5525_v5, %v1703_v16  ;;  %v6886_v44 = vadd.f32 %v662_v13, %v6020_v12  ;;  %v2644_v47 = vadd.f32 %v2612_v21, %v2514_v53  ;;  %v6891_v20 = vadd.f32 %v1421_v0, %v6310_v1 }
 0x194   : > { %v6877_v27 = vsel %vm2575_vm5, %v2546_v42, %v11423_v33  ;;  %v6883_v37 = vsel %vm2380_vm1, %v2349_v19, %v11425_v14  ;;  %v6888_v63 = vpop.eup %5528  ;;  %v1712_v2 = vsel %vm1709_vm7, %v1711_v34, %v1707_v3  ;;  %v1685_v42 = vmul.f32 %v6852_v52, %v6779_v36 }
 0x195   : > { %11424 = vst [vmem:[#allocation14_spill] sm:$0xff] %v6877_v27  ;;  %v2677_v5 = vmul.f32 %v6642_v62, %v6871_v7  ;;  %v1219_v54 = vmul.f32 %v6888_v63, %v6826_v43  ;;  %v2742_v13 = vmul.f32 %v6655_v8, %v6877_v27  ;;  %v5095_v19 = vmul.f32 -1.442695, %v6886_v44  ;;  %v1423_v3 = vpop.f32.mrf.mxu1 }
 0x196   : > { %11426 = vst [vmem:[#allocation15_spill] sm:$0xff] %v6883_v37  ;;  %v1323_v15 = vpack.c.bf16 %v1305_v29, %v1304_v49  ;;  %v2095_v21 = vmul.f32 %v1712_v2, %v6682_v57  ;;  %v5130_v53 = vmul.f32 -1.442695, %v6891_v20  ;;  %v1686_v17 = vsub.f32 1.0, %v1685_v42  ;;  %v384_v57 = vld [vmem:[%s11241_s3 + $0xa8] sm:$0xff] }
 0x197   : > { %5530 = vpow2.f32 %v5095_v19  ;;  %vm1690_vm8 = vweird.f32 %v6852_v52  ;;  %v1695_v32 = vand.u32 2147483648, %v6779_v36  ;;  %v1693_v16 = vand.u32 2147483647, %v6779_v36  ;;  %2228 = vperm.xlu0 %5383, %v384_v57  }
 0x198   : > { %5532 = vpow2.f32 %v5130_v53  ;;  %v1687_v0 = vmul.f32 %v6852_v52, %v1686_v17  ;;  %v2709_v34 = vadd.f32 %v2677_v5, %v2644_v47  ;;  %v1220_v49 = vsub.f32 1.0, %v1219_v54 }
 0x199   : > { %5534 = vpow2.f32 %v5129_v61  ;;  %v2678_v29 = vmul.f32 %v6642_v62, %v6883_v37  ;;  %v6916_v33 = vadd.f32 %v665_v30, %v6020_v12  ;;  %vm1689_vm10 = vweird.f32 %v6779_v36  ;;  %5119 = vmatmul.msk.bf16.gmra.mxu1 %vm1343_vm9, %v1323_v15 }
 0x19a   : > { %v1688_v14 = vadd.f32 %v6852_v52, %v1687_v0  ;;  %v6920_v2 = vadd.f32 %v2742_v13, %v2709_v34  ;;  %v6923_v47 = vmul.f32 %v6906_v56, %v2095_v21  ;;  %vm1691_vm11 = vmor %vm1689_vm10, %vm1690_vm8  ;;  %v1696_v61 = vor.u32 1.1754944e-38, %v1695_v32  ;;  %v6945_v0 = vpop.permute.xlu2 %2148 }
 0x19b   : > { %v5096_v42 = vmul.f32 -1.442695, %v6916_v33  ;;  %v6929_v5 = vadd.f32 %v2678_v29, %v2645_v6  ;;  %vm1694_vm12 = vcmp.eq.f32.partialorder %v1693_v16, 8.507059e+37  ;;  %v6933_v36 = vadd.f32 %v1423_v3, %v6310_v1  ;;  %11428 = vst [vmem:[#allocation17_spill] sm:$0xff] %v6945_v0 }
 0x19c   : > { %v1692_v54 = vsel %vm1691_vm11, %v6852_v52, %v1688_v14  ;;  %v2320_v13 = vmul.f32 %v6462_v11, %v6923_v47  ;;  %v1221_v15 = vmul.f32 %v6888_v63, %v1220_v49  ;;  %v2420_v53 = vmul.f32 %v6785_v46, %v6883_v37 }
 0x19d   : > { %v5531_v19 = vpop.eup %5530  ;;  %v1697_v21 = vsel %vm1694_vm12, %v1696_v61, %v1692_v54  ;;  %5536 = vpow2.f32 %v5096_v42  ;;  %v2485_v34 = vmul.f32 %v6470_v55, %v6753_v59  ;;  %v5131_v57 = vmul.f32 -1.442695, %v6933_v36 }
 0x19e   : > { %v5533_v17 = vpop.eup %5532  ;;  %v6940_v30 = vadd.f32 1.0, %v5531_v19  ;;  %v2094_v6 = vmul.f32 %v1697_v21, %v6604_v35  ;;  %v2452_v16 = vadd.f32 %v2420_v53, %v2320_v13  ;;  %v1222_v49 = vadd.f32 %v6888_v63, %v1221_v15 }
 0x19f   : > { %v5535_v52 = vpop.eup %5534  ;;  %v6943_v32 = vadd.f32 1.0, %v5533_v17  ;;  %vm1224_vm13 = vweird.f32 %v6888_v63  ;;  %v1229_v35 = vand.u32 2147483648, %v6826_v43  ;;  %v6961_v61 = vperm.slane %v6442_v39, 5 }
 0x1a0   : > { %5538 = vrcp.f32 %v6940_v30  ;;  %v6955_v29 = vadd.f32 1.0, %v5535_v52  ;;  %v6958_v3 = vmul.f32 %v6945_v0, %v2094_v6  ;;  %v2517_v14 = vadd.f32 %v2485_v34, %v2452_v16 }
 0x1a1   : > { %5540 = vrcp.f32 %v6943_v32  ;;  %vm1223_vm14 = vweird.f32 %v6826_v43  ;;  %v1227_v42 = vand.u32 2147483647, %v6826_v43  ;;  %v2419_v21 = vmul.f32 %v6785_v46, %v6871_v7 }
 0x1a2   : > { %vm6965_vm15 = vmor %vm1223_vm14, %vm1224_vm13  ;;  %v2319_v19 = vmul.f32 %v6462_v11, %v6958_v3  ;;  %v2351_v15 = vrot.slane %v6958_v3, 7  ;;  %5542 = vpow2.f32 %v5131_v57  ;;  %v6975_v53 = vperm.slane %v6442_v39, 4 }
 0x1a3   : > { %v5537_v54 = vpop.eup %5536  ;;  %v2484_v43 = vmul.f32 %v6470_v55, %v6782_v31  ;;  %v1226_v17 = vsel %vm6965_vm15, %v6888_v63, %v1222_v49  ;;  %v2548_v6 = vrot.slane %v6958_v3, 1  ;;  %v1230_v16 = vor.u32 1.1754944e-38, %v1229_v35  ;;  %v667_v35 = vpop.f32.mrf.mxu0 }
 0x1a4   : > { %5544 = vrcp.f32 %v6955_v29  ;;  %v11431_v34 = vrot.slane %v6753_v59, 7  ;;  %v2451_v9 = vadd.f32 %v2419_v21, %v2319_v19  ;;  %vm1228_vm2 = vcmp.eq.f32.partialorder %v1227_v42, 8.507059e+37 }
 0x1a5   : > { %v2614_v13 = vmul.f32 %v6629_v23, %v6877_v27  ;;  %v6995_v49 = vadd.f32 1.0, %v5537_v54  ;;  %v1231_v22 = vsel %vm1228_vm2, %v1230_v16, %v1226_v17  ;;  %v1242_v19 = vand.u32 2147483647, %v6940_v30 }
 0x1a6   : > { %v5539_v52 = vpop.eup %5538  ;;  %v6988_v57 = vsel %vm2380_vm1, %v11431_v34, %v2351_v15  ;;  %v2516_v41 = vadd.f32 %v2484_v43, %v2451_v9  ;;  %v11432_v42 = vrot.slane %v6753_v59, 1  ;;  %v1244_v17 = vand.u32 2147483648, %v6940_v30 }
 0x1a7   : > { %v6990_v51 = vpop.eup %5540  ;;  %v1234_v63 = vmul.f32 %v5539_v52, %v6940_v30  ;;  %v2807_v54 = vmul.f32 %v6975_v53, %v6988_v57  ;;  %v7013_v9 = vadd.f32 %v667_v35, %v6020_v12  ;;  %vm1239_vm3 = vweird.f32 %v5539_v52 }
 0x1a8   : > { %v1730_v28 = vmul.f32 %v6990_v51, %v6943_v32  ;;  %v7005_v21 = vsel %vm2575_vm5, %v11432_v42, %v2548_v6  ;;  %v5543_v56 = vpop.eup %5542  ;;  %v7010_v0 = vadd.f32 %v2614_v13, %v2516_v41  ;;  %5546 = vrcp.f32 %v6995_v49 }
 0x1a9   : > { %v1235_v60 = vsub.f32 1.0, %v1234_v63  ;;  %11433 = vst [vmem:[#allocation18_spill] sm:$0xff] %v7005_v21  ;;  %v2839_v63 = vadd.f32 %v2807_v54, %v6920_v2  ;;  %v7020_v34 = vperm.slane %v6442_v39, 6  ;;  %v11260_v41 = vrot.slane %v6923_v47, 1  ;;  %v385_v54 = vld [vmem:[%s11241_s3 + $0xb0] sm:$0xff] }
 0x1aa   : > { %v1731_v16 = vsub.f32 1.0, %v1730_v28  ;;  %v7017_v42 = vpop.eup %5544  ;;  %v2615_v28 = vmul.f32 %v6629_v23, %v7005_v21  ;;  %vm1238_vm4 = vweird.f32 %v6940_v30  ;;  %v7029_v2 = vadd.f32 1.0, %v5543_v56  ;;  %2233 = vperm.xlu1 %5384, %v385_v54  }
 0x1ab   : > { %v1236_v43 = vmul.f32 %v5539_v52, %v1235_v60  ;;  %v2743_v60 = vmul.f32 %v6655_v8, %v7005_v21  ;;  %v1306_v13 = vmul.f32 %v1231_v22, %v6726_v48  ;;  %vm1240_vm6 = vmor %vm1238_vm4, %vm1239_vm3  ;;  %vm1243_vm0 = vcmp.eq.f32.partialorder %v1242_v19, 8.507059e+37  ;;  %v1426_v19 = vpop.f32.mrf.mxu1 }
 0x1ac   : > { %v1732_v50 = vmul.f32 %v6990_v51, %v1731_v16  ;;  %v1245_v39 = vor.u32 1.1754944e-38, %v1244_v17  ;;  %v7032_v35 = vadd.f32 %v2615_v28, %v2517_v14  ;;  %v2872_v30 = vmul.f32 %v6961_v61, %v6958_v3 }
 0x1ad   : > { %v1237_v12 = vadd.f32 %v5539_v52, %v1236_v43  ;;  %v11434_v43 = vrot.slane %v6923_v47, 7  ;;  %v5097_v22 = vmul.f32 -1.442695, %v7013_v9  ;;  %vm1735_vm7 = vweird.f32 %v6990_v51 }
 0x1ae   : > { %v1733_v14 = vadd.f32 %v6990_v51, %v1732_v50  ;;  %v7054_v17 = vpop.eup %5546  ;;  %v1740_v28 = vand.u32 2147483648, %v6943_v32  ;;  %5548 = vrcp.f32 %v7029_v2  ;;  %vm1734_vm8 = vweird.f32 %v6943_v32 }
 0x1af   : > { %v1241_v16 = vsel %vm1240_vm6, %v5539_v52, %v1237_v12  ;;  %v7043_v56 = vsel %vm2380_vm1, %v2351_v15, %v11434_v43  ;;  %v7052_v52 = vsel %vm2575_vm5, %v2548_v6, %v11260_v41  ;;  %v2775_v12 = vadd.f32 %v2743_v60, %v6929_v5  ;;  %vm7062_vm10 = vmor %vm1734_vm8, %vm1735_vm7 }
 0x1b0   : > { %v1246_v48 = vsel %vm1243_vm0, %v1245_v39, %v1241_v16  ;;  %v1738_v50 = vand.u32 2147483647, %v6943_v32  ;;  %v2904_v39 = vadd.f32 %v2872_v30, %v2839_v63  ;;  %v2808_v16 = vmul.f32 %v6975_v53, %v7043_v56 }
 0x1b1   : > { %v1307_v15 = vmul.f32 %v1246_v48, %v6886_v44  ;;  %v2937_v44 = vmul.f32 %v7020_v34, %v7052_v52  ;;  %5550 = vpow2.f32 %v5097_v22  ;;  %v1737_v5 = vsel %vm7062_vm10, %v6990_v51, %v1733_v14 }
 0x1b2   : > { %v1249_v32 = vmul.f32 %v7054_v17, %v6995_v49  ;;  %v7076_v63 = vadd.f32 %v1426_v19, %v6310_v1  ;;  %v1715_v60 = vmul.f32 %v7017_v42, %v6955_v29  ;;  %v2840_v30 = vadd.f32 %v2808_v16, %v2775_v12 }
 0x1b3   : > { %v1324_v54 = vpack.c.bf16 %v1307_v15, %v1306_v13  ;;  %v1741_v13 = vor.u32 1.1754944e-38, %v1740_v28  ;;  %v2873_v43 = vmul.f32 %v6961_v61, %v6923_v47  ;;  %v7082_v48 = vadd.f32 %v2937_v44, %v2904_v39 }
 0x1b4   : > { %vm1739_vm11 = vcmp.eq.f32.partialorder %v1738_v50, 8.507059e+37  ;;  %v5132_v51 = vmul.f32 -1.442695, %v7076_v63  ;;  %v1716_v22 = vsub.f32 1.0, %v1715_v60  ;;  %v7086_v14 = vpop.eup %5548  ;;  %v1250_v6 = vsub.f32 1.0, %v1249_v32 }
 0x1b5   : > { %5120 = vmatmul.msk.bf16.gmra.mxu1 %vm1343_vm9, %v1324_v54  ;;  %v1742_v19 = vsel %vm1739_vm11, %v1741_v13, %v1737_v5  ;;  %v7088_v15 = vadd.f32 %v2873_v43, %v2840_v30  ;;  %v1725_v12 = vand.u32 2147483648, %v6955_v29  ;;  %v2679_v39 = vmul.f32 %v6642_v62, %v6988_v57  ;;  %v1428_v13 = vpop.f32.mrf.mxu1  ;;  %v7106_v43 = vpop.permute.xlu2 %2163 }
 0x1b6   : > { %5552 = vpow2.f32 %v5132_v51  ;;  %v1717_v28 = vmul.f32 %v7017_v42, %v1716_v22  ;;  %v2744_v50 = vmul.f32 %v6655_v8, %v7052_v52  ;;  %vm1720_vm12 = vweird.f32 %v7017_v42  ;;  %11437 = vst [vmem:[#allocation19_spill] sm:$0xff] %v7106_v43 }
 0x1b7   : > { %v5551_v16 = vpop.eup %5550  ;;  %v1723_v54 = vand.u32 2147483647, %v6955_v29  ;;  %v2097_v44 = vmul.f32 %v1742_v19, %v6891_v20  ;;  %v1745_v5 = vmul.f32 %v7086_v14, %v7029_v2  ;;  %vm1719_vm13 = vweird.f32 %v6955_v29 }
 0x1b8   : > { %v7101_v32 = vadd.f32 1.0, %v5551_v16  ;;  %v1718_v60 = vadd.f32 %v7017_v42, %v1717_v28  ;;  %v2711_v30 = vadd.f32 %v2679_v39, %v7010_v0  ;;  %v1251_v51 = vmul.f32 %v7054_v17, %v1250_v6  ;;  %vm1721_vm14 = vmor %vm1719_vm13, %vm1720_vm12  ;;  %v383_v0 = vld [vmem:[%s11241_s3 + $0xa0] sm:$0xff] }
 0x1b9   : > { %v1726_v20 = vor.u32 1.1754944e-38, %v1725_v12  ;;  %vm1724_vm15 = vcmp.eq.f32.partialorder %v1723_v54, 8.507059e+37  ;;  %v7114_v28 = vadd.f32 %v1428_v13, %v6310_v1  ;;  %v1257_v16 = vand.u32 2147483647, %v6995_v49  ;;  %2223 = vperm.xlu2 %5385, %v383_v0  }
 0x1ba   : > { %5554 = vrcp.f32 %v7101_v32  ;;  %v1722_v22 = vsel %vm1721_vm14, %v7017_v42, %v1718_v60  ;;  %v7111_v19 = vadd.f32 %v2744_v50, %v2711_v30  ;;  %v1746_v6 = vsub.f32 1.0, %v1745_v5  ;;  %v7126_v50 = vpop.permute.xlu1 %2158 }
 0x1bb   : > { %v1727_v39 = vsel %vm1724_vm15, %v1726_v20, %v1722_v22  ;;  %v7121_v41 = vmul.f32 %v7106_v43, %v2097_v44  ;;  %v1259_v42 = vand.u32 2147483648, %v6995_v49  ;;  %11438 = vst [vmem:[#allocation20_spill] sm:$0xff] %v7126_v50  ;;  %v1252_v60 = vadd.f32 %v7054_v17, %v1251_v51 }
 0x1bc   : > { %v5553_v29 = vpop.eup %5552  ;;  %v2096_v54 = vmul.f32 %v1727_v39, %v6829_v18  ;;  %vm1254_vm2 = vweird.f32 %v7054_v17  ;;  %v2422_v44 = vmul.f32 %v6785_v46, %v7043_v56  ;;  %v2486_v13 = vmul.f32 %v6470_v55, %v6958_v3 }
 0x1bd   : > { %v7124_v12 = vadd.f32 1.0, %v5553_v29  ;;  %v2322_v5 = vmul.f32 %v6462_v11, %v7121_v41  ;;  %vm1253_vm3 = vweird.f32 %v6995_v49  ;;  %v5133_v30 = vmul.f32 -1.442695, %v7114_v28 }
 0x1be   : > { %vm7140_vm4 = vcmp.eq.f32.partialorder %v1257_v16, 8.507059e+37  ;;  %v1747_v20 = vmul.f32 %v7086_v14, %v1746_v6  ;;  %v7146_v22 = vmul.f32 %v7126_v50, %v2096_v54  ;;  %vm7148_vm6 = vmor %vm1253_vm3, %vm1254_vm2  ;;  %v1260_v3 = vor.u32 1.1754944e-38, %v1259_v42 }
 0x1bf   : > { %5556 = vrcp.f32 %v7124_v12  ;;  %v2454_v0 = vadd.f32 %v2422_v44, %v2322_v5  ;;  %vm1749_vm0 = vweird.f32 %v7029_v2  ;;  %v1753_v49 = vand.u32 2147483647, %v7029_v2 }
 0x1c0   : > { %v5555_v18 = vpop.eup %5554  ;;  %v1256_v39 = vsel %vm7148_vm6, %v7054_v17, %v1252_v60  ;;  %vm1750_vm7 = vweird.f32 %v7086_v14  ;;  %v1755_v6 = vand.u32 2147483648, %v7029_v2  ;;  %v2421_v54 = vmul.f32 %v6785_v46, %v6988_v57 }
 0x1c1   : > { %v1264_v16 = vmul.f32 %v5555_v18, %v7101_v32  ;;  %v2321_v42 = vmul.f32 %v6462_v11, %v7146_v22  ;;  %v2353_v44 = vrot.slane %v7146_v22, 7  ;;  %5558 = vpow2.f32 %v5133_v30  ;;  %v387_v30 = vld [vmem:[%s11241_s3 + $0xc0] sm:$0xff]  ;;  %vm7194_vm10 = vmor %vm1749_vm0, %vm1750_vm7 }
 0x1c2   : > { %v1748_v43 = vadd.f32 %v7086_v14, %v1747_v20  ;;  %v1272_v50 = vand.u32 2147483647, %v7101_v32  ;;  %v1274_v17 = vand.u32 2147483648, %v7101_v32  ;;  %v2550_v60 = vrot.slane %v7146_v22, 1  ;;  %2243 = vperm.xlu0 %5383, %v387_v30  }
 0x1c3   : > { %v1265_v5 = vsub.f32 1.0, %v1264_v16  ;;  %vm1269_vm8 = vweird.f32 %v5555_v18  ;;  %v11443_v57 = vrot.slane %v6923_v47, 7  ;;  %v2453_v21 = vadd.f32 %v2421_v54, %v2321_v42 }
 0x1c4   : > { %v1756_v20 = vor.u32 1.1754944e-38, %v1755_v6  ;;  %v2616_v27 = vmul.f32 %v6629_v23, %v7052_v52  ;;  %v1261_v54 = vsel %vm7140_vm4, %v1260_v3, %v1256_v39  ;;  %vm1268_vm11 = vweird.f32 %v7101_v32 }
 0x1c5   : > { %v7169_v29 = vpop.eup %5556  ;;  %v1266_v26 = vmul.f32 %v5555_v18, %v1265_v5  ;;  %v7175_v16 = vsel %vm2380_vm1, %v11443_v57, %v2353_v44  ;;  %v11444_v5 = vrot.slane %v6923_v47, 1  ;;  %v2518_v42 = vadd.f32 %v2486_v13, %v2453_v21  ;;  %vm1270_vm12 = vmor %vm1268_vm11, %vm1269_vm8 }
 0x1c6   : > { %v1760_v59 = vmul.f32 %v7169_v29, %v7124_v12  ;;  %v1275_v57 = vor.u32 1.1754944e-38, %v1274_v17  ;;  %v2809_v30 = vmul.f32 %v6975_v53, %v7175_v16  ;;  %v1752_v2 = vsel %vm7194_vm10, %v7086_v14, %v1748_v43 }
 0x1c7   : > { %v2600_v37 = vsel %vm2575_vm5, %v11444_v5, %v2550_v60  ;;  %v1267_v52 = vadd.f32 %v5555_v18, %v1266_v26  ;;  %v5559_v3 = vpop.eup %5558  ;;  %vm1273_vm13 = vcmp.eq.f32.partialorder %v1272_v50, 8.507059e+37  ;;  %v2648_v5 = vadd.f32 %v2616_v27, %v2518_v42 }
 0x1c8   : > { %v1761_v7 = vsub.f32 1.0, %v1760_v59  ;;  %v2938_v51 = vmul.f32 %v7020_v34, %v2600_v37  ;;  %v2841_v32 = vadd.f32 %v2809_v30, %v7111_v19  ;;  %v2354_v59 = vrot.slane %v7121_v41, 7 }
 0x1c9   : > { %v1271_v39 = vsel %vm1270_vm12, %v5555_v18, %v1267_v52  ;;  %v1308_v13 = vmul.f32 %v1261_v54, %v6916_v33  ;;  %vm1754_vm14 = vcmp.eq.f32.partialorder %v1753_v49, 8.507059e+37  ;;  %v2487_v17 = vmul.f32 %v6470_v55, %v6923_v47 }
 0x1ca   : > { %v1276_v26 = vsel %vm1273_vm13, %v1275_v57, %v1271_v39  ;;  %v7207_v21 = vadd.f32 %v2938_v51, %v7088_v15  ;;  %v1757_v14 = vsel %vm1754_vm14, %v1756_v20, %v1752_v2  ;;  %v1762_v43 = vmul.f32 %v7169_v29, %v1761_v7 }
 0x1cb   : > { %v1309_v6 = vmul.f32 %v1276_v26, %v7013_v9  ;;  %v7215_v27 = vadd.f32 1.0, %v5559_v3  ;;  %v2551_v19 = vrot.slane %v7121_v41, 1  ;;  %v2519_v15 = vadd.f32 %v2487_v17, %v2454_v0 }
 0x1cc   : > { %v2680_v18 = vmul.f32 %v6642_v62, %v7043_v56  ;;  %v2617_v33 = vmul.f32 %v6629_v23, %v2600_v37  ;;  %v7223_v49 = vsel %vm2380_vm1, %v2353_v44, %v2354_v59  ;;  %v2098_v47 = vmul.f32 %v1757_v14, %v6933_v36  ;;  %v1431_v44 = vpop.f32.mrf.mxu1 }
 0x1cd   : > { %v1325_v50 = vpack.c.bf16 %v1309_v6, %v1308_v13  ;;  %vm1765_vm15 = vweird.f32 %v7169_v29  ;;  %v1770_v7 = vand.u32 2147483648, %v7124_v12  ;;  %v2745_v9 = vmul.f32 %v6655_v8, %v2600_v37  ;;  %v7239_v37 = vpop.permute.xlu0 %2168 }
 0x1ce   : > { %v1763_v0 = vadd.f32 %v7169_v29, %v1762_v43  ;;  %5560 = vrcp.f32 %v7215_v27  ;;  %v2599_v56 = vsel %vm2575_vm5, %v2550_v60, %v2551_v19  ;;  %v2649_v20 = vadd.f32 %v2617_v33, %v2519_v15  ;;  %11447 = vst [vmem:[#allocation21_spill] sm:$0xff] %v7239_v37  ;;  %v388_v60 = vld [vmem:[%s11241_s3 + $0xc8] sm:$0xff] }
 0x1cf   : > { %5121 = vmatmul.msk.bf16.gmra.mxu1 %vm1343_vm9, %v1325_v50  ;;  %v2874_v36 = vmul.f32 %v6961_v61, %v7146_v22  ;;  %v2712_v54 = vadd.f32 %v2680_v18, %v7032_v35  ;;  %v2810_v52 = vmul.f32 %v6975_v53, %v7223_v49  ;;  %vm1764_vm2 = vweird.f32 %v7124_v12  ;;  %2248 = vperm.xlu1 %5384, %v388_v60  }
 0x1d0   : > { %v1768_v42 = vand.u32 2147483647, %v7124_v12  ;;  %v2681_v57 = vmul.f32 %v6642_v62, %v7175_v16  ;;  %vm7250_vm3 = vmor %vm1764_vm2, %vm1765_vm15  ;;  %v2939_v3 = vmul.f32 %v7020_v34, %v2599_v56  ;;  %v7256_v2 = vadd.f32 %v1431_v44, %v6310_v1 }
 0x1d1   : > { %v2906_v30 = vadd.f32 %v2874_v36, %v2841_v32  ;;  %v2777_v51 = vadd.f32 %v2745_v9, %v2712_v54  ;;  %v1767_v12 = vsel %vm7250_vm3, %v7169_v29, %v1763_v0  ;;  %v1771_v39 = vor.u32 1.1754944e-38, %v1770_v7 }
 0x1d2   : > { %v7262_v26 = vmul.f32 %v7239_v37, %v2098_v47  ;;  %v2713_v13 = vadd.f32 %v2681_v57, %v2648_v5  ;;  %v2875_v32 = vmul.f32 %v6961_v61, %v7121_v41  ;;  %v5134_v14 = vmul.f32 -1.442695, %v7256_v2 }
 0x1d3   : > { %v2842_v17 = vadd.f32 %v2810_v52, %v2777_v51  ;;  %v7266_v6 = vadd.f32 %v2939_v3, %v2906_v30  ;;  %vm1769_vm4 = vcmp.eq.f32.partialorder %v1768_v42, 8.507059e+37  ;;  %v2423_v15 = vmul.f32 %v6785_v46, %v7175_v16  ;;  %v7290_v42 = vpop.permute.xlu1 %2173 }
 0x1d4   : > { %v7269_v43 = vpop.eup %5560  ;;  %v2323_v50 = vmul.f32 %v6462_v11, %v7262_v26  ;;  %v2355_v29 = vrot.slane %v7262_v26, 7  ;;  %v1772_v5 = vsel %vm1769_vm4, %v1771_v39, %v1767_v12  ;;  %5562 = vpow2.f32 %v5134_v14  ;;  %v1433_v52 = vpop.f32.mrf.mxu1  ;;  %11450 = vst [vmem:[#allocation22_spill] sm:$0xff] %v7290_v42 }
 0x1d5   : > { %v2907_v18 = vadd.f32 %v2875_v32, %v2842_v17  ;;  %v2488_v33 = vmul.f32 %v6470_v55, %v7146_v22  ;;  %v2552_v9 = vrot.slane %v7262_v26, 1  ;;  %v1775_v0 = vmul.f32 %v7269_v43, %v7215_v27 }
 0x1d6   : > { %v7280_v47 = vsel %vm2380_vm1, %v2354_v59, %v2355_v29  ;;  %v2455_v7 = vadd.f32 %v2423_v15, %v2323_v50  ;;  %v2746_v44 = vmul.f32 %v6655_v8, %v2599_v56  ;;  %v2099_v16 = vmul.f32 %v1772_v5, %v7076_v63 }
 0x1d7   : > { %v2618_v36 = vmul.f32 %v6629_v23, %v2599_v56  ;;  %v2598_v22 = vsel %vm2575_vm5, %v2551_v19, %v2552_v9  ;;  %v1776_v60 = vsub.f32 1.0, %v1775_v0  ;;  %v2682_v35 = vmul.f32 %v6642_v62, %v7223_v49 }
 0x1d8   : > { %v2520_v54 = vadd.f32 %v2488_v33, %v2455_v7  ;;  %v2778_v30 = vadd.f32 %v2746_v44, %v2713_v13  ;;  %v2811_v63 = vmul.f32 %v6975_v53, %v7280_v47  ;;  %v2940_v56 = vmul.f32 %v7020_v34, %v2598_v22 }
 0x1d9   : > { %v7302_v19 = vadd.f32 %v1433_v52, %v6310_v1  ;;  %v7305_v3 = vmul.f32 %v7290_v42, %v2099_v16  ;;  %v2876_v39 = vmul.f32 %v6961_v61, %v7262_v26  ;;  %v2714_v17 = vadd.f32 %v2682_v35, %v2649_v20 }
 0x1da   : > { %v7292_v59 = vadd.f32 %v2618_v36, %v2520_v54  ;;  %v5563_v57 = vpop.eup %5562  ;;  %v2843_v12 = vadd.f32 %v2811_v63, %v2778_v30  ;;  %v1777_v13 = vmul.f32 %v7269_v43, %v1776_v60  ;;  %v7311_v14 = vadd.f32 %v2940_v56, %v2907_v18  ;;  %v391_v60 = vld [vmem:[%s11241_s3 + $0xe0] sm:$0xff] }
 0x1db   : > { %v7298_v51 = vadd.f32 1.0, %v5563_v57  ;;  %v5135_v50 = vmul.f32 -1.442695, %v7302_v19  ;;  %v2324_v15 = vmul.f32 %v6462_v11, %v7305_v3  ;;  %v2356_v5 = vrot.slane %v7305_v3, 7  ;;  %2263 = vperm.xlu1 %5384, %v391_v60  }
 0x1dc   : > { %v2908_v32 = vadd.f32 %v2876_v39, %v2843_v12  ;;  %v2424_v33 = vmul.f32 %v6785_v46, %v7223_v49  ;;  %v2489_v20 = vmul.f32 %v6470_v55, %v7121_v41  ;;  %v1778_v0 = vadd.f32 %v7269_v43, %v1777_v13  ;;  %v390_v49 = vld [vmem:[%s11241_s3 + $0xd8] sm:$0xff]  ;;  %v1436_v63 = vpop.f32.mrf.mxu1 }
 0x1dd   : > { %5564 = vrcp.f32 %v7298_v51  ;;  %v7325_v18 = vsel %vm2380_vm1, %v2355_v29, %v2356_v5  ;;  %vm1780_vm6 = vweird.f32 %v7269_v43  ;;  %v2747_v44 = vmul.f32 %v6655_v8, %v2598_v22  ;;  %2258 = vperm.xlu0 %5383, %v390_v49   ;;  %v386_v29 = vld [vmem:[%s11241_s3 + $0xb8] sm:$0xff] }
 0x1de   : > { %5566 = vpow2.f32 %v5135_v50  ;;  %v2456_v7 = vadd.f32 %v2424_v33, %v2324_v15  ;;  %v1785_v41 = vand.u32 2147483648, %v7215_v27  ;;  %v2619_v36 = vmul.f32 %v6629_v23, %v2598_v22  ;;  %2238 = vperm.xlu2 %5385, %v386_v29  }
 0x1df   : > { %vm1779_vm0 = vweird.f32 %v7215_v27  ;;  %v1783_v52 = vand.u32 2147483647, %v7215_v27  ;;  %v2553_v35 = vrot.slane %v7305_v3, 1  ;;  %v2779_v12 = vadd.f32 %v2747_v44, %v2714_v17 }
 0x1e0   : > { %v2521_v54 = vadd.f32 %v2489_v20, %v2456_v7  ;;  %vm7347_vm7 = vmor %vm1779_vm0, %vm1780_vm6  ;;  %v1786_v13 = vor.u32 1.1754944e-38, %v1785_v41  ;;  %v2812_v15 = vmul.f32 %v6975_v53, %v7325_v18  ;;  %v7364_v20 = vadd.f32 %v1436_v63, %v6310_v1 }
 0x1e1   : > { %v1782_v27 = vsel %vm7347_vm7, %v7269_v43, %v1778_v0  ;;  %v2597_v50 = vsel %vm2575_vm5, %v2552_v9, %v2553_v35  ;;  %vm1784_vm8 = vcmp.eq.f32.partialorder %v1783_v52, 8.507059e+37  ;;  %v2877_v43 = vmul.f32 %v6961_v61, %v7305_v3 }
 0x1e2   : > { %v7352_v30 = vadd.f32 %v2619_v36, %v2521_v54  ;;  %v1787_v7 = vsel %vm1784_vm8, %v1786_v13, %v1782_v27  ;;  %v2844_v49 = vadd.f32 %v2812_v15, %v2779_v12  ;;  %v2941_v9 = vmul.f32 %v7020_v34, %v2597_v50  ;;  %v7377_v54 = vpop.permute.xlu2 %2178  ;;  %v4856_v27 = vld [vmem:[%s11240_s2 + $0x8] sm:$0xff]  ;;  %v4857_v15 = vld [vmem:[%s11240_s2 + $0x10] sm:$0xff] }
 0x1e3   : > { %v7333_v16 = vpop.eup %5564  ;;  %v2100_v44 = vmul.f32 %v1787_v7, %v7114_v28  ;;  %v5136_v41 = vmul.f32 -1.442695, %v7364_v20  ;;  %11453 = vst [vmem:[#allocation23_spill] sm:$0xff] %v7377_v54  ;;  %v2683_v52 = vmul.f32 %v6642_v62, %v7280_v47  ;;  %vm1794_vm11 = vweird.f32 %v7298_v51  ;;  %4874 = vperm.xlu1 %5384, %v4857_v15  }
 0x1e4   : > { %v1790_v57 = vmul.f32 %v7333_v16, %v7298_v51  ;;  %v5567_v39 = vpop.eup %5566  ;;  %v7370_v0 = vadd.f32 %v2877_v43, %v2844_v49  ;;  %v7375_v36 = vadd.f32 %v2941_v9, %v2908_v32  ;;  %vm1795_vm10 = vweird.f32 %v7333_v16 }
 0x1e5   : > { %v7361_v33 = vadd.f32 1.0, %v5567_v39  ;;  %v1798_v28 = vand.u32 2147483647, %v7298_v51  ;;  %v2748_v32 = vmul.f32 %v6655_v8, %v2597_v50  ;;  %v7390_v22 = vmul.f32 %v7377_v54, %v2100_v44  ;;  %vm7396_vm12 = vmor %vm1794_vm11, %vm1795_vm10  ;;  %4869 = vperm.xlu0 %5383, %v4856_v27  }
 0x1e6   : > { %v1791_v56 = vsub.f32 1.0, %v1790_v57  ;;  %v1800_v57 = vand.u32 2147483648, %v7298_v51  ;;  %v2715_v63 = vadd.f32 %v2683_v52, %v7292_v59  ;;  %v2425_v13 = vmul.f32 %v6785_v46, %v7280_v47 }
 0x1e7   : > { %5568 = vrcp.f32 %v7361_v33  ;;  %v2325_v39 = vmul.f32 %v6462_v11, %v7390_v22  ;;  %v2357_v59 = vrot.slane %v7390_v22, 7  ;;  %v2490_v49 = vmul.f32 %v6470_v55, %v7262_v26 }
 0x1e8   : > { %v1792_v17 = vmul.f32 %v7333_v16, %v1791_v56  ;;  %5570 = vpow2.f32 %v5136_v41  ;;  %v1801_v7 = vor.u32 1.1754944e-38, %v1800_v57  ;;  %vm1799_vm13 = vcmp.eq.f32.partialorder %v1798_v28, 8.507059e+37  ;;  %v7434_v56 = vpop.permute.xlu0 %2183 }
 0x1e9   : > { %v2457_v47 = vadd.f32 %v2425_v13, %v2325_v39  ;;  %v2780_v9 = vadd.f32 %v2748_v32, %v2715_v63  ;;  %v2620_v28 = vmul.f32 %v6629_v23, %v2597_v50  ;;  %v1438_v63 = vpop.f32.mrf.mxu1  ;;  %11456 = vst [vmem:[#allocation24_spill] sm:$0xff] %v7434_v56  ;;  %vm1809_vm15 = vweird.f32 %v7361_v33 }
 0x1ea   : > { %v1793_v29 = vadd.f32 %v7333_v16, %v1792_v17  ;;  %v2554_v17 = vrot.slane %v7390_v22, 1  ;;  %v7445_v13 = vadd.f32 %v1438_v63, %v6310_v1 }
 0x1eb   : > { %v2522_v26 = vadd.f32 %v2490_v49, %v2457_v47 }
 0x1ec   : > { %v1797_v51 = vsel %vm7396_vm12, %v7333_v16, %v1793_v29  ;;  %v7420_v16 = vsel %vm2380_vm1, %v2356_v5, %v2357_v59  ;;  %v2596_v57 = vsel %vm2575_vm5, %v2553_v35, %v2554_v17  ;;  %v1813_v35 = vand.u32 2147483647, %v7361_v33 }
 0x1ed   : > { %v7385_v60 = vpop.eup %5568  ;;  %v1802_v41 = vsel %vm1799_vm13, %v1801_v7, %v1797_v51  ;;  %v7430_v5 = vadd.f32 %v2620_v28, %v2522_v26  ;;  %v2813_v32 = vmul.f32 %v6975_v53, %v7420_v16  ;;  %v2878_v51 = vmul.f32 %v6961_v61, %v7390_v22 }
 0x1ee   : > { %v1805_v12 = vmul.f32 %v7385_v60, %v7361_v33  ;;  %v5571_v44 = vpop.eup %5570  ;;  %v2101_v27 = vmul.f32 %v1802_v41, %v7256_v2  ;;  %vm1810_vm14 = vweird.f32 %v7385_v60  ;;  %v1815_v2 = vand.u32 2147483648, %v7361_v33  ;;  %v4859_v33 = vld [vmem:[%s11240_s2 + $0x20] sm:$0xff]  ;;  %v4860_v41 = vld [vmem:[%s11240_s2 + $0x28] sm:$0xff] }
 0x1ef   : > { %v7423_v52 = vadd.f32 1.0, %v5571_v44  ;;  %v2845_v50 = vadd.f32 %v2813_v32, %v2780_v9  ;;  %v2942_v39 = vmul.f32 %v7020_v34, %v2596_v57  ;;  %vm7450_vm2 = vmor %vm1809_vm15, %vm1810_vm14  ;;  %4884 = vperm.xlu0 %5383, %v4859_v33   ;;  %vm1814_vm3 = vcmp.eq.f32.partialorder %v1813_v35, 8.507059e+37  ;;  %4889 = vperm.xlu1 %5384, %v4860_v41   ;;  %v7491_v41 = vpop.permute.xlu1 %2188 }
 0x1f0   : > { %v1806_v43 = vsub.f32 1.0, %v1805_v12  ;;  %v7448_v15 = vmul.f32 %v7434_v56, %v2101_v27  ;;  %v1816_v44 = vor.u32 1.1754944e-38, %v1815_v2  ;;  %v5137_v26 = vmul.f32 -1.442695, %v7445_v13  ;;  %11459 = vst [vmem:[#allocation25_spill] sm:$0xff] %v7491_v41 }
 0x1f1   : > { %5572 = vrcp.f32 %v7423_v52  ;;  %v2910_v47 = vadd.f32 %v2878_v51, %v2845_v50  ;;  %v7463_v9 = vadd.f32 %v2942_v39, %v7370_v0  ;;  %v2684_v27 = vmul.f32 %v6642_v62, %v7325_v18 }
 0x1f2   : > { %v1807_v29 = vmul.f32 %v7385_v60, %v1806_v43  ;;  %v2326_v28 = vmul.f32 %v6462_v11, %v7448_v15  ;;  %v2749_v32 = vmul.f32 %v6655_v8, %v2596_v57  ;;  %v2358_v63 = vrot.slane %v7448_v15, 7 }
 0x1f3   : > { %5574 = vpow2.f32 %v5137_v26  ;;  %v2555_v2 = vrot.slane %v7448_v15, 1  ;;  %v2716_v51 = vadd.f32 %v2684_v27, %v7352_v30  ;;  %v2621_v7 = vmul.f32 %v6629_v23, %v2596_v57 }
 0x1f4   : > { %v1808_v12 = vadd.f32 %v7385_v60, %v1807_v29  ;;  %v7484_v50 = vsel %vm2380_vm1, %v2357_v59, %v2358_v63  ;;  %v2879_v27 = vmul.f32 %v6961_v61, %v7448_v15  ;;  %vm1824_vm6 = vweird.f32 %v7423_v52 }
 0x1f5   : > { %v2814_v59 = vmul.f32 %v6975_v53, %v7484_v50 }
 0x1f6   : > { %v1812_v43 = vsel %vm7450_vm2, %v7385_v60, %v1808_v12  ;;  %v2426_v60 = vmul.f32 %v6785_v46, %v7325_v18  ;;  %v2491_v12 = vmul.f32 %v6470_v55, %v7305_v3  ;;  %v2595_v3 = vsel %vm2575_vm5, %v2554_v17, %v2555_v2 }
 0x1f7   : > { %v7457_v49 = vpop.eup %5572  ;;  %v1817_v0 = vsel %vm1814_vm3, %v1816_v44, %v1812_v43  ;;  %v1441_v43 = vpop.f32.mrf.mxu1  ;;  %v2781_v44 = vadd.f32 %v2749_v32, %v2716_v51  ;;  %v2943_v30 = vmul.f32 %v7020_v34, %v2595_v3 }
 0x1f8   : > { %v1820_v29 = vmul.f32 %v7457_v49, %v7423_v52  ;;  %v2458_v35 = vadd.f32 %v2426_v60, %v2326_v28  ;;  %v2102_v39 = vmul.f32 %v1817_v0, %v7302_v19  ;;  %v7499_v19 = vadd.f32 %v1441_v43, %v6310_v1 }
 0x1f9   : > { %v2846_v60 = vadd.f32 %v2814_v59, %v2781_v44  ;;  %v7507_v0 = vadd.f32 %v2943_v30, %v2910_v47  ;;  %vm1825_vm4 = vweird.f32 %v7457_v49  ;;  %v1830_v47 = vand.u32 2147483648, %v7423_v52 }
 0x1fa   : > { %v1821_v18 = vsub.f32 1.0, %v1820_v29  ;;  %v2523_v33 = vadd.f32 %v2491_v12, %v2458_v35  ;;  %v5575_v29 = vpop.eup %5574  ;;  %v7503_v28 = vmul.f32 %v7491_v41, %v2102_v39  ;;  %v5138_v32 = vmul.f32 -1.442695, %v7499_v19  ;;  %vm7526_vm0 = vmor %vm1824_vm6, %vm1825_vm4 }
 0x1fb   : > { %v7505_v17 = vadd.f32 1.0, %v5575_v29  ;;  %v2911_v51 = vadd.f32 %v2879_v27, %v2846_v60  ;;  %v2685_v44 = vmul.f32 %v6642_v62, %v7420_v16  ;;  %v2750_v59 = vmul.f32 %v6655_v8, %v2595_v3 }
 0x1fc   : > { %v7493_v26 = vadd.f32 %v2621_v7, %v2523_v33  ;;  %v1822_v57 = vmul.f32 %v7457_v49, %v1821_v18  ;;  %v2359_v12 = vrot.slane %v7503_v28, 7  ;;  %v2327_v39 = vmul.f32 %v6462_v11, %v7503_v28  ;;  %v389_v33 = vld [vmem:[%s11241_s3 + $0xd0] sm:$0xff] }
 0x1fd   : > { %5576 = vrcp.f32 %v7505_v17  ;;  %v1828_v18 = vand.u32 2147483647, %v7423_v52  ;;  %v2427_v7 = vmul.f32 %v6785_v46, %v7420_v16  ;;  %2253 = vperm.xlu2 %5385, %v389_v33   ;;  %v2492_v29 = vmul.f32 %v6470_v55, %v7390_v22 }
 0x1fe   : > { %v1823_v35 = vadd.f32 %v7457_v49, %v1822_v57  ;;  %5578 = vpow2.f32 %v5138_v32  ;;  %v7537_v52 = vsel %vm2380_vm1, %v2358_v63, %v2359_v12  ;;  %v1831_v16 = vor.u32 1.1754944e-38, %v1830_v47 }
 0x1ff   : > { %v2459_v57 = vadd.f32 %v2427_v7, %v2327_v39  ;;  %v2556_v27 = vrot.slane %v7503_v28, 1  ;;  %v2717_v32 = vadd.f32 %v2685_v44, %v7430_v5  ;;  %v1443_v41 = vpop.f32.mrf.mxu1  ;;  %vm1829_vm7 = vcmp.eq.f32.partialorder %v1828_v18, 8.507059e+37 }
 0x200   : > { %v1827_v30 = vsel %vm7526_vm0, %v7457_v49, %v1823_v35  ;;  %v2815_v49 = vmul.f32 %v6975_v53, %v7537_v52  ;;  %v2622_v22 = vmul.f32 %v6629_v23, %v2595_v3  ;;  %v2880_v7 = vmul.f32 %v6961_v61, %v7503_v28 }
 0x201   : > { %v2524_v33 = vadd.f32 %v2492_v29, %v2459_v57  ;;  %v1832_v35 = vsel %vm1829_vm7, %v1831_v16, %v1827_v30  ;;  %v2594_v39 = vsel %vm2575_vm5, %v2555_v2, %v2556_v27  ;;  %v2782_v47 = vadd.f32 %v2750_v59, %v2717_v32  ;;  %v7568_v59 = vpop.permute.xlu2 %2193 }
 0x202   : > { %v7558_v5 = vadd.f32 %v1443_v41, %v6310_v1  ;;  %v2944_v57 = vmul.f32 %v7020_v34, %v2594_v39  ;;  %v2103_v30 = vmul.f32 %v1832_v35, %v7364_v20  ;;  %11462 = vst [vmem:[#allocation26_spill] sm:$0xff] %v7568_v59  ;;  %v4855_v20 = vld [vmem:[%s11240_s2] sm:$0xff]  ;;  %vm1839_vm8 = vweird.f32 %v7505_v17 }
 0x203   : > { %v7544_v60 = vpop.eup %5576  ;;  %v7560_v44 = vadd.f32 %v2622_v22, %v2524_v33  ;;  %v2847_v29 = vadd.f32 %v2815_v49, %v2782_v47  ;;  %v1845_v35 = vand.u32 2147483648, %v7505_v17  ;;  %v2623_v54 = vmul.f32 %v6629_v23, %v2594_v39 }
 0x204   : > { %v1835_v63 = vmul.f32 %v7544_v60, %v7505_v17  ;;  %v5579_v18 = vpop.eup %5578  ;;  %v7566_v2 = vadd.f32 %v2944_v57, %v2911_v51  ;;  %v5139_v32 = vmul.f32 -1.442695, %v7558_v5  ;;  %v2686_v51 = vmul.f32 %v6642_v62, %v7484_v50 }
 0x205   : > { %v7564_v3 = vadd.f32 1.0, %v5579_v18  ;;  %v2912_v16 = vadd.f32 %v2880_v7, %v2847_v29  ;;  %4864 = vperm.xlu2 %5385, %v4855_v20   ;;  %vm1840_vm10 = vweird.f32 %v7544_v60  ;;  %v2428_v7 = vmul.f32 %v6785_v46, %v7484_v50 }
 0x206   : > { %v1836_v43 = vsub.f32 1.0, %v1835_v63  ;;  %v7574_v63 = vmul.f32 %v7568_v59, %v2103_v30  ;;  %v1843_v18 = vand.u32 2147483647, %v7505_v17  ;;  %v2751_v29 = vmul.f32 %v6655_v8, %v2594_v39  ;;  %vm7594_vm11 = vmor %vm1839_vm8, %vm1840_vm10 }
 0x207   : > { %5580 = vrcp.f32 %v7564_v3  ;;  %v1846_v56 = vor.u32 1.1754944e-38, %v1845_v35  ;;  %vm1854_vm14 = vweird.f32 %v7564_v3 }
 0x208   : > { %v1837_v41 = vmul.f32 %v7544_v60, %v1836_v43  ;;  %5582 = vpow2.f32 %v5139_v32  ;;  %v2328_v22 = vmul.f32 %v6462_v11, %v7574_v63  ;;  %v2360_v47 = vrot.slane %v7574_v63, 7 }
 0x209   : > { %v2718_v32 = vadd.f32 %v2686_v51, %v7493_v26  ;;  %v11465_v59 = vrot.slane %v7574_v63, 1  ;;  %vm1844_vm12 = vcmp.eq.f32.partialorder %v1843_v18, 8.507059e+37 }
 0x20a   : > { %v1838_v33 = vadd.f32 %v7544_v60, %v1837_v41  ;;  %v2493_v41 = vmul.f32 %v6470_v55, %v7448_v15  ;;  %v7606_v50 = vsel %vm2380_vm1, %v2359_v12, %v2360_v47  ;;  %v2460_v17 = vadd.f32 %v2428_v7, %v2328_v22 }
 0x20b   : > { %v2593_v15 = vsel %vm2575_vm5, %v2556_v27, %v11465_v59  ;;  %v2783_v22 = vadd.f32 %v2751_v29, %v2718_v32  ;;  %v2816_v26 = vmul.f32 %v6975_v53, %v7606_v50  ;;  %v1860_v27 = vand.u32 2147483648, %v7564_v3  ;;  %v1446_v59 = vpop.f32.mrf.mxu1 }
 0x20c   : > { %v1842_v20 = vsel %vm7594_vm11, %v7544_v60, %v1838_v33  ;;  %v2525_v42 = vadd.f32 %v2493_v41, %v2460_v17  ;;  %v2945_v39 = vmul.f32 %v7020_v34, %v2593_v15 }
 0x20d   : > { %v5581_v49 = vpop.eup %5580  ;;  %v1847_v51 = vsel %vm1844_vm12, %v1846_v56, %v1842_v20  ;;  %v1858_v56 = vand.u32 2147483647, %v7564_v3 }
 0x20e   : > { %v1850_v43 = vmul.f32 %v5581_v49, %v7564_v3  ;;  %v5583_v37 = vpop.eup %5582  ;;  %v7621_v60 = vadd.f32 %v2623_v54, %v2525_v42  ;;  %vm1855_vm13 = vweird.f32 %v5581_v49  ;;  %v2104_v35 = vmul.f32 %v1847_v51, %v7445_v13  ;;  %v7631_v42 = vpop.permute.xlu0 %2198  ;;  %v4858_v54 = vld [vmem:[%s11240_s2 + $0x18] sm:$0xff] }
 0x20f   : > { %v7619_v7 = vadd.f32 1.0, %v5583_v37  ;;  %v2881_v37 = vmul.f32 %v6961_v61, %v7574_v63  ;;  %vm1856_vm15 = vmor %vm1854_vm14, %vm1855_vm13  ;;  %11466 = vst [vmem:[#allocation27_spill] sm:$0xff] %v7631_v42  ;;  %4879 = vperm.xlu2 %5385, %v4858_v54   ;;  %v2687_v13 = vmul.f32 %v6642_v62, %v7537_v52  ;;  %v7638_v30 = vadd.f32 %v2945_v39, %v2912_v16 }
 0x210   : > { %v1851_v57 = vsub.f32 1.0, %v1850_v43  ;;  %v2848_v43 = vadd.f32 %v2816_v26, %v2783_v22  ;;  %vm1859_vm2 = vcmp.eq.f32.partialorder %v1858_v56, 8.507059e+37  ;;  %v7641_v3 = vadd.f32 %v1446_v59, %v6310_v1 }
 0x211   : > { %5584 = vrcp.f32 %v7619_v7  ;;  %v7644_v41 = vmul.f32 %v7631_v42, %v2104_v35  ;;  %v2719_v20 = vadd.f32 %v2687_v13, %v7560_v44  ;;  %v2429_v26 = vmul.f32 %v6785_v46, %v7537_v52  ;;  %v7659_v35 = vpop.permute.xlu1 %2203 }
 0x212   : > { %v1852_v12 = vmul.f32 %v5581_v49, %v1851_v57  ;;  %v2913_v29 = vadd.f32 %v2881_v37, %v2848_v43  ;;  %v1861_v57 = vor.u32 1.1754944e-38, %v1860_v27  ;;  %v5140_v22 = vmul.f32 -1.442695, %v7641_v3  ;;  %11467 = vst [vmem:[#allocation28_spill] sm:$0xff] %v7659_v35 }
 0x213   : > { %v2329_v16 = vmul.f32 %v6462_v11, %v7644_v41  ;;  %v2361_v43 = vrot.slane %v7644_v41, 7  ;;  %v2494_v44 = vmul.f32 %v6470_v55, %v7503_v28  ;;  %v2558_v39 = vrot.slane %v7644_v41, 1  ;;  %v1448_v59 = vpop.f32.mrf.mxu1 }
 0x214   : > { %v1853_v33 = vadd.f32 %v5581_v49, %v1852_v12  ;;  %v2752_v12 = vmul.f32 %v6655_v8, %v2593_v15  ;;  %5586 = vpow2.f32 %v5140_v22  ;;  %v2624_v37 = vmul.f32 %v6629_v23, %v2593_v15 }
 0x215   : > { %v2461_v27 = vadd.f32 %v2429_v26, %v2329_v16  ;;  %v7665_v52 = vsel %vm2380_vm1, %v2360_v47, %v2361_v43  ;;  %v7675_v13 = vadd.f32 %v1448_v59, %v6310_v1  ;;  %vm1869_vm4 = vweird.f32 %v7619_v7 }
 0x216   : > { %v1857_v18 = vsel %vm1856_vm15, %v5581_v49, %v1853_v33  ;;  %v1873_v59 = vand.u32 2147483647, %v7619_v7 }
 0x217   : > { %v5585_v17 = vpop.eup %5584  ;;  %v1862_v32 = vsel %vm1859_vm2, %v1861_v57, %v1857_v18  ;;  %v2526_v54 = vadd.f32 %v2494_v44, %v2461_v27  ;;  %v11468_v18 = vrot.slane %v7574_v63, 1  ;;  %v2817_v57 = vmul.f32 %v6975_v53, %v7665_v52 }
 0x218   : > { %v1865_v49 = vmul.f32 %v5585_v17, %v7619_v7  ;;  %v2105_v51 = vmul.f32 %v1862_v32, %v7499_v19  ;;  %v2784_v19 = vadd.f32 %v2752_v12, %v2719_v20  ;;  %v2882_v12 = vmul.f32 %v6961_v61, %v7644_v41 }
 0x219   : > { %v2592_v28 = vsel %vm2575_vm5, %v11468_v18, %v2558_v39  ;;  %v7680_v47 = vadd.f32 %v2624_v37, %v2526_v54  ;;  %vm1870_vm3 = vweird.f32 %v5585_v17  ;;  %vm1874_vm0 = vcmp.eq.f32.partialorder %v1873_v59, 8.507059e+37 }
 0x21a   : > { %v1866_v33 = vsub.f32 1.0, %v1865_v49  ;;  %v7678_v32 = vmul.f32 %v7659_v35, %v2105_v51  ;;  %v2946_v20 = vmul.f32 %v7020_v34, %v2592_v28  ;;  %v5587_v15 = vpop.eup %5586  ;;  %v2849_v49 = vadd.f32 %v2817_v57, %v2784_v19  ;;  %v4861_v19 = vld [vmem:[%s11240_s2 + $0x30] sm:$0x1]  ;;  %vm1871_vm6 = vmor %vm1869_vm4, %vm1870_vm3 }
 0x21b   : > { %v7685_v16 = vadd.f32 1.0, %v5587_v15  ;;  %v5141_v51 = vmul.f32 -1.442695, %v7675_v13  ;;  %4894 = vperm.xlu2 %5385, %v4861_v19   ;;  %v2753_v18 = vmul.f32 %v6655_v8, %v2592_v28  ;;  %v1451_v57 = vpop.f32.mrf.mxu1 }
 0x21c   : > { %v1867_v56 = vmul.f32 %v5585_v17, %v1866_v33  ;;  %v7687_v26 = vadd.f32 %v2946_v20, %v2913_v29  ;;  %v1875_v33 = vand.u32 2147483648, %v7619_v7  ;;  %v2914_v44 = vadd.f32 %v2882_v12, %v2849_v49 }
 0x21d   : > { %v2362_v27 = vrot.slane %v7678_v32, 7  ;;  %5588 = vrcp.f32 %v7685_v16  ;;  %v2330_v37 = vmul.f32 %v6462_v11, %v7678_v32  ;;  %v2430_v20 = vmul.f32 %v6785_v46, %v7606_v50 }
 0x21e   : > { %v1868_v22 = vadd.f32 %v5585_v17, %v1867_v56  ;;  %11469 = vst [vmem:[#allocation29_spill] sm:$0xff] %v7687_v26  ;;  %v2688_v56 = vmul.f32 %v6642_v62, %v7606_v50  ;;  %v1876_v54 = vor.u32 1.1754944e-38, %v1875_v33  ;;  %5590 = vpow2.f32 %v5141_v51 }
 0x21f   : > { %v7705_v7 = vsel %vm2380_vm1, %v2361_v43, %v2362_v27  ;;  %v2559_v15 = vrot.slane %v7678_v32, 1  ;;  %v2495_v33 = vmul.f32 %v6470_v55, %v7574_v63  ;;  %v2462_v51 = vadd.f32 %v2430_v20, %v2330_v37 }
 0x220   : > { %v1872_v29 = vsel %vm1871_vm6, %v5585_v17, %v1868_v22  ;;  %v2720_v49 = vadd.f32 %v2688_v56, %v7621_v60  ;;  %v2818_v12 = vmul.f32 %v6975_v53, %v7705_v7  ;;  %v7716_v43 = vadd.f32 %v1451_v57, %v6310_v1  ;;  %v7726_v57 = vpop.permute.xlu2 %2208 }
 0x221   : > { %v1877_v17 = vsel %vm1874_vm0, %v1876_v54, %v1872_v29  ;;  %v2591_v50 = vsel %vm2575_vm5, %v2558_v39, %v2559_v15  ;;  %v2625_v60 = vmul.f32 %v6629_v23, %v2592_v28  ;;  %v2527_v56 = vadd.f32 %v2495_v33, %v2462_v51  ;;  %11470 = vst [vmem:[#allocation30_spill] sm:$0xff] %v7726_v57 }
 0x222   : > { %v2785_v19 = vadd.f32 %v2753_v18, %v2720_v49  ;;  %v2106_v29 = vmul.f32 %v1877_v17, %v7558_v5  ;;  %v2883_v63 = vmul.f32 %v6961_v61, %v7678_v32  ;;  %v2947_v37 = vmul.f32 %v7020_v34, %v2591_v50 }
 0x223   : > { %v5589_v22 = vpop.eup %5588  ;;  %v7730_v26 = vadd.f32 %v2625_v60, %v2527_v56  ;;  %v5142_v39 = vmul.f32 -1.442695, %v7716_v43  ;;  %vm1884_vm8 = vweird.f32 %v7685_v16  ;;  %v1888_v60 = vand.u32 2147483647, %v7685_v16 }
 0x224   : > { %v1880_v59 = vmul.f32 %v5589_v22, %v7685_v16  ;;  %v5591_v54 = vpop.eup %5590  ;;  %v2850_v35 = vadd.f32 %v2818_v12, %v2785_v19  ;;  %v7733_v18 = vadd.f32 %v2947_v37, %v2914_v44  ;;  %v7737_v28 = vmul.f32 %v7726_v57, %v2106_v29 }
 0x225   : > { %v7728_v42 = vadd.f32 1.0, %v5591_v54  ;;  %v2496_v12 = vmul.f32 %v6470_v55, %v7644_v41  ;;  %vm1885_vm7 = vweird.f32 %v5589_v22  ;;  %v2431_v44 = vmul.f32 %v6785_v46, %v7665_v52 }
 0x226   : > { %v1881_v20 = vsub.f32 1.0, %v1880_v59  ;;  %v2915_v5 = vadd.f32 %v2883_v63, %v2850_v35  ;;  %11471 = vst [vmem:[#allocation31_spill] sm:$0xff] %v7733_v18  ;;  %v2331_v49 = vmul.f32 %v6462_v11, %v7737_v28  ;;  %v11278_v35 = vrot.slane %v7737_v28, 7  ;;  %vm1886_vm10 = vmor %vm1884_vm8, %vm1885_vm7 }
 0x227   : > { %5592 = vrcp.f32 %v7728_v42  ;;  %v1890_v59 = vand.u32 2147483648, %v7685_v16  ;;  %v2689_v19 = vmul.f32 %v6642_v62, %v7665_v52  ;;  %v2560_v63 = vrot.slane %v7737_v28, 1 }
 0x228   : > { %v1882_v17 = vmul.f32 %v5589_v22, %v1881_v20  ;;  %5594 = vpow2.f32 %v5142_v39  ;;  %v7759_v56 = vsel %vm2380_vm1, %v2362_v27, %v11278_v35  ;;  %v2463_v54 = vadd.f32 %v2431_v44, %v2331_v49  ;;  %v1453_v35 = vpop.f32.mrf.mxu1 }
 0x229   : > { %v2754_v20 = vmul.f32 %v6655_v8, %v2591_v50  ;;  %v2721_v39 = vadd.f32 %v2689_v19, %v7680_v47  ;;  %v2626_v16 = vmul.f32 %v6629_v23, %v2591_v50  ;;  %v2590_v18 = vsel %vm2575_vm5, %v2559_v15, %v2560_v63  ;;  %v5907_v19 = vld [vmem:[%s11242_s4] sm:$0xff] }
 0x22a   : > { %v1883_v51 = vadd.f32 %v5589_v22, %v1882_v17  ;;  %v2528_v57 = vadd.f32 %v2496_v12, %v2463_v54  ;;  %v1891_v27 = vor.u32 1.1754944e-38, %v1890_v59  ;;  %vm1889_vm11 = vcmp.eq.f32.partialorder %v1888_v60, 8.507059e+37 }
 0x22b   : > { %v2819_v47 = vmul.f32 %v6975_v53, %v7759_v56  ;;  %v7778_v15 = vadd.f32 %v1453_v35, %v6310_v1  ;;  %v2884_v59 = vmul.f32 %v6961_v61, %v7737_v28  ;;  %v7789_v60 = vperm.slane %v5907_v19, 2 }
 0x22c   : > { %v1887_v17 = vsel %vm1886_vm10, %v5589_v22, %v1883_v51  ;;  %v7770_v49 = vadd.f32 %v2626_v16, %v2528_v57  ;;  %v2948_v22 = vmul.f32 %v7020_v34, %v2590_v18  ;;  %vm1899_vm13 = vweird.f32 %v7728_v42 }
 0x22d   : > { %v7743_v33 = vpop.eup %5592  ;;  %v1892_v44 = vsel %vm1889_vm11, %v1891_v27, %v1887_v17  ;;  %v5143_v16 = vmul.f32 -1.442695, %v7778_v15 }
 0x22e   : > { %v1895_v29 = vmul.f32 %v7743_v33, %v7728_v42  ;;  %v5595_v41 = vpop.eup %5594  ;;  %v2107_v50 = vmul.f32 %v1892_v44, %v7641_v3  ;;  %vm1900_vm12 = vweird.f32 %v7743_v33  ;;  %v1905_v3 = vand.u32 2147483648, %v7728_v42 }
 0x22f   : > { %v7763_v52 = vadd.f32 1.0, %v5595_v41  ;;  %v2786_v41 = vadd.f32 %v2754_v20, %v2721_v39  ;;  %v7794_v54 = vadd.f32 %v2948_v22, %v2915_v5  ;;  %v1903_v20 = vand.u32 2147483647, %v7728_v42  ;;  %vm1901_vm14 = vmor %vm1899_vm13, %vm1900_vm12 }
 0x230   : > { %v1896_v37 = vsub.f32 1.0, %v1895_v29  ;;  %v2690_v39 = vmul.f32 %v6642_v62, %v7705_v7  ;;  %v2755_v44 = vmul.f32 %v6655_v8, %v2590_v18  ;;  %v1906_v42 = vor.u32 1.1754944e-38, %v1905_v3 }
 0x231   : > { %5596 = vrcp.f32 %v7763_v52  ;;  %v2851_v51 = vadd.f32 %v2819_v47, %v2786_v41  ;;  %v7811_v41 = vadd.f32 %v7789_v60, %v7082_v48  ;;  %vm1904_vm15 = vcmp.eq.f32.partialorder %v1903_v20, 8.507059e+37 }
 0x232   : > { %v1897_v29 = vmul.f32 %v7743_v33, %v1896_v37  ;;  %v7796_v37 = vpop.permute.xlu0 %2213  ;;  %5598 = vpow2.f32 %v5143_v16  ;;  %v2497_v48 = vmul.f32 %v6470_v55, %v7678_v32  ;;  %vm1914_vm3 = vweird.f32 %v7763_v52 }
 0x233   : > { %11472 = vst [vmem:[#allocation32_spill] sm:$0xff] %v7796_v37  ;;  %v2916_v17 = vadd.f32 %v2884_v59, %v2851_v51  ;;  %v7806_v5 = vmul.f32 %v7796_v37, %v2107_v50  ;;  %v11473_v59 = vrot.slane %v7737_v28, 7  ;;  %v5157_v20 = vmul.f32 -1.442695, %v7811_v41 }
 0x234   : > { %v1898_v57 = vadd.f32 %v7743_v33, %v1897_v29  ;;  %v2722_v29 = vadd.f32 %v2690_v39, %v7730_v26  ;;  %v1456_v26 = vpop.f32.mrf.mxu1 }
 0x235   : > { %v2332_v22 = vmul.f32 %v6462_v11, %v7806_v5  ;;  %v2561_v51 = vrot.slane %v7806_v5, 1  ;;  %5600 = vpow2.f32 %v5157_v20 }
 0x236   : > { %v1902_v27 = vsel %vm1901_vm14, %v7743_v33, %v1898_v57  ;;  %v2364_v33 = vrot.slane %v7806_v5, 7  ;;  %v2432_v57 = vmul.f32 %v6785_v46, %v7705_v7 }
 0x237   : > { %v7780_v12 = vpop.eup %5596  ;;  %v1907_v50 = vsel %vm1904_vm15, %v1906_v42, %v1902_v27  ;;  %v2589_v7 = vsel %vm2575_vm5, %v2560_v63, %v2561_v51  ;;  %v2627_v27 = vmul.f32 %v6629_v23, %v2590_v18 }
 0x238   : > { %v1910_v35 = vmul.f32 %v7780_v12, %v7763_v52  ;;  %v7825_v19 = vsel %vm2380_vm1, %v11473_v59, %v2364_v33  ;;  %v2464_v3 = vadd.f32 %v2432_v57, %v2332_v22  ;;  %v2108_v32 = vmul.f32 %v1907_v50, %v7675_v13  ;;  %v5599_v22 = vpop.eup %5598 }
 0x239   : > { %v2820_v16 = vmul.f32 %v6975_v53, %v7825_v19  ;;  %v7836_v59 = vadd.f32 %v1456_v26, %v6310_v1  ;;  %v7842_v57 = vadd.f32 1.0, %v5599_v22  ;;  %v2949_v37 = vmul.f32 %v7020_v34, %v2589_v7 }
 0x23a   : > { %v1911_v47 = vsub.f32 1.0, %v1910_v35  ;;  %v2787_v35 = vadd.f32 %v2755_v44, %v2722_v29  ;;  %v2529_v42 = vadd.f32 %v2497_v48, %v2464_v3  ;;  %v2885_v29 = vmul.f32 %v6961_v61, %v7806_v5 }
 0x23b   : > { %vm1915_vm2 = vweird.f32 %v7780_v12  ;;  %5602 = vrcp.f32 %v7842_v57  ;;  %v5144_v50 = vmul.f32 -1.442695, %v7836_v59  ;;  %v7856_v48 = vadd.f32 %v7789_v60, %v7207_v21 }
 0x23c   : > { %v1912_v39 = vmul.f32 %v7780_v12, %v1911_v47  ;;  %v2852_v44 = vadd.f32 %v2820_v16, %v2787_v35  ;;  %v7840_v47 = vpop.permute.xlu1 %2218  ;;  %v7844_v63 = vadd.f32 %v2627_v27, %v2529_v42  ;;  %v1920_v3 = vand.u32 2147483648, %v7763_v52  ;;  %vm7862_vm4 = vmor %vm1914_vm3, %vm1915_vm2  ;;  %v5601_v27 = vpop.eup %5600 }
 0x23d   : > { %11474 = vst [vmem:[#allocation33_spill] sm:$0xff] %v7840_v47  ;;  %v7852_v26 = vmul.f32 %v7840_v47, %v2108_v32  ;;  %v7860_v35 = vadd.f32 %v2949_v37, %v2916_v17  ;;  %v2691_v21 = vmul.f32 %v6642_v62, %v7759_v56  ;;  %v2756_v32 = vmul.f32 %v6655_v8, %v2589_v7 }
 0x23e   : > { %v1913_v13 = vadd.f32 %v7780_v12, %v1912_v39  ;;  %v2917_v18 = vadd.f32 %v2885_v29, %v2852_v44  ;;  %v1918_v39 = vand.u32 2147483647, %v7763_v52  ;;  %5604 = vpow2.f32 %v5144_v50 }
 0x23f   : > { %11475 = vst [vmem:[#allocation34_spill] sm:$0xff] %v7860_v35  ;;  %v2333_v37 = vmul.f32 %v6462_v11, %v7852_v26  ;;  %v2433_v17 = vmul.f32 %v6785_v46, %v7759_v56  ;;  %v5158_v42 = vmul.f32 -1.442695, %v7856_v48  ;;  %v1921_v52 = vor.u32 1.1754944e-38, %v1920_v3 }
 0x240   : > { %v1917_v16 = vsel %vm7862_vm4, %v7780_v12, %v1913_v13  ;;  %v2498_v22 = vmul.f32 %v6470_v55, %v7737_v28  ;;  %v11282_v12 = vrot.slane %v7852_v26, 7  ;;  %vm1919_vm6 = vcmp.eq.f32.partialorder %v1918_v39, 8.507059e+37 }
 0x241   : > { %v7881_v44 = vpop.eup %5602  ;;  %v2465_v29 = vadd.f32 %v2433_v17, %v2333_v37  ;;  %v11281_v13 = vrot.slane %v7852_v26, 1  ;;  %v2723_v50 = vadd.f32 %v2691_v21, %v7770_v49  ;;  %v1922_v20 = vsel %vm1919_vm6, %v1921_v52, %v1917_v16  ;;  %v1458_v16 = vpop.f32.mrf.mxu1 }
 0x242   : > { %v1925_v56 = vmul.f32 %v7881_v44, %v7842_v57  ;;  %v7891_v3 = vsel %vm2380_vm1, %v2364_v33, %v11282_v12  ;;  %v2628_v28 = vmul.f32 %v6629_v23, %v2589_v7  ;;  %5606 = vpow2.f32 %v5158_v42 }
 0x243   : > { %v2530_v47 = vadd.f32 %v2498_v22, %v2465_v29  ;;  %v7898_v39 = vsel %vm2575_vm5, %v2561_v51, %v11281_v13  ;;  %v2788_v49 = vadd.f32 %v2756_v32, %v2723_v50  ;;  %v7900_v17 = vadd.f32 1.0, %v5601_v27  ;;  %v7919_v50 = vpop.permute.xlu2 %2223 }
 0x244   : > { %v1926_v21 = vsub.f32 1.0, %v1925_v56  ;;  %v5605_v37 = vpop.eup %5604  ;;  %v2821_v33 = vmul.f32 %v6975_v53, %v7891_v3  ;;  %v2950_v7 = vmul.f32 %v7020_v34, %v7898_v39  ;;  %v2109_v22 = vmul.f32 %v1922_v20, %v7716_v43  ;;  %11479 = vst [vmem:[#allocation36_spill] sm:$0xff] %v7919_v50 }
 0x245   : > { %v7902_v52 = vadd.f32 %v2628_v28, %v2530_v47  ;;  %v7910_v29 = vadd.f32 1.0, %v5605_v37  ;;  %v7913_v32 = vadd.f32 %v1458_v16, %v6310_v1  ;;  %v2886_v47 = vmul.f32 %v6961_v61, %v7852_v26 }
 0x246   : > { %v1927_v51 = vmul.f32 %v7881_v44, %v1926_v21  ;;  %v2853_v42 = vadd.f32 %v2821_v33, %v2788_v49  ;;  %v7917_v27 = vadd.f32 %v2950_v7, %v2917_v18  ;;  %v7923_v56 = vmul.f32 %v6462_v11, %v6555_v40 }
 0x247   : > { %v7927_v43 = vmul.f32 %v6470_v55, %v6555_v40  ;;  %v11284_v20 = vrot.slane %v6555_v40, 1  ;;  %5608 = vrcp.f32 %v7910_v29  ;;  %v7933_v28 = vmul.f32 %v6961_v61, %v6555_v40 }
 0x248   : > { %11478 = vst [vmem:[#allocation35_spill] sm:$0xff] %v7917_v27  ;;  %v7937_v18 = vmul.f32 %v6462_v11, %v6677_v24  ;;  %5610 = vrcp.f32 %v7900_v17  ;;  %v7940_v49 = vadd.f32 %v2886_v47, %v2853_v42  ;;  %v5607_v16 = vpop.eup %5606  ;;  %v1928_v21 = vadd.f32 %v7881_v44, %v1927_v51 }
 0x249   : > { %11480 = vst [vmem:[#allocation37_spill] sm:$0xff] %v7923_v56  ;;  %vm1930_vm0 = vweird.f32 %v7881_v44  ;;  %v5145_v37 = vmul.f32 -1.442695, %v7913_v32  ;;  %v7946_v33 = vmul.f32 %v7919_v50, %v2109_v22  ;;  %v7950_v7 = vmul.f32 %v6462_v11, %v6710_v45 }
 0x24a   : > { %11481 = vst [vmem:[#allocation38_spill] sm:$0xff] %v7927_v43  ;;  %v7954_v13 = vmul.f32 %v6961_v61, %v6710_v45  ;;  %v7958_v42 = vmul.f32 %v6961_v61, %v6677_v24  ;;  %v1935_v51 = vand.u32 2147483648, %v7842_v57  ;;  %v11487_v47 = vrot.slane %v6710_v45, 1 }
 0x24b   : > { %11482 = vst [vmem:[#allocation39_spill] sm:$0xff] %v7933_v28  ;;  %v7971_v12 = vmul.f32 %v6642_v62, %v6765_v10  ;;  %vm1929_vm7 = vweird.f32 %v7842_v57  ;;  %v1933_v50 = vand.u32 2147483647, %v7842_v57  ;;  %v7977_v24 = vmul.f32 %v6975_v53, %v6765_v10 }
 0x24c   : > { %11483 = vst [vmem:[#allocation40_spill] sm:$0xff] %v7937_v18  ;;  %v7967_v22 = vsel %vm2575_vm5, %v11284_v20, %v11487_v47  ;;  %v7983_v45 = vadd.f32 %v7789_v60, %v7266_v6  ;;  %vm7985_vm8 = vmor %vm1929_vm7, %vm1930_vm0  ;;  %v2499_v20 = vmul.f32 %v6470_v55, %v7806_v5  ;;  %5612 = vpow2.f32 %v5145_v37 }
 0x24d   : > { %11484 = vst [vmem:[#allocation41_spill] sm:$0xff] %v7950_v7  ;;  %v1932_v10 = vsel %vm7985_vm8, %v7881_v44, %v1928_v21  ;;  %v2334_v57 = vmul.f32 %v6462_v11, %v7946_v33  ;;  %v2434_v6 = vmul.f32 %v6785_v46, %v7825_v19  ;;  %v1936_v28 = vor.u32 1.1754944e-38, %v1935_v51 }
 0x24e   : > { %11485 = vst [vmem:[#allocation42_spill] sm:$0xff] %v7954_v13  ;;  %v7979_v13 = vadd.f32 1.0, %v5607_v16  ;;  %vm1934_vm10 = vcmp.eq.f32.partialorder %v1933_v50, 8.507059e+37  ;;  %v2757_v44 = vmul.f32 %v6655_v8, %v7898_v39  ;;  %v11285_v37 = vrot.slane %v7946_v33, 1 }
 0x24f   : > { %11486 = vst [vmem:[#allocation43_spill] sm:$0xff] %v7958_v42  ;;  %v7991_v42 = vpop.eup %5608  ;;  %v2466_v21 = vadd.f32 %v2434_v6, %v2334_v57  ;;  %v1937_v47 = vsel %vm1934_vm10, %v1936_v28, %v1932_v10  ;;  %v11493_v51 = vrot.slane %v7852_v26, 7  ;;  %v8021_v50 = vmul.f32 %v6629_v23, %v7967_v22 }
 0x250   : > { %11488 = vst [vmem:[#allocation44_spill] sm:$0xff] %v7967_v22  ;;  %v8000_v16 = vpop.eup %5610  ;;  %v1940_v5 = vmul.f32 %v7991_v42, %v7910_v29  ;;  %v2629_v57 = vmul.f32 %v6629_v23, %v7898_v39  ;;  %v11495_v28 = vrot.slane %v7852_v26, 1  ;;  %5614 = vrcp.f32 %v7979_v13 }
 0x251   : > { %11489 = vst [vmem:[#allocation45_spill] sm:$0xff] %v7971_v12  ;;  %v11286_v12 = vrot.slane %v7946_v33, 7  ;;  %v2531_v6 = vadd.f32 %v2499_v20, %v2466_v21  ;;  %v3205_v39 = vmul.f32 %v8000_v16, %v7900_v17  ;;  %vm1945_vm11 = vweird.f32 %v7991_v42 }
 0x252   : > { %11490 = vst [vmem:[#allocation46_spill] sm:$0xff] %v7977_v24  ;;  %v2692_v24 = vmul.f32 %v6642_v62, %v7825_v19  ;;  %v1941_v43 = vsub.f32 1.0, %v1940_v5  ;;  %v8031_v10 = vsel %vm2575_vm5, %v11495_v28, %v11285_v37  ;;  %v8035_v5 = vmul.f32 %v6655_v8, %v7967_v22  ;;  %v5613_v20 = vpop.eup %5612  ;;  %v1461_v37 = vpop.f32.mrf.mxu1 }
 0x253   : > { %v8016_v19 = vsel %vm2380_vm1, %v11493_v51, %v11286_v12  ;;  %11494 = vst [vmem:[#allocation47_spill] sm:$0xff] %v8021_v50  ;;  %v8045_v21 = vadd.f32 %v2629_v57, %v2531_v6  ;;  %v8051_v12 = vmul.f32 %v6655_v8, %v6797_v38  ;;  %v5159_v22 = vmul.f32 -1.442695, %v7983_v45  ;;  %v8057_v50 = vpop.permute.xlu0 %2228  ;;  %v11503_v6 = vld [vmem:[#allocation13_spill] sm:$0xff] }
 0x254   : > { %v2724_v18 = vadd.f32 %v2692_v24, %v7844_v63  ;;  %11496 = vst [vmem:[#allocation48_spill] sm:$0xff] %v8035_v5  ;;  %v8039_v63 = vmul.f32 %v6642_v62, %v6776_v58  ;;  %v2110_v24 = vmul.f32 %v1937_v47, %v7778_v15  ;;  %v2822_v28 = vmul.f32 %v6975_v53, %v8016_v19 }
 0x255   : > { %11498 = vst [vmem:[#allocation50_spill] sm:$0xff] %v8051_v12  ;;  %v8055_v5 = vadd.f32 1.0, %v5613_v20  ;;  %v8061_v15 = vmul.f32 %v6975_v53, %v6776_v58  ;;  %v2951_v47 = vmul.f32 %v7020_v34, %v8031_v10  ;;  %v8071_v57 = vmul.f32 %v6655_v8, %v6840_v4 }
 0x256   : > { %11497 = vst [vmem:[#allocation49_spill] sm:$0xff] %v8039_v63  ;;  %v2789_v51 = vadd.f32 %v2757_v44, %v2724_v18  ;;  %v1942_v63 = vmul.f32 %v7991_v42, %v1941_v43  ;;  %v8065_v18 = vadd.f32 %v7789_v60, %v7311_v14  ;;  %v8075_v43 = vmul.f32 %v6961_v61, %v6782_v31  ;;  %v8090_v38 = vpop.eup %5614 }
 0x257   : > { %11499 = vst [vmem:[#allocation51_spill] sm:$0xff] %v8057_v50  ;;  %5616 = vrcp.f32 %v8055_v5  ;;  %v8079_v58 = vadd.f32 %v1461_v37, %v6310_v1  ;;  %v8083_v14 = vmul.f32 %v6975_v53, %v11503_v6  ;;  %v3206_v20 = vsub.f32 1.0, %v3205_v39 }
 0x258   : > { %11500 = vst [vmem:[#allocation52_spill] sm:$0xff] %v8061_v15  ;;  %v2854_v44 = vadd.f32 %v2822_v28, %v2789_v51  ;;  %v2887_v51 = vmul.f32 %v6961_v61, %v7946_v33  ;;  %v8088_v28 = vmul.f32 %v8057_v50, %v2110_v24  ;;  %v8094_v31 = vmul.f32 %v7020_v34, %v6840_v4  ;;  %v11507_v50 = vld [vmem:[#allocation15_spill] sm:$0xff] }
 0x259   : > { %11501 = vst [vmem:[#allocation53_spill] sm:$0xff] %v8071_v57  ;;  %5618 = vpow2.f32 %v5159_v22  ;;  %v1943_v37 = vadd.f32 %v7991_v42, %v1942_v63  ;;  %v5160_v6 = vmul.f32 -1.442695, %v8065_v18  ;;  %v1950_v39 = vand.u32 2147483648, %v7910_v29  ;;  %v11509_v63 = vld [vmem:[#allocation10_spill] sm:$0xff] }
 0x25a   : > { %11502 = vst [vmem:[#allocation54_spill] sm:$0xff] %v8075_v43  ;;  %v8100_v43 = vadd.f32 %v2887_v51, %v2854_v44  ;;  %v8103_v24 = vadd.f32 %v2951_v47, %v7940_v49  ;;  %vm1944_vm12 = vweird.f32 %v7910_v29  ;;  %v1948_v4 = vand.u32 2147483647, %v7910_v29 }
 0x25b   : > { %11504 = vst [vmem:[#allocation13_spill] sm:$0xff] %v8083_v14  ;;  %v8107_v14 = vmul.f32 %v6975_v53, %v11507_v50  ;;  %v5146_v22 = vmul.f32 -1.442695, %v8079_v58  ;;  %v3207_v44 = vmul.f32 %v8000_v16, %v3206_v20  ;;  %v3220_v49 = vmul.f32 %v8090_v38, %v7979_v13  ;;  %vm8119_vm13 = vmor %vm1944_vm12, %vm1945_vm11 }
 0x25c   : > { %11505 = vst [vmem:[#allocation55_spill] sm:$0xff] %v8094_v31  ;;  %v8114_v31 = vmul.f32 %v6961_v61, %v11509_v63  ;;  %v2335_v50 = vmul.f32 %v6462_v11, %v8088_v28  ;;  %v1947_v29 = vsel %vm8119_vm13, %v7991_v42, %v1943_v37  ;;  %v11292_v63 = vrot.slane %v8088_v28, 7 }
 0x25d   : > { %11506 = vst [vmem:[#allocation56_spill] sm:$0xff] %v8103_v24  ;;  %v8125_v51 = vpop.eup %5616  ;;  %5620 = vpow2.f32 %v5146_v22  ;;  %v2435_v20 = vmul.f32 %v6785_v46, %v7891_v3  ;;  %vm1949_vm14 = vcmp.eq.f32.partialorder %v1948_v4, 8.507059e+37  ;;  %v2693_v47 = vmul.f32 %v6642_v62, %v7891_v3  ;;  %v1463_v4 = vpop.f32.mrf.mxu1 }
 0x25e   : > { %11508 = vst [vmem:[#allocation15_spill] sm:$0xff] %v8107_v14  ;;  %5622 = vpow2.f32 %v5160_v6  ;;  %v2500_v14 = vmul.f32 %v6470_v55, %v7852_v26  ;;  %v1955_v57 = vmul.f32 %v8125_v51, %v8055_v5  ;;  %v11513_v42 = vrot.slane %v7946_v33, 7 }
 0x25f   : > { %11510 = vst [vmem:[#allocation10_spill] sm:$0xff] %v8114_v31  ;;  %v1951_v31 = vor.u32 1.1754944e-38, %v1950_v39  ;;  %v5619_v12 = vpop.eup %5618  ;;  %v2467_v6 = vadd.f32 %v2435_v20, %v2335_v50  ;;  %v2758_v26 = vmul.f32 %v6655_v8, %v8031_v10  ;;  %v11293_v15 = vrot.slane %v8088_v28, 1 }
 0x260   : > { %v8145_v37 = vsel %vm2380_vm1, %v11513_v42, %v11292_v63  ;;  %v1956_v22 = vsub.f32 1.0, %v1955_v57  ;;  %v8152_v3 = vadd.f32 %v7789_v60, %v7375_v36  ;;  %v2630_v7 = vmul.f32 %v6629_v23, %v8031_v10  ;;  %v11514_v63 = vld [vmem:[#allocation14_spill] sm:$0xff] }
 0x261   : > { %v1952_v39 = vsel %vm1949_vm14, %v1951_v31, %v1947_v29  ;;  %v2532_v40 = vadd.f32 %v2500_v14, %v2467_v6  ;;  %v2725_v42 = vadd.f32 %v2693_v47, %v7902_v52  ;;  %v8159_v31 = vmul.f32 %v7020_v34, %v11514_v63 }
 0x262   : > { %v3213_v57 = vand.u32 2147483647, %v7900_v17  ;;  %v1957_v50 = vmul.f32 %v8125_v51, %v1956_v22  ;;  %v11516_v29 = vrot.slane %v7946_v33, 1  ;;  %v8169_v10 = vadd.f32 1.0, %v5619_v12 }
 0x263   : > { %11515 = vst [vmem:[#allocation14_spill] sm:$0xff] %v8159_v31  ;;  %v5621_v20 = vpop.eup %5620  ;;  %v2111_v52 = vmul.f32 %v1952_v39, %v7836_v59  ;;  %v8172_v14 = vadd.f32 %v2630_v7, %v2532_v40  ;;  %v8175_v63 = vadd.f32 %v1463_v4, %v6310_v1  ;;  %v3215_v6 = vand.u32 2147483648, %v7900_v17 }
 0x264   : > { %v2586_v36 = vsel %vm2575_vm5, %v11516_v29, %v11293_v15  ;;  %v5623_v47 = vpop.eup %5622  ;;  %v8178_v22 = vadd.f32 1.0, %v5621_v20  ;;  %v2790_v31 = vadd.f32 %v2758_v26, %v2725_v42  ;;  %v2823_v56 = vmul.f32 %v6975_v53, %v8145_v37  ;;  %v8182_v29 = vpop.permute.xlu1 %2233 }
 0x265   : > { %11517 = vst [vmem:[#allocation57_spill] sm:$0xff] %v8182_v29  ;;  %v8185_v12 = vadd.f32 %v8000_v16, %v3207_v44  ;;  %vm3210_vm15 = vweird.f32 %v8000_v16  ;;  %v3221_v40 = vsub.f32 1.0, %v3220_v49  ;;  %v5161_v59 = vmul.f32 -1.442695, %v8152_v3 }
 0x266   : > { %vm3209_vm2 = vweird.f32 %v7900_v17  ;;  %v1958_v7 = vadd.f32 %v8125_v51, %v1957_v50  ;;  %vm1960_vm3 = vweird.f32 %v8125_v51  ;;  %5624 = vrcp.f32 %v8178_v22 }
 0x267   : > { %v2952_v39 = vmul.f32 %v7020_v34, %v2586_v36  ;;  %5626 = vrcp.f32 %v8169_v10  ;;  %v1965_v44 = vand.u32 2147483648, %v8055_v5  ;;  %v5147_v26 = vmul.f32 -1.442695, %v8175_v63  ;;  %vm8256_vm10 = vmor %vm3209_vm2, %vm3210_vm15 }
 0x268   : > { %v8198_v49 = vmul.f32 %v8182_v29, %v2111_v52  ;;  %vm1959_vm4 = vweird.f32 %v8055_v5  ;;  %v1963_v4 = vand.u32 2147483647, %v8055_v5  ;;  %v2855_v42 = vadd.f32 %v2823_v56, %v2790_v31 }
 0x269   : > { %v2888_v50 = vmul.f32 %v6961_v61, %v8088_v28  ;;  %v3222_v20 = vmul.f32 %v8090_v38, %v3221_v40  ;;  %v3230_v15 = vand.u32 2147483648, %v7979_v13  ;;  %v8206_v24 = vadd.f32 1.0, %v5623_v47  ;;  %vm8210_vm6 = vmor %vm1959_vm4, %vm1960_vm3 }
 0x26a   : > { %5628 = vpow2.f32 %v5161_v59  ;;  %vm8214_vm0 = vcmp.eq.f32.partialorder %v3213_v57, 8.507059e+37  ;;  %v1962_v56 = vsel %vm8210_vm6, %v8125_v51, %v1958_v7  ;;  %v2501_v5 = vmul.f32 %v6470_v55, %v7946_v33 }
 0x26b   : > { %v2920_v31 = vadd.f32 %v2888_v50, %v2855_v42  ;;  %v8224_v47 = vadd.f32 %v2952_v39, %v8100_v43  ;;  %v1966_v40 = vor.u32 1.1754944e-38, %v1965_v44  ;;  %5630 = vpow2.f32 %v5147_v26 }
 0x26c   : > { %v2336_v59 = vmul.f32 %v6462_v11, %v8198_v49  ;;  %v2436_v57 = vmul.f32 %v6785_v46, %v8016_v19  ;;  %v8230_v27 = vpop.eup %5624  ;;  %vm1964_vm7 = vcmp.eq.f32.partialorder %v1963_v4, 8.507059e+37  ;;  %v2694_v51 = vmul.f32 %v6642_v62, %v8016_v19 }
 0x26d   : > { %11522 = vst [vmem:[#allocation58_spill] sm:$0xff] %v8224_v47  ;;  %v2759_v33 = vmul.f32 %v6655_v8, %v2586_v36  ;;  %v11295_v7 = vrot.slane %v8198_v49, 7  ;;  %v8236_v43 = vpop.eup %5626  ;;  %v1967_v39 = vsel %vm1964_vm7, %v1966_v40, %v1962_v56  ;;  %v1970_v44 = vmul.f32 %v8230_v27, %v8178_v22 }
 0x26e   : > { %v2468_v26 = vadd.f32 %v2436_v57, %v2336_v59  ;;  %v11296_v42 = vrot.slane %v8198_v49, 1  ;;  %v3223_v50 = vadd.f32 %v8090_v38, %v3222_v20  ;;  %vm3225_vm8 = vweird.f32 %v8090_v38 }
 0x26f   : > { %v11523_v19 = vrot.slane %v8088_v28, 7  ;;  %v2726_v52 = vadd.f32 %v2694_v51, %v8045_v21  ;;  %5632 = vrcp.f32 %v8206_v24  ;;  %v2631_v20 = vmul.f32 %v6629_v23, %v2586_v36  ;;  %v1466_v36 = vpop.f32.mrf.mxu1 }
 0x270   : > { %v5629_v56 = vpop.eup %5628  ;;  %v2533_v59 = vadd.f32 %v2501_v5, %v2468_v26  ;;  %v11526_v57 = vrot.slane %v8088_v28, 1  ;;  %v3212_v17 = vsel %vm8256_vm10, %v8000_v16, %v8185_v12  ;;  %v3216_v51 = vor.u32 1.1754944e-38, %v3215_v6 }
 0x271   : > { %v8249_v4 = vsel %vm2380_vm1, %v11523_v19, %v11295_v7  ;;  %vm3224_vm11 = vweird.f32 %v7979_v13  ;;  %v2112_v19 = vmul.f32 %v1967_v39, %v7913_v32  ;;  %v5631_v5 = vpop.eup %5630  ;;  %v3228_v26 = vand.u32 2147483647, %v7979_v13 }
 0x272   : > { %v8268_v21 = vsel %vm2575_vm5, %v11526_v57, %v11296_v42  ;;  %v1971_v7 = vsub.f32 1.0, %v1970_v44  ;;  %v8277_v47 = vadd.f32 %v2631_v20, %v2533_v59  ;;  %v2791_v35 = vadd.f32 %v2759_v33, %v2726_v52  ;;  %v8279_v57 = vpop.permute.xlu2 %2238  ;;  %vm8283_vm12 = vmor %vm3224_vm11, %vm3225_vm8 }
 0x273   : > { %11527 = vst [vmem:[#allocation59_spill] sm:$0xff] %v8279_v57  ;;  %v8289_v16 = vadd.f32 %v7789_v60, %v7463_v9  ;;  %v8291_v32 = vadd.f32 1.0, %v5631_v5  ;;  %v2824_v13 = vmul.f32 %v6975_v53, %v8249_v4  ;;  %v2953_v6 = vmul.f32 %v7020_v34, %v8268_v21 }
 0x274   : > { %v3217_v12 = vsel %vm8214_vm0, %v3216_v51, %v3212_v17  ;;  %v3227_v33 = vsel %vm8283_vm12, %v8090_v38, %v3223_v50  ;;  %v3231_v39 = vor.u32 1.1754944e-38, %v3230_v15  ;;  %v8303_v44 = vadd.f32 %v1466_v36, %v6310_v1 }
 0x275   : > { %v3235_v9 = vmul.f32 %v8236_v43, %v8169_v10  ;;  %v8307_v52 = vadd.f32 1.0, %v5629_v56  ;;  %5634 = vrcp.f32 %v8291_v32  ;;  %v8311_v20 = vmul.f32 %v8279_v57, %v2112_v19  ;;  %v8313_v29 = vpop.eup %5632 }
 0x276   : > { %v1972_v59 = vmul.f32 %v8230_v27, %v1971_v7  ;;  %v2856_v17 = vadd.f32 %v2824_v13, %v2791_v35  ;;  %v2889_v38 = vmul.f32 %v6961_v61, %v8198_v49  ;;  %v8318_v15 = vadd.f32 %v2953_v6, %v2920_v31 }
 0x277   : > { %v8321_v50 = vmul.f32 %v3217_v12, %v7811_v41  ;;  %vm3229_vm13 = vcmp.eq.f32.partialorder %v3228_v26, 8.507059e+37  ;;  %v5162_v56 = vmul.f32 -1.442695, %v8289_v16  ;;  %v5148_v51 = vmul.f32 -1.442695, %v8303_v44 }
 0x278   : > { %11530 = vst [vmem:[#allocation60_spill] sm:$0xff] %v8318_v15  ;;  %v3232_v19 = vsel %vm3229_vm13, %v3231_v39, %v3227_v33  ;;  %v3245_v5 = vand.u32 2147483648, %v8169_v10  ;;  %v8327_v7 = vadd.f32 %v2889_v38, %v2856_v17  ;;  %v3236_v35 = vsub.f32 1.0, %v3235_v9 }
 0x279   : > { %11531 = vst [vmem:[#allocation61_spill] sm:$0xff] %v8321_v50  ;;  %v3250_v31 = vmul.f32 %v8313_v29, %v8206_v24  ;;  %5636 = vpow2.f32 %v5148_v51  ;;  %v2337_v41 = vmul.f32 %v6462_v11, %v8311_v20  ;;  %v1973_v26 = vadd.f32 %v8230_v27, %v1972_v59 }
 0x27a   : > { %5638 = vrcp.f32 %v8307_v52  ;;  %vm1975_vm14 = vweird.f32 %v8230_v27  ;;  %v2437_v40 = vmul.f32 %v6785_v46, %v8145_v37  ;;  %v1980_v6 = vand.u32 2147483648, %v8178_v22 }
 0x27b   : > { %v8338_v13 = vpop.eup %5634  ;;  %5640 = vpow2.f32 %v5162_v56  ;;  %v2502_v12 = vmul.f32 %v6470_v55, %v8088_v28  ;;  %v11298_v33 = vrot.slane %v8311_v20, 7  ;;  %vm3239_vm15 = vweird.f32 %v8169_v10 }
 0x27c   : > { %vm1974_vm2 = vweird.f32 %v8178_v22  ;;  %v1978_v39 = vand.u32 2147483647, %v8178_v22  ;;  %v1985_v9 = vmul.f32 %v8338_v13, %v8291_v32  ;;  %v2469_v59 = vadd.f32 %v2437_v40, %v2337_v41 }
 0x27d   : > { %v3237_v17 = vmul.f32 %v8236_v43, %v3236_v35  ;;  %v3251_v38 = vsub.f32 1.0, %v3250_v31  ;;  %vm8350_vm3 = vmor %vm1974_vm2, %vm1975_vm14  ;;  %v2695_v28 = vmul.f32 %v6642_v62, %v8145_v37  ;;  %v11534_v51 = vrot.slane %v8198_v49, 7 }
 0x27e   : > { %v1977_v35 = vsel %vm8350_vm3, %v8230_v27, %v1973_v26  ;;  %v2632_v31 = vmul.f32 %v6629_v23, %v8268_v21  ;;  %v2534_v41 = vadd.f32 %v2502_v12, %v2469_v59  ;;  %v11299_v40 = vrot.slane %v8311_v20, 1 }
 0x27f   : > { %v8362_v22 = vsel %vm2380_vm1, %v11534_v51, %v11298_v33  ;;  %v5637_v36 = vpop.eup %5636  ;;  %v1981_v37 = vor.u32 1.1754944e-38, %v1980_v6  ;;  %v1986_v42 = vsub.f32 1.0, %v1985_v9  ;;  %v2760_v57 = vmul.f32 %v6655_v8, %v8268_v21 }
 0x280   : > { %v2727_v15 = vadd.f32 %v2695_v28, %v8172_v14  ;;  %v8373_v51 = vpop.eup %5638  ;;  %vm1979_vm4 = vcmp.eq.f32.partialorder %v1978_v39, 8.507059e+37  ;;  %v8375_v33 = vadd.f32 1.0, %v5637_v36  ;;  %v11535_v27 = vrot.slane %v8198_v49, 1  ;;  %v1468_v39 = vpop.f32.mrf.mxu1 }
 0x281   : > { %v8385_v6 = vadd.f32 %v2632_v31, %v2534_v41  ;;  %v5641_v12 = vpop.eup %5640  ;;  %v8388_v21 = vmul.f32 %v3232_v19, %v7856_v48  ;;  %v8390_v14 = vor.u32 1.1754944e-38, %v3245_v5  ;;  %v1982_v9 = vsel %vm1979_vm4, %v1981_v37, %v1977_v35 }
 0x282   : > { %v8383_v26 = vsel %vm2575_vm5, %v11535_v27, %v11299_v40  ;;  %v2825_v36 = vmul.f32 %v6975_v53, %v8362_v22  ;;  %v8395_v59 = vadd.f32 %v8236_v43, %v3237_v17  ;;  %vm3240_vm6 = vweird.f32 %v8236_v43 }
 0x283   : > { %11536 = vst [vmem:[#allocation62_spill] sm:$0xff] %v8388_v21  ;;  %v3252_v56 = vmul.f32 %v8313_v29, %v3251_v38  ;;  %v3258_v28 = vand.u32 2147483647, %v8206_v24  ;;  %vm3254_vm0 = vweird.f32 %v8206_v24  ;;  %v1987_v48 = vmul.f32 %v8338_v13, %v1986_v42  ;;  %vm8415_vm7 = vmor %vm3239_vm15, %vm3240_vm6 }
 0x284   : > { %5642 = vrcp.f32 %v8375_v33  ;;  %v2792_v19 = vadd.f32 %v2760_v57, %v2727_v15  ;;  %v2954_v5 = vmul.f32 %v7020_v34, %v8383_v26  ;;  %v3265_v17 = vmul.f32 %v8373_v51, %v8307_v52 }
 0x285   : > { %v8407_v35 = vadd.f32 1.0, %v5641_v12  ;;  %v2113_v31 = vmul.f32 %v1982_v9, %v8079_v58  ;;  %v8411_v38 = vadd.f32 %v1468_v39, %v6310_v1  ;;  %v3260_v57 = vand.u32 2147483648, %v8206_v24  ;;  %v8426_v58 = vpop.permute.xlu0 %2243 }
 0x286   : > { %v8422_v15 = vadd.f32 %v7789_v60, %v7507_v0  ;;  %v2857_v41 = vadd.f32 %v2825_v36, %v2792_v19  ;;  %v2890_v37 = vmul.f32 %v6961_v61, %v8311_v20  ;;  %11540 = vst [vmem:[#allocation64_spill] sm:$0xff] %v8426_v58  ;;  %v3242_v27 = vsel %vm8415_vm7, %v8236_v43, %v8395_v59 }
 0x287   : > { %v11541_v12 = vand.u32 2147483647, %v8169_v10  ;;  %v3253_v0 = vadd.f32 %v8313_v29, %v3252_v56  ;;  %vm3255_vm10 = vweird.f32 %v8313_v29  ;;  %v1995_v36 = vand.u32 2147483648, %v8291_v32 }
 0x288   : > { %11539 = vst [vmem:[#allocation63_spill] sm:$0xff] %v8422_v15  ;;  %v1988_v39 = vadd.f32 %v8338_v13, %v1987_v48  ;;  %vm1990_vm11 = vweird.f32 %v8338_v13  ;;  %v2922_v19 = vadd.f32 %v2890_v37, %v2857_v41  ;;  %v8444_v42 = vadd.f32 %v2954_v5, %v8327_v7  ;;  %vm8482_vm15 = vmor %vm3254_vm0, %vm3255_vm10 }
 0x289   : > { %vm8434_vm8 = vcmp.eq.f32.partialorder %v11541_v12, 8.507059e+37  ;;  %vm8446_vm12 = vcmp.eq.f32.partialorder %v3258_v28, 8.507059e+37  ;;  %v3266_v43 = vsub.f32 1.0, %v3265_v17  ;;  %5644 = vrcp.f32 %v8407_v35 }
 0x28a   : > { %11544 = vst [vmem:[#allocation65_spill] sm:$0xff] %v8444_v42  ;;  %v5149_v59 = vmul.f32 -1.442695, %v8411_v38  ;;  %v8453_v56 = vmul.f32 %v8426_v58, %v2113_v31  ;;  %v8455_v12 = vpop.eup %5642  ;;  %v5163_v48 = vmul.f32 -1.442695, %v8422_v15  ;;  %vm1989_vm13 = vweird.f32 %v8291_v32 }
 0x28b   : > { %v1993_v7 = vand.u32 2147483647, %v8291_v32  ;;  %v2503_v28 = vmul.f32 %v6470_v55, %v8198_v49  ;;  %vm8462_vm14 = vmor %vm1989_vm13, %vm1990_vm11  ;;  %v2696_v17 = vmul.f32 %v6642_v62, %v8249_v4  ;;  %v2438_v41 = vmul.f32 %v6785_v46, %v8249_v4 }
 0x28c   : > { %5646 = vpow2.f32 %v5149_v59  ;;  %v2338_v31 = vmul.f32 %v6462_v11, %v8453_v56  ;;  %v1992_v32 = vsel %vm8462_vm14, %v8338_v13, %v1988_v39  ;;  %v1996_v37 = vor.u32 1.1754944e-38, %v1995_v36 }
 0x28d   : > { %v2761_v49 = vmul.f32 %v6655_v8, %v8383_v26  ;;  %v2000_v4 = vmul.f32 %v8455_v12, %v8375_v33  ;;  %v11302_v13 = vrot.slane %v8453_v56, 1  ;;  %v2728_v36 = vadd.f32 %v2696_v17, %v8277_v47 }
 0x28e   : > { %v2470_v58 = vadd.f32 %v2438_v41, %v2338_v31  ;;  %v3257_v39 = vsel %vm8482_vm15, %v8313_v29, %v3253_v0  ;;  %v3261_v5 = vor.u32 1.1754944e-38, %v3260_v57  ;;  %vm1994_vm2 = vcmp.eq.f32.partialorder %v1993_v7, 8.507059e+37 }
 0x28f   : > { %v2633_v24 = vmul.f32 %v6629_v23, %v8383_v26  ;;  %v8495_v40 = vpop.eup %5644  ;;  %v1997_v42 = vsel %vm1994_vm2, %v1996_v37, %v1992_v32  ;;  %v11551_v15 = vrot.slane %v8453_v56, 7  ;;  %v11552_v31 = vrot.slane %v8311_v20, 7 }
 0x290   : > { %v2535_v47 = vadd.f32 %v2503_v28, %v2470_v58  ;;  %v11553_v29 = vrot.slane %v8311_v20, 1  ;;  %v3247_v26 = vsel %vm8434_vm8, %v8390_v14, %v3242_v27  ;;  %v3267_v0 = vmul.f32 %v8373_v51, %v3266_v43 }
 0x291   : > { %v8503_v41 = vsel %vm2380_vm1, %v11552_v31, %v11551_v15  ;;  %v3273_v7 = vand.u32 2147483647, %v8307_v52  ;;  %5648 = vpow2.f32 %v5163_v48  ;;  %v1471_v15 = vpop.f32.mrf.mxu1  ;;  %v2001_v58 = vsub.f32 1.0, %v2000_v4 }
 0x292   : > { %v8511_v57 = vsel %vm2575_vm5, %v11553_v29, %v11302_v13  ;;  %v5647_v17 = vpop.eup %5646  ;;  %v8518_v28 = vadd.f32 %v2633_v24, %v2535_v47  ;;  %v2793_v32 = vadd.f32 %v2761_v49, %v2728_v36  ;;  %v2826_v37 = vmul.f32 %v6975_v53, %v8503_v41  ;;  %v8535_v36 = vpop.permute.xlu1 %2248  ;;  %v11556_v29 = vld [vmem:[#allocation11_spill] sm:$0xff] }
 0x293   : > { %v3262_v59 = vsel %vm8446_vm12, %v3261_v5, %v3257_v39  ;;  %v3275_v9 = vand.u32 2147483648, %v8307_v52  ;;  %v2114_v14 = vmul.f32 %v1997_v42, %v8175_v63  ;;  %v8526_v27 = vadd.f32 1.0, %v5647_v17  ;;  %11554 = vst [vmem:[#allocation66_spill] sm:$0xff] %v8535_v36  ;;  %v11555_v42 = vld [vmem:[#allocation18_spill] sm:$0xff] }
 0x294   : > { %v2858_v43 = vadd.f32 %v2826_v37, %v2793_v32  ;;  %v2891_v48 = vmul.f32 %v6961_v61, %v8453_v56  ;;  %v2955_v4 = vmul.f32 %v7020_v34, %v8511_v57  ;;  %v8533_v49 = vadd.f32 %v1471_v15, %v6310_v1  ;;  %v11558_v32 = vld [vmem:[#allocation9_spill] sm:$0xff] }
 0x295   : > { %v3268_v10 = vadd.f32 %v8373_v51, %v3267_v0  ;;  %vm3270_vm3 = vweird.f32 %v8373_v51  ;;  %v8541_v63 = vmul.f32 %v8495_v40, %v8407_v35  ;;  %5650 = vrcp.f32 %v8526_v27 }
 0x296   : > { %v8546_v39 = vmul.f32 %v7020_v34, %v11555_v42  ;;  %v2002_v5 = vmul.f32 %v8455_v12, %v2001_v58  ;;  %v8549_v24 = vadd.f32 %v2891_v48, %v2858_v43  ;;  %v8551_v31 = vadd.f32 %v2955_v4, %v2922_v19 }
 0x297   : > { %v5649_v47 = vpop.eup %5648  ;;  %v8555_v0 = vmul.f32 %v8321_v50, %v11556_v29  ;;  %vm3269_vm4 = vweird.f32 %v8307_v52  ;;  %v5150_v15 = vmul.f32 -1.442695, %v8533_v49  ;;  %v8560_v17 = vmul.f32 %v8535_v36, %v2114_v14 }
 0x298   : > { %v8564_v37 = vmul.f32 %v8388_v21, %v11558_v32  ;;  %v8567_v58 = vmul.f32 %v3247_v26, %v7983_v45  ;;  %v8570_v19 = vmul.f32 %v3262_v59, %v8065_v18  ;;  %vm8574_vm6 = vmor %vm3269_vm4, %vm3270_vm3  ;;  %v3276_v52 = vor.u32 1.1754944e-38, %v3275_v9 }
 0x299   : > { %11557 = vst [vmem:[#allocation18_spill] sm:$0xff] %v8555_v0  ;;  %v3272_v14 = vsel %vm8574_vm6, %v8373_v51, %v3268_v10  ;;  %vm8581_vm0 = vcmp.eq.f32.partialorder %v3273_v7, 8.507059e+37  ;;  %v3281_v45 = vsub.f32 1.0, %v8541_v63  ;;  %v3290_v18 = vand.u32 2147483648, %v8407_v35  ;;  %v1473_v43 = vpop.f32.mrf.mxu1  ;;  %v11586_v0 = vld [vmem:[#allocation31_spill] sm:$0xff] }
 0x29a   : > { %11559 = vst [vmem:[#allocation11_spill] sm:$0xff] %v8564_v37  ;;  %v2010_v26 = vand.u32 2147483648, %v8375_v33  ;;  %v2003_v59 = vadd.f32 %v8455_v12, %v2002_v5  ;;  %vm2005_vm7 = vweird.f32 %v8455_v12  ;;  %5652 = vpow2.f32 %v5150_v15 }
 0x29b   : > { %11560 = vst [vmem:[#allocation9_spill] sm:$0xff] %v8567_v58  ;;  %v2339_v9 = vmul.f32 %v6462_v11, %v8560_v17  ;;  %v8592_v4 = vpop.eup %5650  ;;  %v8594_v51 = vadd.f32 1.0, %v5649_v47  ;;  %v2504_v7 = vmul.f32 %v6470_v55, %v8311_v20  ;;  %v11306_v10 = vrot.slane %v8560_v17, 7 }
 0x29c   : > { %11561 = vst [vmem:[#allocation67_spill] sm:$0xff] %v8570_v19  ;;  %v2439_v63 = vmul.f32 %v6785_v46, %v8362_v22  ;;  %vm2004_vm8 = vweird.f32 %v8375_v33  ;;  %v2008_v42 = vand.u32 2147483647, %v8375_v33  ;;  %v2697_v5 = vmul.f32 %v6642_v62, %v8362_v22 }
 0x29d   : > { %v2015_v29 = vmul.f32 %v8592_v4, %v8526_v27  ;;  %vm8607_vm10 = vmor %vm2004_vm8, %vm2005_vm7  ;;  %v2762_v20 = vmul.f32 %v6655_v8, %v8511_v57  ;;  %v11568_v15 = vrot.slane %v8453_v56, 7  ;;  %v11307_v22 = vrot.slane %v8560_v17, 1 }
 0x29e   : > { %v2471_v32 = vadd.f32 %v2439_v63, %v2339_v9  ;;  %v8624_v13 = vadd.f32 %v7789_v60, %v7566_v2  ;;  %v2007_v50 = vsel %vm8607_vm10, %v8455_v12, %v2003_v59  ;;  %v2011_v21 = vor.u32 1.1754944e-38, %v2010_v26 }
 0x29f   : > { %v8619_v33 = vsel %vm2380_vm1, %v11568_v15, %v11306_v10  ;;  %v2729_v36 = vadd.f32 %v2697_v5, %v8385_v6  ;;  %v2016_v37 = vsub.f32 1.0, %v2015_v29  ;;  %v2634_v15 = vmul.f32 %v6629_v23, %v8511_v57  ;;  %v11570_v5 = vld [vmem:[#allocation17_spill] sm:$0xff] }
 0x2a0   : > { %v2536_v10 = vadd.f32 %v2504_v7, %v2471_v32  ;;  %v11569_v9 = vrot.slane %v8453_v56, 1  ;;  %v5653_v63 = vpop.eup %5652  ;;  %5654 = vrcp.f32 %v8594_v51  ;;  %vm2009_vm11 = vcmp.eq.f32.partialorder %v2008_v42, 8.507059e+37 }
 0x2a1   : > { %v2827_v6 = vmul.f32 %v6975_v53, %v8619_v33  ;;  %v8644_v12 = vadd.f32 %v1473_v43, %v6310_v1  ;;  %v2012_v57 = vsel %vm2009_vm11, %v2011_v21, %v2007_v50  ;;  %v8646_v26 = vadd.f32 1.0, %v5653_v63  ;;  %v11572_v43 = vld [vmem:[#allocation16_spill] sm:$0xff] }
 0x2a2   : > { %v8638_v2 = vsel %vm2575_vm5, %v11569_v9, %v11307_v22  ;;  %v8648_v59 = vadd.f32 %v2634_v15, %v2536_v10  ;;  %v2794_v7 = vadd.f32 %v2762_v20, %v2729_v36  ;;  %v8652_v29 = vmul.f32 %v8567_v58, %v11570_v5 }
 0x2a3   : > { %v3277_v47 = vsel %vm8581_vm0, %v3276_v52, %v3272_v14  ;;  %v5164_v42 = vmul.f32 -1.442695, %v8624_v13  ;;  %v8659_v32 = vadd.f32 %v7789_v60, %v7638_v30  ;;  %v8663_v50 = vmul.f32 %v8570_v19, %v11572_v43 }
 0x2a4   : > { %11571 = vst [vmem:[#allocation17_spill] sm:$0xff] %v8652_v29  ;;  %v2017_v21 = vmul.f32 %v8592_v4, %v2016_v37  ;;  %5656 = vrcp.f32 %v8646_v26  ;;  %v2956_v36 = vmul.f32 %v7020_v34, %v8638_v2  ;;  %v3282_v48 = vmul.f32 %v8495_v40, %v3281_v45 }
 0x2a5   : > { %11573 = vst [vmem:[#allocation16_spill] sm:$0xff] %v8663_v50  ;;  %vm3284_vm12 = vweird.f32 %v8407_v35  ;;  %v2115_v52 = vmul.f32 %v2012_v57, %v8303_v44  ;;  %v2859_v14 = vadd.f32 %v2827_v6, %v2794_v7  ;;  %v5151_v30 = vmul.f32 -1.442695, %v8644_v12  ;;  %v8694_v6 = vpop.permute.xlu2 %2253 }
 0x2a6   : > { %v8674_v10 = vmul.f32 %v3277_v47, %v8152_v3  ;;  %v3288_v20 = vand.u32 2147483647, %v8407_v35  ;;  %v8677_v37 = vor.u32 1.1754944e-38, %v3290_v18  ;;  %v2892_v15 = vmul.f32 %v6961_v61, %v8560_v17  ;;  %v8681_v9 = vpop.eup %5654  ;;  %11576 = vst [vmem:[#allocation70_spill] sm:$0xff] %v8694_v6 }
 0x2a7   : > { %vm3285_vm13 = vweird.f32 %v8495_v40  ;;  %5658 = vpow2.f32 %v5164_v42  ;;  %v5165_v44 = vmul.f32 -1.442695, %v8659_v32  ;;  %v2698_v45 = vmul.f32 %v6642_v62, %v8503_v41 }
 0x2a8   : > { %11574 = vst [vmem:[#allocation68_spill] sm:$0xff] %v8674_v10  ;;  %v2018_v3 = vadd.f32 %v8592_v4, %v2017_v21  ;;  %vm2020_vm14 = vweird.f32 %v8592_v4  ;;  %v8689_v63 = vadd.f32 %v2892_v15, %v2859_v14  ;;  %v8692_v18 = vadd.f32 %v2956_v36, %v8549_v24  ;;  %vm8739_vm4 = vmor %vm3284_vm12, %vm3285_vm13 }
 0x2a9   : > { %v3283_v57 = vadd.f32 %v8495_v40, %v3282_v48  ;;  %v2025_v7 = vand.u32 2147483648, %v8526_v27  ;;  %5660 = vpow2.f32 %v5151_v30  ;;  %v8699_v5 = vmul.f32 %v8694_v6, %v2115_v52 }
 0x2aa   : > { %11575 = vst [vmem:[#allocation69_spill] sm:$0xff] %v8692_v18  ;;  %v8701_v47 = vpop.eup %5656  ;;  %v3295_v42 = vmul.f32 %v8681_v9, %v8594_v51  ;;  %vm2019_vm15 = vweird.f32 %v8526_v27  ;;  %v2023_v24 = vand.u32 2147483647, %v8526_v27  ;;  %v2730_v43 = vadd.f32 %v2698_v45, %v8518_v28  ;;  %v11581_v45 = vld [vmem:[#allocation29_spill] sm:$0xff] }
 0x2ab   : > { %5662 = vpow2.f32 %v5165_v44  ;;  %vm8708_vm2 = vmor %vm2019_vm15, %vm2020_vm14  ;;  %v2030_v36 = vmul.f32 %v8701_v47, %v8646_v26  ;;  %v2763_v48 = vmul.f32 %v6655_v8, %v8638_v2  ;;  %v2340_v52 = vmul.f32 %v6462_v11, %v8699_v5 }
 0x2ac   : > { %vm8718_vm3 = vcmp.eq.f32.partialorder %v3288_v20, 8.507059e+37  ;;  %v2022_v28 = vsel %vm8708_vm2, %v8592_v4, %v2018_v3  ;;  %v11311_v27 = vrot.slane %v8699_v5, 7  ;;  %v2440_v30 = vmul.f32 %v6785_v46, %v8503_v41 }
 0x2ad   : > { %v11312_v15 = vrot.slane %v8699_v5, 1  ;;  %v5659_v44 = vpop.eup %5658  ;;  %v8731_v22 = vadd.f32 %v7789_v60, %v11581_v45  ;;  %v2026_v20 = vor.u32 1.1754944e-38, %v2025_v7  ;;  %v2505_v19 = vmul.f32 %v6470_v55, %v8453_v56 }
 0x2ae   : > { %v2031_v58 = vsub.f32 1.0, %v2030_v36  ;;  %vm2024_vm6 = vcmp.eq.f32.partialorder %v2023_v24, 8.507059e+37  ;;  %v11584_v41 = vrot.slane %v8560_v17, 7  ;;  %v2472_v7 = vadd.f32 %v2440_v30, %v2340_v52 }
 0x2af   : > { %v11585_v56 = vrot.slane %v8560_v17, 1  ;;  %v5661_v21 = vpop.eup %5660  ;;  %v3287_v24 = vsel %vm8739_vm4, %v8495_v40, %v3283_v57  ;;  %v3296_v36 = vsub.f32 1.0, %v3295_v42  ;;  %v2027_v45 = vsel %vm2024_vm6, %v2026_v20, %v2022_v28 }
 0x2b0   : > { %v8749_v3 = vsel %vm2380_vm1, %v11584_v41, %v11311_v27  ;;  %v2032_v6 = vmul.f32 %v8701_v47, %v2031_v58  ;;  %v8761_v50 = vadd.f32 1.0, %v5659_v44  ;;  %v8763_v41 = vadd.f32 1.0, %v5661_v21 }
 0x2b1   : > { %v2581_v35 = vsel %vm2575_vm5, %v11585_v56, %v11312_v15  ;;  %v2537_v52 = vadd.f32 %v2505_v19, %v2472_v7  ;;  %v2795_v30 = vadd.f32 %v2763_v48, %v2730_v43  ;;  %v5663_v27 = vpop.eup %5662  ;;  %v5166_v29 = vmul.f32 -1.442695, %v8731_v22 }
 0x2b2   : > { %v8768_v56 = vadd.f32 %v7789_v60, %v11586_v0  ;;  %v2635_v40 = vmul.f32 %v6629_v23, %v8638_v2  ;;  %v2828_v57 = vmul.f32 %v6975_v53, %v8749_v3  ;;  %v2116_v58 = vmul.f32 %v2027_v45, %v8411_v38  ;;  %v11587_v2 = vld [vmem:[#allocation20_spill] sm:$0xff]  ;;  %v8801_v45 = vpop.permute.xlu0 %2258 }
 0x2b3   : > { %v2033_v42 = vadd.f32 %v8701_v47, %v2032_v6  ;;  %vm2035_vm0 = vweird.f32 %v8701_v47  ;;  %5664 = vrcp.f32 %v8763_v41  ;;  %v2040_v19 = vand.u32 2147483648, %v8646_v26  ;;  %11591 = vst [vmem:[#allocation31_spill] sm:$0xff] %v8801_v45 }
 0x2b4   : > { %v8779_v43 = vadd.f32 %v2635_v40, %v2537_v52  ;;  %v2860_v0 = vadd.f32 %v2828_v57, %v2795_v30  ;;  %v2893_v48 = vmul.f32 %v6961_v61, %v8699_v5  ;;  %v8785_v28 = vmul.f32 %v8674_v10, %v11587_v2 }
 0x2b5   : > { %vm2034_vm7 = vweird.f32 %v8646_v26  ;;  %v2038_v38 = vand.u32 2147483647, %v8646_v26  ;;  %v2957_v6 = vmul.f32 %v7020_v34, %v2581_v35  ;;  %v8793_v44 = vsel %vm8718_vm3, %v8677_v37, %v3287_v24 }
 0x2b6   : > { %11588 = vst [vmem:[#allocation29_spill] sm:$0xff] %v8785_v28  ;;  %v5167_v4 = vmul.f32 -1.442695, %v8768_v56  ;;  %vm8797_vm8 = vmor %vm2034_vm7, %vm2035_vm0  ;;  %v2925_v21 = vadd.f32 %v2893_v48, %v2860_v0  ;;  %5666 = vrcp.f32 %v8761_v50  ;;  %v8811_v14 = vmul.f32 %v8801_v45, %v2116_v58 }
 0x2b7   : > { %v2037_v26 = vsel %vm8797_vm8, %v8701_v47, %v2033_v42  ;;  %v8808_v37 = vadd.f32 %v2957_v6, %v8689_v63  ;;  %v3297_v24 = vmul.f32 %v8681_v9, %v3296_v36  ;;  %v8814_v52 = vadd.f32 1.0, %v5663_v27 }
 0x2b8   : > { %5668 = vpow2.f32 %v5166_v29  ;;  %v2041_v30 = vor.u32 1.1754944e-38, %v2040_v19  ;;  %vm2039_vm10 = vcmp.eq.f32.partialorder %v2038_v38, 8.507059e+37  ;;  %v2341_v57 = vmul.f32 %v6462_v11, %v8811_v14 }
 0x2b9   : > { %11592 = vst [vmem:[#allocation20_spill] sm:$0xff] %v8808_v37  ;;  %v5665_v40 = vpop.eup %5664  ;;  %v2373_v0 = vrot.slane %v8811_v14, 7  ;;  %v2441_v63 = vmul.f32 %v6785_v46, %v8619_v33  ;;  %5670 = vpow2.f32 %v5167_v4  ;;  %v2506_v58 = vmul.f32 %v6470_v55, %v8560_v17 }
 0x2ba   : > { %v2042_v47 = vsel %vm2039_vm10, %v2041_v30, %v2037_v26  ;;  %v2045_v27 = vmul.f32 %v5665_v40, %v8763_v41  ;;  %v2699_v29 = vmul.f32 %v6642_v62, %v8619_v33  ;;  %v2636_v36 = vmul.f32 %v6629_v23, %v2581_v35 }
 0x2bb   : > { %v11593_v42 = vrot.slane %v8699_v5, 7  ;;  %v2473_v48 = vadd.f32 %v2441_v63, %v2341_v57  ;;  %v2053_v38 = vand.u32 2147483647, %v8763_v41  ;;  %v2764_v17 = vmul.f32 %v6655_v8, %v2581_v35 }
 0x2bc   : > { %v2046_v2 = vsub.f32 1.0, %v2045_v27  ;;  %v11313_v6 = vrot.slane %v8811_v14, 1  ;;  %v8836_v4 = vpop.eup %5666  ;;  %v2117_v33 = vmul.f32 %v2042_v47, %v8533_v49  ;;  %v2055_v7 = vand.u32 2147483648, %v8763_v41  ;;  %v1476_v27 = vpop.f32.mrf.mxu1 }
 0x2bd   : > { %v2385_v19 = vsel %vm2380_vm1, %v11593_v42, %v2373_v0  ;;  %v2538_v26 = vadd.f32 %v2506_v58, %v2473_v48  ;;  %v2731_v30 = vadd.f32 %v2699_v29, %v8648_v59  ;;  %vm2050_vm11 = vweird.f32 %v5665_v40 }
 0x2be   : > { %v5669_v20 = vpop.eup %5668  ;;  %v2047_v15 = vmul.f32 %v5665_v40, %v2046_v2  ;;  %v11594_v57 = vrot.slane %v8699_v5, 1  ;;  %v2829_v63 = vmul.f32 %v6975_v53, %v2385_v19  ;;  %v8852_v49 = vadd.f32 %v7789_v60, %v7794_v54  ;;  %v8858_v2 = vpop.permute.xlu1 %2263 }
 0x2bf   : > { %vm2049_vm12 = vweird.f32 %v8763_v41  ;;  %v2668_v59 = vadd.f32 %v2636_v36, %v2538_v26  ;;  %v2701_v47 = vmul.f32 %v6642_v62, %v2385_v19  ;;  %v5671_v58 = vpop.eup %5670  ;;  %vm2054_vm13 = vcmp.eq.f32.partialorder %v2053_v38, 8.507059e+37  ;;  %11596 = vst [vmem:[#allocation72_spill] sm:$0xff] %v8858_v2 }
 0x2c0   : > { %v8847_v35 = vsel %vm2575_vm5, %v11594_v57, %v11313_v6  ;;  %11595 = vst [vmem:[#allocation71_spill] sm:$0xff] %v8852_v49  ;;  %v2048_v29 = vadd.f32 %v5665_v40, %v2047_v15  ;;  %v2796_v42 = vadd.f32 %v2764_v17, %v2731_v30  ;;  %vm2051_vm14 = vmor %vm2049_vm12, %vm2050_vm11  ;;  %v2056_v57 = vor.u32 1.1754944e-38, %v2055_v7 }
 0x2c1   : > { %v2958_v48 = vmul.f32 %v7020_v34, %v8847_v35  ;;  %v8860_v6 = vadd.f32 %v2701_v47, %v2668_v59  ;;  %v8863_v54 = vadd.f32 %v1476_v27, %v6310_v1  ;;  %v8866_v41 = vmul.f32 %v8858_v2, %v2117_v33 }
 0x2c2   : > { %v2052_v36 = vsel %vm2051_vm14, %v5665_v40, %v2048_v29  ;;  %v2861_v26 = vadd.f32 %v2829_v63, %v2796_v42  ;;  %v2894_v15 = vmul.f32 %v6961_v61, %v8811_v14  ;;  %v2442_v27 = vmul.f32 %v6785_v46, %v8749_v3  ;;  %v11598_v42 = vld [vmem:[#allocation6_spill] sm:$0xff] }
 0x2c3   : > { %v8870_v38 = vadd.f32 %v2958_v48, %v2925_v21  ;;  %v2057_v17 = vsel %vm2054_vm13, %v2056_v57, %v2052_v36  ;;  %v5152_v30 = vmul.f32 -1.442695, %v8863_v54  ;;  %v2342_v7 = vmul.f32 %v6462_v11, %v8866_v41 }
 0x2c4   : > { %v8878_v59 = vadd.f32 %v8681_v9, %v3297_v24  ;;  %vm3300_vm15 = vweird.f32 %v8681_v9  ;;  %v2118_v40 = vmul.f32 %v2057_v17, %v8644_v12  ;;  %v8882_v33 = vadd.f32 %v2894_v15, %v2861_v26 }
 0x2c5   : > { %11597 = vst [vmem:[#allocation73_spill] sm:$0xff] %v8870_v38  ;;  %v3310_v21 = vmul.f32 %v8836_v4, %v8761_v50  ;;  %5672 = vpow2.f32 %v5152_v30  ;;  %v2374_v63 = vrot.slane %v8866_v41, 7  ;;  %v2474_v47 = vadd.f32 %v2442_v27, %v2342_v7 }
 0x2c6   : > { %vm3299_vm2 = vweird.f32 %v8594_v51  ;;  %v3303_v29 = vand.u32 2147483647, %v8594_v51  ;;  %v5168_v24 = vmul.f32 -1.442695, %v8852_v49  ;;  %v8891_v48 = vmul.f32 %v11598_v42, %v2118_v40 }
 0x2c7   : > { %v11599_v12 = vand.u32 2147483648, %v8594_v51  ;;  %v3320_v36 = vand.u32 2147483648, %v8761_v50  ;;  %5674 = vrcp.f32 %v8814_v52  ;;  %v8903_v26 = vsel %vm2380_vm1, %v2373_v0, %v2374_v63  ;;  %vm8911_vm3 = vmor %vm3299_vm2, %vm3300_vm15 }
 0x2c8   : > { %v8907_v15 = vmul.f32 %v8793_v44, %v8289_v16  ;;  %v2343_v30 = vmul.f32 %v6462_v11, %v8891_v48  ;;  %v2443_v7 = vmul.f32 %v6785_v46, %v2385_v19  ;;  %v3311_v16 = vsub.f32 1.0, %v3310_v21 }
 0x2c9   : > { %v8895_v57 = vor.u32 1.1754944e-38, %v11599_v12  ;;  %v8923_v44 = vadd.f32 1.0, %v5669_v20  ;;  %v2507_v27 = vmul.f32 %v6470_v55, %v8699_v5  ;;  %5676 = vpow2.f32 %v5168_v24 }
 0x2ca   : > { %11600 = vst [vmem:[#allocation74_spill] sm:$0xff] %v8907_v15  ;;  %v11316_v40 = vrot.slane %v8891_v48, 7  ;;  %v2475_v12 = vadd.f32 %v2443_v7, %v2343_v30  ;;  %v2508_v17 = vmul.f32 %v6470_v55, %v8811_v14  ;;  %v8930_v19 = vor.u32 1.1754944e-38, %v3320_v36 }
 0x2cb   : > { %v5673_v10 = vpop.eup %5672  ;;  %v11317_v42 = vrot.slane %v8891_v48, 1  ;;  %v2539_v2 = vadd.f32 %v2507_v27, %v2474_v47  ;;  %v2571_v21 = vrot.slane %v8866_v41, 1  ;;  %vm3315_vm4 = vweird.f32 %v8836_v4 }
 0x2cc   : > { %v8935_v20 = vadd.f32 1.0, %v5671_v58  ;;  %v2540_v5 = vadd.f32 %v2508_v17, %v2475_v12  ;;  %v8937_v24 = vadd.f32 1.0, %v5673_v10  ;;  %v3312_v30 = vmul.f32 %v8836_v4, %v3311_v16 }
 0x2cd   : > { %v8939_v0 = vpop.eup %5674  ;;  %vm3314_vm6 = vweird.f32 %v8761_v50  ;;  %5678 = vrcp.f32 %v8923_v44  ;;  %v2637_v47 = vmul.f32 %v6629_v23, %v8847_v35  ;;  %v11603_v36 = vrot.slane %v8811_v14, 1 }
 0x2ce   : > { %v2700_v10 = vmul.f32 %v6642_v62, %v8749_v3  ;;  %v2765_v17 = vmul.f32 %v6655_v8, %v8847_v35  ;;  %5680 = vrcp.f32 %v8937_v24  ;;  %v8959_v7 = vsel %vm2380_vm1, %v2374_v63, %v11316_v40  ;;  %v11604_v40 = vld [vmem:[#allocation34_spill] sm:$0xff]  ;;  %vm9013_vm7 = vmor %vm3314_vm6, %vm3315_vm4 }
 0x2cf   : > { %v2579_v58 = vsel %vm2575_vm5, %v11603_v36, %v2571_v21  ;;  %v8965_v14 = vsel %vm2575_vm5, %v2571_v21, %v11317_v42  ;;  %v2669_v3 = vadd.f32 %v2637_v47, %v2539_v2  ;;  %v2702_v35 = vmul.f32 %v6642_v62, %v8903_v26  ;;  %v5677_v27 = vpop.eup %5676 }
 0x2d0   : > { %v2638_v16 = vmul.f32 %v6629_v23, %v2579_v58  ;;  %v3325_v12 = vmul.f32 %v8939_v0, %v8814_v52  ;;  %5682 = vrcp.f32 %v8935_v20  ;;  %v2732_v63 = vadd.f32 %v2700_v10, %v8779_v43 }
 0x2d1   : > { %v2766_v36 = vmul.f32 %v6655_v8, %v2579_v58  ;;  %v8977_v21 = vadd.f32 %v7789_v60, %v11604_v40  ;;  %v2703_v2 = vmul.f32 %v6642_v62, %v8959_v7  ;;  %v2734_v47 = vadd.f32 %v2702_v35, %v2669_v3 }
 0x2d2   : > { %v2670_v42 = vadd.f32 %v2638_v16, %v2540_v5  ;;  %v2767_v45 = vmul.f32 %v6655_v8, %v8965_v14  ;;  %v2797_v28 = vadd.f32 %v2765_v17, %v2732_v63  ;;  %v2830_v43 = vmul.f32 %v6975_v53, %v8903_v26 }
 0x2d3   : > { %11605 = vst [vmem:[#allocation34_spill] sm:$0xff] %v8977_v21  ;;  %v2798_v38 = vadd.f32 %v2766_v36, %v8860_v6  ;;  %v8986_v10 = vpop.eup %5678  ;;  %vm8988_vm0 = vcmp.eq.f32.partialorder %v3303_v29, 8.507059e+37  ;;  %v3313_v40 = vadd.f32 %v8836_v4, %v3312_v30  ;;  %v8993_v5 = vadd.f32 1.0, %v5677_v27  ;;  %v1478_v36 = vpop.f32.mrf.mxu1 }
 0x2d4   : > { %v8995_v16 = vadd.f32 %v2703_v2, %v2670_v42  ;;  %v2831_v17 = vmul.f32 %v6975_v53, %v8959_v7  ;;  %v5681_v3 = vpop.eup %5680  ;;  %v8999_v6 = vadd.f32 %v2767_v45, %v2734_v47  ;;  %v2862_v35 = vadd.f32 %v2830_v43, %v2797_v28 }
 0x2d5   : > { %v2895_v63 = vmul.f32 %v6961_v61, %v8866_v41  ;;  %v2959_v29 = vmul.f32 %v7020_v34, %v2579_v58  ;;  %v3326_v49 = vsub.f32 1.0, %v3325_v12  ;;  %v2896_v30 = vmul.f32 %v6961_v61, %v8891_v48 }
 0x2d6   : > { %v2060_v42 = vmul.f32 %v5681_v3, %v8937_v24  ;;  %v2863_v27 = vadd.f32 %v2831_v17, %v2798_v38  ;;  %v9007_v2 = vpop.eup %5682  ;;  %v5169_v45 = vmul.f32 -1.442695, %v8977_v21  ;;  %v2960_v12 = vmul.f32 %v7020_v34, %v8965_v14  ;;  %v11610_v21 = vld [vmem:[#allocation35_spill] sm:$0xff] }
 0x2d7   : > { %v2927_v58 = vadd.f32 %v2895_v63, %v2862_v35  ;;  %v9021_v47 = vadd.f32 %v2959_v29, %v8882_v33  ;;  %v3317_v38 = vsel %vm9013_vm7, %v8836_v4, %v3313_v40  ;;  %v9029_v18 = vadd.f32 %v1478_v36, %v6310_v1 }
 0x2d8   : > { %v2061_v43 = vsub.f32 1.0, %v2060_v42  ;;  %v9026_v17 = vadd.f32 %v2896_v30, %v2863_v27  ;;  %5684 = vrcp.f32 %v8993_v5  ;;  %v9034_v35 = vadd.f32 %v7789_v60, %v11610_v21 }
 0x2d9   : > { %v2070_v63 = vand.u32 2147483648, %v8937_v24  ;;  %v9037_v33 = vadd.f32 %v2960_v12, %v2927_v58  ;;  %vm2065_vm8 = vweird.f32 %v5681_v3  ;;  %v2068_v4 = vand.u32 2147483647, %v8937_v24  ;;  %v11613_v12 = vld [vmem:[#allocation19_spill] sm:$0xff] }
 0x2da   : > { %v2062_v29 = vmul.f32 %v5681_v3, %v2061_v43  ;;  %v5153_v40 = vmul.f32 -1.442695, %v9029_v18  ;;  %v3327_v30 = vmul.f32 %v8939_v0, %v3326_v49  ;;  %v3340_v1 = vmul.f32 %v8986_v10, %v8923_v44 }
 0x2db   : > { %v3355_v36 = vmul.f32 %v9007_v2, %v8935_v20  ;;  %5686 = vpow2.f32 %v5169_v45  ;;  %v11611_v21 = vand.u32 2147483647, %v8761_v50  ;;  %vm2064_vm11 = vweird.f32 %v8937_v24 }
 0x2dc   : > { %v2063_v42 = vadd.f32 %v5681_v3, %v2062_v29  ;;  %5688 = vpow2.f32 %v5153_v40  ;;  %v11612_v27 = vsel %vm8911_vm3, %v8681_v9, %v8878_v59  ;;  %v3335_v45 = vand.u32 2147483648, %v8814_v52  ;;  %vm2066_vm12 = vmor %vm2064_vm11, %vm2065_vm8 }
 0x2dd   : > { %vm3319_vm10 = vcmp.eq.f32.partialorder %v11611_v21, 8.507059e+37  ;;  %v3307_v49 = vsel %vm8988_vm0, %v8895_v57, %v11612_v27  ;;  %v2071_v50 = vor.u32 1.1754944e-38, %v2070_v63  ;;  %vm3330_vm13 = vweird.f32 %v8939_v0 }
 0x2de   : > { %v3322_v28 = vsel %vm3319_vm10, %v8930_v19, %v3317_v38  ;;  %v5170_v24 = vmul.f32 -1.442695, %v9034_v35  ;;  %v2067_v58 = vsel %vm2066_vm12, %v5681_v3, %v2063_v42  ;;  %vm2069_vm14 = vcmp.eq.f32.partialorder %v2068_v4, 8.507059e+37  ;;  %v9061_v51 = vpop.eup %5684  ;;  %v11615_v38 = vld [vmem:[#allocation63_spill] sm:$0xff] }
 0x2df   : > { %v9064_v9 = vadd.f32 %v8939_v0, %v3327_v30  ;;  %v3341_v59 = vsub.f32 1.0, %v3340_v1  ;;  %v3356_v37 = vsub.f32 1.0, %v3355_v36  ;;  %v2072_v57 = vsel %vm2069_vm14, %v2071_v50, %v2067_v58 }
 0x2e0   : > { %v9068_v19 = vmul.f32 %v8907_v15, %v11613_v12  ;;  %v9071_v43 = vmul.f32 %v3307_v49, %v11615_v38  ;;  %v3333_v63 = vand.u32 2147483647, %v8814_v52  ;;  %v2119_v3 = vmul.f32 %v2072_v57, %v8863_v54  ;;  %v11620_v54 = vld [vmem:[#allocation56_spill] sm:$0xff] }
 0x2e1   : > { %v5687_v29 = vpop.eup %5686  ;;  %v9076_v4 = vmul.f32 %v3322_v28, %v8624_v13  ;;  %vm3329_vm15 = vweird.f32 %v8814_v52  ;;  %v3336_v40 = vor.u32 1.1754944e-38, %v3335_v45  ;;  %vm3344_vm2 = vweird.f32 %v8923_v44  ;;  %v11621_v13 = vld [vmem:[#allocation8_spill] sm:$0xff] }
 0x2e2   : > { %11614 = vst [vmem:[#allocation35_spill] sm:$0xff] %v9068_v19  ;;  %v5689_v30 = vpop.eup %5688  ;;  %vm9082_vm3 = vmor %vm3329_vm15, %vm3330_vm13  ;;  %v3348_v36 = vand.u32 2147483647, %v8923_v44  ;;  %5690 = vpow2.f32 %v5170_v24  ;;  %v9089_v21 = vadd.f32 %v7789_v60, %v11620_v54  ;;  %v9092_v42 = vmul.f32 %v11621_v13, %v2119_v3 }
 0x2e3   : > { %11616 = vst [vmem:[#allocation19_spill] sm:$0xff] %v9071_v43  ;;  %v3332_v52 = vsel %vm9082_vm3, %v8939_v0, %v9064_v9  ;;  %v3342_v27 = vmul.f32 %v8986_v10, %v3341_v59  ;;  %v3357_v49 = vmul.f32 %v9007_v2, %v3356_v37  ;;  %v9100_v28 = vadd.f32 1.0, %v5689_v30 }
 0x2e4   : > { %11617 = vst [vmem:[#allocation63_spill] sm:$0xff] %v9076_v4  ;;  %vm9102_vm4 = vcmp.eq.f32.partialorder %v3333_v63, 8.507059e+37  ;;  %v3350_v50 = vand.u32 2147483648, %v8923_v44  ;;  %v2344_v24 = vmul.f32 %v6462_v11, %v9092_v42  ;;  %v11321_v58 = vrot.slane %v9092_v42, 7 }
 0x2e5   : > { %v2444_v0 = vmul.f32 %v6785_v46, %v8903_v26  ;;  %vm3345_vm6 = vweird.f32 %v8986_v10  ;;  %v3370_v9 = vmul.f32 %v9061_v51, %v8993_v5  ;;  %v9115_v59 = vadd.f32 1.0, %v5687_v29 }
 0x2e6   : > { %5692 = vrcp.f32 %v9100_v28  ;;  %v5171_v37 = vmul.f32 -1.442695, %v9089_v21  ;;  %v11624_v57 = vrot.slane %v8891_v48, 7  ;;  %v2509_v26 = vmul.f32 %v6470_v55, %v8866_v41  ;;  %vm9139_vm8 = vmor %vm3344_vm2, %vm3345_vm6 }
 0x2e7   : > { %v2476_v38 = vadd.f32 %v2444_v0, %v2344_v24  ;;  %v3343_v63 = vadd.f32 %v8986_v10, %v3342_v27  ;;  %v3358_v3 = vadd.f32 %v9007_v2, %v3357_v49  ;;  %vm3360_vm0 = vweird.f32 %v9007_v2 }
 0x2e8   : > { %v2382_v12 = vsel %vm2380_vm1, %v11624_v57, %v11321_v58  ;;  %v5691_v30 = vpop.eup %5690  ;;  %vm3359_vm7 = vweird.f32 %v8935_v20  ;;  %v3365_v1 = vand.u32 2147483648, %v8935_v20  ;;  %v2639_v24 = vmul.f32 %v6629_v23, %v8965_v14 }
 0x2e9   : > { %v2832_v29 = vmul.f32 %v6975_v53, %v2382_v12  ;;  %v2541_v54 = vadd.f32 %v2509_v26, %v2476_v38  ;;  %v3363_v27 = vand.u32 2147483647, %v8935_v20  ;;  %5694 = vrcp.f32 %v9115_v59  ;;  %vm9148_vm10 = vmor %vm3359_vm7, %vm3360_vm0 }
 0x2ea   : > { %v2897_v49 = vmul.f32 %v6961_v61, %v9092_v42  ;;  %v3371_v14 = vsub.f32 1.0, %v3370_v9  ;;  %5696 = vpow2.f32 %v5171_v37  ;;  %v2704_v38 = vmul.f32 %v6642_v62, %v2382_v12 }
 0x2eb   : > { %v2864_v0 = vadd.f32 %v2832_v29, %v8999_v6  ;;  %v2671_v44 = vadd.f32 %v2639_v24, %v2541_v54  ;;  %v3347_v20 = vsel %vm9139_vm8, %v8986_v10, %v3343_v63  ;;  %v3362_v58 = vsel %vm9148_vm10, %v9007_v2, %v3358_v3  ;;  %v11629_v54 = vld [vmem:[#allocation21_spill] sm:$0xff] }
 0x2ec   : > { %v5693_v26 = vpop.eup %5692  ;;  %v9159_v15 = vadd.f32 1.0, %v5691_v30  ;;  %v3351_v29 = vor.u32 1.1754944e-38, %v3350_v50  ;;  %v3366_v13 = vor.u32 1.1754944e-38, %v3365_v1  ;;  %v9168_v24 = vmul.f32 %v9071_v43, %v11629_v54  ;;  %v11631_v1 = vld [vmem:[#allocation22_spill] sm:$0xff]  ;;  %v11646_v43 = vld [vmem:[#allocation4_spill] sm:$0xff] }
 0x2ed   : > { %v9161_v6 = vadd.f32 %v2897_v49, %v2864_v0  ;;  %v9163_v9 = vadd.f32 %v2704_v38, %v2671_v44  ;;  %v2075_v37 = vmul.f32 %v5693_v26, %v9100_v28  ;;  %v3337_v10 = vsel %vm9102_vm4, %v3336_v40, %v3332_v52  ;;  %v11633_v49 = vld [vmem:[#allocation58_spill] sm:$0xff] }
 0x2ee   : > { %11630 = vst [vmem:[#allocation56_spill] sm:$0xff] %v9168_v24  ;;  %vm3349_vm11 = vcmp.eq.f32.partialorder %v3348_v36, 8.507059e+37  ;;  %vm3364_vm12 = vcmp.eq.f32.partialorder %v3363_v27, 8.507059e+37  ;;  %v3372_v3 = vmul.f32 %v9061_v51, %v3371_v14  ;;  %v9177_v41 = vmul.f32 %v9076_v4, %v11631_v1  ;;  %v11637_v14 = vld [vmem:[#allocation60_spill] sm:$0xff] }
 0x2ef   : > { %v3352_v2 = vsel %vm3349_vm11, %v3351_v29, %v3347_v20  ;;  %v3367_v63 = vsel %vm3364_vm12, %v3366_v13, %v3362_v58  ;;  %v2076_v30 = vsub.f32 1.0, %v2075_v37  ;;  %v9173_v50 = vpop.eup %5694  ;;  %5698 = vrcp.f32 %v9159_v15  ;;  %v11650_v24 = vld [vmem:[#allocation40_spill] sm:$0xff] }
 0x2f0   : > { %11632 = vst [vmem:[#allocation21_spill] sm:$0xff] %v9177_v41  ;;  %v9182_v0 = vadd.f32 %v7789_v60, %v11633_v49  ;;  %v2085_v40 = vand.u32 2147483648, %v9100_v28  ;;  %v5697_v36 = vpop.eup %5696  ;;  %v2573_v13 = vrot.slane %v9092_v42, 1  ;;  %vm2080_vm13 = vweird.f32 %v5693_v26 }
 0x2f1   : > { %v2077_v52 = vmul.f32 %v5693_v26, %v2076_v30  ;;  %v2083_v45 = vand.u32 2147483647, %v9100_v28  ;;  %v9188_v58 = vmul.f32 %v3337_v10, %v8659_v32  ;;  %v9191_v27 = vmul.f32 %v3352_v2, %v8731_v22 }
 0x2f2   : > { %v9194_v57 = vmul.f32 %v3367_v63, %v8768_v56  ;;  %v9198_v44 = vadd.f32 %v7789_v60, %v11637_v14  ;;  %v9201_v38 = vadd.f32 %v9061_v51, %v3372_v3  ;;  %vm3375_vm14 = vweird.f32 %v9061_v51  ;;  %v11639_v3 = vld [vmem:[#allocation65_spill] sm:$0xff] }
 0x2f3   : > { %11634 = vst [vmem:[#allocation22_spill] sm:$0xff] %v9188_v58  ;;  %v2078_v20 = vadd.f32 %v5693_v26, %v2077_v52  ;;  %vm2079_vm15 = vweird.f32 %v9100_v28  ;;  %v9207_v32 = vmul.f32 %v9173_v50, %v9115_v59  ;;  %v9209_v22 = vadd.f32 1.0, %v5697_v36 }
 0x2f4   : > { %11635 = vst [vmem:[#allocation58_spill] sm:$0xff] %v9191_v27  ;;  %v2414_v56 = vmul.f32 %v6785_v46, %v2382_v12  ;;  %vm2081_vm2 = vmor %vm2079_vm15, %vm2080_vm13  ;;  %v2086_v29 = vor.u32 1.1754944e-38, %v2085_v40  ;;  %v5172_v37 = vmul.f32 -1.442695, %v9182_v0  ;;  %v11638_v54 = vrot.slane %v8891_v48, 1 }
 0x2f5   : > { %11636 = vst [vmem:[#allocation75_spill] sm:$0xff] %v9194_v57  ;;  %v2082_v2 = vsel %vm2081_vm2, %v5693_v26, %v2078_v20  ;;  %vm2084_vm3 = vcmp.eq.f32.partialorder %v2083_v45, 8.507059e+37  ;;  %v9219_v28 = vpop.eup %5698  ;;  %vm3374_vm4 = vweird.f32 %v8993_v5  ;;  %v5173_v63 = vmul.f32 -1.442695, %v9198_v44  ;;  %v11643_v45 = vld [vmem:[#allocation37_spill] sm:$0xff] }
 0x2f6   : > { %v9217_v10 = vsel %vm2575_vm5, %v11638_v54, %v2573_v13  ;;  %v9225_v12 = vadd.f32 %v7789_v60, %v11639_v3  ;;  %v2087_v30 = vsel %vm2084_vm3, %v2086_v29, %v2082_v2  ;;  %vm9229_vm6 = vmor %vm3374_vm4, %vm3375_vm14  ;;  %v3378_v26 = vand.u32 2147483647, %v8993_v5 }
 0x2f7   : > { %v2120_v36 = vmul.f32 %v2087_v30, %v9029_v18  ;;  %5700 = vrcp.f32 %v9209_v22  ;;  %v2446_v14 = vadd.f32 %v2414_v56, %v11643_v45  ;;  %v2768_v20 = vmul.f32 %v6655_v8, %v9217_v10  ;;  %v11644_v18 = vld [vmem:[#allocation2_spill] sm:$0xff] }
 0x2f8   : > { %11640 = vst [vmem:[#allocation60_spill] sm:$0xff] %v9225_v12  ;;  %v3386_v29 = vsub.f32 1.0, %v9207_v32  ;;  %v9248_v54 = vmul.f32 %v9219_v28, %v9159_v15  ;;  %5702 = vpow2.f32 %v5172_v37  ;;  %v5174_v3 = vmul.f32 -1.442695, %v9225_v12 }
 0x2f9   : > { %v2312_v2 = vmul.f32 %v11644_v18, %v2120_v36  ;;  %5704 = vpow2.f32 %v5173_v63  ;;  %v9254_v30 = vadd.f32 %v7789_v60, %v8551_v31  ;;  %v2479_v56 = vmul.f32 %v6470_v55, %v9092_v42 }
 0x2fa   : > { %v2510_v32 = vmul.f32 %v6470_v55, %v8891_v48  ;;  %v2445_v37 = vmul.f32 %v6785_v46, %v8959_v7  ;;  %v2640_v63 = vmul.f32 %v6629_v23, %v9217_v10  ;;  %v2800_v31 = vadd.f32 %v2768_v20, %v8995_v16 }
 0x2fb   : > { %v2345_v45 = vmul.f32 %v6462_v11, %v2312_v2  ;;  %v2377_v40 = vrot.slane %v2312_v2, 7  ;;  %v2511_v36 = vadd.f32 %v2479_v56, %v2446_v14  ;;  %v2574_v52 = vrot.slane %v2312_v2, 1 }
 0x2fc   : > { %v11645_v49 = vrot.slane %v9092_v42, 7  ;;  %v11647_v48 = vrot.slane %v11646_v43, 7  ;;  %v2480_v7 = vmul.f32 %v6470_v55, %v2312_v2  ;;  %v11648_v42 = vrot.slane %v11646_v43, 1 }
 0x2fd   : > { %v2477_v18 = vadd.f32 %v2445_v37, %v2345_v45  ;;  %v9275_v14 = vpop.eup %5700  ;;  %v9281_v16 = vsel %vm2575_vm5, %v2573_v13, %v2574_v52  ;;  %5706 = vpow2.f32 %v5174_v3  ;;  %vm3389_vm0 = vweird.f32 %v9115_v59 }
 0x2fe   : > { %v2381_v4 = vsel %vm2380_vm1, %v11645_v49, %v2377_v40  ;;  %v2412_v11 = vsel %vm2380_vm1, %v2377_v40, %v11647_v48  ;;  %v9287_v49 = vsel %vm2575_vm5, %v2574_v52, %v11648_v42  ;;  %v5703_v40 = vpop.eup %5702  ;;  %v2609_v55 = vmul.f32 %v6629_v23, %v9281_v16  ;;  %v11649_v48 = vld [vmem:[#allocation41_spill] sm:$0xff] }
 0x2ff   : > { %v2415_v56 = vmul.f32 %v6785_v46, %v2381_v4  ;;  %v2416_v41 = vmul.f32 %v6785_v46, %v2412_v11  ;;  %v2542_v20 = vadd.f32 %v2510_v32, %v2477_v18  ;;  %v2610_v45 = vmul.f32 %v6629_v23, %v9287_v49  ;;  %v5705_v37 = vpop.eup %5704 }
 0x300   : > { %v2898_v46 = vmul.f32 %v6961_v61, %v2312_v2  ;;  %v2674_v43 = vmul.f32 %v6642_v62, %v2412_v11  ;;  %v2769_v25 = vmul.f32 %v6655_v8, %v9281_v16  ;;  %vm3390_vm1 = vweird.f32 %v9173_v50  ;;  %v11651_v61 = vld [vmem:[#allocation38_spill] sm:$0xff] }
 0x301   : > { %v2447_v13 = vadd.f32 %v2415_v56, %v11649_v48  ;;  %v2448_v19 = vadd.f32 %v2416_v41, %v11650_v24  ;;  %v2641_v52 = vadd.f32 %v2609_v55, %v2511_v36  ;;  %v2672_v18 = vadd.f32 %v2640_v63, %v2542_v20  ;;  %v11655_v55 = vld [vmem:[#allocation48_spill] sm:$0xff]  ;;  %vm9356_vm7 = vmor %vm3389_vm0, %vm3390_vm1 }
 0x302   : > { %v2705_v32 = vmul.f32 %v6642_v62, %v2381_v4  ;;  %v2833_v23 = vmul.f32 %v6975_v53, %v2381_v4  ;;  %v2770_v56 = vmul.f32 %v6655_v8, %v9287_v49  ;;  %v2834_v24 = vmul.f32 %v6975_v53, %v2412_v11 }
 0x303   : > { %v2512_v42 = vadd.f32 %v2480_v7, %v2447_v13  ;;  %v2513_v2 = vadd.f32 %v11651_v61, %v2448_v19  ;;  %vm9306_vm5 = vcmp.eq.f32.partialorder %v3378_v26, 8.507059e+37  ;;  %v2706_v48 = vadd.f32 %v2674_v43, %v2641_v52  ;;  %v11654_v19 = vld [vmem:[#allocation47_spill] sm:$0xff]  ;;  %v11657_v52 = vld [vmem:[#allocation49_spill] sm:$0xff] }
 0x304   : > { %v2865_v12 = vadd.f32 %v2833_v23, %v2800_v31  ;;  %v2737_v36 = vadd.f32 %v2705_v32, %v2672_v18  ;;  %v2801_v63 = vadd.f32 %v2769_v25, %v9163_v9  ;;  %v3387_v62 = vmul.f32 %v9173_v50, %v3386_v29  ;;  %v11656_v31 = vld [vmem:[#allocation45_spill] sm:$0xff]  ;;  %v11660_v32 = vld [vmem:[#allocation39_spill] sm:$0xff] }
 0x305   : > { %v9312_v4 = vadd.f32 1.0, %v5703_v40  ;;  %v2642_v7 = vadd.f32 %v2610_v45, %v2512_v42  ;;  %v2643_v20 = vadd.f32 %v11654_v19, %v2513_v2  ;;  %v2771_v8 = vadd.f32 %v11655_v55, %v2706_v48  ;;  %v11658_v40 = vld [vmem:[#allocation52_spill] sm:$0xff]  ;;  %v11659_v45 = vld [vmem:[#allocation46_spill] sm:$0xff] }
 0x306   : > { %v9316_v13 = vadd.f32 %v2898_v46, %v2865_v12  ;;  %v2802_v53 = vadd.f32 %v2770_v56, %v2737_v36  ;;  %v2866_v26 = vadd.f32 %v2834_v24, %v2801_v63  ;;  %v3401_v11 = vsub.f32 1.0, %v9248_v54  ;;  %v11661_v54 = vld [vmem:[#allocation50_spill] sm:$0xff]  ;;  %v11662_v46 = vld [vmem:[#allocation53_spill] sm:$0xff]  ;;  %v11663_v56 = vld [vmem:[#allocation43_spill] sm:$0xff] }
 0x307   : > { %v2707_v43 = vadd.f32 %v11656_v31, %v2642_v7  ;;  %v2708_v9 = vadd.f32 %v11657_v52, %v2643_v20  ;;  %v5175_v29 = vmul.f32 -1.442695, %v9254_v30  ;;  %v2836_v25 = vadd.f32 %v11658_v40, %v2771_v8  ;;  %v11664_v48 = vld [vmem:[#allocation42_spill] sm:$0xff]  ;;  %v11666_v20 = vld [vmem:[#allocation13_spill] sm:$0xff]  ;;  %v11667_v8 = vld [vmem:[#allocation15_spill] sm:$0xff]  ;;  %v5707_v31 = vpop.eup %5706 }
 0x308   : > { %v2867_v18 = vadd.f32 %v11659_v45, %v2802_v53  ;;  %v9325_v23 = vadd.f32 %v11660_v32, %v2866_v26  ;;  %v3415_v12 = vmul.f32 %v9275_v14, %v9209_v22  ;;  %5708 = vrcp.f32 %v9312_v4  ;;  %v11673_v40 = vld [vmem:[#allocation10_spill] sm:$0xff] }
 0x309   : > { %v2772_v3 = vadd.f32 %v11661_v54, %v2707_v43  ;;  %v2773_v42 = vadd.f32 %v11662_v46, %v2708_v9  ;;  %v3388_v61 = vadd.f32 %v9173_v50, %v3387_v62  ;;  %v9333_v2 = vadd.f32 1.0, %v5705_v37  ;;  %v11668_v37 = vld [vmem:[#allocation55_spill] sm:$0xff]  ;;  %v11675_v32 = vld [vmem:[#allocation14_spill] sm:$0xff] }
 0x30a   : > { %v2901_v24 = vadd.f32 %v11663_v56, %v2836_v25  ;;  %v9337_v36 = vadd.f32 %v11664_v48, %v2867_v18  ;;  %v11665_v63 = vand.u32 2147483648, %v8993_v5  ;;  %v3395_v19 = vand.u32 2147483648, %v9115_v59  ;;  %v11676_v48 = vld [vmem:[#allocation69_spill] sm:$0xff] }
 0x30b   : > { %v2837_v55 = vadd.f32 %v11666_v20, %v2772_v3  ;;  %v2838_v53 = vadd.f32 %v11667_v8, %v2773_v42  ;;  %v3402_v62 = vmul.f32 %v9219_v28, %v3401_v11  ;;  %5710 = vpow2.f32 %v5175_v29  ;;  %v11672_v11 = vld [vmem:[#allocation54_spill] sm:$0xff] }
 0x30c   : > { %v3381_v7 = vor.u32 1.1754944e-38, %v11665_v63  ;;  %v2966_v26 = vadd.f32 %v11668_v37, %v2901_v24  ;;  %v11669_v5 = vsel %vm9229_vm6, %v9061_v51, %v9201_v38  ;;  %v3416_v9 = vsub.f32 1.0, %v3415_v12  ;;  %v11681_v37 = vld [vmem:[#allocation34_spill] sm:$0xff] }
 0x30d   : > { %v2902_v29 = vadd.f32 %v11672_v11, %v2837_v55  ;;  %v2903_v25 = vadd.f32 %v11673_v40, %v2838_v53  ;;  %v3392_v1 = vsel %vm9356_vm7, %v9173_v50, %v3388_v61  ;;  %v11674_v51 = vand.u32 2147483647, %v9115_v59 }
 0x30e   : > { %v3382_v43 = vsel %vm9306_vm5, %v3381_v7, %v11669_v5  ;;  %5712 = vrcp.f32 %v9333_v2  ;;  %v9369_v38 = vadd.f32 %v7789_v60, %v2966_v26  ;;  %v9371_v41 = vpop.eup %5708  ;;  %v3396_v45 = vor.u32 1.1754944e-38, %v3395_v19  ;;  %v11677_v7 = vld [vmem:[#allocation71_spill] sm:$0xff] }
 0x30f   : > { %vm3394_vm8 = vcmp.eq.f32.partialorder %v11674_v51, 8.507059e+37  ;;  %v3410_v18 = vand.u32 2147483648, %v9159_v15  ;;  %v2967_v12 = vadd.f32 %v11675_v32, %v2902_v29  ;;  %v2968_v54 = vadd.f32 %v8546_v39, %v2903_v25  ;;  %v11683_v25 = vld [vmem:[#allocation23_spill] sm:$0xff]  ;;  %v11684_v51 = vld [vmem:[#allocation24_spill] sm:$0xff] }
 0x310   : > { %v3403_v3 = vadd.f32 %v9219_v28, %v3402_v62  ;;  %vm3405_vm10 = vweird.f32 %v9219_v28  ;;  %v9378_v59 = vadd.f32 1.0, %v5707_v31  ;;  %v5154_v50 = vmul.f32 -1.442695, %v9369_v38 }
 0x311   : > { %v3397_v46 = vsel %vm3394_vm8, %v3396_v45, %v3392_v1  ;;  %v3417_v42 = vmul.f32 %v9275_v14, %v3416_v9  ;;  %v9383_v61 = vadd.f32 %v7789_v60, %v2967_v12  ;;  %v9386_v56 = vadd.f32 %v7789_v60, %v2968_v54  ;;  %v5711_v24 = vpop.eup %5710  ;;  %v11688_v54 = vld [vmem:[#allocation26_spill] sm:$0xff] }
 0x312   : > { %vm3404_vm11 = vweird.f32 %v9159_v15  ;;  %v3430_v39 = vmul.f32 %v9371_v41, %v9312_v4  ;;  %v9393_v63 = vadd.f32 %v7789_v60, %v11676_v48  ;;  %5714 = vpow2.f32 %v5154_v50 }
 0x313   : > { %v9396_v19 = vmul.f32 %v3382_v43, %v11677_v7  ;;  %vm9398_vm12 = vmor %vm3404_vm11, %vm3405_vm10  ;;  %v3408_v55 = vand.u32 2147483647, %v9159_v15  ;;  %v5155_v8 = vmul.f32 -1.442695, %v9383_v61  ;;  %v5156_v53 = vmul.f32 -1.442695, %v9386_v56 }
 0x314   : > { %v9405_v62 = vpop.eup %5712  ;;  %v9408_v26 = vmul.f32 %v3397_v46, %v11681_v37  ;;  %v3407_v31 = vsel %vm9398_vm12, %v9219_v28, %v3403_v3  ;;  %v3411_v5 = vor.u32 1.1754944e-38, %v3410_v18  ;;  %5716 = vrcp.f32 %v9378_v59  ;;  %v11685_v18 = vld [vmem:[#allocation25_spill] sm:$0xff]  ;;  %v11691_v37 = vld [vmem:[#allocation20_spill] sm:$0xff] }
 0x315   : > { %11678 = vst [vmem:[#allocation65_spill] sm:$0xff] %v9396_v19  ;;  %v3418_v43 = vadd.f32 %v9275_v14, %v3417_v42  ;;  %vm3420_vm13 = vweird.f32 %v9275_v14  ;;  %v9416_v15 = vadd.f32 1.0, %v5711_v24  ;;  %5718 = vpow2.f32 %v5155_v8  ;;  %v11689_v24 = vld [vmem:[#allocation27_spill] sm:$0xff] }
 0x316   : > { %11682 = vst [vmem:[#allocation37_spill] sm:$0xff] %v9408_v26  ;;  %v3425_v52 = vand.u32 2147483648, %v9209_v22  ;;  %v3431_v9 = vsub.f32 1.0, %v3430_v39  ;;  %v5176_v11 = vmul.f32 -1.442695, %v9393_v63  ;;  %5720 = vpow2.f32 %v5156_v53 }
 0x317   : > { %vm3409_vm14 = vcmp.eq.f32.partialorder %v3408_v55, 8.507059e+37  ;;  %vm3419_vm15 = vweird.f32 %v9209_v22  ;;  %v3423_v28 = vand.u32 2147483647, %v9209_v22  ;;  %v3445_v29 = vmul.f32 %v9405_v62, %v9333_v2 }
 0x318   : > { %v5715_v40 = vpop.eup %5714  ;;  %v9426_v1 = vmul.f32 %v9188_v58, %v11683_v25  ;;  %v9430_v45 = vmul.f32 %v9191_v27, %v11684_v51  ;;  %v9434_v32 = vmul.f32 %v9194_v57, %v11685_v18  ;;  %v3412_v12 = vsel %vm3409_vm14, %v3411_v5, %v3407_v31  ;;  %vm9438_vm2 = vmor %vm3419_vm15, %vm3420_vm13 }
 0x319   : > { %v9444_v3 = vmul.f32 %v9396_v19, %v11688_v54  ;;  %v3422_v50 = vsel %vm9438_vm2, %v9275_v14, %v3418_v43  ;;  %5722 = vrcp.f32 %v9416_v15  ;;  %v9450_v46 = vadd.f32 1.0, %v5715_v40 }
 0x31a   : > { %v9452_v42 = vpop.eup %5716  ;;  %v9456_v39 = vmul.f32 %v9408_v26, %v11689_v24  ;;  %v3426_v48 = vor.u32 1.1754944e-38, %v3425_v52  ;;  %v3432_v7 = vmul.f32 %v9371_v41, %v3431_v9  ;;  %5724 = vpow2.f32 %v5176_v11  ;;  %v11692_v52 = vld [vmem:[#allocation73_spill] sm:$0xff] }
 0x31b   : > { %v5719_v20 = vpop.eup %5718  ;;  %v9460_v55 = vmul.f32 %v3412_v12, %v9034_v35  ;;  %vm3424_vm3 = vcmp.eq.f32.partialorder %v3423_v28, 8.507059e+37  ;;  %v3446_v14 = vsub.f32 1.0, %v3445_v29  ;;  %5726 = vrcp.f32 %v9450_v46 }
 0x31c   : > { %11690 = vst [vmem:[#allocation4_spill] sm:$0xff] %v9456_v39  ;;  %v5721_v8 = vpop.eup %5720  ;;  %v3427_v53 = vsel %vm3424_vm3, %v3426_v48, %v3422_v50  ;;  %vm3434_vm4 = vweird.f32 %v9312_v4  ;;  %v9466_v31 = vadd.f32 %v7789_v60, %v11691_v37  ;;  %v9468_v5 = vadd.f32 1.0, %v5719_v20  ;;  %v5348_v20 = vld [vmem:[%s11245_s7 + $0x38] sm:$0xff] }
 0x31d   : > { %v3440_v43 = vand.u32 2147483648, %v9312_v4  ;;  %v9473_v35 = vadd.f32 %v7789_v60, %v11692_v52  ;;  %v2962_v9 = vmul.f32 %v7020_v34, %v9281_v16  ;;  %v9477_v11 = vadd.f32 1.0, %v5721_v8  ;;  %3809 = vmatpush.bf16.msra.mxu2 %v5348_v20 }
 0x31e   : > { %v9480_v28 = vadd.f32 %v9371_v41, %v3432_v7  ;;  %vm3435_vm6 = vweird.f32 %v9371_v41  ;;  %v9485_v29 = vadd.f32 %v7789_v60, %v9037_v33  ;;  %5728 = vrcp.f32 %v9468_v5 }
 0x31f   : > { %11693 = vst [vmem:[#allocation41_spill] sm:$0xff] %v9473_v35  ;;  %v9488_v40 = vpop.eup %5722  ;;  %v3447_v25 = vmul.f32 %v9405_v62, %v3446_v14  ;;  %v3455_v51 = vand.u32 2147483648, %v9333_v2  ;;  %v9494_v16 = vmul.f32 %v9452_v42, %v9378_v59  ;;  %5730 = vrcp.f32 %v9477_v11  ;;  %vm9506_vm1 = vmor %vm3434_vm4, %vm3435_vm6 }
 0x320   : > { %11694 = vst [vmem:[#allocation40_spill] sm:$0xff] %v9485_v29  ;;  %v5725_v18 = vpop.eup %5724  ;;  %v9498_v12 = vmul.f32 %v3427_v53, %v9089_v21  ;;  %v3438_v33 = vand.u32 2147483647, %v9312_v4  ;;  %v5177_v22 = vmul.f32 -1.442695, %v9466_v31  ;;  %v2963_v54 = vmul.f32 %v7020_v34, %v9287_v49 }
 0x321   : > { %v5727_v50 = vpop.eup %5726  ;;  %v9510_v48 = vor.u32 1.1754944e-38, %v3440_v43  ;;  %v5178_v21 = vmul.f32 -1.442695, %v9473_v35  ;;  %v9518_v14 = vadd.f32 %v2962_v9, %v9161_v6  ;;  %v5180_v4 = vmul.f32 -1.442695, %v9485_v29  ;;  %v5347_v9 = vld [vmem:[%s11245_s7 + $0x30] sm:$0xff] }
 0x322   : > { %v3160_v8 = vmul.f32 %v5727_v50, %v9450_v46  ;;  %v9527_v53 = vadd.f32 %v2963_v54, %v9316_v13  ;;  %v9530_v37 = vadd.f32 %v9405_v62, %v3447_v25  ;;  %v9532_v43 = vor.u32 1.1754944e-38, %v3455_v51  ;;  %3810 = vmatpush.bf16.msra.mxu2 %v5347_v9 }
 0x323   : > { %v3168_v52 = vand.u32 2147483647, %v9450_v46  ;;  %vm3450_vm5 = vweird.f32 %v9405_v62  ;;  %v9542_v13 = vmul.f32 %v9488_v40, %v9416_v15  ;;  %v9544_v25 = vadd.f32 1.0, %v5725_v18 }
 0x324   : > { %v5729_v49 = vpop.eup %5728  ;;  %5732 = vpow2.f32 %v5177_v22  ;;  %v3161_v51 = vsub.f32 1.0, %v3160_v8  ;;  %v9548_v20 = vadd.f32 %v7789_v60, %v9021_v47  ;;  %v3170_v6 = vand.u32 2147483648, %v9450_v46  ;;  %v5346_v8 = vld [vmem:[%s11245_s7 + $0x28] sm:$0xff] }
 0x325   : > { %v5731_v54 = vpop.eup %5730  ;;  %5734 = vpow2.f32 %v5178_v21  ;;  %v3175_v7 = vmul.f32 %v5729_v49, %v9468_v5  ;;  %vm9552_vm0 = vcmp.eq.f32.partialorder %v3438_v33, 8.507059e+37  ;;  %vm3449_vm7 = vweird.f32 %v9333_v2 }
 0x326   : > { %5736 = vpow2.f32 %v5180_v4  ;;  %v3162_v18 = vmul.f32 %v5727_v50, %v3161_v51  ;;  %vm3165_vm8 = vweird.f32 %v5727_v50  ;;  %v3190_v22 = vmul.f32 %v5731_v54, %v9477_v11  ;;  %3811 = vmatpush.bf16.msra.mxu2 %v5346_v8 }
 0x327   : > { %v2961_v21 = vmul.f32 %v7020_v34, %v9217_v10  ;;  %vm3164_vm10 = vweird.f32 %v9450_v46  ;;  %vm9561_vm11 = vcmp.eq.f32.partialorder %v3168_v52, 8.507059e+37  ;;  %v3176_v33 = vsub.f32 1.0, %v3175_v7 }
 0x328   : > { %v3163_v4 = vadd.f32 %v5727_v50, %v3162_v18  ;;  %v3183_v51 = vand.u32 2147483647, %v9468_v5  ;;  %v3185_v19 = vand.u32 2147483648, %v9468_v5  ;;  %v3191_v57 = vsub.f32 1.0, %v3190_v22  ;;  %vm3166_vm12 = vmor %vm3164_vm10, %vm3165_vm8 }
 0x329   : > { %v3171_v10 = vor.u32 1.1754944e-38, %v3170_v6  ;;  %v3177_v27 = vmul.f32 %v5729_v49, %v3176_v33  ;;  %vm3180_vm13 = vweird.f32 %v5729_v49  ;;  %v3200_v46 = vand.u32 2147483648, %v9477_v11  ;;  %v5345_v6 = vld [vmem:[%s11245_s7 + $0x20] sm:$0xff] }
 0x32a   : > { %v5733_v52 = vpop.eup %5732  ;;  %v3167_v58 = vsel %vm3166_vm12, %v5727_v50, %v3163_v4  ;;  %v3192_v7 = vmul.f32 %v5731_v54, %v3191_v57  ;;  %vm3195_vm14 = vweird.f32 %v5731_v54  ;;  %v3198_v9 = vand.u32 2147483647, %v9477_v11  ;;  %3812 = vmatpush.bf16.msra.mxu2 %v5345_v6  ;;  %v5343_v6 = vld [vmem:[%s11245_s7 + $0x10] sm:$0xff] }
 0x32b   : > { %v5735_v35 = vpop.eup %5734  ;;  %v5179_v18 = vmul.f32 -1.442695, %v9548_v20  ;;  %v3172_v29 = vsel %vm9561_vm11, %v3171_v10, %v3167_v58  ;;  %v3178_v39 = vadd.f32 %v5729_v49, %v3177_v27  ;;  %vm3179_vm15 = vweird.f32 %v9468_v5  ;;  %vm9607_vm11 = vmor %vm3449_vm7, %vm3450_vm5 }
 0x32c   : > { %v5737_v22 = vpop.eup %5736  ;;  %vm3181_vm2 = vmor %vm3179_vm15, %vm3180_vm13  ;;  %vm3184_vm3 = vcmp.eq.f32.partialorder %v3183_v51, 8.507059e+37  ;;  %v3186_v57 = vor.u32 1.1754944e-38, %v3185_v19  ;;  %v3193_v50 = vadd.f32 %v5731_v54, %v3192_v7  ;;  %vm3194_vm4 = vweird.f32 %v9477_v11  ;;  %v11711_v7 = vld [vmem:[#allocation7_spill] sm:$0xff] }
 0x32d   : > { %v11701_v33 = vand.u32 2147483647, %v9333_v2  ;;  %v3182_v27 = vsel %vm3181_vm2, %v5729_v49, %v3178_v39  ;;  %vm3196_vm8 = vmor %vm3194_vm4, %vm3195_vm14  ;;  %v3201_v5 = vor.u32 1.1754944e-38, %v3200_v46  ;;  %v9589_v47 = vmul.f32 %v3172_v29, %v9369_v38  ;;  %v11708_v49 = vld [vmem:[#allocation3_spill] sm:$0xff]  ;;  %v11710_v46 = vld [vmem:[#allocation44_spill] sm:$0xff] }
 0x32e   : > { %v2993_v8 = vadd.f32 %v2961_v21, %v9026_v17  ;;  %5738 = vrcp.f32 %v9544_v25  ;;  %v3187_v19 = vsel %vm3184_vm3, %v3186_v57, %v3182_v27  ;;  %v3197_v4 = vsel %vm3196_vm8, %v5731_v54, %v3193_v50  ;;  %v11709_v21 = vld [vmem:[#allocation5_spill] sm:$0xff]  ;;  %v11715_v17 = vld [vmem:[#allocation18_spill] sm:$0xff] }
 0x32f   : > { %vm9583_vm6 = vcmp.eq.f32.partialorder %v11701_v33, 8.507059e+37  ;;  %vm3199_vm10 = vcmp.eq.f32.partialorder %v3198_v9, 8.507059e+37  ;;  %v11704_v11 = vsel %vm9506_vm1, %v9371_v41, %v9480_v28  ;;  %v9611_v38 = vadd.f32 1.0, %v5733_v52  ;;  %v5344_v41 = vld [vmem:[%s11245_s7 + $0x18] sm:$0xff] }
 0x330   : > { %v9601_v39 = vsel %vm9552_vm0, %v9510_v48, %v11704_v11  ;;  %v3202_v29 = vsel %vm3199_vm10, %v3201_v5, %v3197_v4  ;;  %v9614_v24 = vmul.f32 %v3187_v19, %v9383_v61  ;;  %v3452_v2 = vsel %vm9607_vm11, %v9405_v62, %v9530_v37  ;;  %3813 = vmatpush.bf16.msra.mxu2 %v5344_v41 }
 0x331   : > { %5740 = vpow2.f32 %v5179_v18  ;;  %v9623_v26 = vadd.f32 1.0, %v5737_v22  ;;  %v9626_v28 = vmul.f32 %v3202_v29, %v9386_v56  ;;  %v11707_v48 = vsub.f32 1.0, %v9494_v16 }
 0x332   : > { %v3671_v54 = vmul.f32 %v9589_v47, %v11708_v49  ;;  %v3672_v51 = vmul.f32 %v9614_v24, %v11709_v21  ;;  %v9636_v10 = vadd.f32 %v7789_v60, %v2993_v8  ;;  %v3468_v62 = vand.u32 2147483647, %v9378_v59 }
 0x333   : > { %v3462_v61 = vmul.f32 %v9452_v42, %v11707_v48  ;;  %v3470_v37 = vand.u32 2147483648, %v9378_v59  ;;  %v3476_v56 = vsub.f32 1.0, %v9542_v13  ;;  %v2964_v16 = vmul.f32 %v7020_v34, %v11710_v46  ;;  %v11712_v13 = vld [vmem:[#allocation12_spill] sm:$0xff] }
 0x334   : > { %5742 = vrcp.f32 %v9611_v38  ;;  %v9644_v52 = vadd.f32 1.0, %v5735_v35  ;;  %v3673_v9 = vmul.f32 %v9626_v28, %v11711_v7  ;;  %v3703_v18 = vadd.f32 %v3672_v51, %v3671_v54  ;;  %v9651_v22 = vpop.eup %5738  ;;  %3814 = vmatpush.bf16.msra.mxu2 %v5343_v6 }
 0x335   : > { %5744 = vrcp.f32 %v9623_v26  ;;  %v2965_v57 = vmul.f32 %v7020_v34, %v11712_v13  ;;  %v2996_v50 = vadd.f32 %v2964_v16, %v9325_v23  ;;  %v9659_v35 = vadd.f32 %v7789_v60, %v9518_v14  ;;  %v5341_v16 = vld [vmem:[%s11245_s7] sm:$0xff] }
 0x336   : > { %v3463_v33 = vadd.f32 %v9452_v42, %v3462_v61  ;;  %vm3465_vm1 = vweird.f32 %v9452_v42  ;;  %v3704_v27 = vadd.f32 %v3703_v18, %v3673_v9  ;;  %v5181_v5 = vmul.f32 -1.442695, %v9636_v10  ;;  %v11718_v61 = vld [vmem:[#allocation11_spill] sm:$0xff] }
 0x337   : > { %v5741_v8 = vpop.eup %5740  ;;  %v3457_v19 = vsel %vm9583_vm6, %v9532_v43, %v3452_v2  ;;  %v3477_v34 = vmul.f32 %v9488_v40, %v3476_v56  ;;  %v2997_v23 = vadd.f32 %v2965_v57, %v9337_v36  ;;  %v9671_v14 = vadd.f32 %v7789_v60, %v9527_v53  ;;  %v5342_v36 = vld [vmem:[%s11245_s7 + $0x8] sm:$0xff]  ;;  %v11719_v56 = vld [vmem:[#allocation17_spill] sm:$0xff]  ;;  %v11722_v57 = vld [vmem:[#allocation16_spill] sm:$0xff] }
 0x338   : > { %vm3464_vm5 = vweird.f32 %v9378_v59  ;;  %vm9674_vm0 = vcmp.eq.f32.partialorder %v3468_v62, 8.507059e+37  ;;  %v3490_v11 = vmul.f32 %v9651_v22, %v9544_v25  ;;  %v3705_v58 = vadd.f32 %v3704_v27, %v11715_v17  ;;  %3815 = vmatpush.bf16.msra.mxu2 %v5342_v36 }
 0x339   : > { %vm9684_vm7 = vmor %vm3464_vm5, %vm3465_vm1  ;;  %v3471_v53 = vor.u32 1.1754944e-38, %v3470_v37  ;;  %5746 = vrcp.f32 %v9644_v52  ;;  %v9690_v59 = vadd.f32 %v7789_v60, %v2996_v50  ;;  %v5182_v29 = vmul.f32 -1.442695, %v9659_v35 }
 0x33a   : > { %v9693_v41 = vpop.eup %5742  ;;  %v3467_v2 = vsel %vm9684_vm7, %v9452_v42, %v3463_v33  ;;  %v9698_v48 = vadd.f32 1.0, %v5741_v8  ;;  %v3706_v49 = vadd.f32 %v3705_v58, %v11718_v61  ;;  %5748 = vpow2.f32 %v5181_v5  ;;  %v11724_v58 = vld [vmem:[#allocation60_spill] sm:$0xff] }
 0x33b   : > { %v9701_v54 = vpop.eup %5744  ;;  %v3478_v21 = vadd.f32 %v9488_v40, %v3477_v34  ;;  %vm3480_vm12 = vweird.f32 %v9488_v40  ;;  %v9706_v51 = vadd.f32 %v7789_v60, %v2997_v23  ;;  %v5183_v62 = vmul.f32 -1.442695, %v9671_v14 }
 0x33c   : > { %vm3479_vm13 = vweird.f32 %v9416_v15  ;;  %v3485_v42 = vand.u32 2147483648, %v9416_v15  ;;  %v3491_v37 = vsub.f32 1.0, %v3490_v11  ;;  %v3707_v46 = vadd.f32 %v3706_v49, %v11719_v56  ;;  %v11723_v11 = vld [vmem:[#allocation29_spill] sm:$0xff]  ;;  %3816 = vmatpush.bf16.msra.mxu2 %v5341_v16  ;;  %v11728_v16 = vld [vmem:[#allocation32_spill] sm:$0xff] }
 0x33d   : > { %v3483_v7 = vand.u32 2147483647, %v9416_v15  ;;  %v3505_v60 = vmul.f32 %v9693_v41, %v9611_v38  ;;  %5750 = vpow2.f32 %v5182_v29  ;;  %v5184_v9 = vmul.f32 -1.442695, %v9690_v59  ;;  %vm9721_vm14 = vmor %vm3479_vm13, %vm3480_vm12 }
 0x33e   : > { %v3472_v18 = vsel %vm9674_vm0, %v3471_v53, %v3467_v2  ;;  %5752 = vrcp.f32 %v9698_v48  ;;  %v3550_v13 = vmul.f32 %v9701_v54, %v9623_v26  ;;  %v3708_v15 = vadd.f32 %v3707_v46, %v11722_v57  ;;  %v11725_v53 = vld [vmem:[#allocation35_spill] sm:$0xff] }
 0x33f   : > { %v9729_v50 = vpop.eup %5746  ;;  %v9733_v33 = vmul.f32 %v9601_v39, %v9182_v0  ;;  %v3482_v27 = vsel %vm9721_vm14, %v9488_v40, %v3478_v21  ;;  %5754 = vpow2.f32 %v5183_v62  ;;  %v5185_v5 = vmul.f32 -1.442695, %v9706_v51  ;;  %v11726_v21 = vld [vmem:[#allocation28_spill] sm:$0xff] }
 0x340   : > { %v5749_v8 = vpop.eup %5748  ;;  %v9740_v34 = vmul.f32 %v3457_v19, %v9198_v44  ;;  %v3486_v23 = vor.u32 1.1754944e-38, %v3485_v42  ;;  %v3492_v4 = vmul.f32 %v9651_v22, %v3491_v37  ;;  %v3709_v17 = vadd.f32 %v3708_v15, %v11723_v11  ;;  %v11727_v42 = vld [vmem:[#allocation30_spill] sm:$0xff] }
 0x341   : > { %v9745_v0 = vmul.f32 %v3472_v18, %v11724_v58  ;;  %vm3484_vm15 = vcmp.eq.f32.partialorder %v3483_v7, 8.507059e+37  ;;  %v3506_v39 = vsub.f32 1.0, %v3505_v60  ;;  %5756 = vpow2.f32 %v5184_v9  ;;  %v11729_v60 = vld [vmem:[#allocation33_spill] sm:$0xff]  ;;  %v11730_v18 = vld [vmem:[#allocation36_spill] sm:$0xff] }
 0x342   : > { %v3487_v40 = vsel %vm3484_vm15, %v3486_v23, %v3482_v27  ;;  %v3498_v36 = vand.u32 2147483647, %v9544_v25  ;;  %v3551_v43 = vsub.f32 1.0, %v3550_v13  ;;  %v3710_v29 = vadd.f32 %v3709_v17, %v11725_v53 }
 0x343   : > { %v5751_v44 = vpop.eup %5750  ;;  %v3500_v19 = vand.u32 2147483648, %v9544_v25  ;;  %5758 = vpow2.f32 %v5185_v5  ;;  %v9750_v2 = vadd.f32 1.0, %v5749_v8  ;;  %v3520_v61 = vmul.f32 %v9729_v50, %v9644_v52 }
 0x344   : > { %v9754_v49 = vpop.eup %5752  ;;  %v9758_v62 = vmul.f32 %v9460_v55, %v11726_v21  ;;  %v9762_v37 = vmul.f32 %v9498_v12, %v11727_v42  ;;  %v3493_v56 = vadd.f32 %v9651_v22, %v3492_v4  ;;  %vm3495_vm2 = vweird.f32 %v9651_v22 }
 0x345   : > { %v5755_v46 = vpop.eup %5754  ;;  %v9768_v7 = vmul.f32 %v9733_v33, %v11728_v16  ;;  %v9772_v9 = vmul.f32 %v9740_v34, %v11729_v60  ;;  %v9776_v6 = vmul.f32 %v9745_v0, %v11730_v18  ;;  %v3507_v13 = vmul.f32 %v9693_v41, %v3506_v39 }
 0x346   : > { %v9780_v57 = vmul.f32 %v3487_v40, %v9254_v30  ;;  %vm3494_vm3 = vweird.f32 %v9544_v25  ;;  %v3552_v15 = vmul.f32 %v9701_v54, %v3551_v43  ;;  %v9784_v27 = vadd.f32 1.0, %v5751_v44  ;;  %v11735_v43 = vld [vmem:[#allocation56_spill] sm:$0xff] }
 0x347   : > { %v5757_v5 = vpop.eup %5756  ;;  %vm9786_vm4 = vmor %vm3494_vm3, %vm3495_vm2  ;;  %vm9790_vm6 = vcmp.eq.f32.partialorder %v3498_v36, 8.507059e+37  ;;  %v3501_v4 = vor.u32 1.1754944e-38, %v3500_v19  ;;  %v3521_v11 = vsub.f32 1.0, %v3520_v61  ;;  %5760 = vrcp.f32 %v9750_v2  ;;  %v11736_v61 = vld [vmem:[#allocation21_spill] sm:$0xff] }
 0x348   : > { %v3497_v30 = vsel %vm9786_vm4, %v9651_v22, %v3493_v56  ;;  %v3513_v25 = vand.u32 2147483647, %v9611_v38  ;;  %v9799_v17 = vadd.f32 1.0, %v5755_v46  ;;  %v3535_v58 = vmul.f32 %v9754_v49, %v9698_v48 }
 0x349   : > { %v5759_v39 = vpop.eup %5758  ;;  %v3508_v40 = vadd.f32 %v9693_v41, %v3507_v13  ;;  %vm3510_vm8 = vweird.f32 %v9693_v41  ;;  %v3515_v36 = vand.u32 2147483648, %v9611_v38  ;;  %v3711_v53 = vadd.f32 %v3710_v29, %v11735_v43 }
 0x34a   : > { %v3553_v44 = vadd.f32 %v9701_v54, %v3552_v15  ;;  %vm3555_vm10 = vweird.f32 %v9701_v54  ;;  %v9809_v22 = vadd.f32 1.0, %v5757_v5  ;;  %5762 = vrcp.f32 %v9784_v27 }
 0x34b   : > { %vm3509_vm11 = vweird.f32 %v9611_v38  ;;  %vm3554_vm1 = vweird.f32 %v9623_v26  ;;  %v3522_v19 = vmul.f32 %v9729_v50, %v3521_v11  ;;  %v3712_v21 = vadd.f32 %v3711_v53, %v11736_v61 }
 0x34c   : > { %vm9816_vm5 = vmor %vm3509_vm11, %vm3510_vm8  ;;  %v3560_v29 = vand.u32 2147483648, %v9623_v26  ;;  %v9821_v56 = vadd.f32 1.0, %v5759_v39  ;;  %v3536_v46 = vsub.f32 1.0, %v3535_v58  ;;  %5764 = vrcp.f32 %v9799_v17 }
 0x34d   : > { %v9824_v16 = vpop.eup %5760  ;;  %v3502_v38 = vsel %vm9790_vm6, %v3501_v4, %v3497_v30  ;;  %vm9828_vm0 = vcmp.eq.f32.partialorder %v3513_v25, 8.507059e+37  ;;  %vm9834_vm7 = vmor %vm3554_vm1, %vm3555_vm10  ;;  %v3558_v13 = vand.u32 2147483647, %v9623_v26  ;;  %v3713_v15 = vadd.f32 %v3712_v21, %v9426_v1 }
 0x34e   : > { %v3512_v5 = vsel %vm9816_vm5, %v9693_v41, %v3508_v40  ;;  %v3516_v8 = vor.u32 1.1754944e-38, %v3515_v36  ;;  %v3557_v23 = vsel %vm9834_vm7, %v9701_v54, %v3553_v44  ;;  %5766 = vrcp.f32 %v9809_v22 }
 0x34f   : > { %v3523_v4 = vadd.f32 %v9729_v50, %v3522_v19  ;;  %vm3525_vm12 = vweird.f32 %v9729_v50  ;;  %v3530_v11 = vand.u32 2147483648, %v9644_v52  ;;  %v3714_v26 = vadd.f32 %v3713_v15, %v9430_v45  ;;  %v11743_v45 = vld [vmem:[#allocation51_spill] sm:$0xff] }
 0x350   : > { %v9851_v1 = vpop.eup %5762  ;;  %v3561_v30 = vor.u32 1.1754944e-38, %v3560_v29  ;;  %v3537_v41 = vmul.f32 %v9754_v49, %v3536_v46  ;;  %v3565_v25 = vmul.f32 %v9824_v16, %v9750_v2  ;;  %5768 = vrcp.f32 %v9821_v56 }
 0x351   : > { %vm3559_vm13 = vcmp.eq.f32.partialorder %v3558_v13, 8.507059e+37  ;;  %vm3524_vm14 = vweird.f32 %v9644_v52  ;;  %v3528_v54 = vand.u32 2147483647, %v9644_v52  ;;  %v3715_v58 = vadd.f32 %v3714_v26, %v9434_v32 }
 0x352   : > { %v9860_v39 = vpop.eup %5764  ;;  %v9864_v40 = vmul.f32 %v9780_v57, %v11743_v45  ;;  %v9867_v36 = vmul.f32 %v3502_v38, %v9393_v63  ;;  %v3517_v43 = vsel %vm9828_vm0, %v3516_v8, %v3512_v5  ;;  %v3562_v53 = vsel %vm3559_vm13, %v3561_v30, %v3557_v23  ;;  %vm9873_vm15 = vmor %vm3524_vm14, %vm3525_vm12  ;;  %v11746_v38 = vld [vmem:[#allocation4_spill] sm:$0xff] }
 0x353   : > { %v3527_v32 = vsel %vm9873_vm15, %v9729_v50, %v3523_v4  ;;  %v3531_v52 = vor.u32 1.1754944e-38, %v3530_v11  ;;  %v3580_v19 = vmul.f32 %v9851_v1, %v9784_v27  ;;  %v3716_v63 = vadd.f32 %v3715_v58, %v9444_v3  ;;  %v11747_v3 = vld [vmem:[#allocation40_spill] sm:$0xff] }
 0x354   : > { %v9883_v61 = vpop.eup %5766  ;;  %v3538_v21 = vadd.f32 %v9754_v49, %v3537_v41  ;;  %vm3540_vm2 = vweird.f32 %v9754_v49  ;;  %v3543_v42 = vand.u32 2147483647, %v9698_v48  ;;  %v3566_v29 = vsub.f32 1.0, %v3565_v25 }
 0x355   : > { %v9889_v46 = vmul.f32 %v3517_v43, %v9466_v31  ;;  %vm3529_vm3 = vcmp.eq.f32.partialorder %v3528_v54, 8.507059e+37  ;;  %v3595_v50 = vmul.f32 %v9860_v39, %v9799_v17  ;;  %v3717_v60 = vadd.f32 %v3716_v63, %v11746_v38 }
 0x356   : > { %v9894_v18 = vpop.eup %5768  ;;  %v9897_v13 = vmul.f32 %v3562_v53, %v11747_v3  ;;  %v3532_v15 = vsel %vm3529_vm3, %v3531_v52, %v3527_v32  ;;  %vm3539_vm4 = vweird.f32 %v9698_v48  ;;  %v3545_v5 = vand.u32 2147483648, %v9698_v48 }
 0x357   : > { %vm9901_vm6 = vmor %vm3539_vm4, %vm3540_vm2  ;;  %v3573_v31 = vand.u32 2147483647, %v9750_v2  ;;  %v3581_v23 = vsub.f32 1.0, %v3580_v19  ;;  %v3610_v4 = vmul.f32 %v9883_v61, %v9809_v22  ;;  %v3718_v11 = vadd.f32 %v3717_v60, %v9758_v62  ;;  %v11765_v62 = vld [vmem:[#allocation64_spill] sm:$0xff]  ;;  %v11768_v19 = vld [vmem:[#allocation66_spill] sm:$0xff] }
 0x358   : > { %v3542_v26 = vsel %vm9901_vm6, %v9754_v49, %v3538_v21  ;;  %vm3544_vm8 = vcmp.eq.f32.partialorder %v3543_v42, 8.507059e+37  ;;  %v3567_v30 = vmul.f32 %v9824_v16, %v3566_v29  ;;  %v3575_v48 = vand.u32 2147483648, %v9750_v2 }
 0x359   : > { %v3588_v41 = vand.u32 2147483647, %v9784_v27  ;;  %v3596_v25 = vsub.f32 1.0, %v3595_v50  ;;  %v3625_v54 = vmul.f32 %v9894_v18, %v9821_v56  ;;  %v3719_v58 = vadd.f32 %v3718_v11, %v9762_v37 }
 0x35a   : > { %v3546_v45 = vor.u32 1.1754944e-38, %v3545_v5  ;;  %vm3569_vm10 = vweird.f32 %v9750_v2  ;;  %vm3584_vm11 = vweird.f32 %v9784_v27  ;;  %v3590_v49 = vand.u32 2147483648, %v9784_v27  ;;  %v11756_v2 = vld [vmem:[#allocation41_spill] sm:$0xff] }
 0x35b   : > { %vm9921_vm1 = vcmp.eq.f32.partialorder %v3573_v31, 8.507059e+37  ;;  %v3582_v43 = vmul.f32 %v9851_v1, %v3581_v23  ;;  %v3611_v53 = vsub.f32 1.0, %v3610_v4  ;;  %v3720_v44 = vadd.f32 %v3719_v58, %v9768_v7  ;;  %v11757_v4 = vld [vmem:[#allocation57_spill] sm:$0xff] }
 0x35c   : > { %v3547_v32 = vsel %vm3544_vm8, %v3546_v45, %v3542_v26  ;;  %v3568_v52 = vadd.f32 %v9824_v16, %v3567_v30  ;;  %vm3570_vm5 = vweird.f32 %v9824_v16  ;;  %v3576_v37 = vor.u32 1.1754944e-38, %v3575_v48  ;;  %v11762_v48 = vld [vmem:[#allocation59_spill] sm:$0xff] }
 0x35d   : > { %vm9929_vm0 = vcmp.eq.f32.partialorder %v3588_v41, 8.507059e+37  ;;  %v3597_v63 = vmul.f32 %v9860_v39, %v3596_v25  ;;  %v3626_v21 = vsub.f32 1.0, %v3625_v54  ;;  %v3721_v42 = vadd.f32 %v3720_v44, %v9772_v9  ;;  %vm9940_vm12 = vmor %vm3569_vm10, %vm3570_vm5 }
 0x35e   : > { %v3591_v29 = vor.u32 1.1754944e-38, %v3590_v49  ;;  %vm3599_vm7 = vweird.f32 %v9799_v17  ;;  %v3603_v7 = vand.u32 2147483647, %v9799_v17  ;;  %v3605_v50 = vand.u32 2147483648, %v9799_v17 }
 0x35f   : > { %v3583_v60 = vadd.f32 %v9851_v1, %v3582_v43  ;;  %vm3585_vm13 = vweird.f32 %v9851_v1  ;;  %v3612_v3 = vmul.f32 %v9883_v61, %v3611_v53  ;;  %v3722_v9 = vadd.f32 %v3721_v42, %v9776_v6 }
 0x360   : > { %v3572_v5 = vsel %vm9940_vm12, %v9824_v16, %v3568_v52  ;;  %vm3600_vm14 = vweird.f32 %v9860_v39  ;;  %vm3614_vm15 = vweird.f32 %v9809_v22  ;;  %v9954_v8 = vmul.f32 %v3532_v15, %v11756_v2  ;;  %vm9963_vm2 = vmor %vm3584_vm11, %vm3585_vm13  ;;  %v11773_v16 = vld [vmem:[#allocation8_spill] sm:$0xff] }
 0x361   : > { %v3598_v31 = vadd.f32 %v9860_v39, %v3597_v63  ;;  %v3627_v23 = vmul.f32 %v9894_v18, %v3626_v21  ;;  %v3693_v11 = vmul.f32 %v9867_v36, %v11757_v4  ;;  %v3723_v6 = vadd.f32 %v3722_v9, %v9864_v40  ;;  %vm9987_vm6 = vmor %vm3599_vm7, %vm3600_vm14 }
 0x362   : > { %vm9967_vm3 = vcmp.eq.f32.partialorder %v3603_v7, 8.507059e+37  ;;  %v3606_v15 = vor.u32 1.1754944e-38, %v3605_v50  ;;  %vm3615_vm4 = vweird.f32 %v9883_v61  ;;  %v9973_v30 = vmul.f32 %v3547_v32, %v9548_v20 }
 0x363   : > { %v3587_v40 = vsel %vm9963_vm2, %v9851_v1, %v3583_v60  ;;  %v3613_v27 = vadd.f32 %v9883_v61, %v3612_v3  ;;  %v3694_v41 = vmul.f32 %v9889_v46, %v11762_v48  ;;  %v3724_v25 = vadd.f32 %v3723_v6, %v3693_v11  ;;  %vm10006_vm10 = vmor %vm3614_vm15, %vm3615_vm4  ;;  %v11770_v3 = vld [vmem:[#allocation31_spill] sm:$0xff]  ;;  %v11772_v11 = vld [vmem:[#allocation6_spill] sm:$0xff] }
 0x364   : > { %v3577_v54 = vsel %vm9921_vm1, %v3576_v37, %v3572_v5  ;;  %v3618_v58 = vand.u32 2147483647, %v9809_v22  ;;  %v3620_v1 = vand.u32 2147483648, %v9809_v22  ;;  %vm3630_vm8 = vweird.f32 %v9894_v18 }
 0x365   : > { %v3602_v45 = vsel %vm9987_vm6, %v9860_v39, %v3598_v31  ;;  %v3628_v49 = vadd.f32 %v9894_v18, %v3627_v23  ;;  %v3695_v43 = vmul.f32 %v9954_v8, %v11765_v62  ;;  %v3725_v17 = vadd.f32 %v3724_v25, %v3694_v41 }
 0x366   : > { %v3592_v53 = vsel %vm9929_vm0, %v3591_v29, %v3587_v40  ;;  %vm3629_vm11 = vweird.f32 %v9821_v56  ;;  %v3633_v39 = vand.u32 2147483647, %v9821_v56  ;;  %v3635_v32 = vand.u32 2147483648, %v9821_v56  ;;  %v11774_v40 = vld [vmem:[#allocation2_spill] sm:$0xff] }
 0x367   : > { %v3617_v52 = vsel %vm10006_vm10, %v9883_v61, %v3613_v27  ;;  %v10017_v37 = vmul.f32 %v3577_v54, %v9636_v10  ;;  %v3696_v22 = vmul.f32 %v9973_v30, %v11768_v19  ;;  %v3726_v63 = vadd.f32 %v3725_v17, %v3695_v43  ;;  %vm3631_vm5 = vmor %vm3629_vm11, %vm3630_vm8  ;;  %v11769_v61 = vld [vmem:[#allocation70_spill] sm:$0xff] }
 0x368   : > { %v3607_v21 = vsel %vm9967_vm3, %v3606_v15, %v3602_v45  ;;  %vm3619_vm1 = vcmp.eq.f32.partialorder %v3618_v58, 8.507059e+37  ;;  %v3621_v42 = vor.u32 1.1754944e-38, %v3620_v1  ;;  %v3632_v56 = vsel %vm3631_vm5, %v9894_v18, %v3628_v49  ;;  %v10053_v49 = vld [vmem:[%s11242_s4] sm:$0xff] }
 0x369   : > { %v10027_v29 = vmul.f32 %v3592_v53, %v9659_v35  ;;  %v3697_v10 = vmul.f32 %v9897_v13, %v11769_v61  ;;  %v3727_v7 = vadd.f32 %v3726_v63, %v3696_v22  ;;  %v3636_v38 = vor.u32 1.1754944e-38, %v3635_v32  ;;  %v11771_v35 = vld [vmem:[#allocation72_spill] sm:$0xff]  ;;  %v5350_v53 = vld [vmem:[%s11246_s8 + $0x8] sm:$0xff] }
 0x36a   : > { %v3622_v50 = vsel %vm3619_vm1, %v3621_v42, %v3617_v52  ;;  %vm3634_vm0 = vcmp.eq.f32.partialorder %v3633_v39, 8.507059e+37  ;;  %v10032_v60 = vmul.f32 %v3607_v21, %v9671_v14  ;;  %v3698_v9 = vmul.f32 %v10017_v37, %v11770_v3  ;;  %3870 = vmatpush.bf16.msra.mxu3 %v5350_v53  ;;  %v5349_v39 = vld [vmem:[%s11246_s8] sm:$0xff] }
 0x36b   : > { %v3728_v5 = vadd.f32 %v3727_v7, %v3697_v10  ;;  %v3637_v2 = vsel %vm3634_vm0, %v3636_v38, %v3632_v56  ;;  %v10037_v18 = vmul.f32 %v3622_v50, %v9690_v59  ;;  %v3699_v31 = vmul.f32 %v10027_v29, %v11771_v35 }
 0x36c   : > { %v10042_v4 = vmul.f32 %v3637_v2, %v9706_v51  ;;  %v3700_v6 = vmul.f32 %v10032_v60, %v11772_v11  ;;  %v3807_v62 = vrot.slane %v10053_v49, 3  ;;  %v5358_v2 = vld [vmem:[%s11247_s9 + $0x38] sm:$0xff] }
 0x36d   : > { %v3729_v23 = vadd.f32 %v3728_v5, %v3698_v9  ;;  %v3701_v26 = vmul.f32 %v10037_v18, %v11773_v16  ;;  %v3859_v5 = vrot.slane %v10053_v49, 4  ;;  %4010 = vmatpush.bf16.msrb.mxu2 %v5358_v2  ;;  %v5355_v16 = vld [vmem:[%s11247_s9 + $0x20] sm:$0xff] }
 0x36e   : > { %v3702_v27 = vmul.f32 %v10042_v4, %v11774_v40  ;;  %3871 = vmatpush.bf16.msra.mxu3 %v5349_v39  ;;  %v5354_v40 = vld [vmem:[%s11247_s9 + $0x18] sm:$0xff]  ;;  %v11775_v39 = vld [vmem:[#allocation62_spill] sm:$0xff] }
 0x36f   : > { %v3730_v14 = vadd.f32 %v3729_v23, %v3699_v31  ;;  %v5357_v23 = vld [vmem:[%s11247_s9 + $0x30] sm:$0xff] }
 0x371   : > { %v3731_v15 = vadd.f32 %v3730_v14, %v3700_v6  ;;  %4011 = vmatpush.bf16.msrb.mxu2 %v5357_v23  ;;  %v5356_v6 = vld [vmem:[%s11247_s9 + $0x28] sm:$0xff] }
 0x372   : > { %5365 = vmatpush.bf16.msrb.mxu3 %v5358_v2  ;;  %v11782_v2 = vld [vmem:[#allocation63_spill] sm:$0xff] }
 0x373   : > { %v3732_v59 = vadd.f32 %v3731_v15, %v3701_v26 }
 0x375   : > { %v3733_v48 = vadd.f32 %v3732_v59, %v3702_v27  ;;  %4012 = vmatpush.bf16.msrb.mxu2 %v5356_v6  ;;  %v5353_v27 = vld [vmem:[%s11247_s9 + $0x10] sm:$0xff] }
 0x376   : > { %5366 = vmatpush.bf16.msrb.mxu3 %v5357_v23 }
 0x377   : > { %v3734_v41 = vrot.slane %v3733_v48, 4 }
 0x379   : > { %v3735_v25 = vadd.f32 %v3734_v41, %v3733_v48  ;;  %4013 = vmatpush.bf16.msrb.mxu2 %v5355_v16  ;;  %v5352_v41 = vld [vmem:[%s11247_s9 + $0x8] sm:$0xff] }
 0x37a   : > { %5367 = vmatpush.bf16.msrb.mxu3 %v5356_v6  ;;  %v11784_v6 = vld [vmem:[#allocation58_spill] sm:$0xff] }
 0x37b   : > { %v3736_v54 = vrot.slane %v3735_v25, 2 }
 0x37d   : > { %v3737_v20 = vadd.f32 %v3736_v54, %v3735_v25  ;;  %4014 = vmatpush.bf16.msrb.mxu2 %v5354_v40 }
 0x37e   : > { %5368 = vmatpush.bf16.msrb.mxu3 %v5355_v16  ;;  %v11785_v16 = vld [vmem:[#allocation75_spill] sm:$0xff] }
 0x37f   : > { %v3738_v58 = vrot.slane %v3737_v20, 1 }
 0x381   : > { %v3739_v51 = vadd.f32 %v3738_v58, %v3737_v20  ;;  %4015 = vmatpush.bf16.msrb.mxu2 %v5353_v27 }
 0x382   : > { %5369 = vmatpush.bf16.msrb.mxu3 %v5354_v40  ;;  %v11786_v40 = vld [vmem:[#allocation65_spill] sm:$0xff] }
 0x383   : > { %v3740_v1 = vmul.f32 0.0051020407, %v3739_v51  ;;  %v5351_v51 = vld [vmem:[%s11247_s9] sm:$0xff] }
 0x385   : > { %v3741_v45 = vpack.c.bf16 %v3740_v1, %v3740_v1  ;;  %4016 = vmatpush.bf16.msrb.mxu2 %v5352_v41 }
 0x386   : > { %5370 = vmatpush.bf16.msrb.mxu3 %v5353_v27 }
 0x387   : > { %3817 = vmatmul.bf16.vlgmr.msra.gmra.mxu2 %v3741_v45 }
 0x389   : > { %4017 = vmatpush.bf16.msrb.mxu2 %v5351_v51 }
 0x38a   : > { %5371 = vmatpush.bf16.msrb.mxu3 %v5352_v41 }
 0x38e   : > { %5372 = vmatpush.bf16.msrb.mxu3 %v5351_v51 }
 0x40a   : > { %v3818_v43 = vpop.f32.mrf.mxu2 }
 0x40b   : > { %v3819_v17 = vadd.f32 %v3818_v43, %v3807_v62 }
 0x40d   : > { %v5218_v44 = vmul.f32 -1.442695, %v3819_v17 }
 0x40f   : > { %5770 = vpow2.f32 %v5218_v44 }
 0x412   : > { %v3820_v32 = vpop.f32.mrf.mxu2 }
 0x415   : > { %v5771_v52 = vpop.eup %5770 }
 0x416   : > { %v3825_v19 = vadd.f32 1.0, %v5771_v52  ;;  %v11776_v52 = vld [vmem:[#allocation9_spill] sm:$0xff] }
 0x418   : > { %5772 = vrcp.f32 %v3825_v19  ;;  %v3837_v42 = vand.u32 2147483648, %v3825_v19  ;;  %v3835_v61 = vand.u32 2147483647, %v3825_v19  ;;  %vm3831_vm12 = vweird.f32 %v3825_v19 }
 0x41a   : > { %v3838_v7 = vor.u32 1.1754944e-38, %v3837_v42  ;;  %vm3836_vm14 = vcmp.eq.f32.partialorder %v3835_v61, 8.507059e+37  ;;  %v11777_v42 = vld [vmem:[#allocation61_spill] sm:$0xff] }
 0x41e   : > { %v5773_v22 = vpop.eup %5772 }
 0x41f   : > { %v3827_v63 = vmul.f32 %v5773_v22, %v3825_v19  ;;  %vm3832_vm7 = vweird.f32 %v5773_v22 }
 0x420   : > { %vm3833_vm13 = vmor %vm3831_vm12, %vm3832_vm7 }
 0x421   : > { %v3828_v21 = vsub.f32 1.0, %v3827_v63 }
 0x423   : > { %v3829_v56 = vmul.f32 %v5773_v22, %v3828_v21 }
 0x425   : > { %v3830_v10 = vadd.f32 %v5773_v22, %v3829_v56 }
 0x427   : > { %v3834_v50 = vsel %vm3833_vm13, %v5773_v22, %v3830_v10 }
 0x428   : > { %v3839_v38 = vsel %vm3836_vm14, %v3838_v7, %v3834_v50 }
 0x429   : > { %v3841_v3 = vmul.f32 %v3839_v38, %v3819_v17  ;;  %v11780_v38 = vld [vmem:[#allocation74_spill] sm:$0xff] }
 0x42b   : > { %v3842_v9 = vpack.c.bf16 %v3841_v3, %v3841_v3 }
 0x42d   : > { %5227 = vmatmul.msk.bf16.vlgmr.msra.gmra.mxu3 %vm1343_vm9, %v3842_v9  ;;  %v11781_v9 = vld [vmem:[#allocation19_spill] sm:$0xff] }
 0x4b0   : > { %v3873_v35 = vpop.f32.mrf.mxu3 }
 0x4b1   : > { %v3874_v31 = vadd.f32 %v3873_v35, %v3859_v5 }
 0x4b3   : > { %v5228_v11 = vmul.f32 -1.442695, %v3874_v31  ;;  %v11783_v31 = vld [vmem:[#allocation22_spill] sm:$0xff] }
 0x4b5   : > { %5774 = vpow2.f32 %v5228_v11 }
 0x4b8   : > { %v3875_v14 = vpop.f32.mrf.mxu3 }
 0x4bb   : > { %v5775_v26 = vpop.eup %5774 }
 0x4bc   : > { %v3880_v15 = vadd.f32 1.0, %v5775_v26 }
 0x4be   : > { %5776 = vrcp.f32 %v3880_v15  ;;  %v3892_v54 = vand.u32 2147483648, %v3880_v15  ;;  %v3890_v58 = vand.u32 2147483647, %v3880_v15  ;;  %vm3886_vm15 = vweird.f32 %v3880_v15 }
 0x4c0   : > { %v3893_v45 = vor.u32 1.1754944e-38, %v3892_v54  ;;  %vm3891_vm3 = vcmp.eq.f32.partialorder %v3890_v58, 8.507059e+37 }
 0x4c4   : > { %v5777_v59 = vpop.eup %5776 }
 0x4c5   : > { %v3882_v48 = vmul.f32 %v5777_v59, %v3880_v15  ;;  %vm3887_vm9 = vweird.f32 %v5777_v59 }
 0x4c6   : > { %vm3888_vm2 = vmor %vm3886_vm15, %vm3887_vm9 }
 0x4c7   : > { %v3883_v25 = vsub.f32 1.0, %v3882_v48 }
 0x4c9   : > { %v3884_v20 = vmul.f32 %v5777_v59, %v3883_v25 }
 0x4cb   : > { %v3885_v1 = vadd.f32 %v5777_v59, %v3884_v20 }
 0x4cd   : > { %v3889_v62 = vsel %vm3888_vm2, %v5777_v59, %v3885_v1  ;;  %v11787_v59 = vld [vmem:[#allocation37_spill] sm:$0xff] }
 0x4ce   : > { %v3894_v43 = vsel %vm3891_vm3, %v3893_v45, %v3889_v62 }
 0x4cf   : > { %v10088_v17 = vperm.slane %v3894_v43, 0 }
 0x4d1   : > { %v3897_v53 = vmul.f32 %v10088_v17, %v9589_v47  ;;  %v3898_v44 = vmul.f32 %v10088_v17, %v9614_v24  ;;  %v3901_v32 = vmul.f32 %v10088_v17, %v11775_v39  ;;  %v3902_v19 = vmul.f32 %v10088_v17, %v11776_v52  ;;  %v11778_v47 = vld [vmem:[#allocation67_spill] sm:$0xff]  ;;  %v11779_v24 = vld [vmem:[#allocation68_spill] sm:$0xff] }
 0x4d2   : > { %v3899_v21 = vmul.f32 %v10088_v17, %v9626_v28  ;;  %v3900_v56 = vmul.f32 %v10088_v17, %v11777_v42  ;;  %v3903_v61 = vmul.f32 %v10088_v17, %v11778_v47  ;;  %v3904_v10 = vmul.f32 %v10088_v17, %v11779_v24 }
 0x4d3   : > { %v3929_v22 = vpack.c.bf16 %v3898_v44, %v3897_v53  ;;  %v3931_v63 = vpack.c.bf16 %v3902_v19, %v3901_v32  ;;  %v3905_v3 = vmul.f32 %v10088_v17, %v11780_v38  ;;  %v3906_v5 = vmul.f32 %v10088_v17, %v11781_v9 }
 0x4d4   : > { %v3930_v7 = vpack.c.bf16 %v3900_v56, %v3899_v21  ;;  %v3932_v50 = vpack.c.bf16 %v3904_v10, %v3903_v61  ;;  %v3907_v35 = vmul.f32 %v10088_v17, %v11782_v2  ;;  %v3908_v23 = vmul.f32 %v10088_v17, %v11783_v31 }
 0x4d5   : > { %4018 = vmatmul.bf16.vlgmr.msrb.gmra.mxu2 %v3929_v22  ;;  %4028 = vmatmul.bf16.vlgmr.msrb.gmra.mxu3 %v3931_v63  ;;  %v3933_v28 = vpack.c.bf16 %v3906_v5, %v3905_v3  ;;  %v3909_v14 = vmul.f32 %v10088_v17, %v11784_v6  ;;  %v3910_v26 = vmul.f32 %v10088_v17, %v11785_v16 }
 0x4d6   : > { %v3934_v11 = vpack.c.bf16 %v3908_v23, %v3907_v35  ;;  %v3911_v27 = vmul.f32 %v10088_v17, %v11786_v40  ;;  %v3912_v48 = vmul.f32 %v10088_v17, %v11787_v59  ;;  %v3913_v25 = vmul.f32 %v10088_v17, %v9460_v55 }
 0x4d7   : > { %v3935_v15 = vpack.c.bf16 %v3910_v26, %v3909_v14  ;;  %v3914_v54 = vmul.f32 %v10088_v17, %v9498_v12  ;;  %v3915_v58 = vmul.f32 %v10088_v17, %v9733_v33  ;;  %v3916_v51 = vmul.f32 %v10088_v17, %v9740_v34 }
 0x4d8   : > { %v3936_v41 = vpack.c.bf16 %v3912_v48, %v3911_v27  ;;  %v3917_v45 = vmul.f32 %v10088_v17, %v9745_v0  ;;  %v3918_v62 = vmul.f32 %v10088_v17, %v9780_v57  ;;  %v3919_v53 = vmul.f32 %v10088_v17, %v9867_v36 }
 0x4d9   : > { %v3937_v20 = vpack.c.bf16 %v3914_v54, %v3913_v25  ;;  %v3938_v1 = vpack.c.bf16 %v3916_v51, %v3915_v58  ;;  %v3920_v33 = vmul.f32 %v10088_v17, %v9889_v46  ;;  %v3921_v0 = vmul.f32 %v10088_v17, %v9954_v8 }
 0x4da   : > { %v3939_v55 = vpack.c.bf16 %v3918_v62, %v3917_v45  ;;  %v3922_v57 = vmul.f32 %v10088_v17, %v9973_v30  ;;  %v10143_v36 = vperm.slane %v10053_v49, 5  ;;  %v3923_v21 = vmul.f32 %v10088_v17, %v9897_v13 }
 0x4db   : > { %v3940_v44 = vpack.c.bf16 %v3920_v33, %v3919_v53  ;;  %v3924_v8 = vmul.f32 %v10088_v17, %v10017_v37  ;;  %v3925_v2 = vmul.f32 %v10088_v17, %v10027_v29  ;;  %v3926_v35 = vmul.f32 %v10088_v17, %v10032_v60 }
 0x4dc   : > { %v3941_v19 = vpack.c.bf16 %v3922_v57, %v3921_v0  ;;  %11788 = vst [vmem:[#allocation38_spill] sm:$0xff] %v10143_v36 }
 0x4dd   : > { %v3942_v61 = vpack.c.bf16 %v3924_v8, %v3923_v21  ;;  %v3943_v40 = vpack.c.bf16 %v3926_v35, %v3925_v2 }
 0x4e5   : > { %4023 = vmatmul.bf16.gmra.mxu2 %v3930_v7  ;;  %4033 = vmatmul.bf16.gmra.mxu3 %v3932_v50 }
 0x4f5   : > { %4038 = vmatmul.bf16.gmra.mxu3 %v3933_v28 }
 0x505   : > { %4043 = vmatmul.bf16.gmra.mxu3 %v3934_v11 }
 0x515   : > { %4048 = vmatmul.bf16.gmra.mxu3 %v3935_v15 }
 0x525   : > { %4053 = vmatmul.bf16.gmra.mxu3 %v3936_v41 }
 0x535   : > { %4058 = vmatmul.bf16.gmra.mxu3 %v3937_v20 }
 0x545   : > { %4063 = vmatmul.bf16.gmra.mxu3 %v3938_v1 }
 0x555   : > { %4068 = vmatmul.bf16.gmra.mxu3 %v3939_v55 }
 0x558   : > { %v4029_v43 = vpop.f32.mrf.mxu3  ;;  %v4019_v32 = vpop.f32.mrf.mxu2 }
 0x559   : > { %v10146_v46 = vadd.f32 %v4019_v32, %v10143_v36  ;;  %v10154_v30 = vadd.f32 %v4029_v43, %v10143_v36 }
 0x55b   : > { %11789 = vst [vmem:[#allocation47_spill] sm:$0xff] %v10146_v46  ;;  %v5261_v56 = vmul.f32 -1.442695, %v10146_v46  ;;  %v5265_v49 = vmul.f32 -1.442695, %v10154_v30 }
 0x55c   : > { %11790 = vst [vmem:[#allocation48_spill] sm:$0xff] %v10154_v30 }
 0x55d   : > { %5778 = vpow2.f32 %v5261_v56 }
 0x55e   : > { %5780 = vpow2.f32 %v5265_v49 }
 0x560   : > { %v4031_v12 = vpop.f32.mrf.mxu3  ;;  %v4021_v63 = vpop.f32.mrf.mxu2 }
 0x561   : > { %v10158_v10 = vadd.f32 %v4021_v63, %v10143_v36  ;;  %v10161_v13 = vadd.f32 %v4031_v12, %v10143_v36  ;;  %v3928_v63 = vmul.f32 %v10088_v17, %v10042_v4 }
 0x563   : > { %11791 = vst [vmem:[#allocation45_spill] sm:$0xff] %v10158_v10  ;;  %v5779_v37 = vpop.eup %5778  ;;  %v5262_v50 = vmul.f32 -1.442695, %v10158_v10  ;;  %v5266_v9 = vmul.f32 -1.442695, %v10161_v13 }
 0x564   : > { %11792 = vst [vmem:[#allocation49_spill] sm:$0xff] %v10161_v13  ;;  %v10174_v28 = vadd.f32 1.0, %v5779_v37  ;;  %v5781_v23 = vpop.eup %5780 }
 0x565   : > { %4073 = vmatmul.bf16.gmra.mxu3 %v3940_v44  ;;  %5782 = vpow2.f32 %v5262_v50  ;;  %v10193_v60 = vadd.f32 1.0, %v5781_v23 }
 0x566   : > { %11796 = vst [vmem:[#allocation50_spill] sm:$0xff] %v10174_v28  ;;  %5784 = vpow2.f32 %v5266_v9 }
 0x567   : > { %5786 = vrcp.f32 %v10174_v28  ;;  %vm4292_vm6 = vweird.f32 %v10193_v60 }
 0x568   : > { %v4034_v34 = vpop.f32.mrf.mxu3  ;;  %v4024_v47 = vpop.f32.mrf.mxu2 }
 0x569   : > { %v10164_v7 = vadd.f32 %v4034_v34, %v10143_v36  ;;  %v10168_v38 = vadd.f32 %v4024_v47, %v10143_v36 }
 0x56b   : > { %11793 = vst [vmem:[#allocation52_spill] sm:$0xff] %v10164_v7  ;;  %v5267_v11 = vmul.f32 -1.442695, %v10164_v7  ;;  %v5263_v14 = vmul.f32 -1.442695, %v10168_v38  ;;  %v5783_v54 = vpop.eup %5782 }
 0x56c   : > { %11794 = vst [vmem:[#allocation46_spill] sm:$0xff] %v10168_v38  ;;  %v5785_v51 = vpop.eup %5784  ;;  %v10219_v34 = vadd.f32 1.0, %v5783_v54 }
 0x56d   : > { %5788 = vpow2.f32 %v5267_v11  ;;  %v10212_v45 = vpop.eup %5786  ;;  %v10217_v33 = vadd.f32 1.0, %v5785_v51 }
 0x56e   : > { %5790 = vpow2.f32 %v5263_v14  ;;  %11799 = vst [vmem:[#allocation42_spill] sm:$0xff] %v10219_v34 }
 0x56f   : > { %vm4307_vm2 = vweird.f32 %v10217_v33 }
 0x570   : > { %v4036_v39 = vpop.f32.mrf.mxu3  ;;  %v4026_v3 = vpop.f32.mrf.mxu2 }
 0x571   : > { %v10172_v5 = vadd.f32 %v4036_v39, %v10143_v36  ;;  %v10182_v6 = vadd.f32 %v4026_v3, %v10143_v36 }
 0x573   : > { %11795 = vst [vmem:[#allocation39_spill] sm:$0xff] %v10172_v5  ;;  %v5268_v26 = vmul.f32 -1.442695, %v10172_v5  ;;  %v5264_v27 = vmul.f32 -1.442695, %v10182_v6  ;;  %v5789_v55 = vpop.eup %5788 }
 0x574   : > { %11797 = vst [vmem:[#allocation53_spill] sm:$0xff] %v10182_v6  ;;  %v5791_v53 = vpop.eup %5790  ;;  %v10223_v32 = vadd.f32 1.0, %v5789_v55 }
 0x575   : > { %4078 = vmatmul.bf16.gmra.mxu3 %v3941_v19  ;;  %5792 = vpow2.f32 %v5268_v26 }
 0x576   : > { %5794 = vrcp.f32 %v10193_v60 }
 0x577   : > { %5796 = vpow2.f32 %v5264_v27 }
 0x578   : > { %v4039_v52 = vpop.f32.mrf.mxu3 }
 0x579   : > { %v10186_v16 = vadd.f32 %v4039_v52, %v10143_v36  ;;  %v10225_v52 = vadd.f32 1.0, %v5791_v53 }
 0x57b   : > { %11798 = vst [vmem:[#allocation43_spill] sm:$0xff] %v10186_v16  ;;  %v5269_v59 = vmul.f32 -1.442695, %v10186_v16  ;;  %v5793_v44 = vpop.eup %5792 }
 0x57c   : > { %v10221_v39 = vpop.eup %5794  ;;  %11800 = vst [vmem:[#allocation13_spill] sm:$0xff] %v10225_v52  ;;  %v10228_v19 = vadd.f32 1.0, %v5793_v44 }
 0x57d   : > { %5798 = vpow2.f32 %v5269_v59  ;;  %v5797_v0 = vpop.eup %5796  ;;  %vm4293_vm4 = vweird.f32 %v10221_v39 }
 0x57e   : > { %vm10317_vm8 = vmor %vm4292_vm6, %vm4293_vm4 }
 0x580   : > { %v4041_v22 = vpop.f32.mrf.mxu3 }
 0x581   : > { %v10190_v29 = vadd.f32 %v4041_v22, %v10143_v36  ;;  %v3927_v22 = vmul.f32 %v10088_v17, %v10037_v18 }
 0x583   : > { %v5270_v41 = vmul.f32 -1.442695, %v10190_v29  ;;  %v5799_v57 = vpop.eup %5798  ;;  %v3944_v37 = vpack.c.bf16 %v3928_v63, %v3927_v22 }
 0x584   : > { %v10244_v18 = vadd.f32 1.0, %v5799_v57  ;;  %v4313_v57 = vand.u32 2147483648, %v10217_v33 }
 0x585   : > { %4083 = vmatmul.bf16.gmra.mxu3 %v3942_v61  ;;  %5800 = vpow2.f32 %v5270_v41  ;;  %v10241_v61 = vadd.f32 1.0, %v5797_v0 }
 0x587   : > { %11801 = vst [vmem:[#allocation15_spill] sm:$0xff] %v10241_v61 }
 0x588   : > { %v4044_v42 = vpop.f32.mrf.mxu3 }
 0x589   : > { %v10196_v15 = vadd.f32 %v4044_v42, %v10143_v36  ;;  %v4288_v42 = vmul.f32 %v10221_v39, %v10193_v60 }
 0x58b   : > { %v5271_v20 = vmul.f32 -1.442695, %v10196_v15  ;;  %v5801_v8 = vpop.eup %5800  ;;  %v4289_v3 = vsub.f32 1.0, %v4288_v42 }
 0x58d   : > { %5802 = vpow2.f32 %v5271_v20  ;;  %v4290_v27 = vmul.f32 %v10221_v39, %v4289_v3 }
 0x58f   : > { %v10297_v44 = vadd.f32 %v10221_v39, %v4290_v27 }
 0x590   : > { %v4046_v24 = vpop.f32.mrf.mxu3 }
 0x591   : > { %v10205_v25 = vadd.f32 %v4046_v24, %v10143_v36  ;;  %v10248_v24 = vadd.f32 1.0, %v5801_v8 }
 0x593   : > { %v5272_v43 = vmul.f32 -1.442695, %v10205_v25  ;;  %v5803_v47 = vpop.eup %5802 }
 0x594   : > { %v10250_v9 = vadd.f32 1.0, %v5803_v47 }
 0x595   : > { %4088 = vmatmul.bf16.gmra.mxu3 %v3943_v40 }
 0x596   : > { %vm4382_vm9 = vweird.f32 %v10250_v9 }
 0x598   : > { %v4049_v31 = vpop.f32.mrf.mxu3 }
 0x599   : > { %v10201_v48 = vadd.f32 %v4049_v31, %v10143_v36 }
 0x59b   : > { %v5273_v62 = vmul.f32 -1.442695, %v10201_v48 }
 0x5a0   : > { %v4051_v58 = vpop.f32.mrf.mxu3 }
 0x5a1   : > { %v10210_v1 = vadd.f32 %v4051_v58, %v10143_v36  ;;  %v4298_v58 = vand.u32 2147483648, %v10193_v60 }
 0x5a3   : > { %v5274_v12 = vmul.f32 -1.442695, %v10210_v1 }
 0x5a5   : > { %5804 = vpow2.f32 %v5274_v12  ;;  %4093 = vmatmul.bf16.gmra.mxu3 %v3944_v37  ;;  %v10322_v37 = vor.u32 1.1754944e-38, %v4298_v58 }
 0x5a6   : > { %5806 = vpow2.f32 %v5273_v62 }
 0x5a7   : > { %5808 = vpow2.f32 %v5272_v43  ;;  %v10288_v43 = vmul.f32 %v10212_v45, %v10174_v28 }
 0x5a8   : > { %5810 = vrcp.f32 %v10217_v33  ;;  %v4054_v21 = vpop.f32.mrf.mxu3 }
 0x5a9   : > { %5812 = vrcp.f32 %v10219_v34  ;;  %v10238_v56 = vadd.f32 %v4054_v21, %v10143_v36 }
 0x5aa   : > { %5814 = vrcp.f32 %v10223_v32 }
 0x5ab   : > { %v5805_v49 = vpop.eup %5804  ;;  %5816 = vrcp.f32 %v10225_v52  ;;  %v5275_v4 = vmul.f32 -1.442695, %v10238_v56 }
 0x5ac   : > { %v5807_v17 = vpop.eup %5806  ;;  %5818 = vrcp.f32 %v10228_v19  ;;  %v10255_v35 = vadd.f32 1.0, %v5805_v49 }
 0x5ad   : > { %v5809_v50 = vpop.eup %5808  ;;  %5820 = vpow2.f32 %v5275_v4  ;;  %v10260_v23 = vadd.f32 1.0, %v5807_v17 }
 0x5ae   : > { %v10252_v2 = vpop.eup %5810  ;;  %5822 = vrcp.f32 %v10241_v61  ;;  %v10265_v14 = vadd.f32 1.0, %v5809_v50  ;;  %vm4427_vm12 = vweird.f32 %v10255_v35 }
 0x5af   : > { %v10257_v31 = vpop.eup %5812  ;;  %5824 = vrcp.f32 %v10244_v18  ;;  %v4303_v59 = vmul.f32 %v10252_v2, %v10217_v33  ;;  %vm4412_vm10 = vweird.f32 %v10260_v23  ;;  %vm4308_vm0 = vweird.f32 %v10252_v2 }
 0x5b0   : > { %11802 = vst [vmem:[#allocation55_spill] sm:$0xff] %v10257_v31  ;;  %v10262_v11 = vpop.eup %5814  ;;  %5826 = vrcp.f32 %v10248_v24  ;;  %v4056_v26 = vpop.f32.mrf.mxu3  ;;  %v10304_v63 = vmul.f32 %v10257_v31, %v10219_v34  ;;  %vm4397_vm1 = vweird.f32 %v10265_v14 }
 0x5b1   : > { %v10267_v40 = vpop.eup %5816  ;;  %5828 = vrcp.f32 %v10250_v9  ;;  %v10274_v41 = vadd.f32 %v4056_v26, %v10143_v36  ;;  %v4318_v51 = vmul.f32 %v10262_v11, %v10223_v32  ;;  %v4304_v0 = vsub.f32 1.0, %v4303_v59 }
 0x5b2   : > { %v10276_v54 = vpop.eup %5818  ;;  %5830 = vrcp.f32 %v10255_v35  ;;  %11803 = vst [vmem:[#allocation54_spill] sm:$0xff] %v10304_v63 }
 0x5b3   : > { %v5821_v20 = vpop.eup %5820  ;;  %5832 = vrcp.f32 %v10260_v23  ;;  %v5276_v62 = vmul.f32 -1.442695, %v10274_v41  ;;  %v4333_v21 = vmul.f32 %v10276_v54, %v10228_v19  ;;  %v4319_v42 = vsub.f32 1.0, %v4318_v51 }
 0x5b4   : > { %v10284_v55 = vpop.eup %5822  ;;  %5834 = vrcp.f32 %v10265_v14  ;;  %v10292_v12 = vadd.f32 1.0, %v5821_v20  ;;  %v4305_v59 = vmul.f32 %v10252_v2, %v4304_v0  ;;  %v10334_v20 = vor.u32 1.1754944e-38, %v4313_v57 }
 0x5b5   : > { %v10294_v53 = vpop.eup %5824  ;;  %5836 = vpow2.f32 %v5276_v62  ;;  %v10338_v51 = vmul.f32 %v10267_v40, %v10225_v52  ;;  %v4334_v17 = vsub.f32 1.0, %v4333_v21  ;;  %v4320_v27 = vmul.f32 %v10262_v11, %v4319_v42 }
 0x5b6   : > { %v10300_v22 = vpop.eup %5826  ;;  %5838 = vrcp.f32 %v10292_v12  ;;  %v4348_v50 = vmul.f32 %v10294_v53, %v10244_v18  ;;  %v10356_v62 = vmul.f32 %v10284_v55, %v10241_v61  ;;  %v10365_v0 = vadd.f32 %v10252_v2, %v4305_v59 }
 0x5b7   : > { %v10309_v8 = vpop.eup %5828  ;;  %v4363_v57 = vmul.f32 %v10300_v22, %v10248_v24  ;;  %v4335_v28 = vmul.f32 %v10276_v54, %v4334_v17  ;;  %vm4442_vm15 = vweird.f32 %v10292_v12 }
 0x5b8   : > { %v10312_v47 = vpop.eup %5830  ;;  %v10325_v3 = vpop.f32.mrf.mxu3  ;;  %v4378_v21 = vmul.f32 %v10309_v8, %v10250_v9  ;;  %v4349_v52 = vsub.f32 1.0, %v4348_v50  ;;  %vm4383_vm11 = vweird.f32 %v10309_v8 }
 0x5b9   : > { %11806 = vst [vmem:[#allocation10_spill] sm:$0xff] %v10325_v3  ;;  %v10327_v26 = vpop.eup %5832  ;;  %v4423_v36 = vmul.f32 %v10312_v47, %v10255_v35  ;;  %v4364_v59 = vsub.f32 1.0, %v4363_v57  ;;  %vm4428_vm13 = vweird.f32 %v10312_v47  ;;  %v4433_v57 = vand.u32 2147483648, %v10255_v35 }
 0x5ba   : > { %v10340_v58 = vpop.eup %5834  ;;  %v4408_v42 = vmul.f32 %v10327_v26, %v10260_v23  ;;  %v4379_v13 = vsub.f32 1.0, %v4378_v21  ;;  %vm4413_vm7 = vweird.f32 %v10327_v26  ;;  %vm10449_vm6 = vmor %vm4427_vm12, %vm4428_vm13 }
 0x5bb   : > { %v5837_v3 = vpop.eup %5836  ;;  %v4393_v38 = vmul.f32 %v10340_v58, %v10265_v14  ;;  %v4424_v30 = vsub.f32 1.0, %v4423_v36  ;;  %v10389_v36 = vmul.f32 %v10294_v53, %v4349_v52  ;;  %v4365_v21 = vmul.f32 %v10300_v22, %v4364_v59 }
 0x5bc   : > { %v10352_v46 = vpop.eup %5838  ;;  %v10362_v49 = vadd.f32 1.0, %v5837_v3  ;;  %v10376_v3 = vadd.f32 %v10262_v11, %v4320_v27  ;;  %v4409_v16 = vsub.f32 1.0, %v4408_v42  ;;  %v10386_v27 = vadd.f32 %v10276_v54, %v4335_v28 }
 0x5bd   : > { %v4438_v6 = vmul.f32 %v10352_v46, %v10292_v12  ;;  %v4394_v34 = vsub.f32 1.0, %v4393_v38  ;;  %v4425_v38 = vmul.f32 %v10312_v47, %v4424_v30  ;;  %v4416_v52 = vand.u32 2147483647, %v10260_v23 }
 0x5be   : > { %5840 = vrcp.f32 %v10362_v49  ;;  %v4410_v28 = vmul.f32 %v10327_v26, %v4409_v16  ;;  %vm4443_vm5 = vweird.f32 %v10352_v46  ;;  %v4461_v10 = vand.u32 2147483647, %v10362_v49 }
 0x5bf   : > { %v4439_v7 = vsub.f32 1.0, %v4438_v6  ;;  %v4395_v59 = vmul.f32 %v10340_v58, %v4394_v34  ;;  %v4426_v16 = vadd.f32 %v10312_v47, %v4425_v38  ;;  %v4446_v34 = vand.u32 2147483647, %v10292_v12  ;;  %vm10427_vm4 = vmor %vm4442_vm15, %vm4443_vm5 }
 0x5c0   : > { %v10380_v5 = vpop.f32.mrf.mxu3  ;;  %v4411_v17 = vadd.f32 %v10327_v26, %v4410_v28  ;;  %v4431_v6 = vand.u32 2147483647, %v10255_v35  ;;  %v4463_v38 = vand.u32 2147483648, %v10362_v49  ;;  %vm4398_vm15 = vweird.f32 %v10340_v58  ;;  %vm10458_vm5 = vmor %vm4412_vm10, %vm4413_vm7 }
 0x5c1   : > { %11807 = vst [vmem:[#allocation14_spill] sm:$0xff] %v10380_v5  ;;  %v4440_v31 = vmul.f32 %v10352_v46, %v4439_v7  ;;  %v4380_v7 = vmul.f32 %v10309_v8, %v4379_v13  ;;  %v4448_v13 = vand.u32 2147483648, %v10292_v12  ;;  %v4396_v5 = vadd.f32 %v10340_v58, %v4395_v59 }
 0x5c2   : > { %v4430_v59 = vsel %vm10449_vm6, %v10312_v47, %v4426_v16  ;;  %vm4447_vm14 = vcmp.eq.f32.partialorder %v4446_v34, 8.507059e+37  ;;  %vm4457_vm12 = vweird.f32 %v10362_v49  ;;  %vm4322_vm10 = vweird.f32 %v10223_v32 }
 0x5c3   : > { %v4441_v50 = vadd.f32 %v10352_v46, %v4440_v31  ;;  %vm4432_vm7 = vcmp.eq.f32.partialorder %v4431_v6, 8.507059e+37  ;;  %vm4462_vm6 = vcmp.eq.f32.partialorder %v4461_v10, 8.507059e+37 }
 0x5c4   : > { %v10397_v61 = vpop.eup %5840 }
 0x5c5   : > { %v4453_v30 = vmul.f32 %v10397_v61, %v10362_v49  ;;  %v4445_v28 = vsel %vm10427_vm4, %v10352_v46, %v4441_v50  ;;  %vm4458_vm3 = vweird.f32 %v10397_v61  ;;  %v4449_v50 = vor.u32 1.1754944e-38, %v4448_v13 }
 0x5c6   : > { %vm4323_vm4 = vweird.f32 %v10262_v11  ;;  %v4381_v13 = vadd.f32 %v10309_v8, %v4380_v7  ;;  %vm4459_vm13 = vmor %vm4457_vm12, %vm4458_vm3  ;;  %v4415_v46 = vsel %vm10458_vm5, %v10327_v26, %v4411_v17  ;;  %v4366_v49 = vadd.f32 %v10300_v22, %v4365_v21 }
 0x5c7   : > { %v4454_v31 = vsub.f32 1.0, %v4453_v30  ;;  %v4450_v63 = vsel %vm4447_vm14, %v4449_v50, %v4445_v28  ;;  %vm10480_vm14 = vmor %vm4397_vm1, %vm4398_vm15  ;;  %vm4417_vm3 = vcmp.eq.f32.partialorder %v4416_v52, 8.507059e+37  ;;  %v11817_v17 = vand.u32 2147483647, %v10217_v33 }
 0x5c8   : > { %v10432_v12 = vpop.f32.mrf.mxu3  ;;  %v4400_v26 = vsel %vm10480_vm14, %v10340_v58, %v4396_v5  ;;  %v4721_v10 = vmul.f32 %v4450_v63, %v10238_v56  ;;  %v4351_v21 = vadd.f32 %v10294_v53, %v10389_v36  ;;  %vm4353_vm1 = vweird.f32 %v10294_v53  ;;  %vm10502_vm15 = vmor %vm4382_vm9, %vm4383_vm11 }
 0x5c9   : > { %11810 = vst [vmem:[#allocation69_spill] sm:$0xff] %v10432_v12  ;;  %v4455_v30 = vmul.f32 %v10397_v61, %v4454_v31  ;;  %v4418_v12 = vand.u32 2147483648, %v10260_v23  ;;  %v4434_v31 = vor.u32 1.1754944e-38, %v4433_v57  ;;  %v4464_v23 = vor.u32 1.1754944e-38, %v4463_v38  ;;  %vm10520_vm11 = vmor %vm4307_vm2, %vm4308_vm0 }
 0x5ca   : > { %vm10491_vm5 = vcmp.eq.f32.partialorder %v11817_v17, 8.507059e+37  ;;  %v11822_v56 = vand.u32 2147483648, %v10265_v14  ;;  %v11823_v52 = vand.u32 2147483647, %v10193_v60  ;;  %v11828_v28 = vand.u32 2147483647, %v10265_v14 }
 0x5cb   : > { %v4456_v35 = vadd.f32 %v10397_v61, %v4455_v30  ;;  %v4419_v7 = vor.u32 1.1754944e-38, %v4418_v12  ;;  %v4435_v16 = vsel %vm4432_vm7, %v4434_v31, %v4430_v59  ;;  %v4385_v12 = vsel %vm10502_vm15, %v10309_v8, %v4381_v13 }
 0x5cc   : > { %vm10512_vm12 = vcmp.eq.f32.partialorder %v11823_v52, 8.507059e+37  ;;  %vm4402_vm9 = vcmp.eq.f32.partialorder %v11828_v28, 8.507059e+37  ;;  %v4720_v60 = vmul.f32 %v4435_v16, %v10210_v1  ;;  %v4358_v50 = vand.u32 2147483648, %v10244_v18  ;;  %v11855_v52 = vld [vmem:[#allocation55_spill] sm:$0xff] }
 0x5cd   : > { %v4460_v47 = vsel %vm4459_vm13, %v10397_v61, %v4456_v35  ;;  %v4420_v63 = vsel %vm4417_vm3, %v4419_v7, %v4415_v46  ;;  %vm4352_vm13 = vweird.f32 %v10244_v18  ;;  %vm11829_vm7 = vweird.f32 %v10300_v22 }
 0x5ce   : > { %v4465_v34 = vsel %vm4462_vm6, %v4464_v23, %v4460_v47  ;;  %vm11830_vm0 = vweird.f32 %v10248_v24  ;;  %v11833_v8 = vand.u32 2147483648, %v10250_v9  ;;  %vm11834_vm6 = vweird.f32 %v10276_v54 }
 0x5cf   : > { %v4722_v61 = vmul.f32 %v4465_v34, %v10274_v41  ;;  %v4404_v41 = vor.u32 1.1754944e-38, %v11822_v56  ;;  %vm10536_vm2 = vmor %vm11830_vm0, %vm11829_vm7  ;;  %vm11835_vm14 = vweird.f32 %v10228_v19  ;;  %v4356_v59 = vand.u32 2147483647, %v10244_v18 }
 0x5d0   : > { %v10508_v58 = vpop.f32.mrf.mxu3  ;;  %v4389_v42 = vor.u32 1.1754944e-38, %v11833_v8  ;;  %vm10546_vm3 = vmor %vm11835_vm14, %vm11834_vm6  ;;  %v4370_v35 = vsel %vm10536_vm2, %v10300_v22, %v4366_v49  ;;  %v11838_v13 = vand.u32 2147483647, %v10250_v9  ;;  %v4719_v31 = vmul.f32 %v4420_v63, %v10201_v48 }
 0x5d1   : > { %v4753_v30 = vpack.c.bf16 %v4722_v61, %v4721_v10  ;;  %v4405_v14 = vsel %vm4402_vm9, %v4404_v41, %v4400_v26  ;;  %v4310_v23 = vsel %vm10520_vm11, %v10252_v2, %v10365_v0  ;;  %vm10563_vm9 = vmor %vm4352_vm13, %vm4353_vm1  ;;  %v11841_v18 = vand.u32 2147483647, %v10248_v24 }
 0x5d2   : > { %vm4387_vm15 = vcmp.eq.f32.partialorder %v11838_v13, 8.507059e+37  ;;  %v11842_v9 = vand.u32 2147483648, %v10248_v24  ;;  %v4340_v48 = vsel %vm10546_vm3, %v10276_v54, %v10386_v27  ;;  %v4355_v2 = vsel %vm10563_vm9, %v10294_v53, %v4351_v21  ;;  %vm10583_vm1 = vmor %vm4322_vm10, %vm4323_vm4  ;;  %v11868_v24 = vld [vmem:[#allocation50_spill] sm:$0xff] }
 0x5d3   : > { %4799 = vmatpush.bf16.msra.mxu2 %v4753_v30  ;;  %vm4372_vm7 = vcmp.eq.f32.partialorder %v11841_v18, 8.507059e+37  ;;  %v4390_v47 = vsel %vm4387_vm15, %v4389_v42, %v4385_v12  ;;  %v4718_v0 = vmul.f32 %v4405_v14, %v10205_v25  ;;  %v4752_v49 = vpack.c.bf16 %v4720_v60, %v4719_v31  ;;  %v11857_v60 = vld [vmem:[#allocation43_spill] sm:$0xff]  ;;  %v11858_v30 = vld [vmem:[#allocation49_spill] sm:$0xff]  ;;  %v11861_v14 = vld [vmem:[#allocation48_spill] sm:$0xff] }
 0x5d4   : > { %v4374_v22 = vor.u32 1.1754944e-38, %v11842_v9  ;;  %v11845_v57 = vand.u32 2147483647, %v10228_v19  ;;  %v11846_v54 = vand.u32 2147483648, %v10228_v19  ;;  %v4359_v7 = vor.u32 1.1754944e-38, %v4358_v50  ;;  %v11860_v50 = vld [vmem:[#allocation52_spill] sm:$0xff] }
 0x5d5   : > { %v4325_v25 = vsel %vm10583_vm1, %v10262_v11, %v10376_v3  ;;  %v11847_v53 = vsub.f32 1.0, %v10356_v62  ;;  %vm4357_vm4 = vcmp.eq.f32.partialorder %v4356_v59, 8.507059e+37  ;;  %v4717_v26 = vmul.f32 %v4390_v47, %v10196_v15  ;;  %v11862_v59 = vld [vmem:[#allocation13_spill] sm:$0xff]  ;;  %v11865_v9 = vld [vmem:[#allocation42_spill] sm:$0xff] }
 0x5d6   : > { %vm4342_vm11 = vcmp.eq.f32.partialorder %v11845_v57, 8.507059e+37  ;;  %v4344_v27 = vor.u32 1.1754944e-38, %v11846_v54  ;;  %v4375_v16 = vsel %vm4372_vm7, %v4374_v22, %v4370_v35  ;;  %v11848_v10 = vsub.f32 1.0, %v10338_v51 }
 0x5d7   : > { %v4275_v34 = vmul.f32 %v10284_v55, %v11847_v53  ;;  %4800 = vmatpush.bf16.msra.mxu2 %v4752_v49  ;;  %v11849_v61 = vand.u32 2147483648, %v10223_v32  ;;  %v4360_v5 = vsel %vm4357_vm4, %v4359_v7, %v4355_v2  ;;  %vm4233_vm10 = vweird.f32 %v10212_v45 }
 0x5d8   : > { %v4260_v19 = vmul.f32 %v10267_v40, %v11848_v10  ;;  %v4345_v21 = vsel %vm4342_vm11, %v4344_v27, %v4340_v48  ;;  %v4315_v11 = vsel %vm10491_vm5, %v10334_v20, %v4310_v23  ;;  %v11850_v62 = vand.u32 2147483647, %v10223_v32  ;;  %v10611_v3 = vpop.f32.mrf.mxu3  ;;  %v11853_v32 = vld [vmem:[#allocation54_spill] sm:$0xff]  ;;  %v11871_v10 = vld [vmem:[#allocation53_spill] sm:$0xff] }
 0x5d9   : > { %v4329_v17 = vor.u32 1.1754944e-38, %v11849_v61  ;;  %v4716_v15 = vmul.f32 %v4375_v16, %v10190_v29  ;;  %v4751_v51 = vpack.c.bf16 %v4718_v0, %v4717_v26  ;;  %v11851_v56 = vsub.f32 1.0, %v10288_v43  ;;  %v11856_v43 = vld [vmem:[#allocation39_spill] sm:$0xff] }
 0x5da   : > { %vm4327_vm13 = vcmp.eq.f32.partialorder %v11850_v62, 8.507059e+37  ;;  %v11852_v63 = vsel %vm10317_vm8, %v10221_v39, %v10297_v44  ;;  %v11854_v6 = vsub.f32 1.0, %v11853_v32  ;;  %v4276_v12 = vadd.f32 %v10284_v55, %v4275_v34  ;;  %v11873_v62 = vld [vmem:[#allocation45_spill] sm:$0xff]  ;;  %v11875_v32 = vld [vmem:[#allocation38_spill] sm:$0xff] }
 0x5db   : > { %v4230_v41 = vmul.f32 %v10212_v45, %v11851_v56  ;;  %v4300_v20 = vsel %vm10512_vm12, %v10322_v37, %v11852_v63  ;;  %v4330_v38 = vsel %vm4327_vm13, %v4329_v17, %v4325_v25  ;;  %vm4278_vm5 = vweird.f32 %v10284_v55  ;;  %4801 = vmatpush.bf16.msra.mxu2 %v4751_v51  ;;  %v11859_v37 = vld [vmem:[#allocation15_spill] sm:$0xff] }
 0x5dc   : > { %v4245_v29 = vmul.f32 %v11855_v52, %v11854_v6  ;;  %v4714_v28 = vmul.f32 %v4345_v21, %v11856_v43  ;;  %v4715_v4 = vmul.f32 %v4360_v5, %v11857_v60  ;;  %v4712_v39 = vmul.f32 %v4315_v11, %v11858_v30  ;;  %v11872_v21 = vld [vmem:[#allocation46_spill] sm:$0xff]  ;;  %v11874_v56 = vld [vmem:[#allocation47_spill] sm:$0xff] }
 0x5dd   : > { %v4261_v44 = vadd.f32 %v10267_v40, %v4260_v19  ;;  %vm4263_vm8 = vweird.f32 %v10267_v40  ;;  %v4283_v36 = vand.u32 2147483648, %v11859_v37  ;;  %v4713_v33 = vmul.f32 %v4330_v38, %v11860_v50  ;;  %v11876_v6 = vld [vmem:[#allocation10_spill] sm:$0xff] }
 0x5de   : > { %vm4277_vm12 = vweird.f32 %v11859_v37  ;;  %v4281_v8 = vand.u32 2147483647, %v11859_v37  ;;  %v4750_v42 = vpack.c.bf16 %v4716_v15, %v4715_v4  ;;  %v4711_v1 = vmul.f32 %v4300_v20, %v11861_v14  ;;  %v11877_v38 = vld [vmem:[#allocation14_spill] sm:$0xff] }
 0x5df   : > { %vm4248_vm0 = vweird.f32 %v11855_v52  ;;  %vm4262_vm2 = vweird.f32 %v11862_v59  ;;  %v4268_v35 = vand.u32 2147483648, %v11862_v59  ;;  %vm10644_vm6 = vmor %vm4277_vm12, %vm4278_vm5  ;;  %v4246_v31 = vadd.f32 %v11855_v52, %v4245_v29 }
 0x5e0   : > { %v4266_v23 = vand.u32 2147483647, %v11862_v59  ;;  %v4280_v46 = vsel %vm10644_vm6, %v10284_v55, %v4276_v12  ;;  %4802 = vmatpush.bf16.msra.mxu2 %v4750_v42  ;;  %v4749_v18 = vpack.c.bf16 %v4714_v28, %v4713_v33  ;;  %vm4247_vm14 = vweird.f32 %v11865_v9  ;;  %vm10657_vm3 = vmor %vm4262_vm2, %vm4263_vm8  ;;  %v11878_v28 = vld [vmem:[#allocation69_spill] sm:$0xff] }
 0x5e1   : > { %v4253_v22 = vand.u32 2147483648, %v11865_v9  ;;  %v4284_v48 = vor.u32 1.1754944e-38, %v4283_v36  ;;  %v4748_v2 = vpack.c.bf16 %v4712_v39, %v4711_v1  ;;  %v4231_v0 = vadd.f32 %v10212_v45, %v4230_v41  ;;  %vm10669_vm9 = vmor %vm4247_vm14, %vm4248_vm0 }
 0x5e2   : > { %v4251_v49 = vand.u32 2147483647, %v11865_v9  ;;  %v4265_v55 = vsel %vm10657_vm3, %v10267_v40, %v4261_v44  ;;  %vm4282_vm15 = vcmp.eq.f32.partialorder %v4281_v8, 8.507059e+37  ;;  %v4238_v57 = vand.u32 2147483648, %v11868_v24  ;;  %v4071_v40 = vpop.f32.mrf.mxu3 }
 0x5e3   : > { %v4269_v27 = vor.u32 1.1754944e-38, %v4268_v35  ;;  %v4285_v7 = vsel %vm4282_vm15, %v4284_v48, %v4280_v46  ;;  %vm4232_vm7 = vweird.f32 %v11868_v24  ;;  %v4236_v16 = vand.u32 2147483647, %v11868_v24 }
 0x5e4   : > { %v4250_v25 = vsel %vm10669_vm9, %v11855_v52, %v4246_v31  ;;  %vm4267_vm1 = vcmp.eq.f32.partialorder %v4266_v23, 8.507059e+37  ;;  %4803 = vmatpush.bf16.msra.mxu2 %v4749_v18  ;;  %vm4234_vm11 = vmor %vm4232_vm7, %vm4233_vm10  ;;  %v4254_v53 = vor.u32 1.1754944e-38, %v4253_v22  ;;  %vm4252_vm4 = vcmp.eq.f32.partialorder %v4251_v49, 8.507059e+37 }
 0x5e5   : > { %v4270_v34 = vsel %vm4267_vm1, %v4269_v27, %v4265_v55  ;;  %v4235_v26 = vsel %vm4234_vm11, %v10212_v45, %v4231_v0  ;;  %v4710_v19 = vmul.f32 %v4285_v7, %v11871_v10  ;;  %v4239_v61 = vor.u32 1.1754944e-38, %v4238_v57 }
 0x5e6   : > { %v4255_v17 = vsel %vm4252_vm4, %v4254_v53, %v4250_v25  ;;  %vm4237_vm13 = vcmp.eq.f32.partialorder %v4236_v16, 8.507059e+37  ;;  %v4709_v5 = vmul.f32 %v4270_v34, %v11872_v21  ;;  %v10687_v52 = vadd.f32 %v11876_v6, %v11875_v32 }
 0x5e7   : > { %v4240_v11 = vsel %vm4237_vm13, %v4239_v61, %v4235_v26  ;;  %v4708_v15 = vmul.f32 %v4255_v17, %v11873_v62  ;;  %v10692_v12 = vadd.f32 %v11877_v38, %v11875_v32  ;;  %v10697_v60 = vadd.f32 %v11878_v28, %v11875_v32 }
 0x5e8   : > { %4804 = vmatpush.bf16.msra.mxu2 %v4748_v2  ;;  %v4747_v51 = vpack.c.bf16 %v4710_v19, %v4709_v5  ;;  %v4707_v41 = vmul.f32 %v4240_v11, %v11874_v56  ;;  %v5277_v29 = vmul.f32 -1.442695, %v10687_v52  ;;  %v10702_v50 = vadd.f32 %v10508_v58, %v11875_v32 }
 0x5e9   : > { %v5278_v43 = vmul.f32 -1.442695, %v10692_v12  ;;  %v5279_v30 = vmul.f32 -1.442695, %v10697_v60  ;;  %v10708_v8 = vadd.f32 %v10611_v3, %v11875_v32  ;;  %v10716_v58 = vadd.f32 %v4071_v40, %v11875_v32 }
 0x5ea   : > { %v4074_v63 = vpop.f32.mrf.mxu3  ;;  %v4746_v20 = vpack.c.bf16 %v4708_v15, %v4707_v41  ;;  %5842 = vpow2.f32 %v5277_v29  ;;  %v5280_v14 = vmul.f32 -1.442695, %v10702_v50 }
 0x5eb   : > { %5844 = vpow2.f32 %v5278_v43  ;;  %v5281_v1 = vmul.f32 -1.442695, %v10708_v8  ;;  %v10721_v31 = vadd.f32 %v4074_v63, %v11875_v32  ;;  %v5282_v46 = vmul.f32 -1.442695, %v10716_v58 }
 0x5ec   : > { %4805 = vmatpush.bf16.msra.mxu2 %v4747_v51  ;;  %5846 = vpow2.f32 %v5279_v30 }
 0x5ed   : > { %v5283_v9 = vmul.f32 -1.442695, %v10721_v31 }
 0x5f0   : > { %4806 = vmatpush.bf16.msra.mxu2 %v4746_v20  ;;  %v5843_v39 = vpop.eup %5842 }
 0x5f1   : > { %v4211_v44 = vadd.f32 1.0, %v5843_v39  ;;  %v5845_v36 = vpop.eup %5844 }
 0x5f2   : > { %v4076_v45 = vpop.f32.mrf.mxu3  ;;  %v10704_v33 = vadd.f32 1.0, %v5845_v36  ;;  %v5847_v42 = vpop.eup %5846 }
 0x5f3   : > { %5848 = vrcp.f32 %v4211_v44  ;;  %v10713_v35 = vadd.f32 1.0, %v5847_v42  ;;  %v10724_v3 = vadd.f32 %v4076_v45, %v11875_v32  ;;  %v4476_v25 = vand.u32 2147483647, %v4211_v44 }
 0x5f4   : > { %5850 = vrcp.f32 %v10704_v33  ;;  %v4478_v53 = vand.u32 2147483648, %v4211_v44  ;;  %vm4472_vm5 = vweird.f32 %v4211_v44  ;;  %v4493_v62 = vand.u32 2147483648, %v10704_v33 }
 0x5f5   : > { %5852 = vpow2.f32 %v5280_v14  ;;  %v5284_v22 = vmul.f32 -1.442695, %v10724_v3  ;;  %vm10757_vm8 = vcmp.eq.f32.partialorder %v4476_v25, 8.507059e+37  ;;  %vm4487_vm0 = vweird.f32 %v10704_v33 }
 0x5f6   : > { %5854 = vpow2.f32 %v5281_v1  ;;  %v4479_v41 = vor.u32 1.1754944e-38, %v4478_v53  ;;  %v4491_v39 = vand.u32 2147483647, %v10704_v33  ;;  %vm4502_vm15 = vweird.f32 %v10713_v35 }
 0x5f7   : > { %5856 = vrcp.f32 %v10713_v35 }
 0x5f8   : > { %5858 = vpow2.f32 %v5282_v46  ;;  %vm4492_vm3 = vcmp.eq.f32.partialorder %v4491_v39, 8.507059e+37 }
 0x5f9   : > { %v10718_v13 = vpop.eup %5848  ;;  %5860 = vpow2.f32 %v5283_v9 }
 0x5fa   : > { %v4079_v4 = vpop.f32.mrf.mxu3  ;;  %v4468_v23 = vmul.f32 %v10718_v13, %v4211_v44  ;;  %v10729_v18 = vpop.eup %5850  ;;  %5862 = vpow2.f32 %v5284_v22  ;;  %vm4473_vm10 = vweird.f32 %v10718_v13  ;;  %v4494_v44 = vor.u32 1.1754944e-38, %v4493_v62 }
 0x5fb   : > { %v5853_v47 = vpop.eup %5852  ;;  %v4483_v0 = vmul.f32 %v10729_v18, %v10704_v33  ;;  %v10750_v61 = vadd.f32 %v4079_v4, %v11875_v32  ;;  %vm10769_vm12 = vmor %vm4472_vm5, %vm4473_vm10  ;;  %vm4488_vm2 = vweird.f32 %v10729_v18  ;;  %v4506_v22 = vand.u32 2147483647, %v10713_v35 }
 0x5fc   : > { %v4469_v2 = vsub.f32 1.0, %v4468_v23  ;;  %v5855_v49 = vpop.eup %5854  ;;  %v10737_v24 = vadd.f32 1.0, %v5853_v47  ;;  %vm10802_vm6 = vmor %vm4487_vm0, %vm4488_vm2  ;;  %v4508_v47 = vand.u32 2147483648, %v10713_v35 }
 0x5fd   : > { %v10735_v55 = vpop.eup %5856  ;;  %v4484_v54 = vsub.f32 1.0, %v4483_v0  ;;  %v10740_v27 = vadd.f32 1.0, %v5855_v49  ;;  %v5285_v38 = vmul.f32 -1.442695, %v10750_v61  ;;  %vm4507_vm7 = vcmp.eq.f32.partialorder %v4506_v22, 8.507059e+37 }
 0x5fe   : > { %v4470_v57 = vmul.f32 %v10718_v13, %v4469_v2  ;;  %v4498_v7 = vmul.f32 %v10735_v55, %v10713_v35  ;;  %v5859_v16 = vpop.eup %5858  ;;  %5864 = vrcp.f32 %v10737_v24  ;;  %vm4503_vm14 = vweird.f32 %v10735_v55 }
 0x5ff   : > { %v5861_v40 = vpop.eup %5860  ;;  %v4485_v19 = vmul.f32 %v10729_v18, %v4484_v54  ;;  %5866 = vrcp.f32 %v10740_v27  ;;  %v10752_v21 = vadd.f32 1.0, %v5859_v16  ;;  %vm10831_vm9 = vmor %vm4502_vm15, %vm4503_vm14  ;;  %v4523_v54 = vand.u32 2147483648, %v10737_v24 }
 0x600   : > { %v5863_v26 = vpop.eup %5862  ;;  %v4471_v10 = vadd.f32 %v10718_v13, %v4470_v57  ;;  %v4499_v17 = vsub.f32 1.0, %v4498_v7  ;;  %v10762_v15 = vadd.f32 1.0, %v5861_v40  ;;  %v4509_v53 = vor.u32 1.1754944e-38, %v4508_v47 }
 0x601   : > { %v10774_v63 = vadd.f32 1.0, %v5863_v26  ;;  %v4486_v29 = vadd.f32 %v10729_v18, %v4485_v19  ;;  %5868 = vrcp.f32 %v10752_v21  ;;  %vm4517_vm1 = vweird.f32 %v10737_v24 }
 0x602   : > { %v4081_v37 = vpop.f32.mrf.mxu3  ;;  %v4475_v6 = vsel %vm10769_vm12, %v10718_v13, %v4471_v10  ;;  %v4500_v43 = vmul.f32 %v10735_v55, %v4499_v17  ;;  %5870 = vrcp.f32 %v10762_v15  ;;  %v4521_v19 = vand.u32 2147483647, %v10737_v24 }
 0x603   : > { %v10755_v5 = vadd.f32 %v4081_v37, %v11875_v32  ;;  %v4480_v36 = vsel %vm10757_vm8, %v4479_v41, %v4475_v6  ;;  %5872 = vrcp.f32 %v10774_v63  ;;  %v4490_v13 = vsel %vm10802_vm6, %v10729_v18, %v4486_v29 }
 0x604   : > { %v10779_v45 = vpop.eup %5864  ;;  %5874 = vpow2.f32 %v5285_v38  ;;  %v4501_v23 = vadd.f32 %v10735_v55, %v4500_v43  ;;  %v4495_v49 = vsel %vm4492_vm3, %v4494_v44, %v4490_v13  ;;  %v10839_v16 = vmul.f32 %v4480_v36, %v10687_v52 }
 0x605   : > { %v5286_v28 = vmul.f32 -1.442695, %v10755_v5  ;;  %v10793_v30 = vpop.eup %5866  ;;  %v4513_v14 = vmul.f32 %v10779_v45, %v10737_v24  ;;  %v10848_v10 = vmul.f32 %v4495_v49, %v10692_v12  ;;  %v10854_v56 = vor.u32 1.1754944e-38, %v4523_v54 }
 0x606   : > { %v4528_v46 = vmul.f32 %v10793_v30, %v10740_v27  ;;  %v4505_v35 = vsel %vm10831_vm9, %v10735_v55, %v4501_v23  ;;  %vm4518_vm11 = vweird.f32 %v10779_v45  ;;  %vm4532_vm4 = vweird.f32 %v10740_v27 }
 0x607   : > { %5876 = vpow2.f32 %v5286_v28  ;;  %v4514_v2 = vsub.f32 1.0, %v4513_v14  ;;  %v4510_v62 = vsel %vm4507_vm7, %v4509_v53, %v4505_v35  ;;  %v4536_v28 = vand.u32 2147483647, %v10740_v27  ;;  %vm10892_vm5 = vmor %vm4517_vm1, %vm4518_vm11  ;;  %v5295_v53 = vld [vmem:[%s11239_s1] sm:$0xf] }
 0x608   : > { %v4529_v25 = vsub.f32 1.0, %v4528_v46  ;;  %v10871_v42 = vmul.f32 %v4510_v62, %v10697_v60  ;;  %v4538_v13 = vand.u32 2147483648, %v10740_v27  ;;  %vm10879_vm13 = vcmp.eq.f32.partialorder %v4521_v19, 8.507059e+37  ;;  %v5360_v27 = vld [vmem:[%s11239_s1 + $0x4] sm:$0xf0] }
 0x609   : > { %v4515_v52 = vmul.f32 %v10779_v45, %v4514_v2  ;;  %vm4533_vm10 = vweird.f32 %v10793_v30  ;;  %vm10896_vm8 = vcmp.eq.f32.partialorder %v4536_v28, 8.507059e+37  ;;  %vm4547_vm12 = vweird.f32 %v10752_v21 }
 0x60a   : > { %v4084_v59 = vpop.f32.mrf.mxu3  ;;  %v4530_v29 = vmul.f32 %v10793_v30, %v4529_v25  ;;  %vm10912_vm0 = vmor %vm4532_vm4, %vm4533_vm10  ;;  %v4551_v25 = vand.u32 2147483647, %v10752_v21  ;;  %v4539_v28 = vor.u32 1.1754944e-38, %v4538_v13  ;;  %vm4562_vm15 = vweird.f32 %v10762_v15 }
 0x60b   : > { %v10765_v51 = vadd.f32 %v4084_v59, %v11875_v32  ;;  %v4516_v14 = vadd.f32 %v10779_v45, %v4515_v52  ;;  %v5296_v52 = vor.u32 %v5360_v27, %v5295_v53  ;;  %vm4577_vm7 = vweird.f32 %v10774_v63 }
 0x60c   : > { %v4531_v22 = vadd.f32 %v10793_v30, %v4530_v29  ;;  %vm4552_vm1 = vcmp.eq.f32.partialorder %v4551_v25, 8.507059e+37 }
 0x60d   : > { %v5287_v37 = vmul.f32 -1.442695, %v10765_v51  ;;  %v4520_v57 = vsel %vm10892_vm5, %v10779_v45, %v4516_v14  ;;  %4807 = vmatmul.bf16.vlgmr.msra.gmra.mxu2 %v5296_v52 }
 0x60e   : > { %v4525_v14 = vsel %vm10879_vm13, %v10854_v56, %v4520_v57 }
 0x60f   : > { %5878 = vpow2.f32 %v5287_v37  ;;  %v11003_v35 = vmul.f32 %v4525_v14, %v10702_v50 }
 0x612   : > { %v4086_v48 = vpop.f32.mrf.mxu3 }
 0x613   : > { %v10777_v20 = vadd.f32 %v4086_v48, %v11875_v32  ;;  %v10824_v48 = vpop.eup %5868 }
 0x614   : > { %v10827_v0 = vpop.eup %5870  ;;  %vm4548_vm2 = vweird.f32 %v10824_v48 }
 0x615   : > { %v5288_v1 = vmul.f32 -1.442695, %v10777_v20  ;;  %v10836_v7 = vpop.eup %5872  ;;  %v4558_v55 = vmul.f32 %v10827_v0, %v10762_v15  ;;  %vm4563_vm6 = vweird.f32 %v10827_v0  ;;  %vm10955_vm3 = vmor %vm4547_vm12, %vm4548_vm2 }
 0x616   : > { %v5875_v40 = vpop.eup %5874  ;;  %v4573_v41 = vmul.f32 %v10836_v7, %v10774_v63  ;;  %vm4578_vm14 = vweird.f32 %v10836_v7  ;;  %vm10972_vm9 = vmor %vm4562_vm15, %vm4563_vm6 }
 0x617   : > { %5880 = vpow2.f32 %v5288_v1  ;;  %v5877_v26 = vpop.eup %5876  ;;  %v10864_v38 = vadd.f32 1.0, %v5875_v40  ;;  %v4559_v1 = vsub.f32 1.0, %v4558_v55  ;;  %vm10987_vm11 = vmor %vm4577_vm7, %vm4578_vm14 }
 0x618   : > { %v5879_v11 = vpop.eup %5878  ;;  %v10867_v44 = vadd.f32 1.0, %v5877_v26  ;;  %v4574_v23 = vsub.f32 1.0, %v4573_v41  ;;  %v4553_v26 = vand.u32 2147483648, %v10752_v21 }
 0x619   : > { %v4560_v24 = vmul.f32 %v10827_v0, %v4559_v1 }
 0x61a   : > { %v4089_v34 = vpop.f32.mrf.mxu3  ;;  %v4575_v40 = vmul.f32 %v10836_v7, %v4574_v23  ;;  %v4554_v56 = vor.u32 1.1754944e-38, %v4553_v26 }
 0x61b   : > { %v10791_v4 = vadd.f32 %v4089_v34, %v11875_v32  ;;  %v4543_v34 = vmul.f32 %v10824_v48, %v10752_v21 }
 0x61c   : > { %v4576_v29 = vadd.f32 %v10836_v7, %v4575_v40 }
 0x61d   : > { %v5289_v9 = vmul.f32 -1.442695, %v10791_v4  ;;  %v5881_v12 = vpop.eup %5880  ;;  %v4544_v39 = vsub.f32 1.0, %v4543_v34  ;;  %v4535_v34 = vsel %vm10912_vm0, %v10793_v30, %v4531_v22  ;;  %v4566_v30 = vand.u32 2147483647, %v10762_v15 }
 0x61e   : > { %v10877_v46 = vadd.f32 1.0, %v5881_v12  ;;  %v4568_v12 = vand.u32 2147483648, %v10762_v15  ;;  %v4581_v15 = vand.u32 2147483647, %v10774_v63  ;;  %v4540_v23 = vsel %vm10896_vm8, %v4539_v28, %v4535_v34 }
 0x61f   : > { %v4545_v2 = vmul.f32 %v10824_v48, %v4544_v39  ;;  %vm4567_vm4 = vcmp.eq.f32.partialorder %v4566_v30, 8.507059e+37  ;;  %v4580_v47 = vsel %vm10987_vm11, %v10836_v7, %v4576_v29  ;;  %v11016_v52 = vmul.f32 %v4540_v23, %v10708_v8 }
 0x620   : > { %vm4582_vm13 = vcmp.eq.f32.partialorder %v4581_v15, 8.507059e+37  ;;  %v4611_v29 = vand.u32 2147483647, %v10867_v44  ;;  %vm4637_vm12 = vweird.f32 %v10877_v46  ;;  %vm4607_vm11 = vweird.f32 %v10867_v44 }
 0x622   : > { %v4091_v59 = vpop.f32.mrf.mxu3 }
 0x623   : > { %v10815_v33 = vadd.f32 %v4091_v59, %v11875_v32  ;;  %v10874_v59 = vadd.f32 1.0, %v5879_v11  ;;  %v4561_v11 = vadd.f32 %v10827_v0, %v4560_v24 }
 0x625   : > { %v5290_v18 = vmul.f32 -1.442695, %v10815_v33  ;;  %v4628_v23 = vand.u32 2147483648, %v10874_v59  ;;  %vm4622_vm15 = vweird.f32 %v10874_v59 }
 0x627   : > { %5882 = vpow2.f32 %v5290_v18 }
 0x628   : > { %5884 = vpow2.f32 %v5289_v9  ;;  %v4641_v9 = vand.u32 2147483647, %v10877_v46 }
 0x62a   : > { %v4094_v17 = vpop.f32.mrf.mxu3 }
 0x62b   : > { %v10859_v6 = vadd.f32 %v4094_v17, %v11875_v32 }
 0x62d   : > { %v5883_v43 = vpop.eup %5882  ;;  %v5291_v37 = vmul.f32 -1.442695, %v10859_v6 }
 0x62e   : > { %v5885_v36 = vpop.eup %5884  ;;  %v10886_v60 = vadd.f32 1.0, %v5883_v43 }
 0x62f   : > { %5886 = vpow2.f32 %v5291_v37  ;;  %v10902_v49 = vadd.f32 1.0, %v5885_v36  ;;  %v4583_v37 = vand.u32 2147483648, %v10774_v63  ;;  %v4569_v63 = vor.u32 1.1754944e-38, %v4568_v12 }
 0x630   : > { %5888 = vrcp.f32 %v10864_v38  ;;  %vm4667_vm6 = vweird.f32 %v10886_v60 }
 0x631   : > { %5890 = vrcp.f32 %v10867_v44  ;;  %v4584_v57 = vor.u32 1.1754944e-38, %v4583_v37  ;;  %v4613_v37 = vand.u32 2147483648, %v10867_v44  ;;  %vm4652_vm5 = vweird.f32 %v10902_v49 }
 0x632   : > { %5892 = vrcp.f32 %v10874_v59  ;;  %v4096_v54 = vpop.f32.mrf.mxu3 }
 0x633   : > { %5894 = vrcp.f32 %v10877_v46  ;;  %v10920_v45 = vadd.f32 %v4096_v54, %v11875_v32  ;;  %v4546_v32 = vadd.f32 %v10824_v48, %v4545_v2  ;;  %v4585_v53 = vsel %vm4582_vm13, %v4584_v57, %v4580_v47 }
 0x634   : > { %5896 = vrcp.f32 %v10886_v60  ;;  %v4656_v47 = vand.u32 2147483647, %v10902_v49 }
 0x635   : > { %v5887_v19 = vpop.eup %5886  ;;  %5898 = vrcp.f32 %v10902_v49  ;;  %v5292_v55 = vmul.f32 -1.442695, %v10920_v45  ;;  %v4550_v21 = vsel %vm10955_vm3, %v10824_v48, %v4546_v32  ;;  %v4565_v48 = vsel %vm10972_vm9, %v10827_v0, %v4561_v11  ;;  %v5362_v11 = vld [vmem:[%s11239_s1 + $0x14] sm:$0xf0] }
 0x636   : > { %v10937_v17 = vpop.eup %5888  ;;  %v10942_v62 = vadd.f32 1.0, %v5887_v19  ;;  %v4555_v2 = vsel %vm4552_vm1, %v4554_v56, %v4550_v21  ;;  %v4570_v25 = vsel %vm4567_vm4, %v4569_v63, %v4565_v48  ;;  %v4643_v63 = vand.u32 2147483648, %v10877_v46 }
 0x637   : > { %v10944_v41 = vpop.eup %5890  ;;  %5900 = vpow2.f32 %v5292_v55  ;;  %v4588_v18 = vmul.f32 %v10937_v17, %v10864_v38  ;;  %v11019_v50 = vmul.f32 %v4555_v2, %v10716_v58  ;;  %v5303_v55 = vld [vmem:[%s11239_s1 + $0x10] sm:$0xf]  ;;  %v11030_v30 = vmul.f32 %v4570_v25, %v10721_v31 }
 0x638   : > { %v10949_v43 = vpop.eup %5892  ;;  %5902 = vrcp.f32 %v10942_v62  ;;  %v4603_v0 = vmul.f32 %v10944_v41, %v10867_v44  ;;  %v11034_v58 = vmul.f32 %v4585_v53, %v10724_v3  ;;  %v5304_v1 = vor.u32 %v5362_v11, %v5303_v55 }
 0x639   : > { %v10962_v36 = vpop.eup %5894  ;;  %v4618_v24 = vmul.f32 %v10949_v43, %v10874_v59  ;;  %v4589_v19 = vsub.f32 1.0, %v4588_v18  ;;  %v4626_v31 = vand.u32 2147483647, %v10874_v59  ;;  %vm4623_vm8 = vweird.f32 %v10949_v43 }
 0x63a   : > { %v10978_v13 = vpop.eup %5896  ;;  %v4633_v27 = vmul.f32 %v10962_v36, %v10877_v46  ;;  %v4604_v8 = vsub.f32 1.0, %v4603_v0  ;;  %vm4638_vm10 = vweird.f32 %v10962_v36  ;;  %4812 = vmatmul.bf16.gmra.mxu2 %v5304_v1  ;;  %v4686_v53 = vand.u32 2147483647, %v10942_v62 }
 0x63b   : > { %v10991_v22 = vpop.eup %5898  ;;  %v4663_v7 = vmul.f32 %v10978_v13, %v10886_v60  ;;  %v4619_v12 = vsub.f32 1.0, %v4618_v24  ;;  %v11039_v15 = vmul.f32 %v10937_v17, %v4589_v19  ;;  %v4757_v24 = vpack.c.bf16 %v11034_v58, %v11030_v30 }
 0x63c   : > { %v4648_v34 = vmul.f32 %v10991_v22, %v10902_v49  ;;  %v4634_v14 = vsub.f32 1.0, %v4633_v27  ;;  %v4605_v3 = vmul.f32 %v10944_v41, %v4604_v8  ;;  %vm4653_vm0 = vweird.f32 %v10991_v22 }
 0x63d   : > { %v5901_v54 = vpop.eup %5900  ;;  %v4664_v28 = vsub.f32 1.0, %v4663_v7  ;;  %v4620_v48 = vmul.f32 %v10949_v43, %v4619_v12  ;;  %vm4668_vm14 = vweird.f32 %v10978_v13  ;;  %v4688_v27 = vand.u32 2147483648, %v10942_v62 }
 0x63e   : > { %v11007_v40 = vpop.eup %5902  ;;  %v11013_v26 = vadd.f32 1.0, %v5901_v54  ;;  %v4649_v21 = vsub.f32 1.0, %v4648_v34  ;;  %v4635_v57 = vmul.f32 %v10962_v36, %v4634_v14  ;;  %v4756_v54 = vpack.c.bf16 %v11019_v50, %v11016_v52  ;;  %vm11096_vm13 = vmor %vm4667_vm6, %vm4668_vm14  ;;  %v5361_v52 = vld [vmem:[%s11239_s1 + $0x14] sm:$0xf]  ;;  %v5363_v50 = vld [vmem:[%s11239_s1 + $0x24] sm:$0xf] }
 0x63f   : > { %v4678_v32 = vmul.f32 %v11007_v40, %v10942_v62  ;;  %v4665_v18 = vmul.f32 %v10978_v13, %v4664_v28  ;;  %vm4683_vm2 = vweird.f32 %v11007_v40  ;;  %vm4608_vm3 = vweird.f32 %v10944_v41 }
 0x640   : > { %5904 = vrcp.f32 %v11013_v26  ;;  %v4650_v0 = vmul.f32 %v10991_v22, %v4649_v21  ;;  %vm4682_vm9 = vweird.f32 %v10942_v62  ;;  %v4671_v11 = vand.u32 2147483647, %v10886_v60 }
 0x641   : > { %v4679_v39 = vsub.f32 1.0, %v4678_v32  ;;  %v4666_v34 = vadd.f32 %v10978_v13, %v4665_v18  ;;  %v4755_v32 = vpack.c.bf16 %v11003_v35, %v10871_v42  ;;  %v4673_v8 = vand.u32 2147483648, %v10886_v60  ;;  %vm11079_vm7 = vmor %vm4682_vm9, %vm4683_vm2  ;;  %v5305_v42 = vld [vmem:[%s11239_s1 + $0x18] sm:$0xf0] }
 0x642   : > { %v4651_v55 = vadd.f32 %v10991_v22, %v4650_v0  ;;  %v4703_v28 = vand.u32 2147483648, %v11013_v26  ;;  %vm4593_vm1 = vweird.f32 %v10937_v17  ;;  %v4701_v14 = vand.u32 2147483647, %v11013_v26  ;;  %vm11104_vm9 = vmor %vm4652_vm5, %vm4653_vm0 }
 0x643   : > { %v4680_v56 = vmul.f32 %v11007_v40, %v4679_v39  ;;  %v4636_v21 = vadd.f32 %v10962_v36, %v4635_v57  ;;  %v4658_v1 = vand.u32 2147483648, %v10902_v49  ;;  %vm4687_vm2 = vcmp.eq.f32.partialorder %v4686_v53, 8.507059e+37 }
 0x644   : > { %v4689_v18 = vor.u32 1.1754944e-38, %v4688_v27  ;;  %v4670_v57 = vsel %vm11096_vm13, %v10978_v13, %v4666_v34  ;;  %vm4697_vm6 = vweird.f32 %v11013_v26  ;;  %v4754_v60 = vpack.c.bf16 %v10848_v10, %v10839_v16  ;;  %v5311_v13 = vld [vmem:[%s11239_s1 + $0x20] sm:$0xf]  ;;  %v5313_v16 = vld [vmem:[%s11239_s1 + $0x28] sm:$0xf0] }
 0x645   : > { %v4681_v25 = vadd.f32 %v11007_v40, %v4680_v56  ;;  %v4704_v27 = vor.u32 1.1754944e-38, %v4703_v28  ;;  %vm4672_vm5 = vcmp.eq.f32.partialorder %v4671_v11, 8.507059e+37  ;;  %vm4702_vm0 = vcmp.eq.f32.partialorder %v4701_v14, 8.507059e+37 }
 0x646   : > { %v5905_v2 = vpop.eup %5904  ;;  %v4591_v28 = vadd.f32 %v10937_v17, %v11039_v15  ;;  %vm4627_vm13 = vcmp.eq.f32.partialorder %v4626_v31, 8.507059e+37  ;;  %v5308_v35 = vor.u32 %v5361_v52, %v5305_v42  ;;  %v5316_v10 = vor.u32 %v5363_v50, %v5313_v16 }
 0x647   : > { %v4693_v7 = vmul.f32 %v5905_v2, %v11013_v26  ;;  %v4685_v62 = vsel %vm11079_vm7, %v11007_v40, %v4681_v25  ;;  %vm4698_vm4 = vweird.f32 %v5905_v2  ;;  %v4621_v25 = vadd.f32 %v10949_v43, %v4620_v48  ;;  %v5364_v26 = vld [vmem:[%s11239_s1 + $0x24] sm:$0xf0]  ;;  %vm11130_vm7 = vmor %vm4637_vm12, %vm4638_vm10 }
 0x648   : > { %v4690_v53 = vsel %vm4687_vm2, %v4689_v18, %v4685_v62  ;;  %vm4699_vm14 = vmor %vm4697_vm6, %vm4698_vm4  ;;  %v4606_v48 = vadd.f32 %v10944_v41, %v4605_v3  ;;  %v4640_v11 = vsel %vm11130_vm7, %v10962_v36, %v4636_v21  ;;  %vm4657_vm4 = vcmp.eq.f32.partialorder %v4656_v47, 8.507059e+37 }
 0x649   : > { %v4694_v19 = vsub.f32 1.0, %v4693_v7  ;;  %v4674_v7 = vor.u32 1.1754944e-38, %v4673_v8  ;;  %v4737_v3 = vmul.f32 %v4690_v53, %v10859_v6  ;;  %vm11147_vm10 = vmor %vm4622_vm15, %vm4623_vm8  ;;  %v4644_v36 = vor.u32 1.1754944e-38, %v4643_v63 }
 0x64a   : > { %v5312_v47 = vor.u32 %v5364_v26, %v5311_v13  ;;  %v4625_v6 = vsel %vm11147_vm10, %v10949_v43, %v4621_v25  ;;  %vm4642_vm12 = vcmp.eq.f32.partialorder %v4641_v9, 8.507059e+37  ;;  %vm4592_vm8 = vweird.f32 %v10864_v38  ;;  %vm11165_vm15 = vmor %vm4607_vm11, %vm4608_vm3 }
 0x64b   : > { %v4695_v39 = vmul.f32 %v5905_v2, %v4694_v19  ;;  %v4655_v19 = vsel %vm11104_vm9, %v10991_v22, %v4651_v55  ;;  %v4659_v22 = vor.u32 1.1754944e-38, %v4658_v1  ;;  %v4629_v43 = vor.u32 1.1754944e-38, %v4628_v23  ;;  %vm4594_vm3 = vmor %vm4592_vm8, %vm4593_vm1 }
 0x64c   : > { %v4645_v46 = vsel %vm4642_vm12, %v4644_v36, %v4640_v11  ;;  %v4596_v9 = vand.u32 2147483647, %v10864_v38  ;;  %v4614_v21 = vor.u32 1.1754944e-38, %v4613_v37  ;;  %4817 = vmatmul.bf16.gmra.mxu2 %v5312_v47  ;;  %vm4612_vm11 = vcmp.eq.f32.partialorder %v4611_v29, 8.507059e+37 }
 0x64d   : > { %v4696_v0 = vadd.f32 %v5905_v2, %v4695_v39  ;;  %v4660_v49 = vsel %vm4657_vm4, %v4659_v22, %v4655_v19  ;;  %v4598_v39 = vand.u32 2147483648, %v10864_v38  ;;  %v4630_v23 = vsel %vm4627_vm13, %v4629_v43, %v4625_v6  ;;  %v4865_v19 = vpop.permute.xlu2 %4864 }
 0x64e   : > { %v4735_v14 = vmul.f32 %v4660_v49, %v10791_v4  ;;  %v4595_v38 = vsel %vm4594_vm3, %v10937_v17, %v4591_v28  ;;  %vm4597_vm2 = vcmp.eq.f32.partialorder %v4596_v9, 8.507059e+37  ;;  %v4733_v4 = vmul.f32 %v4630_v23, %v10765_v51  ;;  %v4745_v17 = vld [vmem:[%s11239_s1 + $0x30] sm:$0x11] }
 0x64f   : > { %v4700_v12 = vsel %vm4699_vm14, %v5905_v2, %v4696_v0  ;;  %v4675_v2 = vsel %vm4672_vm5, %v4674_v7, %v4670_v57  ;;  %v4599_v31 = vor.u32 1.1754944e-38, %v4598_v39  ;;  %v4781_v29 = vunpack.c.l.b16 %v4745_v17 }
 0x650   : > { %v4705_v55 = vsel %vm4702_vm0, %v4704_v27, %v4700_v12  ;;  %v4782_v30 = vunpack.c.h.b16 %v4745_v17 }
 0x651   : > { %v4738_v8 = vmul.f32 %v4705_v55, %v10920_v45  ;;  %v4736_v45 = vmul.f32 %v4675_v2, %v10815_v33  ;;  %v4610_v33 = vsel %vm11165_vm15, %v10944_v41, %v4606_v48  ;;  %v4734_v41 = vmul.f32 %v4645_v46, %v10777_v20  ;;  %v4870_v48 = vpop.permute.xlu0 %4869  ;;  %v4875_v55 = vpop.permute.xlu1 %4874 }
 0x652   : > { %v4615_v1 = vsel %vm4612_vm11, %v4614_v21, %v4610_v33  ;;  %v4600_v56 = vsel %vm4597_vm2, %v4599_v31, %v4595_v38  ;;  %v4789_v40 = vpack.c.b16 %v4781_v29, %v4781_v29  ;;  %v4790_v58 = vpack.c.b16 %v4782_v30, %v4782_v30 }
 0x653   : > { %v4761_v15 = vpack.c.bf16 %v4738_v8, %v4737_v3  ;;  %v4760_v59 = vpack.c.bf16 %v4736_v45, %v4735_v14  ;;  %v4732_v18 = vmul.f32 %v4615_v1, %v10755_v5  ;;  %v4759_v37 = vpack.c.bf16 %v4734_v41, %v4733_v4  ;;  %v5297_v5 = vld [vmem:[%s11239_s1 + $0x8] sm:$0xf0] }
 0x654   : > { %v4731_v44 = vmul.f32 %v4600_v56, %v10750_v61  ;;  %v5359_v61 = vld [vmem:[%s11239_s1 + $0x4] sm:$0xf] }
 0x655   : > { %4827 = vmatpush.bf16.msrb.mxu2 %v4761_v15  ;;  %v5300_v51 = vor.u32 %v5359_v61, %v5297_v5  ;;  %v4880_v28 = vpop.permute.xlu2 %4879 }
 0x656   : > { %v4758_v20 = vpack.c.bf16 %v4732_v18, %v4731_v44 }
 0x659   : > { %4828 = vmatpush.bf16.msrb.mxu2 %v4760_v59  ;;  %v4885_v47 = vpop.permute.xlu0 %4884  ;;  %v4890_v39 = vpop.permute.xlu1 %4889 }
 0x65c   : > { %4822 = vmatmul.bf16.gmra.mxu2 %v4789_v40 }
 0x65d   : > { %4829 = vmatpush.bf16.msrb.mxu2 %v4759_v37  ;;  %v4895_v9 = vpop.permute.xlu2 %4894 }
 0x661   : > { %4830 = vmatpush.bf16.msrb.mxu2 %v4758_v20 }
 0x665   : > { %4831 = vmatpush.bf16.msrb.mxu2 %v4757_v24 }
 0x669   : > { %4832 = vmatpush.bf16.msrb.mxu2 %v4756_v54 }
 0x66d   : > { %4833 = vmatpush.bf16.msrb.mxu2 %v4755_v32 }
 0x671   : > { %4834 = vmatpush.bf16.msrb.mxu2 %v4754_v60 }
 0x674   : > { %4835 = vmatmul.bf16.vlgmr.msrb.gmra.mxu2 %v5300_v51 }
 0x684   : > { %4840 = vmatmul.bf16.gmra.mxu2 %v5308_v35 }
 0x690   : > { %v4808_v24 = vpop.f32.mrf.mxu2 }
 0x694   : > { %4845 = vmatmul.bf16.gmra.mxu2 %v5316_v10 }
 0x698   : > { %v4810_v54 = vpop.f32.mrf.mxu2 }
 0x6a4   : > { %4850 = vmatmul.bf16.gmra.mxu2 %v4790_v58 }
 0x6bd   : > { %v4813_v32 = vpop.f32.mrf.mxu2 }
 0x6c5   : > { %v4815_v57 = vpop.f32.mrf.mxu2 }
 0x6cf   : > { %v4818_v0 = vpop.f32.mrf.mxu2 }
 0x6d7   : > { %v4820_v60 = vpop.f32.mrf.mxu2 }
 0x6df   : > { %v4823_v25 = vpop.f32.mrf.mxu2 }
 0x6e7   : > { %v4825_v7 = vpop.f32.mrf.mxu2 }
 0x6f7   : > { %v4836_v53 = vpop.f32.mrf.mxu2 }
 0x6f8   : > { %v4837_v27 = vadd.f32 %v4836_v53, %v4808_v24 }
 0x6fa   : > { %v4897_v12 = vmul.f32 %v4865_v19, %v4837_v27 }
 0x6fc   : > { %4904 = vst [vmem:[%s11226_s20] sm:$0xff] %v4897_v12 }
 0x6ff   : > { %v4838_v13 = vpop.f32.mrf.mxu2 }
 0x700   : > { %v4839_v26 = vadd.f32 %v4838_v13, %v4810_v54 }
 0x702   : > { %v4898_v34 = vmul.f32 %v4870_v48, %v4839_v26 }
 0x704   : > { %4905 = vst [vmem:[%s11226_s20 + $0x8] sm:$0xff] %v4898_v34 }
 0x707   : > { %v4841_v22 = vpop.f32.mrf.mxu2 }
 0x708   : > { %v4842_v2 = vadd.f32 %v4841_v22, %v4813_v32 }
 0x70a   : > { %v4899_v11 = vmul.f32 %v4875_v55, %v4842_v2 }
 0x70c   : > { %4906 = vst [vmem:[%s11226_s20 + $0x10] sm:$0xff] %v4899_v11 }
 0x70f   : > { %v4843_v3 = vpop.f32.mrf.mxu2 }
 0x710   : > { %v4844_v8 = vadd.f32 %v4843_v3, %v4815_v57 }
 0x712   : > { %v4900_v62 = vmul.f32 %v4880_v28, %v4844_v8 }
 0x714   : > { %4907 = vst [vmem:[%s11226_s20 + $0x18] sm:$0xff] %v4900_v62 }
 0x717   : > { %v4846_v36 = vpop.f32.mrf.mxu2 }
 0x718   : > { %v4847_v49 = vadd.f32 %v4846_v36, %v4818_v0 }
 0x71a   : > { %v4901_v6 = vmul.f32 %v4885_v47, %v4847_v49 }
 0x71c   : > { %4908 = vst [vmem:[%s11226_s20 + $0x20] sm:$0xff] %v4901_v6 }
 0x71f   : > { %v4848_v45 = vpop.f32.mrf.mxu2 }
 0x720   : > { %v4849_v15 = vadd.f32 %v4848_v45, %v4820_v60 }
 0x722   : > { %v4902_v63 = vmul.f32 %v4890_v39, %v4849_v15 }
 0x724   : > { %4909 = vst [vmem:[%s11226_s20 + $0x28] sm:$0xff] %v4902_v63 }
 0x727   : > { %v4851_v43 = vpop.f32.mrf.mxu2 }
 0x728   : > { %v4852_v46 = vadd.f32 %v4851_v43, %v4823_v25 }
 0x72a   : > { %v4903_v33 = vmul.f32 %v4895_v9, %v4852_v46 }
 0x72c   : > { %4910 = vst [vmem:[%s11226_s20 + $0x30] sm:$0x1] %v4903_v33 }
 0x72f   : > { %v4853_v14 = vpop.f32.mrf.mxu2 }
 0x730 PF: > { %s20_s13 = sadd.s32 1, %s5915_s13  }
 0x731   : > { %p17_p4 = scmp.ge.s32.totalorder %s20_s13, 4  }
 0x733   :  { %19 = sbr.rel (!%p17_p4) target bundleno = 1 (0x1), region = 90 }

</bundles_post_ra>
